<compile_context>
chip_gen: v7x
topology: tpu7x:2x2x1
jax: 0.10.0
libtpu: 0.0.40
codegen_flags: <defaults>
</compile_context>

<pallas_src>
import jax
import jax.numpy as jnp
from jax.experimental import pallas as pl
from jax.experimental.pallas import tpu as pltpu

IMG_SHAPE = (1, 28, 28)
NUM_CLASSES = 10
Z_DIM = 100
IN_DIM = Z_DIM + NUM_CLASSES      # 110 logical input features
IN_DIM_PAD = 128                  # lane-aligned K for the first matmul
OUT_DIM = 784                     # logical output features (28*28)
OUT_DIM_PAD = 896                 # 7 * 128 -> lane-dense output store
EPS = 1e-5                        # torch.nn.BatchNorm1d default eps


def _leaky_relu(x, slope=0.2):
    # one mul + one max (no compare/select)
    return jnp.maximum(x, slope * x)


def generator_kernel(x_ref,
                     w1_ref, b1_ref,
                     w2_ref, g2_ref, be2_ref,
                     w3_hbm, g3_ref, be3_ref,
                     w4_hbm, b4_ref,
                     o_ref,
                     w3_vmem, w4_vmem, sem):
    # Kick off the two big weight DMAs immediately so they overlap layers 1-2
    # (and layer 3 for w4) instead of serializing ahead of the kernel body.
    cp3 = pltpu.make_async_copy(w3_hbm, w3_vmem, sem.at[0])
    cp4 = pltpu.make_async_copy(w4_hbm, w4_vmem, sem.at[1])
    cp3.start()
    cp4.start()

    # ---- Linear(110[pad 128] -> 256) + LeakyReLU(0.2) ----
    # x and w1 are bf16; accumulate in f32 on the MXU.
    h = jnp.dot(x_ref[...], w1_ref[...], preferred_element_type=jnp.float32)
    h = _leaky_relu(h + b1_ref[...])

    # ---- Linear(256 -> 512, bias dropped: cancelled exactly by BN centering) ----
    # ---- + BatchNorm1d(512, batch stats) + LeakyReLU ----
    h = jnp.dot(h.astype(jnp.bfloat16), w2_ref[...],
                preferred_element_type=jnp.float32)
    mean2 = jnp.mean(h, axis=0, keepdims=True)
    hc = h - mean2                                        # center once, reuse
    var2 = jnp.mean(hc * hc, axis=0, keepdims=True)       # biased variance
    h = _leaky_relu(hc * (jax.lax.rsqrt(var2 + EPS) * g2_ref[...]) + be2_ref[...])

    # ---- Linear(512 -> 1024, bias dropped) + BatchNorm1d(1024) + LeakyReLU ----
    cp3.wait()                                            # w3 now resident in VMEM
    h = jnp.dot(h.astype(jnp.bfloat16), w3_vmem[...],
                preferred_element_type=jnp.float32)
    mean3 = jnp.mean(h, axis=0, keepdims=True)
    hc = h - mean3
    var3 = jnp.mean(hc * hc, axis=0, keepdims=True)
    h = _leaky_relu(hc * (jax.lax.rsqrt(var3 + EPS) * g3_ref[...]) + be3_ref[...])

    # ---- Linear(1024 -> 784[pad 896]) + Tanh (lane-dense bf16 store) ----
    cp4.wait()                                            # w4 now resident in VMEM
    h = jnp.dot(h.astype(jnp.bfloat16), w4_vmem[...],
                preferred_element_type=jnp.float32) + b4_ref[...]
    o_ref[...] = jnp.tanh(h).astype(o_ref.dtype)


def init_params(key):
    """Deterministic parameter init (logical shapes match the PyTorch module);
    weights stored in bf16 and padded for lane alignment.  b2/b3 are not created:
    a Linear bias right before training-mode BatchNorm is exactly cancelled by the
    mean subtraction, so the forward pass is unchanged without them."""
    ks = jax.random.split(key, 10)

    def linear(kw, kb, fan_in, fan_out):
        bound = 1.0 / jnp.sqrt(float(fan_in))
        w = jax.random.uniform(kw, (fan_in, fan_out), jnp.float32, -bound, bound)
        b = jax.random.uniform(kb, (1, fan_out), jnp.float32, -bound, bound)
        return w, b

    params = {}
    params["emb"] = jax.random.normal(ks[0], (NUM_CLASSES, NUM_CLASSES), jnp.float32)

    w1, b1 = linear(ks[1], ks[2], IN_DIM, 256)
    # zero rows 110..127 -> the padded input columns contribute nothing
    w1 = jnp.pad(w1, ((0, IN_DIM_PAD - IN_DIM), (0, 0)))
    params["w1"], params["b1"] = w1.astype(jnp.bfloat16), b1

    w2, _ = linear(ks[3], ks[4], 256, 512)
    params["w2"] = w2.astype(jnp.bfloat16)
    params["g2"] = jnp.ones((1, 512), jnp.float32)
    params["be2"] = jnp.zeros((1, 512), jnp.float32)

    w3, _ = linear(ks[5], ks[6], 512, 1024)
    params["w3"] = w3.astype(jnp.bfloat16)
    params["g3"] = jnp.ones((1, 1024), jnp.float32)
    params["be3"] = jnp.zeros((1, 1024), jnp.float32)

    w4, b4 = linear(ks[7], ks[8], 1024, OUT_DIM)
    # zero-pad output columns 784..895 -> unmasked lane-dense store; tanh(0)=0 there
    w4 = jnp.pad(w4, ((0, 0), (0, OUT_DIM_PAD - OUT_DIM)))
    b4 = jnp.pad(b4, ((0, 0), (0, OUT_DIM_PAD - OUT_DIM)))
    params["w4"], params["b4"] = w4.astype(jnp.bfloat16), b4
    return params


def generator_forward_padded(params, noise, labels):
    """noise: (B, 100) f32, labels: (B,) int32 -> (B, 896) bf16 padded image buffer.

    B should be a multiple of 8 (sublane alignment / exact BN over real rows).
    Larger B amortizes the fixed ~3 MB weight DMA per call.
    """
    B = noise.shape[0]
    # Glue: embedding lookup + concat (== torch.cat((noise, emb(labels)), -1)),
    # then zero-pad 110 -> 128 features and cast to bf16 for the MXU.
    emb = params["emb"][labels]                                   # (B, 10)
    gen_input = jnp.concatenate([noise, emb], -1)                 # (B, 110)
    gen_input = jnp.pad(gen_input, ((0, 0), (0, IN_DIM_PAD - IN_DIM)))
    gen_input = gen_input.astype(jnp.bfloat16)                    # (B, 128) bf16

    args = (gen_input,
            params["w1"], params["b1"],
            params["w2"], params["g2"], params["be2"],
            params["w3"], params["g3"], params["be3"],
            params["w4"], params["b4"])

    vmem_spec = pl.BlockSpec(memory_space=pltpu.MemorySpace.VMEM)
    hbm_spec = pl.BlockSpec(memory_space=pl.ANY)   # raw HBM ref, manual DMA in-kernel
    in_specs = [
        vmem_spec,              # x
        vmem_spec, vmem_spec,   # w1, b1
        vmem_spec, vmem_spec, vmem_spec,   # w2, g2, be2
        hbm_spec,  vmem_spec, vmem_spec,   # w3 (HBM), g3, be3
        hbm_spec,  vmem_spec,              # w4 (HBM), b4
    ]

    return pl.pallas_call(
        generator_kernel,
        out_shape=jax.ShapeDtypeStruct((B, OUT_DIM_PAD), jnp.bfloat16),
        in_specs=in_specs,
        out_specs=pl.BlockSpec(memory_space=pltpu.MemorySpace.VMEM),
        scratch_shapes=[
            pltpu.VMEM((512, 1024), jnp.bfloat16),        # w3 double-use buffer
            pltpu.VMEM((1024, OUT_DIM_PAD), jnp.bfloat16),  # w4 buffer
            pltpu.SemaphoreType.DMA((2,)),
        ],
        compiler_params=pltpu.CompilerParams(
            # headroom so larger batches also fit on v5e's 16 MiB default scoped VMEM
            vmem_limit_bytes=32 * 1024 * 1024,
        ),
    )(*args)


def generator_forward(params, noise, labels):
    """noise: (B, 100) f32, labels: (B,) int32 -> (B, 1, 28, 28) bf16 image.

    The crop/reshape here is a convenience copy; latency-sensitive consumers should
    take the padded (B, 896) bf16 buffer from generator_forward_padded directly.
    """
    B = noise.shape[0]
    img_pad = generator_forward_padded(params, noise, labels)
    return img_pad[:, :OUT_DIM].reshape(B, *IMG_SHAPE)


def generator_forward_ref(params, noise, labels):
    """Pure-JAX reference with identical math (bf16 weights, f32 accumulation,
    no pre-BN biases, bf16 output)."""
    emb = params["emb"][labels]
    h = jnp.concatenate([noise, emb], -1)
    h = jnp.pad(h, ((0, 0), (0, IN_DIM_PAD - IN_DIM))).astype(jnp.bfloat16)

    h = jnp.dot(h, params["w1"], preferred_element_type=jnp.float32)
    h = _leaky_relu(h + params["b1"])

    h = jnp.dot(h.astype(jnp.bfloat16), params["w2"],
                preferred_element_type=jnp.float32)
    m = jnp.mean(h, 0, keepdims=True)
    hc = h - m
    v = jnp.mean(hc * hc, 0, keepdims=True)
    h = _leaky_relu(hc * (jax.lax.rsqrt(v + EPS) * params["g2"]) + params["be2"])

    h = jnp.dot(h.astype(jnp.bfloat16), params["w3"],
                preferred_element_type=jnp.float32)
    m = jnp.mean(h, 0, keepdims=True)
    hc = h - m
    v = jnp.mean(hc * hc, 0, keepdims=True)
    h = _leaky_relu(hc * (jax.lax.rsqrt(v + EPS) * params["g3"]) + params["be3"])

    h = jnp.dot(h.astype(jnp.bfloat16), params["w4"],
                preferred_element_type=jnp.float32) + params["b4"]
    h = jnp.tanh(h).astype(jnp.bfloat16)
    return h[:, :OUT_DIM].reshape(h.shape[0], *IMG_SHAPE)


if __name__ == "__main__":
    key = jax.random.PRNGKey(0)
    k_params, k_noise, k_labels = jax.random.split(key, 3)

    # Multiple of 8 sublanes; any multiple of 8 works.  Larger B (>=256 on v5e,
    # ~512-640 on v6e) further amortizes the fixed ~3 MB weight DMA per call.
    B = 128
    params = init_params(k_params)
    noise = jax.random.normal(k_noise, (B, Z_DIM), jnp.float32)
    labels = jax.random.randint(k_labels, (B,), 0, NUM_CLASSES, jnp.int32)

    img = generator_forward(params, noise, labels)
    jax.block_until_ready(img)

    ref = generator_forward_ref(params, noise, labels)
    assert img.shape == (B, 1, 28, 28), img.shape
    assert jnp.allclose(img.astype(jnp.float32), ref.astype(jnp.float32),
                        atol=2e-2, rtol=2e-2), "mismatch vs reference"

    print("KERNEL_OK")
</pallas_src>

<mosaic_0001>
module attributes {stable_mosaic.version = 11 : i64} {
  func.func @generator_kernel(%arg0: memref<128x128xbf16, #tpu.memory_space<vmem>>, %arg1: memref<128x256xbf16, #tpu.memory_space<vmem>>, %arg2: memref<1x256xf32, #tpu.memory_space<vmem>>, %arg3: memref<256x512xbf16, #tpu.memory_space<vmem>>, %arg4: memref<1x512xf32, #tpu.memory_space<vmem>>, %arg5: memref<1x512xf32, #tpu.memory_space<vmem>>, %arg6: memref<512x1024xbf16, #tpu.memory_space<any>>, %arg7: memref<1x1024xf32, #tpu.memory_space<vmem>>, %arg8: memref<1x1024xf32, #tpu.memory_space<vmem>>, %arg9: memref<1024x896xbf16, #tpu.memory_space<any>>, %arg10: memref<1x896xf32, #tpu.memory_space<vmem>>, %arg11: memref<128x896xbf16, #tpu.memory_space<vmem>>, %arg12: memref<512x1024xbf16, #tpu.memory_space<vmem>>, %arg13: memref<1024x896xbf16, #tpu.memory_space<vmem>>, %arg14: memref<2x!tpu.dma_semaphore, #tpu.memory_space<semaphore_mem>>) attributes {dimension_semantics = [], scalar_prefetch = 0 : i64, scratch_operands = 3 : i64, tpu.core_type = #tpu.core_type<tc>} {
    %c0_i32 = arith.constant 0 : i32
    %0 = tpu.memref_slice %arg14[%c0_i32] : memref<2x!tpu.dma_semaphore, #tpu.memory_space<semaphore_mem>> -> memref<1x!tpu.dma_semaphore, #tpu.memory_space<semaphore_mem>>
    %1 = tpu.memref_squeeze %0 : memref<1x!tpu.dma_semaphore, #tpu.memory_space<semaphore_mem>> -> memref<!tpu.dma_semaphore, #tpu.memory_space<semaphore_mem>>
    tpu.enqueue_dma source(%arg6 : memref<512x1024xbf16, #tpu.memory_space<any>>) target(%arg12 : memref<512x1024xbf16, #tpu.memory_space<vmem>>) target_semaphore(%1 : memref<!tpu.dma_semaphore, #tpu.memory_space<semaphore_mem>>)
    %c1_i32 = arith.constant 1 : i32
    %2 = tpu.memref_slice %arg14[%c1_i32] : memref<2x!tpu.dma_semaphore, #tpu.memory_space<semaphore_mem>> -> memref<1x!tpu.dma_semaphore, #tpu.memory_space<semaphore_mem>>
    %3 = tpu.memref_squeeze %2 : memref<1x!tpu.dma_semaphore, #tpu.memory_space<semaphore_mem>> -> memref<!tpu.dma_semaphore, #tpu.memory_space<semaphore_mem>>
    tpu.enqueue_dma source(%arg9 : memref<1024x896xbf16, #tpu.memory_space<any>>) target(%arg13 : memref<1024x896xbf16, #tpu.memory_space<vmem>>) target_semaphore(%3 : memref<!tpu.dma_semaphore, #tpu.memory_space<semaphore_mem>>)
    %c0 = arith.constant 0 : index
    %c0_0 = arith.constant 0 : index
    %4 = vector.load %arg0[%c0, %c0_0] : memref<128x128xbf16, #tpu.memory_space<vmem>>, vector<128x128xbf16>
    %c0_1 = arith.constant 0 : index
    %c0_2 = arith.constant 0 : index
    %5 = vector.load %arg1[%c0_1, %c0_2] : memref<128x256xbf16, #tpu.memory_space<vmem>>, vector<128x256xbf16>
    %cst = arith.constant dense<0.000000e+00> : vector<128x256xf32>
    %6 = tpu.matmul %4, %5, %cst {dimension_numbers = #tpu.dot_dimension_numbers<[1], [0], [0], [1], [0, 0, 1, 1], [], []>} : vector<128x128xbf16>, vector<128x256xbf16>, vector<128x256xf32> -> vector<128x256xf32>
    %c0_3 = arith.constant 0 : index
    %c0_4 = arith.constant 0 : index
    %7 = vector.load %arg2[%c0_3, %c0_4] : memref<1x256xf32, #tpu.memory_space<vmem>>, vector<1x256xf32>
    %8 = vector.broadcast %7 : vector<1x256xf32> to vector<128x256xf32>
    %9 = arith.addf %6, %8 : vector<128x256xf32>
    %cst_5 = arith.constant 2.000000e-01 : f32
    %10 = vector.broadcast %cst_5 : f32 to vector<128x256xf32>
    %11 = arith.mulf %10, %9 : vector<128x256xf32>
    %12 = arith.maximumf %9, %11 : vector<128x256xf32>
    %13 = arith.truncf %12 : vector<128x256xf32> to vector<128x256xbf16>
    %c0_6 = arith.constant 0 : index
    %c0_7 = arith.constant 0 : index
    %14 = vector.load %arg3[%c0_6, %c0_7] : memref<256x512xbf16, #tpu.memory_space<vmem>>, vector<256x512xbf16>
    %cst_8 = arith.constant dense<0.000000e+00> : vector<128x512xf32>
    %15 = tpu.matmul %13, %14, %cst_8 {dimension_numbers = #tpu.dot_dimension_numbers<[1], [0], [0], [1], [0, 0, 1, 1], [], []>} : vector<128x256xbf16>, vector<256x512xbf16>, vector<128x512xf32> -> vector<128x512xf32>
    %cst_9 = arith.constant dense<0.000000e+00> : vector<512xf32>
    %16 = vector.multi_reduction <add>, %15, %cst_9 [0] : vector<128x512xf32> to vector<512xf32>
    %17 = vector.shape_cast %16 : vector<512xf32> to vector<1x512xf32>
    %cst_10 = arith.constant 1.280000e+02 : f32
    %18 = vector.broadcast %cst_10 : f32 to vector<1x512xf32>
    %19 = arith.divf %17, %18 : vector<1x512xf32>
    %20 = vector.broadcast %19 : vector<1x512xf32> to vector<128x512xf32>
    %21 = arith.subf %15, %20 : vector<128x512xf32>
    %22 = arith.mulf %21, %21 : vector<128x512xf32>
    %cst_11 = arith.constant dense<0.000000e+00> : vector<512xf32>
    %23 = vector.multi_reduction <add>, %22, %cst_11 [0] : vector<128x512xf32> to vector<512xf32>
    %24 = vector.shape_cast %23 : vector<512xf32> to vector<1x512xf32>
    %cst_12 = arith.constant 1.280000e+02 : f32
    %25 = vector.broadcast %cst_12 : f32 to vector<1x512xf32>
    %26 = arith.divf %24, %25 : vector<1x512xf32>
    %cst_13 = arith.constant 9.99999974E-6 : f32
    %27 = vector.broadcast %cst_13 : f32 to vector<1x512xf32>
    %28 = arith.addf %26, %27 : vector<1x512xf32>
    %29 = math.rsqrt %28 : vector<1x512xf32>
    %c0_14 = arith.constant 0 : index
    %c0_15 = arith.constant 0 : index
    %30 = vector.load %arg4[%c0_14, %c0_15] : memref<1x512xf32, #tpu.memory_space<vmem>>, vector<1x512xf32>
    %31 = arith.mulf %29, %30 : vector<1x512xf32>
    %32 = vector.broadcast %31 : vector<1x512xf32> to vector<128x512xf32>
    %33 = arith.mulf %21, %32 : vector<128x512xf32>
    %c0_16 = arith.constant 0 : index
    %c0_17 = arith.constant 0 : index
    %34 = vector.load %arg5[%c0_16, %c0_17] : memref<1x512xf32, #tpu.memory_space<vmem>>, vector<1x512xf32>
    %35 = vector.broadcast %34 : vector<1x512xf32> to vector<128x512xf32>
    %36 = arith.addf %33, %35 : vector<128x512xf32>
    %cst_18 = arith.constant 2.000000e-01 : f32
    %37 = vector.broadcast %cst_18 : f32 to vector<128x512xf32>
    %38 = arith.mulf %37, %36 : vector<128x512xf32>
    %39 = arith.maximumf %36, %38 : vector<128x512xf32>
    %c0_i32_19 = arith.constant 0 : i32
    %40 = tpu.memref_slice %arg14[%c0_i32_19] : memref<2x!tpu.dma_semaphore, #tpu.memory_space<semaphore_mem>> -> memref<1x!tpu.dma_semaphore, #tpu.memory_space<semaphore_mem>>
    %41 = tpu.memref_squeeze %40 : memref<1x!tpu.dma_semaphore, #tpu.memory_space<semaphore_mem>> -> memref<!tpu.dma_semaphore, #tpu.memory_space<semaphore_mem>>
    tpu.wait_dma2 semaphore(%41 : memref<!tpu.dma_semaphore, #tpu.memory_space<semaphore_mem>>) src(%arg6 : memref<512x1024xbf16, #tpu.memory_space<any>>) dst(%arg12 : memref<512x1024xbf16, #tpu.memory_space<vmem>>)
    %42 = arith.truncf %39 : vector<128x512xf32> to vector<128x512xbf16>
    %c0_20 = arith.constant 0 : index
    %c0_21 = arith.constant 0 : index
    %43 = vector.load %arg12[%c0_20, %c0_21] : memref<512x1024xbf16, #tpu.memory_space<vmem>>, vector<512x1024xbf16>
    %cst_22 = arith.constant dense<0.000000e+00> : vector<128x1024xf32>
    %44 = tpu.matmul %42, %43, %cst_22 {dimension_numbers = #tpu.dot_dimension_numbers<[1], [0], [0], [1], [0, 0, 1, 1], [], []>} : vector<128x512xbf16>, vector<512x1024xbf16>, vector<128x1024xf32> -> vector<128x1024xf32>
    %cst_23 = arith.constant dense<0.000000e+00> : vector<1024xf32>
    %45 = vector.multi_reduction <add>, %44, %cst_23 [0] : vector<128x1024xf32> to vector<1024xf32>
    %46 = vector.shape_cast %45 : vector<1024xf32> to vector<1x1024xf32>
    %cst_24 = arith.constant 1.280000e+02 : f32
    %47 = vector.broadcast %cst_24 : f32 to vector<1x1024xf32>
    %48 = arith.divf %46, %47 : vector<1x1024xf32>
    %49 = vector.broadcast %48 : vector<1x1024xf32> to vector<128x1024xf32>
    %50 = arith.subf %44, %49 : vector<128x1024xf32>
    %51 = arith.mulf %50, %50 : vector<128x1024xf32>
    %cst_25 = arith.constant dense<0.000000e+00> : vector<1024xf32>
    %52 = vector.multi_reduction <add>, %51, %cst_25 [0] : vector<128x1024xf32> to vector<1024xf32>
    %53 = vector.shape_cast %52 : vector<1024xf32> to vector<1x1024xf32>
    %cst_26 = arith.constant 1.280000e+02 : f32
    %54 = vector.broadcast %cst_26 : f32 to vector<1x1024xf32>
    %55 = arith.divf %53, %54 : vector<1x1024xf32>
    %cst_27 = arith.constant 9.99999974E-6 : f32
    %56 = vector.broadcast %cst_27 : f32 to vector<1x1024xf32>
    %57 = arith.addf %55, %56 : vector<1x1024xf32>
    %58 = math.rsqrt %57 : vector<1x1024xf32>
    %c0_28 = arith.constant 0 : index
    %c0_29 = arith.constant 0 : index
    %59 = vector.load %arg7[%c0_28, %c0_29] : memref<1x1024xf32, #tpu.memory_space<vmem>>, vector<1x1024xf32>
    %60 = arith.mulf %58, %59 : vector<1x1024xf32>
    %61 = vector.broadcast %60 : vector<1x1024xf32> to vector<128x1024xf32>
    %62 = arith.mulf %50, %61 : vector<128x1024xf32>
    %c0_30 = arith.constant 0 : index
    %c0_31 = arith.constant 0 : index
    %63 = vector.load %arg8[%c0_30, %c0_31] : memref<1x1024xf32, #tpu.memory_space<vmem>>, vector<1x1024xf32>
    %64 = vector.broadcast %63 : vector<1x1024xf32> to vector<128x1024xf32>
    %65 = arith.addf %62, %64 : vector<128x1024xf32>
    %cst_32 = arith.constant 2.000000e-01 : f32
    %66 = vector.broadcast %cst_32 : f32 to vector<128x1024xf32>
    %67 = arith.mulf %66, %65 : vector<128x1024xf32>
    %68 = arith.maximumf %65, %67 : vector<128x1024xf32>
    %c1_i32_33 = arith.constant 1 : i32
    %69 = tpu.memref_slice %arg14[%c1_i32_33] : memref<2x!tpu.dma_semaphore, #tpu.memory_space<semaphore_mem>> -> memref<1x!tpu.dma_semaphore, #tpu.memory_space<semaphore_mem>>
    %70 = tpu.memref_squeeze %69 : memref<1x!tpu.dma_semaphore, #tpu.memory_space<semaphore_mem>> -> memref<!tpu.dma_semaphore, #tpu.memory_space<semaphore_mem>>
    tpu.wait_dma2 semaphore(%70 : memref<!tpu.dma_semaphore, #tpu.memory_space<semaphore_mem>>) src(%arg9 : memref<1024x896xbf16, #tpu.memory_space<any>>) dst(%arg13 : memref<1024x896xbf16, #tpu.memory_space<vmem>>)
    %71 = arith.truncf %68 : vector<128x1024xf32> to vector<128x1024xbf16>
    %c0_34 = arith.constant 0 : index
    %c0_35 = arith.constant 0 : index
    %72 = vector.load %arg13[%c0_34, %c0_35] : memref<1024x896xbf16, #tpu.memory_space<vmem>>, vector<1024x896xbf16>
    %cst_36 = arith.constant dense<0.000000e+00> : vector<128x896xf32>
    %73 = tpu.matmul %71, %72, %cst_36 {dimension_numbers = #tpu.dot_dimension_numbers<[1], [0], [0], [1], [0, 0, 1, 1], [], []>} : vector<128x1024xbf16>, vector<1024x896xbf16>, vector<128x896xf32> -> vector<128x896xf32>
    %c0_37 = arith.constant 0 : index
    %c0_38 = arith.constant 0 : index
    %74 = vector.load %arg10[%c0_37, %c0_38] : memref<1x896xf32, #tpu.memory_space<vmem>>, vector<1x896xf32>
    %75 = vector.broadcast %74 : vector<1x896xf32> to vector<128x896xf32>
    %76 = arith.addf %73, %75 : vector<128x896xf32>
    %77 = math.tanh %76 : vector<128x896xf32>
    %78 = arith.truncf %77 : vector<128x896xf32> to vector<128x896xbf16>
    %c0_39 = arith.constant 0 : index
    %c0_40 = arith.constant 0 : index
    %79 = vector.load %arg11[%c0_39, %c0_40] : memref<128x896xbf16, #tpu.memory_space<vmem>>, vector<128x896xbf16>
    tpu.vector_store %arg11[%c0_39, %c0_40], %78 {strides = array<i32>} : memref<128x896xbf16, #tpu.memory_space<vmem>>, vector<128x896xbf16>,
    return
  }
}

</mosaic_0001>

<bundles_post_ra>
// kernel: tpu_custom_call.1
= control target key start
LH: loop header
LB: loop body
LE: loop exit
PB: predicated region body
PF: predicated region fallthrough
CT: control target
= control target key end

     0   :  { %16 = vsyncpa [#allocation6], 0  ;;  %s13743_s0 = inlined_call_operand.hbm [shape: bf16[128,128], index: 0, kind: input, shape index: {}]   ;;  %s13744_s1 = inlined_call_operand.hbm [shape: bf16[128,256], index: 1, kind: input, shape index: {}]   ;;  %s13745_s2 = inlined_call_operand.hbm [shape: f32[1,256], index: 2, kind: input, shape index: {}]   ;;  %s13746_s3 = inlined_call_operand.hbm [shape: bf16[256,512], index: 3, kind: input, shape index: {}]   ;;  %s13747_s4 = inlined_call_operand.hbm [shape: f32[1,512], index: 4, kind: input, shape index: {}]   ;;  %s13748_s5 = inlined_call_operand.hbm [shape: f32[1,512], index: 5, kind: input, shape index: {}]   ;;  %s13749_s6 = inlined_call_operand.hbm [shape: bf16[512,1024], index: 6, kind: input, shape index: {}]   ;;  %s13750_s7 = inlined_call_operand.hbm [shape: f32[1,1024], index: 7, kind: input, shape index: {}]   ;;  %s13751_s8 = inlined_call_operand.hbm [shape: f32[1,1024], index: 8, kind: input, shape index: {}]   ;;  %s13752_s9 = inlined_call_operand.hbm [shape: bf16[1024,896], index: 9, kind: input, shape index: {}]   ;;  %s13753_s10 = inlined_call_operand.hbm [shape: f32[1,896], index: 10, kind: input, shape index: {}]   ;;  %s13754_s11 = inlined_call_operand.hbm [shape: bf16[128,896], index: 11, kind: output, shape index: {}]  }
   0x1   :  { %17 = vsyncpa [#allocation9], 0 }
   0x2   :  { %18 = vsyncpa [#allocation12], 0 }
   0x3   :  { %19 = vsyncpa [#allocation15], 0 }
   0x4   :  { %20 = vsyncpa [#allocation18], 0 }
   0x5   :  { %21 = vsyncpa [#allocation7], 0  ;;  %s8806_s17 = smov [#allocation8]   ;;  %s8570_s21 = scalar_lea.hbm %s13744_s1, 2048 }
   0x6   :  { %s39_s18 = sshll.u32 %s8806_s17, 4  ;;  %p8571_p0 = scmp.ne.s32.totalorder %s13744_s1, %s8570_s21  ;;  %s40_s18 = int_to_ptr.vmem [resolvable:$true] %s39_s18 }
   0x7   :  { %p8574_p1 = scmp.lt.u32.totalorder %s8570_s21, %s13744_s1 }
   0x9   :  { %p8576_p2 = pnand %p8574_p1, %p8571_p0 }
   0xb   :  { %8579 = shalt.err (!%p8576_p2)
}
   0xc   :  { %s8580_s26 = scalar_lea.vmem %s40_s18, 2048  ;;  %p8585_p4 = scmp.lt.s32.totalorder %s40_s18, %s40_s18 }
   0xd   :  { %p8581_p3 = scmp.ne.s32.totalorder %s40_s18, %s8580_s26  ;;  %p8586_p5 = scmp.lt.s32.totalorder %s8580_s26, %s8580_s26 }
   0xf   :  { %p8587_p6 = por %p8586_p5, %p8585_p4 }
  0x11   :  { %p8588_p7 = pnand %p8587_p6, %p8581_p3 }
  0x13   :  { %8591 = shalt.err (!%p8588_p7)
}
  0x14   :  { %s8807_s27 = smov 128   ;;  %s8808_s28 = smov 8  }
  0x15   :  { %45 = dma.hbm_to_vmem [thread:$0]  %s13744_s1, 2048, %s40_s18, [#allocation9], %s8807_s27, %s8807_s27, %s8808_s28  }
  0x16   :  { %s8809_s12 = smov [#allocation11]   ;;  %s8592_s16 = scalar_lea.hbm %s13746_s3, 8192 }
  0x17   :  { %s61_s13 = sshll.u32 %s8809_s12, 4  ;;  %p8593_p8 = scmp.ne.s32.totalorder %s13746_s3, %s8592_s16  ;;  %s62_s13 = int_to_ptr.vmem [resolvable:$true] %s61_s13 }
  0x18   :  { %p8596_p9 = scmp.lt.u32.totalorder %s8592_s16, %s13746_s3 }
  0x1a   :  { %p8598_p10 = pnand %p8596_p9, %p8593_p8 }
  0x1c   :  { %8601 = shalt.err (!%p8598_p10)
}
  0x1d   :  { %s8602_s22 = scalar_lea.vmem %s62_s13, 8192  ;;  %p8607_p12 = scmp.lt.s32.totalorder %s62_s13, %s62_s13 }
  0x1e   :  { %p8603_p11 = scmp.ne.s32.totalorder %s62_s13, %s8602_s22  ;;  %p8608_p13 = scmp.lt.s32.totalorder %s8602_s22, %s8602_s22 }
  0x20   :  { %p8609_p0 = por %p8608_p13, %p8607_p12 }
  0x22   :  { %p8610_p1 = pnand %p8609_p0, %p8603_p11 }
  0x24   :  { %8613 = shalt.err (!%p8610_p1)
}
  0x25   :  { %s8810_s1 = smov 256   ;;  %s8811_s18 = smov 16  }
  0x26   :  { %67 = dma.hbm_to_vmem [thread:$0]  %s13746_s3, 8192, %s62_s13, [#allocation12], %s8810_s1, %s8810_s1, %s8811_s18  }
  0x27   :  { %s8812_s25 = smov [#allocation14]   ;;  %s8813_s29 = smov [#allocation17]  }
  0x28   :  { %s84_s26 = sshll.u32 %s8812_s25, 4  ;;  %s104_s30 = sshll.u32 %s8813_s29, 4  ;;  %s85_s26 = int_to_ptr.vmem [resolvable:$true] %s84_s26  ;;  %s105_s30 = int_to_ptr.vmem [resolvable:$true] %s104_s30 }
  0x29   :  { %s8614_s15 = scalar_lea.hbm %s13748_s5, 64 }
  0x2a   :  { %p8615_p2 = scmp.ne.s32.totalorder %s13748_s5, %s8614_s15  ;;  %p8618_p3 = scmp.lt.u32.totalorder %s8614_s15, %s13748_s5 }
  0x2c   :  { %p8620_p4 = pnand %p8618_p3, %p8615_p2 }
  0x2e   :  { %8623 = shalt.err (!%p8620_p4)
}
  0x2f   :  { %s8624_s3 = scalar_lea.vmem %s85_s26, 64  ;;  %p8629_p6 = scmp.lt.s32.totalorder %s85_s26, %s85_s26 }
  0x30   :  { %p8625_p5 = scmp.ne.s32.totalorder %s85_s26, %s8624_s3  ;;  %p8630_p7 = scmp.lt.s32.totalorder %s8624_s3, %s8624_s3 }
  0x32   :  { %p8631_p8 = por %p8630_p7, %p8629_p6 }
  0x34   :  { %p8632_p9 = pnand %p8631_p8, %p8625_p5 }
  0x36   :  { %8635 = shalt.err (!%p8632_p9)
}
  0x37   :  { %87 = dma.hbm_to_vmem [thread:$0]  %s13748_s5, 64, %s85_s26, [#allocation15]  }
  0x38   :  { %s8636_s18 = scalar_lea.hbm %s13751_s8, 128 }
  0x39   :  { %p8637_p10 = scmp.ne.s32.totalorder %s13751_s8, %s8636_s18  ;;  %p8640_p11 = scmp.lt.u32.totalorder %s8636_s18, %s13751_s8 }
  0x3b   :  { %p8642_p12 = pnand %p8640_p11, %p8637_p10 }
  0x3d   :  { %8645 = shalt.err (!%p8642_p12)
}
  0x3e   :  { %s8646_s12 = scalar_lea.vmem %s105_s30, 128  ;;  %p8651_p0 = scmp.lt.s32.totalorder %s105_s30, %s105_s30 }
  0x3f   :  { %p8647_p13 = scmp.ne.s32.totalorder %s105_s30, %s8646_s12  ;;  %p8652_p1 = scmp.lt.s32.totalorder %s8646_s12, %s8646_s12 }
  0x41   :  { %p8653_p2 = por %p8652_p1, %p8651_p0 }
  0x43   :  { %p8654_p3 = pnand %p8653_p2, %p8647_p13 }
  0x45   :  { %8657 = shalt.err (!%p8654_p3)
}
  0x46   :  { %107 = dma.hbm_to_vmem [thread:$0]  %s13751_s8, 128, %s105_s30, [#allocation18]  }
  0x47   :  { %s8814_s14 = smov [#allocation5]   ;;  %s8658_s19 = scalar_lea.hbm %s13743_s0, 1024 }
  0x48   :  { %s27_s15 = sshll.u32 %s8814_s14, 4  ;;  %p8659_p4 = scmp.ne.s32.totalorder %s13743_s0, %s8658_s19  ;;  %s28_s15 = int_to_ptr.vmem [resolvable:$true] %s27_s15 }
  0x49   :  { %p8662_p5 = scmp.lt.u32.totalorder %s8658_s19, %s13743_s0 }
  0x4b   :  { %p8664_p6 = pnand %p8662_p5, %p8659_p4 }
  0x4d   :  { %8667 = shalt.err (!%p8664_p6)
}
  0x4e   :  { %s8668_s22 = scalar_lea.vmem %s28_s15, 1024  ;;  %p8673_p8 = scmp.lt.s32.totalorder %s28_s15, %s28_s15 }
  0x4f   :  { %p8669_p7 = scmp.ne.s32.totalorder %s28_s15, %s8668_s22  ;;  %p8674_p9 = scmp.lt.s32.totalorder %s8668_s22, %s8668_s22 }
  0x51   :  { %p8675_p10 = por %p8674_p9, %p8673_p8 }
  0x53   :  { %p8676_p11 = pnand %p8675_p10, %p8669_p7 }
  0x55   :  { %8679 = shalt.err (!%p8676_p11)
}
  0x56   :  { %s8815_s8 = smov 64   ;;  %s8816_s30 = smov 4  }
  0x57   :  { %33 = dma.hbm_to_vmem [thread:$0]  %s13743_s0, 1024, %s28_s15, [#allocation6], %s8815_s8, %s8815_s8, %s8816_s30  }
  0x58   :  { %s8817_s23 = smov [#allocation10]   ;;  %s8818_s25 = smov [#allocation13]  }
  0x59   :  { %s52_s24 = sshll.u32 %s8817_s23, 4  ;;  %s74_s29 = sshll.u32 %s8818_s25, 4  ;;  %s53_s24 = int_to_ptr.vmem [resolvable:$true] %s52_s24  ;;  %s75_s29 = int_to_ptr.vmem [resolvable:$true] %s74_s29 }
  0x5a   :  { %s8680_s26 = scalar_lea.hbm %s13745_s2, 32 }
  0x5b   :  { %p8681_p12 = scmp.ne.s32.totalorder %s13745_s2, %s8680_s26  ;;  %p8684_p13 = scmp.lt.u32.totalorder %s8680_s26, %s13745_s2 }
  0x5d   :  { %p8686_p0 = pnand %p8684_p13, %p8681_p12 }
  0x5f   :  { %8689 = shalt.err (!%p8686_p0)
}
  0x60   :  { %s8690_s0 = scalar_lea.vmem %s53_s24, 32  ;;  %p8695_p2 = scmp.lt.s32.totalorder %s53_s24, %s53_s24 }
  0x61   :  { %p8691_p1 = scmp.ne.s32.totalorder %s53_s24, %s8690_s0  ;;  %p8696_p3 = scmp.lt.s32.totalorder %s8690_s0, %s8690_s0 }
  0x63   :  { %p8697_p4 = por %p8696_p3, %p8695_p2 }
  0x65   :  { %p8698_p5 = pnand %p8697_p4, %p8691_p1 }
  0x67   :  { %8701 = shalt.err (!%p8698_p5)
}
  0x68   :  { %55 = dma.hbm_to_vmem [thread:$0]  %s13745_s2, 32, %s53_s24, [#allocation9]  }
  0x69   :  { %s8702_s21 = scalar_lea.hbm %s13747_s4, 64 }
  0x6a   :  { %p8703_p6 = scmp.ne.s32.totalorder %s13747_s4, %s8702_s21  ;;  %p8706_p7 = scmp.lt.u32.totalorder %s8702_s21, %s13747_s4 }
  0x6c   :  { %p8708_p8 = pnand %p8706_p7, %p8703_p6 }
  0x6e   :  { %8711 = shalt.err (!%p8708_p8)
}
  0x6f   :  { %s8712_s25 = scalar_lea.vmem %s75_s29, 64  ;;  %p8717_p10 = scmp.lt.s32.totalorder %s75_s29, %s75_s29 }
  0x70   :  { %p8713_p9 = scmp.ne.s32.totalorder %s75_s29, %s8712_s25  ;;  %p8718_p11 = scmp.lt.s32.totalorder %s8712_s25, %s8712_s25 }
  0x72   :  { %p8719_p12 = por %p8718_p11, %p8717_p10 }
  0x74   :  { %p8720_p13 = pnand %p8719_p12, %p8713_p9 }
  0x76   :  { %8723 = shalt.err (!%p8720_p13)
}
  0x77   :  { %77 = dma.hbm_to_vmem [thread:$0]  %s13747_s4, 64, %s75_s29, [#allocation12]  }
  0x78   :  { %s8819_s12 = smov [#allocation16]   ;;  %s8820_s26 = smov [#allocation19]  }
  0x79   :  { %s94_s5 = sshll.u32 %s8819_s12, 4  ;;  %s114_s14 = sshll.u32 %s8820_s26, 4  ;;  %s95_s5 = int_to_ptr.vmem [resolvable:$true] %s94_s5  ;;  %s115_s14 = int_to_ptr.vmem [resolvable:$true] %s114_s14 }
  0x7a   :  { %s8724_s19 = scalar_lea.hbm %s13750_s7, 128 }
  0x7b   :  { %p8725_p0 = scmp.ne.s32.totalorder %s13750_s7, %s8724_s19  ;;  %p8728_p1 = scmp.lt.u32.totalorder %s8724_s19, %s13750_s7 }
  0x7d   :  { %p8730_p2 = pnand %p8728_p1, %p8725_p0 }
  0x7f   :  { %8733 = shalt.err (!%p8730_p2)
}
  0x80   :  { %s8734_s4 = scalar_lea.vmem %s95_s5, 128  ;;  %p8739_p4 = scmp.lt.s32.totalorder %s95_s5, %s95_s5 }
  0x81   :  { %p8735_p3 = scmp.ne.s32.totalorder %s95_s5, %s8734_s4  ;;  %p8740_p5 = scmp.lt.s32.totalorder %s8734_s4, %s8734_s4 }
  0x83   :  { %p8741_p6 = por %p8740_p5, %p8739_p4 }
  0x85   :  { %p8742_p7 = pnand %p8741_p6, %p8735_p3 }
  0x87   :  { %8745 = shalt.err (!%p8742_p7)
}
  0x88   :  { %97 = dma.hbm_to_vmem [thread:$0]  %s13750_s7, 128, %s95_s5, [#allocation15]  }
  0x89   :  { %s8746_s1 = scalar_lea.hbm %s13753_s10, 112 }
  0x8a   :  { %p8747_p8 = scmp.ne.s32.totalorder %s13753_s10, %s8746_s1  ;;  %p8750_p9 = scmp.lt.u32.totalorder %s8746_s1, %s13753_s10 }
  0x8c   :  { %p8752_p10 = pnand %p8750_p9, %p8747_p8 }
  0x8e   :  { %8755 = shalt.err (!%p8752_p10)
}
  0x8f   :  { %s8756_s24 = scalar_lea.vmem %s115_s14, 112  ;;  %s8760_s12 = scalar_lea.vmem %s115_s14, 128 }
  0x90   :  { %p8757_p11 = scmp.ne.s32.totalorder %s115_s14, %s8756_s24  ;;  %p8761_p12 = scmp.lt.s32.totalorder %s115_s14, %s115_s14 }
  0x91   :  { %p8762_p13 = scmp.lt.s32.totalorder %s8760_s12, %s8756_s24 }
  0x93   :  { %p8763_p0 = por %p8762_p13, %p8761_p12 }
  0x95   :  { %p8764_p1 = pnand %p8763_p0, %p8757_p11 }
  0x97   :  { %8767 = shalt.err (!%p8764_p1)
}
  0x98   :  { %117 = dma.hbm_to_vmem [thread:$0]  %s13753_s10, 112, %s115_s14, [#allocation18]  }
  0x99   :  { %8790 = dma.done.wait [#allocation6], 1024  }
  0x9a   :  { %8791 = vsyncadd [#allocation6], 4294966272 }
  0x9b   :  { %8792 = dma.done.wait [#allocation9], 2080  }
  0x9c   :  { %8793 = vsyncadd [#allocation9], 4294965216 }
  0x9d   :  { %8794 = dma.done.wait [#allocation12], 8256  }
  0x9e   :  { %8795 = vsyncadd [#allocation12], 4294959040 }
  0x9f   :  { %8796 = dma.done.wait [#allocation15], 192  }
  0xa0   :  { %8797 = vsyncadd [#allocation15], 4294967104 }
  0xa1   :  { %8798 = dma.done.wait [#allocation18], 240  }
  0xa2   :  { %8799 = vsyncadd [#allocation18], 4294967056  ;;  %s150_s26 = sld [smem:[#allocation0]]   ;;  %s8821_s16 = smov 1024   ;;  %v8822_v0 = vmov 0  }
  0xa3   :  { %162 = sst [smem:[#allocation22]] %s8821_s16  ;;  %420 = vmatprep.mubr.bf16.mxu0 %v8822_v0  ;;  %s8823_s10 = smov [#allocation2]  }
  0xa4   :  { %164 = sst [smem:[#allocation22 + $0x1]] %s8821_s16  ;;  %s158_s14 = sshll.u32 %s8823_s10, 4  ;;  %s159_s14 = int_to_ptr.vmem [resolvable:$true] %s158_s14 }
  0xa5   :  { %166 = sst [smem:[#allocation22 + $0x2]] %s8808_s28  ;;  %s8824_s17 = smov 512  }
  0xa6   :  { %168 = sst [smem:[#allocation22 + $0x3]] %s8815_s8  ;;  %s8825_s15 = smov 2  }
  0xa7   :  { %170 = sst [smem:[#allocation22 + $0x4]] %s8807_s27  ;;  %s8826_s20 = smov [#allocation4]  }
  0xa8   :  { %174 = sst [smem:[#allocation22 + $0x6]] %s8824_s17  ;;  %s7139_s19 = sshll.u32 %s150_s26, 26 }
  0xa9   :  { %176 = sst [smem:[#allocation22 + $0x7]] %s8815_s8  ;;  %s7140_s0 = sadd.s32 134217728, %s7139_s19 }
  0xaa   :  { %178 = sst [smem:[#allocation22 + $0x8]] %s8816_s30  ;;  %s8827_s3 = smov [#allocation21]  }
  0xab   :  { %172 = sst [smem:[#allocation22 + $0x5]] %s8825_s15  ;;  %s8828_s29 = smov 896  }
  0xac   :  { %180 = dma.general %s13749_s6, 32768, %s159_s14, %s8826_s20, %s8827_s3, [#allocation22], %s7140_s0, 0  }
  0xad   :  { %197 = sst [smem:[#allocation24]] %s8828_s29  ;;  %s8829_s13 = smov 7  }
  0xae   :  { %199 = sst [smem:[#allocation24 + $0x1]] %s8828_s29  ;;  %s8830_s21 = smov [#allocation3]  }
  0xaf   :  { %201 = sst [smem:[#allocation24 + $0x2]] %s8829_s13  ;;  %s193_s22 = sshll.u32 %s8830_s21, 4  ;;  %s194_s22 = int_to_ptr.vmem [resolvable:$true] %s193_s22 }
  0xb0   :  { %203 = sst [smem:[#allocation24 + $0x3]] %s8815_s8  ;;  %s8831_s1 = smov 448  }
  0xb1   :  { %205 = sst [smem:[#allocation24 + $0x4]] %s8807_s27  ;;  %s8832_s6 = smov [#allocation4 + $0x1]  }
  0xb2   :  { %207 = sst [smem:[#allocation24 + $0x5]] %s8825_s15  ;;  %s8833_s18 = smov [#allocation23]  }
  0xb3   :  { %209 = sst [smem:[#allocation24 + $0x6]] %s8831_s1 }
  0xb4   :  { %211 = sst [smem:[#allocation24 + $0x7]] %s8815_s8 }
  0xb5   :  { %213 = sst [smem:[#allocation24 + $0x8]] %s8816_s30 }
  0xb6   :  { %215 = dma.general %s13752_s9, 57344, %s194_s22, %s8832_s6, %s8833_s18, [#allocation24], %s7140_s0, 0  }
  0xb7   :  { %v8175_v1 = vld [vmem:[#allocation8 + $0x4] ss:$8 sps:$4 sm:$0xff]   ;;  %v8177_v2 = vld [vmem:[#allocation8] ss:$8 sps:$4 sm:$0xff]   ;;  %v8178_v3 = vld [vmem:[#allocation8 + $0x14] ss:$8 sps:$4 sm:$0xff]  }
  0xb8   :  { %388 = vmatprep.subr.bf16.mxu0 %v8175_v1  ;;  %v8180_v4 = vld [vmem:[#allocation8 + $0x10] ss:$8 sps:$4 sm:$0xff]   ;;  %v8181_v5 = vld [vmem:[#allocation8 + $0x24] ss:$8 sps:$4 sm:$0xff]   ;;  %v8183_v6 = vld [vmem:[#allocation8 + $0x20] ss:$8 sps:$4 sm:$0xff]  }
  0xb9   :  { %389 = vmatpush1.bf16.msra.mxu0 %v8177_v2  ;;  %v8184_v7 = vld [vmem:[#allocation8 + $0x34] ss:$8 sps:$4 sm:$0xff]   ;;  %v8186_v8 = vld [vmem:[#allocation8 + $0x30] ss:$8 sps:$4 sm:$0xff]   ;;  %v8187_v9 = vld [vmem:[#allocation8 + $0x44] ss:$8 sps:$4 sm:$0xff]  }
  0xba   :  { %390 = vmatprep.subr.bf16.mxu0 %v8178_v3  ;;  %v8189_v10 = vld [vmem:[#allocation8 + $0x40] ss:$8 sps:$4 sm:$0xff]   ;;  %v8190_v11 = vld [vmem:[#allocation8 + $0x54] ss:$8 sps:$4 sm:$0xff]   ;;  %v8192_v12 = vld [vmem:[#allocation8 + $0x50] ss:$8 sps:$4 sm:$0xff]  }
  0xbb   :  { %v8193_v13 = vld [vmem:[#allocation8 + $0x64] ss:$8 sps:$4 sm:$0xff]   ;;  %v8195_v16 = vld [vmem:[#allocation8 + $0x60] ss:$8 sps:$4 sm:$0xff]   ;;  %v8196_v19 = vld [vmem:[#allocation8 + $0x74] ss:$8 sps:$4 sm:$0xff]  }
  0xbc   :  { %v8210_v14 = vld [vmem:[#allocation11 + $0x4] ss:$16 sps:$4 sm:$0xff]   ;;  %v8212_v15 = vld [vmem:[#allocation11] ss:$16 sps:$4 sm:$0xff]   ;;  %v8209_v22 = vld [vmem:[#allocation11 + $0xc] ss:$16 sps:$4 sm:$0xff]  }
  0xbd   :  { %391 = vmatpush1.bf16.msra.mxu0 %v8180_v4  ;;  %965 = vmatprep.subr.bf16.mxu1 %v8210_v14  ;;  %v8216_v17 = vld [vmem:[#allocation11 + $0x24] ss:$16 sps:$4 sm:$0xff]   ;;  %v8218_v18 = vld [vmem:[#allocation11 + $0x20] ss:$16 sps:$4 sm:$0xff]   ;;  %v8207_v26 = vld [vmem:[#allocation11 + $0x8] ss:$16 sps:$4 sm:$0xff]  }
  0xbe   :  { %392 = vmatprep.subr.bf16.mxu0 %v8181_v5  ;;  %966 = vmatpush1.bf16.msra.mxu1 %v8212_v15  ;;  %v8198_v20 = vld [vmem:[#allocation8 + $0x70] ss:$8 sps:$4 sm:$0xff]   ;;  %v8199_v25 = vld [vmem:[#allocation5] sm:$0xff]   ;;  %v8200_v34 = vld [vmem:[#allocation5 + $0x8] sm:$0xff]  }
  0xbf   :  { %967 = vmatprep.subr.bf16.mxu1 %v8216_v17  ;;  %v8222_v21 = vld [vmem:[#allocation11 + $0x44] ss:$16 sps:$4 sm:$0xff]   ;;  %v8224_v23 = vld [vmem:[#allocation11 + $0x40] ss:$16 sps:$4 sm:$0xff]   ;;  %v8215_v27 = vld [vmem:[#allocation11 + $0x2c] ss:$16 sps:$4 sm:$0xff]  }
  0xc0   :  { %v8228_v24 = vld [vmem:[#allocation11 + $0x64] ss:$16 sps:$4 sm:$0xff]   ;;  %v8230_v28 = vld [vmem:[#allocation11 + $0x60] ss:$16 sps:$4 sm:$0xff]   ;;  %v8213_v30 = vld [vmem:[#allocation11 + $0x28] ss:$16 sps:$4 sm:$0xff]  }
  0xc1   :  { %393 = vmatpush1.bf16.msra.mxu0 %v8183_v6  ;;  %v8234_v29 = vld [vmem:[#allocation11 + $0x84] ss:$16 sps:$4 sm:$0xff]   ;;  %v8221_v31 = vld [vmem:[#allocation11 + $0x4c] ss:$16 sps:$4 sm:$0xff]   ;;  %v8236_v32 = vld [vmem:[#allocation11 + $0x80] ss:$16 sps:$4 sm:$0xff]  }
  0xc2   :  { %394 = vmatprep.subr.bf16.mxu0 %v8184_v7  ;;  %968 = vmatpush1.bf16.msra.mxu1 %v8218_v18  ;;  %v8240_v33 = vld [vmem:[#allocation11 + $0xa4] ss:$16 sps:$4 sm:$0xff]   ;;  %v8219_v35 = vld [vmem:[#allocation11 + $0x48] ss:$16 sps:$4 sm:$0xff]   ;;  %v8227_v36 = vld [vmem:[#allocation11 + $0x6c] ss:$16 sps:$4 sm:$0xff]  }
  0xc3   :  { %969 = vmatprep.subr.bf16.mxu1 %v8222_v21  ;;  %v8242_v37 = vld [vmem:[#allocation11 + $0xa0] ss:$16 sps:$4 sm:$0xff]   ;;  %v8246_v38 = vld [vmem:[#allocation11 + $0xc4] ss:$16 sps:$4 sm:$0xff]   ;;  %v8225_v39 = vld [vmem:[#allocation11 + $0x68] ss:$16 sps:$4 sm:$0xff]  }
  0xc4   :  { %v8233_v40 = vld [vmem:[#allocation11 + $0x8c] ss:$16 sps:$4 sm:$0xff]   ;;  %v8248_v41 = vld [vmem:[#allocation11 + $0xc0] ss:$16 sps:$4 sm:$0xff]   ;;  %v8252_v42 = vld [vmem:[#allocation11 + $0xe4] ss:$16 sps:$4 sm:$0xff]  }
  0xc5   :  { %395 = vmatpush1.bf16.msra.mxu0 %v8186_v8  ;;  %v8201_v43 = vld [vmem:[#allocation5 + $0x10] sm:$0xff]   ;;  %v8231_v44 = vld [vmem:[#allocation11 + $0x88] ss:$16 sps:$4 sm:$0xff]   ;;  %v8203_v61 = vld [vmem:[#allocation5 + $0x20] sm:$0xff]  }
  0xc6   :  { %396 = vmatprep.subr.bf16.mxu0 %v8187_v9  ;;  %970 = vmatpush1.bf16.msra.mxu1 %v8224_v23  ;;  %v8239_v45 = vld [vmem:[#allocation11 + $0xac] ss:$16 sps:$4 sm:$0xff]   ;;  %v8254_v46 = vld [vmem:[#allocation11 + $0xe0] ss:$16 sps:$4 sm:$0xff]   ;;  %v8258_v47 = vld [vmem:[#allocation11 + $0x104] ss:$16 sps:$4 sm:$0xff]  }
  0xc7   :  { %971 = vmatprep.subr.bf16.mxu1 %v8228_v24  ;;  %v8237_v48 = vld [vmem:[#allocation11 + $0xa8] ss:$16 sps:$4 sm:$0xff]   ;;  %v8245_v49 = vld [vmem:[#allocation11 + $0xcc] ss:$16 sps:$4 sm:$0xff]   ;;  %v8260_v51 = vld [vmem:[#allocation11 + $0x100] ss:$16 sps:$4 sm:$0xff]  }
  0xc8   :  { %v8202_v50 = vld [vmem:[#allocation5 + $0x18] sm:$0xff]   ;;  %v8266_v55 = vld [vmem:[#allocation11 + $0x120] ss:$16 sps:$4 sm:$0xff]   ;;  %v8204_v6 = vld [vmem:[#allocation5 + $0x28] sm:$0xff]  }
  0xc9   :  { %397 = vmatpush1.bf16.msra.mxu0 %v8189_v10  ;;  %v8243_v52 = vld [vmem:[#allocation11 + $0xc8] ss:$16 sps:$4 sm:$0xff]   ;;  %v8264_v53 = vld [vmem:[#allocation11 + $0x124] ss:$16 sps:$4 sm:$0xff]   ;;  %v8251_v54 = vld [vmem:[#allocation11 + $0xec] ss:$16 sps:$4 sm:$0xff]  }
  0xca   :  { %398 = vmatprep.subr.bf16.mxu0 %v8190_v11  ;;  %972 = vmatpush1.bf16.msra.mxu1 %v8230_v28  ;;  %v8270_v56 = vld [vmem:[#allocation11 + $0x144] ss:$16 sps:$4 sm:$0xff]   ;;  %v8249_v57 = vld [vmem:[#allocation11 + $0xe8] ss:$16 sps:$4 sm:$0xff]   ;;  %v8257_v58 = vld [vmem:[#allocation11 + $0x10c] ss:$16 sps:$4 sm:$0xff]  }
  0xcb   :  { %973 = vmatprep.subr.bf16.mxu1 %v8234_v29  ;;  %v8272_v59 = vld [vmem:[#allocation11 + $0x140] ss:$16 sps:$4 sm:$0xff]   ;;  %v8276_v60 = vld [vmem:[#allocation11 + $0x164] ss:$16 sps:$4 sm:$0xff]   ;;  %v8255_v62 = vld [vmem:[#allocation11 + $0x108] ss:$16 sps:$4 sm:$0xff]  }
  0xcc   :  { %v8263_v63 = vld [vmem:[#allocation11 + $0x12c] ss:$16 sps:$4 sm:$0xff]   ;;  %v8278_v1 = vld [vmem:[#allocation11 + $0x160] ss:$16 sps:$4 sm:$0xff]   ;;  %v8282_v2 = vld [vmem:[#allocation11 + $0x184] ss:$16 sps:$4 sm:$0xff]  }
  0xcd   :  { %399 = vmatpush1.bf16.msra.mxu0 %v8192_v12  ;;  %v8261_v3 = vld [vmem:[#allocation11 + $0x128] ss:$16 sps:$4 sm:$0xff]   ;;  %v8269_v4 = vld [vmem:[#allocation11 + $0x14c] ss:$16 sps:$4 sm:$0xff]   ;;  %v8284_v5 = vld [vmem:[#allocation11 + $0x180] ss:$16 sps:$4 sm:$0xff]  }
  0xce   :  { %400 = vmatprep.subr.bf16.mxu0 %v8193_v13  ;;  %974 = vmatpush1.bf16.msra.mxu1 %v8236_v32  ;;  %v8267_v7 = vld [vmem:[#allocation11 + $0x148] ss:$16 sps:$4 sm:$0xff]   ;;  %v8275_v8 = vld [vmem:[#allocation11 + $0x16c] ss:$16 sps:$4 sm:$0xff]   ;;  %v8288_v15 = vld [vmem:[#allocation11 + $0x1a4] ss:$16 sps:$4 sm:$0xff]  }
  0xcf   :  { %975 = vmatprep.subr.bf16.mxu1 %v8240_v33  ;;  %v8273_v9 = vld [vmem:[#allocation11 + $0x168] ss:$16 sps:$4 sm:$0xff]   ;;  %v8281_v10 = vld [vmem:[#allocation11 + $0x18c] ss:$16 sps:$4 sm:$0xff]   ;;  %v8290_v17 = vld [vmem:[#allocation11 + $0x1a0] ss:$16 sps:$4 sm:$0xff]  }
  0xd0   :  { %v8205_v11 = vld [vmem:[#allocation5 + $0x30] sm:$0xff]   ;;  %v8279_v12 = vld [vmem:[#allocation11 + $0x188] ss:$16 sps:$4 sm:$0xff]   ;;  %v248_v28 = vld [vmem:[#allocation10] sm:$0x3] }
  0xd1   :  { %401 = vmatpush1.bf16.msra.mxu0 %v8195_v16  ;;  %v8206_v13 = vld [vmem:[#allocation5 + $0x38] sm:$0xff]   ;;  %v8296_v21 = vld [vmem:[#allocation11 + $0x1c0] ss:$16 sps:$4 sm:$0xff]  }
  0xd2   :  { %402 = vmatprep.subr.bf16.mxu0 %v8196_v19  ;;  %976 = vmatpush1.bf16.msra.mxu1 %v8242_v37  ;;  %v8287_v14 = vld [vmem:[#allocation11 + $0x1ac] ss:$16 sps:$4 sm:$0xff]   ;;  %v8285_v16 = vld [vmem:[#allocation11 + $0x1a8] ss:$16 sps:$4 sm:$0xff]   ;;  %v8294_v19 = vld [vmem:[#allocation11 + $0x1c4] ss:$16 sps:$4 sm:$0xff]  }
  0xd3   :  { %977 = vmatprep.subr.bf16.mxu1 %v8246_v38  ;;  %v8293_v18 = vld [vmem:[#allocation11 + $0x1cc] ss:$16 sps:$4 sm:$0xff]   ;;  %v8297_v23 = vld [vmem:[#allocation11 + $0x1e8] ss:$16 sps:$4 sm:$0xff]   ;;  %v8302_v24 = vld [vmem:[#allocation11 + $0x1e0] ss:$16 sps:$4 sm:$0xff]  }
  0xd5   :  { %403 = vmatpush1.bf16.msra.mxu0 %v8198_v20  ;;  %v8291_v20 = vld [vmem:[#allocation11 + $0x1c8] ss:$16 sps:$4 sm:$0xff]  }
  0xd6   :  { %1078 = vmatprep.subr.bf16.mxu0 %v8209_v22  ;;  %978 = vmatpush1.bf16.msra.mxu1 %v8248_v41  ;;  %v8300_v22 = vld [vmem:[#allocation11 + $0x1e4] ss:$16 sps:$4 sm:$0xff]  }
  0xd7   :  { %979 = vmatprep.subr.bf16.mxu1 %v8252_v42 }
  0xd8   :  { %421 = vmatmul.mubr.bf16.vlgmr.msra.gmra.mrb[0].mxu0 %v8199_v25  ;;  %v250_v25 = vlaneseq }
  0xd9   :  { %430 = vmatprep.mubr.bf16.mxu0 %v8822_v0  ;;  %1079 = vmatpush1.bf16.msra.mxu0 %v8207_v26 }
  0xda   :  { %1080 = vmatprep.subr.bf16.mxu0 %v8215_v27  ;;  %980 = vmatpush1.bf16.msra.mxu1 %v8254_v46  ;;  %v9034_v26 = vshrl.u32 %v250_v25, 7 }
  0xdb   :  { %981 = vmatprep.subr.bf16.mxu1 %v8258_v47 }
  0xdc   :  { %14327 = vst [vmem:[#allocation33_spill] sm:$0xff] %v9034_v26  ;;  %v9037_v27 = vsub.s32 0, %v9034_v26  ;;  %v9040_v29 = vsub.s32 1, %v9034_v26 }
  0xdd   :  { %1081 = vmatpush1.bf16.msra.mxu0 %v8213_v30 }
  0xde   :  { %1082 = vmatprep.subr.bf16.mxu0 %v8221_v31  ;;  %982 = vmatpush1.bf16.msra.mxu1 %v8260_v51  ;;  %14328 = vst [vmem:[#allocation34_spill] sm:$0xff] %v9037_v27  ;;  %14329 = vst [vmem:[#allocation35_spill] sm:$0xff] %v9040_v29  ;;  %v9043_v30 = vrot.slane %v248_v28, %v9037_v27  ;;  %v9046_v31 = vrot.slane %v248_v28, %v9040_v29 }
  0xdf   :  { %983 = vmatprep.subr.bf16.mxu1 %v8264_v53 }
  0xe0   :  { %431 = vmatmul.mubr.bf16.gmra.mrb[4].mxu0 %v8200_v34 }
  0xe1   :  { %440 = vmatprep.mubr.bf16.mxu0 %v8822_v0  ;;  %1083 = vmatpush1.bf16.msra.mxu0 %v8219_v35 }
  0xe2   :  { %1084 = vmatprep.subr.bf16.mxu0 %v8227_v36  ;;  %984 = vmatpush1.bf16.msra.mxu1 %v8266_v55 }
  0xe3   :  { %985 = vmatprep.subr.bf16.mxu1 %v8270_v56 }
  0xe5   :  { %1085 = vmatpush1.bf16.msra.mxu0 %v8225_v39 }
  0xe6   :  { %1086 = vmatprep.subr.bf16.mxu0 %v8233_v40  ;;  %986 = vmatpush1.bf16.msra.mxu1 %v8272_v59 }
  0xe7   :  { %987 = vmatprep.subr.bf16.mxu1 %v8276_v60 }
  0xe8   :  { %441 = vmatmul.mubr.bf16.gmra.mrb[8].mxu0 %v8201_v43 }
  0xe9   :  { %450 = vmatprep.mubr.bf16.mxu0 %v8822_v0  ;;  %1087 = vmatpush1.bf16.msra.mxu0 %v8231_v44 }
  0xea   :  { %1088 = vmatprep.subr.bf16.mxu0 %v8239_v45  ;;  %988 = vmatpush1.bf16.msra.mxu1 %v8278_v1 }
  0xeb   :  { %989 = vmatprep.subr.bf16.mxu1 %v8282_v2 }
  0xed   :  { %1089 = vmatpush1.bf16.msra.mxu0 %v8237_v48 }
  0xee   :  { %1090 = vmatprep.subr.bf16.mxu0 %v8245_v49  ;;  %990 = vmatpush1.bf16.msra.mxu1 %v8284_v5 }
  0xef   :  { %991 = vmatprep.subr.bf16.mxu1 %v8288_v15 }
  0xf0   :  { %451 = vmatmul.mubr.bf16.gmra.mrb[12].mxu0 %v8202_v50 }
  0xf1   :  { %460 = vmatprep.mubr.bf16.mxu0 %v8822_v0  ;;  %1091 = vmatpush1.bf16.msra.mxu0 %v8243_v52 }
  0xf2   :  { %1092 = vmatprep.subr.bf16.mxu0 %v8251_v54  ;;  %992 = vmatpush1.bf16.msra.mxu1 %v8290_v17 }
  0xf3   :  { %993 = vmatprep.subr.bf16.mxu1 %v8294_v19 }
  0xf5   :  { %1093 = vmatpush1.bf16.msra.mxu0 %v8249_v57 }
  0xf6   :  { %1094 = vmatprep.subr.bf16.mxu0 %v8257_v58  ;;  %994 = vmatpush1.bf16.msra.mxu1 %v8296_v21 }
  0xf7   :  { %995 = vmatprep.subr.bf16.mxu1 %v8300_v22 }
  0xf8   :  { %461 = vmatmul.mubr.bf16.gmra.mrb[16].mxu0 %v8203_v61 }
  0xf9   :  { %470 = vmatprep.mubr.bf16.mxu0 %v8822_v0  ;;  %1095 = vmatpush1.bf16.msra.mxu0 %v8255_v62 }
  0xfa   :  { %1096 = vmatprep.subr.bf16.mxu0 %v8263_v63  ;;  %996 = vmatpush1.bf16.msra.mxu1 %v8302_v24 }
  0xfd   :  { %1097 = vmatpush1.bf16.msra.mxu0 %v8261_v3 }
  0xfe   :  { %1098 = vmatprep.subr.bf16.mxu0 %v8269_v4 }
 0x100   :  { %471 = vmatmul.mubr.bf16.gmra.mrb[20].mxu0 %v8204_v6 }
 0x101   :  { %480 = vmatprep.mubr.bf16.mxu0 %v8822_v0  ;;  %1099 = vmatpush1.bf16.msra.mxu0 %v8267_v7 }
 0x102   :  { %1100 = vmatprep.subr.bf16.mxu0 %v8275_v8 }
 0x105   :  { %1101 = vmatpush1.bf16.msra.mxu0 %v8273_v9 }
 0x106   :  { %1102 = vmatprep.subr.bf16.mxu0 %v8281_v10 }
 0x108   :  { %481 = vmatmul.mubr.bf16.gmra.mrb[24].mxu0 %v8205_v11 }
 0x109   :  { %490 = vmatprep.mubr.bf16.mxu0 %v8822_v0  ;;  %1103 = vmatpush1.bf16.msra.mxu0 %v8279_v12  ;;  %v8299_v0 = vld [vmem:[#allocation11 + $0x1ec] ss:$16 sps:$4 sm:$0xff]  }
 0x10a   :  { %1104 = vmatprep.subr.bf16.mxu0 %v8287_v14 }
 0x10d   :  { %1105 = vmatpush1.bf16.msra.mxu0 %v8285_v16 }
 0x10e   :  { %1106 = vmatprep.subr.bf16.mxu0 %v8293_v18 }
 0x110   :  { %491 = vmatmul.mubr.bf16.gmra.mrb[28].mxu0 %v8206_v13 }
 0x111   :  { %1107 = vmatpush1.bf16.msra.mxu0 %v8291_v20 }
 0x112   :  { %1108 = vmatprep.subr.bf16.mxu0 %v8299_v0 }
 0x115   :  { %1109 = vmatpush1.bf16.msra.mxu0 %v8297_v23 }
 0x1ab   :  { %v422_v32 = vpop.f32.mrb[0].mxu0 }
 0x1ac   :  { %v423_v33 = vadd.f32 %v422_v32, %v9043_v30  ;;  %v424_v34 = vpop.f32.mrb[1].mxu0 }
 0x1ad   :  { %v425_v35 = vadd.f32 %v424_v34, %v9046_v31  ;;  %v426_v36 = vpop.f32.mrb[2].mxu0 }
 0x1ae   :  { %v501_v37 = vmul.f32 0.2, %v423_v33  ;;  %v427_v38 = vadd.f32 %v426_v36, %v9043_v30  ;;  %v428_v39 = vpop.f32.mrb[3].mxu0 }
 0x1af   :  { %v502_v40 = vmul.f32 0.2, %v425_v35  ;;  %v429_v41 = vadd.f32 %v428_v39, %v9046_v31 }
 0x1b0   :  { %v503_v42 = vmul.f32 0.2, %v427_v38  ;;  %v533_v44 = vmax.f32 %v423_v33, %v501_v37 }
 0x1b1   :  { %v504_v43 = vmul.f32 0.2, %v429_v41  ;;  %v534_v46 = vmax.f32 %v425_v35, %v502_v40 }
 0x1b2   :  { %v535_v45 = vmax.f32 %v427_v38, %v503_v42 }
 0x1b3   :  { %v536_v47 = vmax.f32 %v429_v41, %v504_v43  ;;  %v432_v48 = vpop.f32.mrb[4].mxu0 }
 0x1b4   :  { %v433_v49 = vadd.f32 %v432_v48, %v9043_v30  ;;  %v434_v50 = vpop.f32.mrb[5].mxu0  ;;  %v565_v51 = vpack.c.bf16 %v535_v45, %v533_v44 }
 0x1b5   :  { %v435_v52 = vadd.f32 %v434_v50, %v9046_v31  ;;  %v436_v53 = vpop.f32.mrb[6].mxu0  ;;  %v566_v54 = vpack.c.bf16 %v536_v47, %v534_v46 }
 0x1b6   :  { %v505_v55 = vmul.f32 0.2, %v433_v49  ;;  %v437_v56 = vadd.f32 %v436_v53, %v9043_v30  ;;  %v438_v57 = vpop.f32.mrb[7].mxu0 }
 0x1b7   :  { %v506_v58 = vmul.f32 0.2, %v435_v52  ;;  %v439_v59 = vadd.f32 %v438_v57, %v9046_v31  ;;  %997 = vmatprep.mubr.bf16.mxu1 %v566_v54  ;;  %1110 = vmatprep.mubr.bf16.mxu0 %v566_v54 }
 0x1b8   :  { %v507_v60 = vmul.f32 0.2, %v437_v56  ;;  %998 = vmatmul.mubr.bf16.vlgmr.msra.gmra.mrb[0].mxu1 %v565_v51  ;;  %1111 = vmatmul.mubr.bf16.vlgmr.msra.gmra.mrb[32].mxu0 %v565_v51  ;;  %v537_v62 = vmax.f32 %v433_v49, %v505_v55 }
 0x1b9   :  { %v508_v61 = vmul.f32 0.2, %v439_v59  ;;  %v538_v1 = vmax.f32 %v435_v52, %v506_v58 }
 0x1ba   :  { %v539_v63 = vmax.f32 %v437_v56, %v507_v60 }
 0x1bb   :  { %v540_v2 = vmax.f32 %v439_v59, %v508_v61  ;;  %v442_v3 = vpop.f32.mrb[8].mxu0 }
 0x1bc   :  { %v443_v4 = vadd.f32 %v442_v3, %v9043_v30  ;;  %v444_v5 = vpop.f32.mrb[9].mxu0  ;;  %v567_v6 = vpack.c.bf16 %v539_v63, %v537_v62 }
 0x1bd   :  { %v445_v7 = vadd.f32 %v444_v5, %v9046_v31  ;;  %v446_v8 = vpop.f32.mrb[10].mxu0  ;;  %v568_v9 = vpack.c.bf16 %v540_v2, %v538_v1 }
 0x1be   :  { %v509_v10 = vmul.f32 0.2, %v443_v4  ;;  %v447_v11 = vadd.f32 %v446_v8, %v9043_v30  ;;  %v448_v12 = vpop.f32.mrb[11].mxu0 }
 0x1bf   :  { %v510_v13 = vmul.f32 0.2, %v445_v7  ;;  %v449_v14 = vadd.f32 %v448_v12, %v9046_v31  ;;  %1007 = vmatprep.mubr.bf16.mxu1 %v568_v9  ;;  %1120 = vmatprep.mubr.bf16.mxu0 %v568_v9 }
 0x1c0   :  { %v511_v15 = vmul.f32 0.2, %v447_v11  ;;  %1008 = vmatmul.mubr.bf16.gmra.mrb[4].mxu1 %v567_v6  ;;  %1121 = vmatmul.mubr.bf16.gmra.mrb[36].mxu0 %v567_v6  ;;  %v541_v17 = vmax.f32 %v443_v4, %v509_v10 }
 0x1c1   :  { %v512_v16 = vmul.f32 0.2, %v449_v14  ;;  %v542_v19 = vmax.f32 %v445_v7, %v510_v13 }
 0x1c2   :  { %v543_v18 = vmax.f32 %v447_v11, %v511_v15 }
 0x1c3   :  { %v544_v20 = vmax.f32 %v449_v14, %v512_v16  ;;  %v452_v21 = vpop.f32.mrb[12].mxu0 }
 0x1c4   :  { %v453_v0 = vadd.f32 %v452_v21, %v9043_v30  ;;  %v454_v22 = vpop.f32.mrb[13].mxu0  ;;  %v569_v23 = vpack.c.bf16 %v543_v18, %v541_v17 }
 0x1c5   :  { %v455_v24 = vadd.f32 %v454_v22, %v9046_v31  ;;  %v456_v25 = vpop.f32.mrb[14].mxu0  ;;  %v570_v28 = vpack.c.bf16 %v544_v20, %v542_v19 }
 0x1c6   :  { %v513_v32 = vmul.f32 0.2, %v453_v0  ;;  %v457_v33 = vadd.f32 %v456_v25, %v9043_v30  ;;  %v458_v34 = vpop.f32.mrb[15].mxu0 }
 0x1c7   :  { %v514_v35 = vmul.f32 0.2, %v455_v24  ;;  %v459_v36 = vadd.f32 %v458_v34, %v9046_v31  ;;  %1017 = vmatprep.mubr.bf16.mxu1 %v570_v28  ;;  %1130 = vmatprep.mubr.bf16.mxu0 %v570_v28 }
 0x1c8   :  { %v515_v37 = vmul.f32 0.2, %v457_v33  ;;  %1018 = vmatmul.mubr.bf16.gmra.mrb[8].mxu1 %v569_v23  ;;  %1131 = vmatmul.mubr.bf16.gmra.mrb[40].mxu0 %v569_v23  ;;  %v545_v39 = vmax.f32 %v453_v0, %v513_v32 }
 0x1c9   :  { %v516_v38 = vmul.f32 0.2, %v459_v36  ;;  %v546_v41 = vmax.f32 %v455_v24, %v514_v35 }
 0x1ca   :  { %v547_v40 = vmax.f32 %v457_v33, %v515_v37 }
 0x1cb   :  { %v548_v42 = vmax.f32 %v459_v36, %v516_v38  ;;  %v462_v43 = vpop.f32.mrb[16].mxu0 }
 0x1cc   :  { %v463_v44 = vadd.f32 %v462_v43, %v9043_v30  ;;  %v464_v45 = vpop.f32.mrb[17].mxu0  ;;  %v571_v46 = vpack.c.bf16 %v547_v40, %v545_v39 }
 0x1cd   :  { %v465_v47 = vadd.f32 %v464_v45, %v9046_v31  ;;  %v466_v48 = vpop.f32.mrb[18].mxu0  ;;  %v572_v49 = vpack.c.bf16 %v548_v42, %v546_v41 }
 0x1ce   :  { %v517_v50 = vmul.f32 0.2, %v463_v44  ;;  %v467_v51 = vadd.f32 %v466_v48, %v9043_v30  ;;  %v468_v52 = vpop.f32.mrb[19].mxu0 }
 0x1cf   :  { %v518_v53 = vmul.f32 0.2, %v465_v47  ;;  %v469_v54 = vadd.f32 %v468_v52, %v9046_v31  ;;  %1027 = vmatprep.mubr.bf16.mxu1 %v572_v49  ;;  %1140 = vmatprep.mubr.bf16.mxu0 %v572_v49 }
 0x1d0   :  { %v519_v55 = vmul.f32 0.2, %v467_v51  ;;  %1028 = vmatmul.mubr.bf16.gmra.mrb[12].mxu1 %v571_v46  ;;  %1141 = vmatmul.mubr.bf16.gmra.mrb[44].mxu0 %v571_v46  ;;  %v549_v57 = vmax.f32 %v463_v44, %v517_v50 }
 0x1d1   :  { %v520_v56 = vmul.f32 0.2, %v469_v54  ;;  %v550_v59 = vmax.f32 %v465_v47, %v518_v53 }
 0x1d2   :  { %v551_v58 = vmax.f32 %v467_v51, %v519_v55 }
 0x1d3   :  { %v552_v60 = vmax.f32 %v469_v54, %v520_v56  ;;  %v472_v61 = vpop.f32.mrb[20].mxu0 }
 0x1d4   :  { %v473_v62 = vadd.f32 %v472_v61, %v9043_v30  ;;  %v474_v63 = vpop.f32.mrb[21].mxu0  ;;  %v573_v1 = vpack.c.bf16 %v551_v58, %v549_v57 }
 0x1d5   :  { %v475_v2 = vadd.f32 %v474_v63, %v9046_v31  ;;  %v476_v3 = vpop.f32.mrb[22].mxu0  ;;  %v574_v4 = vpack.c.bf16 %v552_v60, %v550_v59 }
 0x1d6   :  { %v521_v5 = vmul.f32 0.2, %v473_v62  ;;  %v477_v6 = vadd.f32 %v476_v3, %v9043_v30  ;;  %v478_v7 = vpop.f32.mrb[23].mxu0 }
 0x1d7   :  { %v522_v8 = vmul.f32 0.2, %v475_v2  ;;  %v479_v9 = vadd.f32 %v478_v7, %v9046_v31  ;;  %1037 = vmatprep.mubr.bf16.mxu1 %v574_v4  ;;  %1150 = vmatprep.mubr.bf16.mxu0 %v574_v4 }
 0x1d8   :  { %v523_v10 = vmul.f32 0.2, %v477_v6  ;;  %1038 = vmatmul.mubr.bf16.gmra.mrb[16].mxu1 %v573_v1  ;;  %1151 = vmatmul.mubr.bf16.gmra.mrb[48].mxu0 %v573_v1  ;;  %v553_v12 = vmax.f32 %v473_v62, %v521_v5 }
 0x1d9   :  { %v524_v11 = vmul.f32 0.2, %v479_v9  ;;  %v554_v14 = vmax.f32 %v475_v2, %v522_v8 }
 0x1da   :  { %v555_v13 = vmax.f32 %v477_v6, %v523_v10 }
 0x1db   :  { %v556_v15 = vmax.f32 %v479_v9, %v524_v11  ;;  %v482_v16 = vpop.f32.mrb[24].mxu0 }
 0x1dc   :  { %v483_v17 = vadd.f32 %v482_v16, %v9043_v30  ;;  %v484_v18 = vpop.f32.mrb[25].mxu0  ;;  %v575_v19 = vpack.c.bf16 %v555_v13, %v553_v12 }
 0x1dd   :  { %v485_v20 = vadd.f32 %v484_v18, %v9046_v31  ;;  %v486_v21 = vpop.f32.mrb[26].mxu0  ;;  %v576_v0 = vpack.c.bf16 %v556_v15, %v554_v14 }
 0x1de   :  { %v525_v22 = vmul.f32 0.2, %v483_v17  ;;  %v487_v23 = vadd.f32 %v486_v21, %v9043_v30  ;;  %v488_v24 = vpop.f32.mrb[27].mxu0 }
 0x1df   :  { %v526_v25 = vmul.f32 0.2, %v485_v20  ;;  %v489_v28 = vadd.f32 %v488_v24, %v9046_v31  ;;  %1047 = vmatprep.mubr.bf16.mxu1 %v576_v0  ;;  %1160 = vmatprep.mubr.bf16.mxu0 %v576_v0 }
 0x1e0   :  { %v527_v32 = vmul.f32 0.2, %v487_v23  ;;  %1048 = vmatmul.mubr.bf16.gmra.mrb[20].mxu1 %v575_v19  ;;  %1161 = vmatmul.mubr.bf16.gmra.mrb[52].mxu0 %v575_v19  ;;  %v557_v34 = vmax.f32 %v483_v17, %v525_v22 }
 0x1e1   :  { %v528_v33 = vmul.f32 0.2, %v489_v28  ;;  %v558_v36 = vmax.f32 %v485_v20, %v526_v25 }
 0x1e2   :  { %v559_v35 = vmax.f32 %v487_v23, %v527_v32 }
 0x1e3   :  { %v560_v37 = vmax.f32 %v489_v28, %v528_v33  ;;  %v492_v38 = vpop.f32.mrb[28].mxu0 }
 0x1e4   :  { %v493_v39 = vadd.f32 %v492_v38, %v9043_v30  ;;  %v494_v40 = vpop.f32.mrb[29].mxu0  ;;  %v577_v41 = vpack.c.bf16 %v559_v35, %v557_v34 }
 0x1e5   :  { %v495_v42 = vadd.f32 %v494_v40, %v9046_v31  ;;  %v496_v43 = vpop.f32.mrb[30].mxu0  ;;  %v578_v44 = vpack.c.bf16 %v560_v37, %v558_v36 }
 0x1e6   :  { %v529_v45 = vmul.f32 0.2, %v493_v39  ;;  %v497_v46 = vadd.f32 %v496_v43, %v9043_v30  ;;  %v498_v47 = vpop.f32.mrb[31].mxu0 }
 0x1e7   :  { %v530_v48 = vmul.f32 0.2, %v495_v42  ;;  %v499_v49 = vadd.f32 %v498_v47, %v9046_v31  ;;  %1057 = vmatprep.mubr.bf16.mxu1 %v578_v44  ;;  %1170 = vmatprep.mubr.bf16.mxu0 %v578_v44 }
 0x1e8   :  { %v531_v50 = vmul.f32 0.2, %v497_v46  ;;  %1058 = vmatmul.mubr.bf16.gmra.mrb[24].mxu1 %v577_v41  ;;  %1171 = vmatmul.mubr.bf16.gmra.mrb[56].mxu0 %v577_v41  ;;  %v561_v52 = vmax.f32 %v493_v39, %v529_v45 }
 0x1e9   :  { %v532_v51 = vmul.f32 0.2, %v499_v49  ;;  %v562_v54 = vmax.f32 %v495_v42, %v530_v48 }
 0x1ea   :  { %v563_v53 = vmax.f32 %v497_v46, %v531_v50 }
 0x1eb   :  { %v564_v55 = vmax.f32 %v499_v49, %v532_v51 }
 0x1ec   :  { %v579_v56 = vpack.c.bf16 %v563_v53, %v561_v52 }
 0x1ed   :  { %v580_v57 = vpack.c.bf16 %v564_v55, %v562_v54 }
 0x1ef   :  { %1067 = vmatprep.mubr.bf16.mxu1 %v580_v57  ;;  %1180 = vmatprep.mubr.bf16.mxu0 %v580_v57 }
 0x1f0   :  { %1068 = vmatmul.mubr.bf16.gmra.mrb[28].mxu1 %v579_v56  ;;  %1181 = vmatmul.mubr.bf16.gmra.mrb[60].mxu0 %v579_v56 }
 0x28b   :  { %v9080_v30 = vpop.f32.mrb[0].mxu1  ;;  %v9082_v58 = vpop.f32.mrb[32].mxu0 }
 0x28c   :  { %v9084_v31 = vpop.f32.mrb[1].mxu1  ;;  %v9086_v59 = vpop.f32.mrb[33].mxu0 }
 0x28d   :  { %14330 = vst [vmem:[#allocation36_spill] sm:$0xff] %v9086_v59  ;;  %v9088_v60 = vpop.f32.mrb[2].mxu1  ;;  %v9090_v61 = vpop.f32.mrb[34].mxu0 }
 0x28e   :  { %v1191_v62 = vadd.f32 %v9088_v60, %v9080_v30  ;;  %v1233_v63 = vadd.f32 %v9090_v61, %v9082_v58  ;;  %v9096_v1 = vpop.f32.mrb[3].mxu1  ;;  %v9098_v2 = vpop.f32.mrb[35].mxu0 }
 0x28f   :  { %14331 = vst [vmem:[#allocation37_spill] sm:$0xff] %v9098_v2  ;;  %v1212_v3 = vadd.f32 %v9096_v1, %v9084_v31  ;;  %v1254_v4 = vadd.f32 %v9098_v2, %v9086_v59 }
 0x293   :  { %v9104_v5 = vpop.f32.mrb[4].mxu1  ;;  %v9106_v6 = vpop.f32.mrb[36].mxu0 }
 0x294   :  { %v1192_v7 = vadd.f32 %v1191_v62, %v9104_v5  ;;  %v1234_v8 = vadd.f32 %v1233_v63, %v9106_v6  ;;  %v9110_v9 = vpop.f32.mrb[5].mxu1  ;;  %v9112_v10 = vpop.f32.mrb[37].mxu0 }
 0x295   :  { %14332 = vst [vmem:[#allocation38_spill] sm:$0xff] %v9112_v10  ;;  %v1213_v11 = vadd.f32 %v1212_v3, %v9110_v9  ;;  %v1255_v12 = vadd.f32 %v1254_v4, %v9112_v10  ;;  %v9116_v13 = vpop.f32.mrb[6].mxu1  ;;  %v9118_v14 = vpop.f32.mrb[38].mxu0 }
 0x296   :  { %v1193_v15 = vadd.f32 %v1192_v7, %v9116_v13  ;;  %v1235_v16 = vadd.f32 %v1234_v8, %v9118_v14  ;;  %v9122_v17 = vpop.f32.mrb[7].mxu1  ;;  %v9124_v18 = vpop.f32.mrb[39].mxu0 }
 0x297   :  { %14333 = vst [vmem:[#allocation39_spill] sm:$0xff] %v9124_v18  ;;  %v1214_v19 = vadd.f32 %v1213_v11, %v9122_v17  ;;  %v1256_v20 = vadd.f32 %v1255_v12, %v9124_v18 }
 0x29b   :  { %v9128_v21 = vpop.f32.mrb[8].mxu1  ;;  %v9130_v0 = vpop.f32.mrb[40].mxu0 }
 0x29c   :  { %v1194_v22 = vadd.f32 %v1193_v15, %v9128_v21  ;;  %v1236_v23 = vadd.f32 %v1235_v16, %v9130_v0  ;;  %v9134_v24 = vpop.f32.mrb[9].mxu1  ;;  %v9136_v25 = vpop.f32.mrb[41].mxu0 }
 0x29d   :  { %14334 = vst [vmem:[#allocation40_spill] sm:$0xff] %v9136_v25  ;;  %v1215_v28 = vadd.f32 %v1214_v19, %v9134_v24  ;;  %v1257_v32 = vadd.f32 %v1256_v20, %v9136_v25  ;;  %v9140_v33 = vpop.f32.mrb[10].mxu1  ;;  %v9142_v34 = vpop.f32.mrb[42].mxu0 }
 0x29e   :  { %v1195_v35 = vadd.f32 %v1194_v22, %v9140_v33  ;;  %v1237_v36 = vadd.f32 %v1236_v23, %v9142_v34  ;;  %v9146_v37 = vpop.f32.mrb[11].mxu1  ;;  %v9148_v38 = vpop.f32.mrb[43].mxu0 }
 0x29f   :  { %14335 = vst [vmem:[#allocation41_spill] sm:$0xff] %v9146_v37  ;;  %14336 = vst [vmem:[#allocation42_spill] sm:$0xff] %v9148_v38  ;;  %v1216_v39 = vadd.f32 %v1215_v28, %v9146_v37  ;;  %v1258_v40 = vadd.f32 %v1257_v32, %v9148_v38 }
 0x2a3   :  { %v9152_v41 = vpop.f32.mrb[12].mxu1  ;;  %v9154_v42 = vpop.f32.mrb[44].mxu0 }
 0x2a4   :  { %v1196_v43 = vadd.f32 %v1195_v35, %v9152_v41  ;;  %v1238_v44 = vadd.f32 %v1237_v36, %v9154_v42  ;;  %v9158_v45 = vpop.f32.mrb[13].mxu1  ;;  %v9160_v46 = vpop.f32.mrb[45].mxu0 }
 0x2a5   :  { %14337 = vst [vmem:[#allocation43_spill] sm:$0xff] %v9158_v45  ;;  %14338 = vst [vmem:[#allocation44_spill] sm:$0xff] %v9160_v46  ;;  %v1217_v47 = vadd.f32 %v1216_v39, %v9158_v45  ;;  %v1259_v48 = vadd.f32 %v1258_v40, %v9160_v46  ;;  %v9164_v49 = vpop.f32.mrb[14].mxu1  ;;  %v9166_v50 = vpop.f32.mrb[46].mxu0 }
 0x2a6   :  { %v1197_v51 = vadd.f32 %v1196_v43, %v9164_v49  ;;  %v1239_v52 = vadd.f32 %v1238_v44, %v9166_v50  ;;  %v9170_v53 = vpop.f32.mrb[15].mxu1  ;;  %v9172_v54 = vpop.f32.mrb[47].mxu0 }
 0x2a7   :  { %14339 = vst [vmem:[#allocation45_spill] sm:$0xff] %v9170_v53  ;;  %14340 = vst [vmem:[#allocation46_spill] sm:$0xff] %v9172_v54  ;;  %v1218_v55 = vadd.f32 %v1217_v47, %v9170_v53  ;;  %v1260_v56 = vadd.f32 %v1259_v48, %v9172_v54 }
 0x2ab   :  { %v9176_v57 = vpop.f32.mrb[16].mxu1  ;;  %v9178_v62 = vpop.f32.mrb[48].mxu0 }
 0x2ac   :  { %v1198_v63 = vadd.f32 %v1197_v51, %v9176_v57  ;;  %v1240_v3 = vadd.f32 %v1239_v52, %v9178_v62  ;;  %v9182_v4 = vpop.f32.mrb[17].mxu1  ;;  %v9184_v7 = vpop.f32.mrb[49].mxu0 }
 0x2ad   :  { %14341 = vst [vmem:[#allocation47_spill] sm:$0xff] %v9182_v4  ;;  %14342 = vst [vmem:[#allocation48_spill] sm:$0xff] %v9184_v7  ;;  %v1219_v8 = vadd.f32 %v1218_v55, %v9182_v4  ;;  %v1261_v11 = vadd.f32 %v1260_v56, %v9184_v7  ;;  %v9188_v12 = vpop.f32.mrb[18].mxu1  ;;  %v9190_v15 = vpop.f32.mrb[50].mxu0 }
 0x2ae   :  { %v1199_v16 = vadd.f32 %v1198_v63, %v9188_v12  ;;  %v1241_v19 = vadd.f32 %v1240_v3, %v9190_v15  ;;  %v9194_v20 = vpop.f32.mrb[19].mxu1  ;;  %v9196_v22 = vpop.f32.mrb[51].mxu0 }
 0x2af   :  { %14343 = vst [vmem:[#allocation49_spill] sm:$0xff] %v9194_v20  ;;  %14344 = vst [vmem:[#allocation50_spill] sm:$0xff] %v9196_v22  ;;  %v1220_v23 = vadd.f32 %v1219_v8, %v9194_v20  ;;  %v1262_v28 = vadd.f32 %v1261_v11, %v9196_v22 }
 0x2b3   :  { %v9200_v32 = vpop.f32.mrb[20].mxu1  ;;  %v9202_v35 = vpop.f32.mrb[52].mxu0 }
 0x2b4   :  { %v1200_v36 = vadd.f32 %v1199_v16, %v9200_v32  ;;  %v1242_v39 = vadd.f32 %v1241_v19, %v9202_v35  ;;  %v9206_v40 = vpop.f32.mrb[21].mxu1  ;;  %v9208_v43 = vpop.f32.mrb[53].mxu0 }
 0x2b5   :  { %14345 = vst [vmem:[#allocation51_spill] sm:$0xff] %v9206_v40  ;;  %14346 = vst [vmem:[#allocation52_spill] sm:$0xff] %v9208_v43  ;;  %v1221_v44 = vadd.f32 %v1220_v23, %v9206_v40  ;;  %v1263_v47 = vadd.f32 %v1262_v28, %v9208_v43  ;;  %v9212_v48 = vpop.f32.mrb[22].mxu1  ;;  %v9214_v51 = vpop.f32.mrb[54].mxu0 }
 0x2b6   :  { %v1201_v52 = vadd.f32 %v1200_v36, %v9212_v48  ;;  %v1243_v55 = vadd.f32 %v1242_v39, %v9214_v51  ;;  %v9218_v56 = vpop.f32.mrb[23].mxu1  ;;  %v9220_v63 = vpop.f32.mrb[55].mxu0 }
 0x2b7   :  { %14347 = vst [vmem:[#allocation53_spill] sm:$0xff] %v9218_v56  ;;  %14348 = vst [vmem:[#allocation54_spill] sm:$0xff] %v9220_v63  ;;  %v1222_v3 = vadd.f32 %v1221_v44, %v9218_v56  ;;  %v1264_v8 = vadd.f32 %v1263_v47, %v9220_v63 }
 0x2bb   :  { %v9224_v11 = vpop.f32.mrb[24].mxu1  ;;  %v9226_v16 = vpop.f32.mrb[56].mxu0 }
 0x2bc   :  { %v1202_v19 = vadd.f32 %v1201_v52, %v9224_v11  ;;  %v1244_v23 = vadd.f32 %v1243_v55, %v9226_v16  ;;  %v9230_v28 = vpop.f32.mrb[25].mxu1  ;;  %v9232_v36 = vpop.f32.mrb[57].mxu0 }
 0x2bd   :  { %14349 = vst [vmem:[#allocation55_spill] sm:$0xff] %v9230_v28  ;;  %14350 = vst [vmem:[#allocation56_spill] sm:$0xff] %v9232_v36  ;;  %v1223_v39 = vadd.f32 %v1222_v3, %v9230_v28  ;;  %v1265_v29 = vadd.f32 %v1264_v8, %v9232_v36  ;;  %v1063_v26 = vpop.f32.mrb[26].mxu1  ;;  %v9236_v44 = vpop.f32.mrb[58].mxu0 }
 0x2be   :  { %v1203_v47 = vadd.f32 %v1202_v19, %v1063_v26  ;;  %v1245_v27 = vadd.f32 %v1244_v23, %v9236_v44  ;;  %v9239_v63 = vpop.f32.mrb[27].mxu1  ;;  %v9241_v43 = vpop.f32.mrb[59].mxu0 }
 0x2bf   :  { %14351 = vst [vmem:[#allocation57_spill] sm:$0xff] %v9239_v63  ;;  %14352 = vst [vmem:[#allocation58_spill] sm:$0xff] %v9241_v43  ;;  %v1224_v52 = vadd.f32 %v1223_v39, %v9239_v63  ;;  %v1266_v55 = vadd.f32 %v1265_v29, %v9241_v43 }
 0x2c3   :  { %v1069_v22 = vpop.f32.mrb[28].mxu1  ;;  %v9245_v7 = vpop.f32.mrb[60].mxu0 }
 0x2c4   :  { %v1204_v3 = vadd.f32 %v1203_v47, %v1069_v22  ;;  %v1246_v8 = vadd.f32 %v1245_v27, %v9245_v7  ;;  %v9248_v36 = vpop.f32.mrb[29].mxu1  ;;  %v9250_v54 = vpop.f32.mrb[61].mxu0 }
 0x2c5   :  { %14353 = vst [vmem:[#allocation59_spill] sm:$0xff] %v9248_v36  ;;  %14354 = vst [vmem:[#allocation60_spill] sm:$0xff] %v9250_v54  ;;  %v1225_v19 = vadd.f32 %v1224_v52, %v9248_v36  ;;  %v1267_v23 = vadd.f32 %v1266_v55, %v9250_v54  ;;  %v1073_v46 = vpop.f32.mrb[30].mxu1  ;;  %v9254_v38 = vpop.f32.mrb[62].mxu0 }
 0x2c6   :  { %v1205_v39 = vadd.f32 %v1204_v3, %v1073_v46  ;;  %v1247_v29 = vadd.f32 %v1246_v8, %v9254_v38  ;;  %v9257_v43 = vpop.f32.mrb[31].mxu1  ;;  %v9259_v25 = vpop.f32.mrb[63].mxu0 }
 0x2c7   :  { %14355 = vst [vmem:[#allocation61_spill] sm:$0xff] %v9257_v43  ;;  %14356 = vst [vmem:[#allocation62_spill] sm:$0xff] %v9259_v25  ;;  %v1226_v27 = vadd.f32 %v1225_v19, %v9257_v43  ;;  %v1268_v47 = vadd.f32 %v1267_v23, %v9259_v25 }
 0x2c8   :  { %v1206_v18 = vrot.slane %v1205_v39, 4  ;;  %v1248_v10 = vrot.slane %v1247_v29, 4 }
 0x2c9   :  { %v1227_v2 = vrot.slane %v1226_v27, 4  ;;  %v1269_v52 = vrot.slane %v1268_v47, 4 }
 0x2ca   :  { %v1207_v59 = vadd.f32 %v1206_v18, %v1205_v39  ;;  %v1249_v55 = vadd.f32 %v1248_v10, %v1247_v29 }
 0x2cb   :  { %v1228_v54 = vadd.f32 %v1227_v2, %v1226_v27  ;;  %v1270_v36 = vadd.f32 %v1269_v52, %v1268_v47 }
 0x2cc   :  { %v1208_v63 = vrot.slane %v1207_v59, 2  ;;  %v1250_v3 = vrot.slane %v1249_v55, 2 }
 0x2cd   :  { %v1229_v28 = vrot.slane %v1228_v54, 2  ;;  %v1271_v8 = vrot.slane %v1270_v36, 2 }
 0x2ce   :  { %v1209_v56 = vadd.f32 %v1208_v63, %v1207_v59  ;;  %v1251_v40 = vadd.f32 %v1250_v3, %v1249_v55 }
 0x2cf   :  { %v1230_v53 = vadd.f32 %v1229_v28, %v1228_v54  ;;  %v1272_v19 = vadd.f32 %v1271_v8, %v1270_v36 }
 0x2d0   :  { %v1210_v20 = vrot.slane %v1209_v56, 1  ;;  %v1252_v4 = vrot.slane %v1251_v40, 1 }
 0x2d1   :  { %v1231_v45 = vrot.slane %v1230_v53, 1  ;;  %v1273_v37 = vrot.slane %v1272_v19, 1 }
 0x2d2   :  { %v1211_v43 = vadd.f32 %v1210_v20, %v1209_v56  ;;  %v1253_v25 = vadd.f32 %v1252_v4, %v1251_v40 }
 0x2d3   :  { %v1232_v56 = vadd.f32 %v1231_v45, %v1230_v53 }
 0x2d4   :  { %v1276_v23 = vmul.f32 0.0078125, %v1211_v43 }
 0x2d6   :  { %v9264_v18 = vsub.f32 %v9080_v30, %v1276_v23  ;;  %v9267_v2 = vsub.f32 %v9088_v60, %v1276_v23  ;;  %v9270_v10 = vsub.f32 %v9104_v5, %v1276_v23  ;;  %v9273_v59 = vsub.f32 %v9116_v13, %v1276_v23 }
 0x2d7   :  { %v9276_v54 = vsub.f32 %v9128_v21, %v1276_v23  ;;  %v9279_v20 = vsub.f32 %v9140_v33, %v1276_v23  ;;  %v9282_v4 = vsub.f32 %v9152_v41, %v1276_v23  ;;  %v9285_v30 = vsub.f32 %v9164_v49, %v1276_v23 }
 0x2d8   :  { %v9288_v60 = vsub.f32 %v9176_v57, %v1276_v23  ;;  %v9291_v5 = vsub.f32 %v9188_v12, %v1276_v23  ;;  %v9294_v13 = vsub.f32 %v9200_v32, %v1276_v23  ;;  %v9297_v21 = vsub.f32 %v9212_v48, %v1276_v23 }
 0x2d9   :  { %v9300_v33 = vsub.f32 %v9224_v11, %v1276_v23  ;;  %v9302_v41 = vsub.f32 %v1063_v26, %v1276_v23  ;;  %v9304_v40 = vsub.f32 %v1069_v22, %v1276_v23  ;;  %v9306_v49 = vsub.f32 %v1073_v46, %v1276_v23 }
 0x2da   :  { %v1344_v57 = vmul.f32 %v9264_v18, %v9264_v18  ;;  %v1348_v12 = vmul.f32 %v9267_v2, %v9267_v2  ;;  %v1278_v32 = vmul.f32 0.0078125, %v1253_v25  ;;  %v1352_v43 = vmul.f32 %v9270_v10, %v9270_v10 }
 0x2db   :  { %14357 = vst [vmem:[#allocation63_spill] sm:$0xff] %v9304_v40  ;;  %14358 = vst [vmem:[#allocation64_spill] sm:$0xff] %v9306_v49  ;;  %v1356_v48 = vmul.f32 %v9273_v59, %v9273_v59  ;;  %v1274_v26 = vadd.f32 %v1273_v37, %v1272_v19  ;;  %v1376_v27 = vmul.f32 %v9288_v60, %v9288_v60 }
 0x2dc   :  { %v1408_v63 = vadd.f32 %v1348_v12, %v1344_v57  ;;  %v9317_v22 = vsub.f32 %v9082_v58, %v1278_v32  ;;  %v9320_v46 = vsub.f32 %v9090_v61, %v1278_v32  ;;  %v9323_v11 = vsub.f32 %v9106_v6, %v1278_v32 }
 0x2dd   :  { %v9326_v25 = vsub.f32 %v9118_v14, %v1278_v32  ;;  %v9329_v28 = vsub.f32 %v9130_v0, %v1278_v32  ;;  %v9332_v36 = vsub.f32 %v9142_v34, %v1278_v32  ;;  %v9335_v37 = vsub.f32 %v9154_v42, %v1278_v32 }
 0x2de   :  { %14359 = vst [vmem:[#allocation65_spill] sm:$0xff] %v9317_v22  ;;  %14360 = vst [vmem:[#allocation66_spill] sm:$0xff] %v9320_v46  ;;  %v1409_v58 = vadd.f32 %v1408_v63, %v1352_v43  ;;  %v9338_v45 = vsub.f32 %v9166_v50, %v1278_v32  ;;  %v9341_v61 = vsub.f32 %v9178_v62, %v1278_v32  ;;  %v9372_v29 = vmul.f32 0.0078125, %v1274_v26  ;;  %v14375_v63 = vld [vmem:[#allocation41_spill] sm:$0xff] }
 0x2df   :  { %14361 = vst [vmem:[#allocation67_spill] sm:$0xff] %v9323_v11  ;;  %14362 = vst [vmem:[#allocation68_spill] sm:$0xff] %v9326_v25  ;;  %v9344_v6 = vsub.f32 %v9190_v15, %v1278_v32  ;;  %v9347_v14 = vsub.f32 %v9202_v35, %v1278_v32  ;;  %v9350_v0 = vsub.f32 %v9214_v51, %v1278_v32 }
 0x2e0   :  { %14363 = vst [vmem:[#allocation69_spill] sm:$0xff] %v9329_v28  ;;  %14364 = vst [vmem:[#allocation70_spill] sm:$0xff] %v9332_v36  ;;  %v9353_v34 = vsub.f32 %v9226_v16, %v1278_v32  ;;  %v9356_v42 = vsub.f32 %v9236_v44, %v1278_v32  ;;  %v1360_v50 = vmul.f32 %v9276_v54, %v9276_v54  ;;  %v1277_v16 = vmul.f32 0.0078125, %v1232_v56 }
 0x2e1   :  { %14365 = vst [vmem:[#allocation71_spill] sm:$0xff] %v9335_v37  ;;  %14366 = vst [vmem:[#allocation72_spill] sm:$0xff] %v9338_v45  ;;  %v1410_v53 = vadd.f32 %v1409_v58, %v1356_v48  ;;  %v9361_v62 = vsub.f32 %v9245_v7, %v1278_v32  ;;  %v9364_v15 = vsub.f32 %v9254_v38, %v1278_v32 }
 0x2e2   :  { %14367 = vst [vmem:[#allocation73_spill] sm:$0xff] %v9341_v61  ;;  %14368 = vst [vmem:[#allocation74_spill] sm:$0xff] %v9344_v6  ;;  %v1346_v35 = vmul.f32 %v9317_v22, %v9317_v22  ;;  %v1350_v51 = vmul.f32 %v9320_v46, %v9320_v46  ;;  %v1364_v44 = vmul.f32 %v9279_v20, %v9279_v20 }
 0x2e3   :  { %14369 = vst [vmem:[#allocation75_spill] sm:$0xff] %v9347_v14  ;;  %v1411_v39 = vadd.f32 %v1410_v53, %v1360_v50  ;;  %v1368_v7 = vmul.f32 %v9282_v4, %v9282_v4  ;;  %v1372_v38 = vmul.f32 %v9285_v30, %v9285_v30  ;;  %v1380_v47 = vmul.f32 %v9291_v5, %v9291_v5  ;;  %v14376_v50 = vld [vmem:[#allocation43_spill] sm:$0xff]  ;;  %v14377_v53 = vld [vmem:[#allocation45_spill] sm:$0xff] }
 0x2e4   :  { %v1384_v52 = vmul.f32 %v9294_v13, %v9294_v13  ;;  %v1354_v3 = vmul.f32 %v9323_v11, %v9323_v11  ;;  %v1358_v8 = vmul.f32 %v9326_v25, %v9326_v25  ;;  %v1362_v19 = vmul.f32 %v9329_v28, %v9329_v28  ;;  %v14385_v28 = vld [vmem:[#allocation61_spill] sm:$0xff] }
 0x2e5   :  { %v1412_v55 = vadd.f32 %v1411_v39, %v1364_v44  ;;  %v1450_v23 = vadd.f32 %v1350_v51, %v1346_v35  ;;  %v9391_v57 = vsub.f32 %v9084_v31, %v1277_v16  ;;  %v9394_v12 = vsub.f32 %v9096_v1, %v1277_v16  ;;  %v14378_v51 = vld [vmem:[#allocation47_spill] sm:$0xff]  ;;  %v14379_v44 = vld [vmem:[#allocation49_spill] sm:$0xff] }
 0x2e6   :  { %v9397_v43 = vsub.f32 %v9110_v9, %v1277_v16  ;;  %v9400_v48 = vsub.f32 %v9122_v17, %v1277_v16  ;;  %v9403_v56 = vsub.f32 %v9134_v24, %v1277_v16  ;;  %v9406_v58 = vsub.f32 %v14375_v63, %v1277_v16  ;;  %v14380_v39 = vld [vmem:[#allocation51_spill] sm:$0xff] }
 0x2e7   :  { %14370 = vst [vmem:[#allocation76_spill] sm:$0xff] %v9391_v57  ;;  %14371 = vst [vmem:[#allocation77_spill] sm:$0xff] %v9394_v12  ;;  %v1413_v32 = vadd.f32 %v1412_v55, %v1368_v7  ;;  %v1451_v26 = vadd.f32 %v1450_v23, %v1354_v3  ;;  %v9409_v31 = vsub.f32 %v14376_v50, %v1277_v16  ;;  %v14381_v55 = vld [vmem:[#allocation53_spill] sm:$0xff]  ;;  %v14382_v23 = vld [vmem:[#allocation55_spill] sm:$0xff] }
 0x2e8   :  { %14372 = vst [vmem:[#allocation78_spill] sm:$0xff] %v9397_v43  ;;  %14373 = vst [vmem:[#allocation79_spill] sm:$0xff] %v9400_v48  ;;  %v9412_v1 = vsub.f32 %v14377_v53, %v1277_v16  ;;  %v9415_v9 = vsub.f32 %v14378_v51, %v1277_v16  ;;  %v9418_v17 = vsub.f32 %v14379_v44, %v1277_v16  ;;  %v14383_v50 = vld [vmem:[#allocation57_spill] sm:$0xff]  ;;  %v14384_v51 = vld [vmem:[#allocation59_spill] sm:$0xff] }
 0x2e9   :  { %14374 = vst [vmem:[#allocation80_spill] sm:$0xff] %v9403_v56  ;;  %v1414_v35 = vadd.f32 %v1413_v32, %v1372_v38  ;;  %v9421_v24 = vsub.f32 %v14380_v39, %v1277_v16  ;;  %v1452_v7 = vadd.f32 %v1451_v26, %v1358_v8  ;;  %v9424_v3 = vsub.f32 %v14381_v55, %v1277_v16 }
 0x2ea   :  { %v9427_v63 = vsub.f32 %v14382_v23, %v1277_v16  ;;  %v9430_v53 = vsub.f32 %v14383_v50, %v1277_v16  ;;  %v1388_v38 = vmul.f32 %v9297_v21, %v9297_v21  ;;  %v9435_v44 = vsub.f32 %v14384_v51, %v1277_v16 }
 0x2eb   :  { %v1415_v32 = vadd.f32 %v1414_v35, %v1376_v27  ;;  %v9438_v39 = vsub.f32 %v14385_v28, %v1277_v16  ;;  %v1392_v8 = vmul.f32 %v9300_v33, %v9300_v33  ;;  %v1396_v26 = vmul.f32 %v9302_v41, %v9302_v41 }
 0x2ec   :  { %v1366_v55 = vmul.f32 %v9332_v36, %v9332_v36  ;;  %v1453_v23 = vadd.f32 %v1452_v7, %v1362_v19  ;;  %v1400_v50 = vmul.f32 %v9304_v40, %v9304_v40  ;;  %v1345_v35 = vmul.f32 %v9391_v57, %v9391_v57 }
 0x2ed   :  { %v1416_v27 = vadd.f32 %v1415_v32, %v1380_v47  ;;  %v1349_v28 = vmul.f32 %v9394_v12, %v9394_v12  ;;  %v1404_v16 = vmul.f32 %v9306_v49, %v9306_v49  ;;  %v1370_v51 = vmul.f32 %v9335_v37, %v9335_v37 }
 0x2ee   :  { %v1374_v36 = vmul.f32 %v9338_v45, %v9338_v45  ;;  %v1454_v19 = vadd.f32 %v1453_v23, %v1366_v55  ;;  %v1378_v47 = vmul.f32 %v9341_v61, %v9341_v61  ;;  %v1382_v32 = vmul.f32 %v9344_v6, %v9344_v6  ;;  %v14388_v6 = vld [vmem:[#allocation37_spill] sm:$0xff] }
 0x2ef   :  { %v1417_v7 = vadd.f32 %v1416_v27, %v1384_v52  ;;  %v1386_v12 = vmul.f32 %v9347_v14, %v9347_v14  ;;  %v1353_v25 = vmul.f32 %v9397_v43, %v9397_v43  ;;  %v1357_v37 = vmul.f32 %v9400_v48, %v9400_v48  ;;  %v14386_v27 = vld [vmem:[#allocation36_spill] sm:$0xff]  ;;  %v14392_v48 = vld [vmem:[#allocation39_spill] sm:$0xff] }
 0x2f0   :  { %v1455_v57 = vadd.f32 %v1454_v19, %v1370_v51  ;;  %v1361_v55 = vmul.f32 %v9403_v56, %v9403_v56  ;;  %v1429_v23 = vadd.f32 %v1349_v28, %v1345_v35  ;;  %v9472_v61 = vsub.f32 %v14386_v27, %v9372_v29  ;;  %v14390_v19 = vld [vmem:[#allocation38_spill] sm:$0xff] }
 0x2f1   :  { %v1418_v52 = vadd.f32 %v1417_v7, %v1388_v38  ;;  %v9476_v45 = vsub.f32 %v14388_v6, %v9372_v29  ;;  %v9480_v43 = vsub.f32 %v14390_v19, %v9372_v29  ;;  %v9484_v14 = vsub.f32 %v14392_v48, %v9372_v29  ;;  %v14393_v38 = vld [vmem:[#allocation40_spill] sm:$0xff]  ;;  %v14394_v27 = vld [vmem:[#allocation42_spill] sm:$0xff] }
 0x2f2   :  { %14387 = vst [vmem:[#allocation41_spill] sm:$0xff] %v9472_v61  ;;  %v1456_v51 = vadd.f32 %v1455_v57, %v1374_v36  ;;  %v9488_v35 = vsub.f32 %v14393_v38, %v9372_v29  ;;  %v1430_v7 = vadd.f32 %v1429_v23, %v1353_v25  ;;  %v9492_v56 = vsub.f32 %v14394_v27, %v9372_v29  ;;  %v14395_v36 = vld [vmem:[#allocation44_spill] sm:$0xff]  ;;  %v14396_v19 = vld [vmem:[#allocation46_spill] sm:$0xff] }
 0x2f3   :  { %14389 = vst [vmem:[#allocation43_spill] sm:$0xff] %v9476_v45  ;;  %14391 = vst [vmem:[#allocation45_spill] sm:$0xff] %v9480_v43  ;;  %v1419_v28 = vadd.f32 %v1418_v52, %v1392_v8  ;;  %v9496_v6 = vsub.f32 %v14395_v36, %v9372_v29  ;;  %v9500_v11 = vsub.f32 %v14396_v19, %v9372_v29  ;;  %v14397_v48 = vld [vmem:[#allocation48_spill] sm:$0xff]  ;;  %v14398_v8 = vld [vmem:[#allocation50_spill] sm:$0xff] }
 0x2f4   :  { %v1457_v57 = vadd.f32 %v1456_v51, %v1378_v47  ;;  %v9504_v46 = vsub.f32 %v14397_v48, %v9372_v29  ;;  %v9508_v25 = vsub.f32 %v14398_v8, %v9372_v29  ;;  %v1431_v23 = vadd.f32 %v1430_v7, %v1357_v37  ;;  %v14400_v38 = vld [vmem:[#allocation52_spill] sm:$0xff]  ;;  %v14402_v47 = vld [vmem:[#allocation54_spill] sm:$0xff] }
 0x2f5   :  { %v1420_v52 = vadd.f32 %v1419_v28, %v1396_v26  ;;  %v9512_v27 = vsub.f32 %v14400_v38, %v9372_v29  ;;  %v9516_v51 = vsub.f32 %v14402_v47, %v9372_v29  ;;  %v14404_v19 = vld [vmem:[#allocation56_spill] sm:$0xff]  ;;  %v14406_v48 = vld [vmem:[#allocation58_spill] sm:$0xff]  ;;  %v1365_v7 = vmul.f32 %v9406_v58, %v9406_v58 }
 0x2f6   :  { %14399 = vst [vmem:[#allocation47_spill] sm:$0xff] %v9508_v25  ;;  %v1458_v36 = vadd.f32 %v1457_v57, %v1382_v32  ;;  %v9520_v22 = vsub.f32 %v14404_v19, %v9372_v29  ;;  %v9524_v49 = vsub.f32 %v14406_v48, %v9372_v29  ;;  %v14408_v26 = vld [vmem:[#allocation60_spill] sm:$0xff]  ;;  %v1432_v8 = vadd.f32 %v1431_v23, %v1361_v55  ;;  %v14410_v38 = vld [vmem:[#allocation62_spill] sm:$0xff] }
 0x2f7   :  { %14401 = vst [vmem:[#allocation49_spill] sm:$0xff] %v9512_v27  ;;  %14403 = vst [vmem:[#allocation51_spill] sm:$0xff] %v9516_v51  ;;  %v9528_v37 = vsub.f32 %v14408_v26, %v9372_v29  ;;  %v1421_v28 = vadd.f32 %v1420_v52, %v1400_v50  ;;  %v9534_v32 = vsub.f32 %v14410_v38, %v9372_v29 }
 0x2f8   :  { %14405 = vst [vmem:[#allocation53_spill] sm:$0xff] %v9520_v22  ;;  %14407 = vst [vmem:[#allocation55_spill] sm:$0xff] %v9524_v49  ;;  %v1390_v57 = vmul.f32 %v9350_v0, %v9350_v0  ;;  %v1459_v47 = vadd.f32 %v1458_v36, %v1386_v12  ;;  %v1369_v48 = vmul.f32 %v9409_v31, %v9409_v31 }
 0x2f9   :  { %14409 = vst [vmem:[#allocation57_spill] sm:$0xff] %v9528_v37  ;;  %14411 = vst [vmem:[#allocation59_spill] sm:$0xff] %v9534_v32  ;;  %v1422_v19 = vadd.f32 %v1421_v28, %v1404_v16  ;;  %v1433_v40 = vadd.f32 %v1432_v8, %v1365_v7  ;;  %v1394_v50 = vmul.f32 %v9353_v34, %v9353_v34 }
 0x2fa   :  { %v1460_v52 = vadd.f32 %v1459_v47, %v1390_v57  ;;  %v1347_v55 = vmul.f32 %v9472_v61, %v9472_v61  ;;  %v1351_v29 = vmul.f32 %v9476_v45, %v9476_v45  ;;  %v1373_v26 = vmul.f32 %v9412_v1, %v9412_v1 }
 0x2fb   :  { %v1423_v23 = vrot.slane %v1422_v19, 4  ;;  %v1434_v12 = vadd.f32 %v1433_v40, %v1369_v48  ;;  %v1398_v16 = vmul.f32 %v9356_v42, %v9356_v42  ;;  %v1377_v7 = vmul.f32 %v9415_v9, %v9415_v9 }
 0x2fc   :  { %v1461_v36 = vadd.f32 %v1460_v52, %v1394_v50  ;;  %v1402_v38 = vmul.f32 %v9361_v62, %v9361_v62  ;;  %v1355_v47 = vmul.f32 %v9480_v43, %v9480_v43  ;;  %v1471_v45 = vadd.f32 %v1351_v29, %v1347_v55 }
 0x2fd   :  { %v1424_v28 = vadd.f32 %v1423_v23, %v1422_v19  ;;  %v1435_v8 = vadd.f32 %v1434_v12, %v1373_v26  ;;  %v1381_v40 = vmul.f32 %v9418_v17, %v9418_v17  ;;  %v1406_v19 = vmul.f32 %v9364_v15, %v9364_v15 }
 0x2fe   :  { %v1462_v57 = vadd.f32 %v1461_v36, %v1398_v16  ;;  %v1359_v52 = vmul.f32 %v9484_v14, %v9484_v14  ;;  %v1472_v23 = vadd.f32 %v1471_v45, %v1355_v47  ;;  %v1385_v12 = vmul.f32 %v9421_v24, %v9421_v24 }
 0x2ff   :  { %v1425_v61 = vrot.slane %v1424_v28, 2  ;;  %v1436_v48 = vadd.f32 %v1435_v8, %v1377_v7  ;;  %v1363_v55 = vmul.f32 %v9488_v35, %v9488_v35  ;;  %v1389_v7 = vmul.f32 %v9424_v3, %v9424_v3 }
 0x300   :  { %v1463_v50 = vadd.f32 %v1462_v57, %v1402_v38  ;;  %v1473_v29 = vadd.f32 %v1472_v23, %v1359_v52  ;;  %v1367_v57 = vmul.f32 %v9492_v56, %v9492_v56  ;;  %v1397_v52 = vmul.f32 %v9430_v53, %v9430_v53 }
 0x301   :  { %v1426_v26 = vadd.f32 %v1425_v61, %v1424_v28  ;;  %v1437_v16 = vadd.f32 %v1436_v48, %v1381_v40  ;;  %v1393_v28 = vmul.f32 %v9427_v63, %v9427_v63  ;;  %v1371_v48 = vmul.f32 %v9496_v6, %v9496_v6 }
 0x302   :  { %v1464_v36 = vadd.f32 %v1463_v50, %v1406_v19  ;;  %v1474_v45 = vadd.f32 %v1473_v29, %v1363_v55 }
 0x303   :  { %v1427_v43 = vrot.slane %v1426_v26, 1  ;;  %v1438_v8 = vadd.f32 %v1437_v16, %v1385_v12  ;;  %v1375_v16 = vmul.f32 %v9500_v11, %v9500_v11 }
 0x304   :  { %v1465_v38 = vrot.slane %v1464_v36, 4  ;;  %v1475_v19 = vadd.f32 %v1474_v45, %v1367_v57 }
 0x305   :  { %v1428_v61 = vadd.f32 %v1427_v43, %v1426_v26  ;;  %v1439_v47 = vadd.f32 %v1438_v8, %v1389_v7  ;;  %v1401_v26 = vmul.f32 %v9435_v44, %v9435_v44  ;;  %v1379_v7 = vmul.f32 %v9504_v46, %v9504_v46 }
 0x306   :  { %v1466_v40 = vadd.f32 %v1465_v38, %v1464_v36  ;;  %v1476_v55 = vadd.f32 %v1475_v19, %v1371_v48  ;;  %v1405_v38 = vmul.f32 %v9438_v39, %v9438_v39  ;;  %v1387_v19 = vmul.f32 %v9512_v27, %v9512_v27 }
 0x307   :  { %v1492_v50 = vmul.f32 0.0078125, %v1428_v61  ;;  %v1440_v23 = vadd.f32 %v1439_v47, %v1393_v28  ;;  %v1383_v61 = vmul.f32 %v9508_v25, %v9508_v25  ;;  %v14446_v25 = vld [vmem:[#allocation69_spill] sm:$0xff] }
 0x308   :  { %v1467_v12 = vrot.slane %v1466_v40, 2  ;;  %v1477_v8 = vadd.f32 %v1476_v55, %v1375_v16 }
 0x309   :  { %v1496_v43 = vadd.f32 1e-05, %v1492_v50  ;;  %v1441_v29 = vadd.f32 %v1440_v23, %v1397_v52  ;;  %v9588_v50 = vld [vmem:[#allocation13] sm:$0xf] }
 0x30a   :  { %v1468_v36 = vadd.f32 %v1467_v12, %v1466_v40  ;;  %v1478_v28 = vadd.f32 %v1477_v8, %v1379_v7  ;;  %v1391_v12 = vmul.f32 %v9516_v51, %v9516_v51 }
 0x30b   :  { %8303 = vrsqrt.f32 %v1496_v43  ;;  %v1442_v57 = vadd.f32 %v1441_v29, %v1401_v26  ;;  %v14412_v43 = vld [vmem:[#allocation34_spill] sm:$0xff] }
 0x30c   :  { %v1469_v45 = vrot.slane %v1468_v36, 1  ;;  %v1479_v40 = vadd.f32 %v1478_v28, %v1383_v61  ;;  %v1509_v26 = vrot.slane %v9588_v50, %v14412_v43  ;;  %v14413_v61 = vld [vmem:[#allocation33_spill] sm:$0xff] }
 0x30d   :  { %v1443_v47 = vadd.f32 %v1442_v57, %v1405_v38  ;;  %v1399_v38 = vmul.f32 %v9524_v49, %v9524_v49  ;;  %v9599_v28 = vsub.s32 2, %v14413_v61 }
 0x30e   :  { %v1470_v48 = vadd.f32 %v1469_v45, %v1468_v36  ;;  %v1480_v16 = vadd.f32 %v1479_v40, %v1387_v19  ;;  %v1395_v36 = vmul.f32 %v9520_v22, %v9520_v22  ;;  %v9601_v19 = vld [vmem:[#allocation14] sm:$0xf]  ;;  %v1403_v40 = vmul.f32 %v9528_v37, %v9528_v37  ;;  %v14416_v37 = vld [vmem:[#allocation64_spill] sm:$0xff] }
 0x30f   :  { %v1444_v52 = vrot.slane %v1443_v47, 4  ;;  %14414 = vst [vmem:[#allocation61_spill] sm:$0xff] %v9599_v28  ;;  %v1623_v27 = vrot.slane %v9601_v19, %v9599_v28 }
 0x310   :  { %v1494_v23 = vmul.f32 0.0078125, %v1470_v48  ;;  %v1481_v7 = vadd.f32 %v1480_v16, %v1391_v12 }
 0x311   :  { %v1445_v55 = vadd.f32 %v1444_v52, %v1443_v47 }
 0x312   :  { %v1498_v29 = vadd.f32 1e-05, %v1494_v23  ;;  %v1482_v57 = vadd.f32 %v1481_v7, %v1395_v36  ;;  %v1615_v36 = vrot.slane %v9601_v19, %v14412_v43 }
 0x313   :  { %v1446_v8 = vrot.slane %v1445_v55, 2 }
 0x314   :  { %8305 = vrsqrt.f32 %v1498_v29  ;;  %v1483_v52 = vadd.f32 %v1482_v57, %v1399_v38  ;;  %v1517_v29 = vrot.slane %v9588_v50, %v9599_v28  ;;  %v14450_v28 = vld [vmem:[#allocation73_spill] sm:$0xff] }
 0x315   :  { %v8304_v45 = vpop.eup %8303  ;;  %v1447_v48 = vadd.f32 %v1446_v8, %v1445_v55  ;;  %v1407_v55 = vmul.f32 %v9534_v32, %v9534_v32  ;;  %v14415_v32 = vld [vmem:[#allocation63_spill] sm:$0xff] }
 0x316   :  { %v1526_v47 = vmul.f32 %v8304_v45, %v1509_v26  ;;  %v1484_v16 = vadd.f32 %v1483_v52, %v1403_v40 }
 0x317   :  { %v1448_v23 = vrot.slane %v1447_v48, 1 }
 0x318   :  { %v1533_v12 = vrot.slane %v1526_v47, %v14412_v43 }
 0x319   :  { %v9610_v7 = vadd.f32 %v1448_v23, %v1447_v48 }
 0x31a   :  { %v1546_v26 = vmul.f32 %v1533_v12, %v9264_v18  ;;  %v1550_v8 = vmul.f32 %v1533_v12, %v9267_v2  ;;  %v1554_v38 = vmul.f32 %v1533_v12, %v9270_v10  ;;  %v1558_v57 = vmul.f32 %v1533_v12, %v9273_v59 }
 0x31b   :  { %v1562_v45 = vmul.f32 %v1533_v12, %v9276_v54  ;;  %v1566_v47 = vmul.f32 %v1533_v12, %v9279_v20  ;;  %v1570_v40 = vmul.f32 %v1533_v12, %v9282_v4  ;;  %v1574_v48 = vmul.f32 %v1533_v12, %v9285_v30 }
 0x31c   :  { %v1578_v52 = vmul.f32 %v1533_v12, %v9288_v60  ;;  %v1582_v23 = vmul.f32 %v1533_v12, %v9291_v5  ;;  %v1586_v18 = vmul.f32 %v1533_v12, %v9294_v13  ;;  %v1590_v2 = vmul.f32 %v1533_v12, %v9297_v21 }
 0x31d   :  { %v1594_v10 = vmul.f32 %v1533_v12, %v9300_v33  ;;  %v1598_v59 = vmul.f32 %v1533_v12, %v9302_v41  ;;  %v1602_v54 = vmul.f32 %v1533_v12, %v14415_v32  ;;  %v1606_v20 = vmul.f32 %v1533_v12, %v14416_v37 }
 0x31e   :  { %v9630_v49 = vadd.f32 %v1615_v36, %v1546_v26  ;;  %v9632_v4 = vadd.f32 %v1615_v36, %v1550_v8  ;;  %v9634_v30 = vadd.f32 %v1615_v36, %v1554_v38  ;;  %v9636_v60 = vadd.f32 %v1615_v36, %v1558_v57  ;;  %v8306_v5 = vpop.eup %8305 }
 0x31f   :  { %v9638_v13 = vadd.f32 %v1615_v36, %v1562_v45  ;;  %v9640_v21 = vadd.f32 %v1615_v36, %v1566_v47  ;;  %v9642_v33 = vadd.f32 %v1615_v36, %v1570_v40  ;;  %v9644_v41 = vadd.f32 %v1615_v36, %v1574_v48 }
 0x320   :  { %14417 = vst [vmem:[#allocation36_spill] sm:$0xff] %v9630_v49  ;;  %14418 = vst [vmem:[#allocation37_spill] sm:$0xff] %v9632_v4  ;;  %v9646_v32 = vadd.f32 %v1615_v36, %v1578_v52  ;;  %v9648_v37 = vadd.f32 %v1615_v36, %v1582_v23  ;;  %v9650_v12 = vadd.f32 %v1615_v36, %v1586_v18  ;;  %v9663_v47 = vmul.f32 0.2, %v9630_v49 }
 0x321   :  { %14419 = vst [vmem:[#allocation38_spill] sm:$0xff] %v9642_v33  ;;  %14420 = vst [vmem:[#allocation39_spill] sm:$0xff] %v9644_v41  ;;  %v9652_v26 = vadd.f32 %v1615_v36, %v1590_v2  ;;  %v9654_v8 = vadd.f32 %v1615_v36, %v1594_v10  ;;  %v9656_v38 = vadd.f32 %v1615_v36, %v1598_v59  ;;  %v9666_v40 = vmul.f32 0.2, %v9632_v4 }
 0x322   :  { %14421 = vst [vmem:[#allocation40_spill] sm:$0xff] %v9646_v32  ;;  %14422 = vst [vmem:[#allocation42_spill] sm:$0xff] %v9648_v37  ;;  %v9658_v57 = vadd.f32 %v1615_v36, %v1602_v54  ;;  %v9660_v45 = vadd.f32 %v1615_v36, %v1606_v20  ;;  %v9669_v48 = vmul.f32 0.2, %v9634_v30  ;;  %v1528_v52 = vmul.f32 %v8306_v5, %v1517_v29 }
 0x323   :  { %14423 = vst [vmem:[#allocation44_spill] sm:$0xff] %v9650_v12  ;;  %14424 = vst [vmem:[#allocation46_spill] sm:$0xff] %v9652_v26  ;;  %v9672_v23 = vmul.f32 0.2, %v9636_v60  ;;  %v9675_v18 = vmul.f32 0.2, %v9638_v13  ;;  %v9680_v36 = vadd.f32 %v1484_v16, %v1407_v55 }
 0x324   :  { %14425 = vst [vmem:[#allocation48_spill] sm:$0xff] %v9654_v8  ;;  %14426 = vst [vmem:[#allocation50_spill] sm:$0xff] %v9656_v38  ;;  %v9678_v2 = vmul.f32 0.2, %v9640_v21  ;;  %v9683_v10 = vmul.f32 0.2, %v9642_v33 }
 0x325   :  { %14427 = vst [vmem:[#allocation52_spill] sm:$0xff] %v9658_v57  ;;  %14428 = vst [vmem:[#allocation54_spill] sm:$0xff] %v9660_v45  ;;  %v9686_v59 = vmul.f32 0.2, %v9644_v41  ;;  %v9689_v54 = vmul.f32 0.2, %v9646_v32 }
 0x326   :  { %14429 = vst [vmem:[#allocation56_spill] sm:$0xff] %v9663_v47  ;;  %14430 = vst [vmem:[#allocation58_spill] sm:$0xff] %v9666_v40  ;;  %v9694_v20 = vmul.f32 0.2, %v9648_v37  ;;  %v9697_v5 = vmul.f32 0.2, %v9650_v12 }
 0x327   :  { %14431 = vst [vmem:[#allocation60_spill] sm:$0xff] %v9669_v48  ;;  %14432 = vst [vmem:[#allocation62_spill] sm:$0xff] %v9683_v10  ;;  %v9700_v16 = vmul.f32 0.2, %v9652_v26  ;;  %v9705_v22 = vmul.f32 0.2, %v9654_v8  ;;  %v1541_v48 = vrot.slane %v1528_v52, %v14412_v43 }
 0x328   :  { %14433 = vst [vmem:[#allocation63_spill] sm:$0xff] %v9686_v59  ;;  %14434 = vst [vmem:[#allocation64_spill] sm:$0xff] %v9689_v54  ;;  %v9708_v51 = vmul.f32 0.2, %v9656_v38  ;;  %v9711_v29 = vmul.f32 0.2, %v9658_v57 }
 0x329   :  { %14435 = vst [vmem:[#allocation81_spill] sm:$0xff] %v9694_v20  ;;  %14436 = vst [vmem:[#allocation82_spill] sm:$0xff] %v9697_v5  ;;  %v9716_v49 = vmul.f32 0.2, %v9660_v45  ;;  %v9748_v5 = vmul.f32 0.0078125, %v9610_v7  ;;  %v14442_v55 = vld [vmem:[#allocation65_spill] sm:$0xff]  ;;  %v1580_v12 = vmul.f32 %v1541_v48, %v14450_v28 }
 0x32a   :  { %14437 = vst [vmem:[#allocation83_spill] sm:$0xff] %v9700_v16  ;;  %14438 = vst [vmem:[#allocation84_spill] sm:$0xff] %v9705_v22  ;;  %v1548_v16 = vmul.f32 %v1541_v48, %v14442_v55  ;;  %v14443_v40 = vld [vmem:[#allocation66_spill] sm:$0xff]  ;;  %v14444_v8 = vld [vmem:[#allocation67_spill] sm:$0xff]  ;;  %v1486_v28 = vrot.slane %v9680_v36, 4 }
 0x32b   :  { %14439 = vst [vmem:[#allocation85_spill] sm:$0xff] %v9708_v51  ;;  %14440 = vst [vmem:[#allocation86_spill] sm:$0xff] %v9711_v29  ;;  %v1552_v22 = vmul.f32 %v1541_v48, %v14443_v40  ;;  %v1556_v4 = vmul.f32 %v1541_v48, %v14444_v8  ;;  %v14445_v51 = vld [vmem:[#allocation68_spill] sm:$0xff]  ;;  %v1564_v29 = vmul.f32 %v1541_v48, %v14446_v25  ;;  %v14447_v57 = vld [vmem:[#allocation70_spill] sm:$0xff] }
 0x32c   :  { %14441 = vst [vmem:[#allocation87_spill] sm:$0xff] %v9716_v49  ;;  %v1560_v38 = vmul.f32 %v1541_v48, %v14445_v51  ;;  %v1568_v47 = vmul.f32 %v1541_v48, %v14447_v57  ;;  %v14448_v49 = vld [vmem:[#allocation71_spill] sm:$0xff]  ;;  %v14449_v45 = vld [vmem:[#allocation72_spill] sm:$0xff]  ;;  %v14451_v7 = vld [vmem:[#allocation74_spill] sm:$0xff]  ;;  %v1592_v40 = vmul.f32 %v1541_v48, %v9350_v0  ;;  %v1596_v8 = vmul.f32 %v1541_v48, %v9353_v34 }
 0x32d   :  { %v1572_v52 = vmul.f32 %v1541_v48, %v14448_v49  ;;  %v1576_v26 = vmul.f32 %v1541_v48, %v14449_v45  ;;  %v1584_v20 = vmul.f32 %v1541_v48, %v14451_v7  ;;  %v14452_v37 = vld [vmem:[#allocation75_spill] sm:$0xff]  ;;  %v1600_v51 = vmul.f32 %v1541_v48, %v9356_v42 }
 0x32e   :  { %v1588_v55 = vmul.f32 %v1541_v48, %v14452_v37  ;;  %v1604_v25 = vmul.f32 %v1541_v48, %v9361_v62  ;;  %v1608_v57 = vmul.f32 %v1541_v48, %v9364_v15  ;;  %v9766_v54 = vadd.f32 %v1623_v27, %v1548_v16 }
 0x32f   :  { %v9768_v49 = vadd.f32 %v1623_v27, %v1552_v22  ;;  %v9770_v45 = vadd.f32 %v1623_v27, %v1556_v4  ;;  %v9773_v7 = vadd.f32 %v1623_v27, %v1560_v38  ;;  %v9775_v37 = vadd.f32 %v1623_v27, %v1564_v29 }
 0x330   :  { %14453 = vst [vmem:[#allocation65_spill] sm:$0xff] %v9766_v54  ;;  %v9777_v0 = vadd.f32 %v1623_v27, %v1568_v47  ;;  %v9779_v34 = vadd.f32 %v1623_v27, %v1572_v52  ;;  %v9781_v42 = vadd.f32 %v1623_v27, %v1576_v26  ;;  %v9783_v62 = vadd.f32 %v1623_v27, %v1580_v12 }
 0x331   :  { %14454 = vst [vmem:[#allocation66_spill] sm:$0xff] %v9768_v49  ;;  %14455 = vst [vmem:[#allocation67_spill] sm:$0xff] %v9770_v45  ;;  %v9785_v15 = vadd.f32 %v1623_v27, %v1584_v20  ;;  %v9787_v22 = vadd.f32 %v1623_v27, %v1588_v55  ;;  %v9789_v4 = vadd.f32 %v1623_v27, %v1592_v40  ;;  %v9800_v16 = vmul.f32 0.2, %v9766_v54 }
 0x332   :  { %14456 = vst [vmem:[#allocation68_spill] sm:$0xff] %v9773_v7  ;;  %14457 = vst [vmem:[#allocation69_spill] sm:$0xff] %v9775_v37  ;;  %v9791_v48 = vadd.f32 %v1623_v27, %v1596_v8  ;;  %v9793_v38 = vadd.f32 %v1623_v27, %v1600_v51  ;;  %v9795_v29 = vadd.f32 %v1623_v27, %v1604_v25  ;;  %v9803_v12 = vmul.f32 0.2, %v9768_v49 }
 0x333   :  { %14458 = vst [vmem:[#allocation70_spill] sm:$0xff] %v9777_v0  ;;  %14459 = vst [vmem:[#allocation71_spill] sm:$0xff] %v9779_v34  ;;  %v9797_v47 = vadd.f32 %v1623_v27, %v1608_v57  ;;  %v9806_v26 = vmul.f32 0.2, %v9770_v45  ;;  %v9809_v20 = vmul.f32 0.2, %v9773_v7  ;;  %v1487_v27 = vadd.f32 %v1486_v28, %v9680_v36 }
 0x334   :  { %14460 = vst [vmem:[#allocation72_spill] sm:$0xff] %v9781_v42  ;;  %14461 = vst [vmem:[#allocation73_spill] sm:$0xff] %v9783_v62  ;;  %v9812_v52 = vmul.f32 0.2, %v9775_v37  ;;  %v9815_v55 = vmul.f32 0.2, %v9777_v0 }
 0x335   :  { %14462 = vst [vmem:[#allocation74_spill] sm:$0xff] %v9785_v15  ;;  %14463 = vst [vmem:[#allocation75_spill] sm:$0xff] %v9787_v22  ;;  %v9819_v40 = vmul.f32 0.2, %v9779_v34  ;;  %v9822_v8 = vmul.f32 0.2, %v9781_v42 }
 0x336   :  { %14464 = vst [vmem:[#allocation88_spill] sm:$0xff] %v9789_v4  ;;  %14465 = vst [vmem:[#allocation89_spill] sm:$0xff] %v9791_v48  ;;  %v9825_v51 = vmul.f32 0.2, %v9783_v62  ;;  %v9830_v57 = vmul.f32 0.2, %v9785_v15 }
 0x337   :  { %14466 = vst [vmem:[#allocation90_spill] sm:$0xff] %v9793_v38  ;;  %14467 = vst [vmem:[#allocation91_spill] sm:$0xff] %v9795_v29  ;;  %v9833_v32 = vmul.f32 0.2, %v9787_v22  ;;  %v9836_v36 = vmul.f32 0.2, %v9789_v4 }
 0x338   :  { %14468 = vst [vmem:[#allocation92_spill] sm:$0xff] %v9797_v47  ;;  %14469 = vst [vmem:[#allocation93_spill] sm:$0xff] %v9800_v16  ;;  %v9841_v59 = vmul.f32 0.2, %v9791_v48  ;;  %v9844_v41 = vmul.f32 0.2, %v9793_v38 }
 0x339   :  { %14470 = vst [vmem:[#allocation94_spill] sm:$0xff] %v9803_v12  ;;  %14471 = vst [vmem:[#allocation95_spill] sm:$0xff] %v9806_v26  ;;  %v9847_v25 = vmul.f32 0.2, %v9795_v29  ;;  %v9852_v54 = vmul.f32 0.2, %v9797_v47 }
 0x33a   :  { %14472 = vst [vmem:[#allocation96_spill] sm:$0xff] %v9809_v20  ;;  %14473 = vst [vmem:[#allocation97_spill] sm:$0xff] %v9812_v52  ;;  %v1497_v26 = vadd.f32 1e-05, %v9748_v5  ;;  %v9887_v5 = vsub.s32 3, %v14413_v61  ;;  %v14501_v34 = vld [vmem:[#allocation41_spill] sm:$0xff] }
 0x33b   :  { %14474 = vst [vmem:[#allocation98_spill] sm:$0xff] %v9815_v55  ;;  %14475 = vst [vmem:[#allocation99_spill] sm:$0xff] %v9819_v40  ;;  %v14503_v52 = vld [vmem:[#allocation45_spill] sm:$0xff]  ;;  %v14506_v7 = vld [vmem:[#allocation51_spill] sm:$0xff] }
 0x33c   :  { %14476 = vst [vmem:[#allocation100_spill] sm:$0xff] %v9822_v8  ;;  %14477 = vst [vmem:[#allocation101_spill] sm:$0xff] %v9825_v51  ;;  %8307 = vrsqrt.f32 %v1497_v26  ;;  %v14487_v26 = vld [vmem:[#allocation76_spill] sm:$0xff]  ;;  %v1627_v51 = vrot.slane %v9601_v19, %v9887_v5  ;;  %v14507_v45 = vld [vmem:[#allocation53_spill] sm:$0xff] }
 0x33d   :  { %14478 = vst [vmem:[#allocation102_spill] sm:$0xff] %v9830_v57  ;;  %14479 = vst [vmem:[#allocation103_spill] sm:$0xff] %v9833_v32  ;;  %v1488_v57 = vrot.slane %v1487_v27, 2 }
 0x33e   :  { %14480 = vst [vmem:[#allocation104_spill] sm:$0xff] %v9836_v36  ;;  %14481 = vst [vmem:[#allocation105_spill] sm:$0xff] %v9841_v59  ;;  %v14485_v36 = vld [vmem:[#allocation35_spill] sm:$0xff] }
 0x33f   :  { %14482 = vst [vmem:[#allocation106_spill] sm:$0xff] %v9844_v41  ;;  %14483 = vst [vmem:[#allocation107_spill] sm:$0xff] %v9847_v25  ;;  %v1489_v10 = vadd.f32 %v1488_v57, %v1487_v27  ;;  %v1513_v12 = vrot.slane %v9588_v50, %v14485_v36  ;;  %v1619_v16 = vrot.slane %v9601_v19, %v14485_v36  ;;  %v14488_v57 = vld [vmem:[#allocation77_spill] sm:$0xff] }
 0x340   :  { %14484 = vst [vmem:[#allocation108_spill] sm:$0xff] %v9852_v54  ;;  %14486 = vst [vmem:[#allocation109_spill] sm:$0xff] %v9887_v5  ;;  %v14490_v54 = vld [vmem:[#allocation79_spill] sm:$0xff] }
 0x341   :  { %v1490_v32 = vrot.slane %v1489_v10, 1 }
 0x343   :  { %v1491_v22 = vadd.f32 %v1490_v32, %v1489_v10  ;;  %v14489_v10 = vld [vmem:[#allocation78_spill] sm:$0xff] }
 0x345   :  { %v1495_v28 = vmul.f32 0.0078125, %v1491_v22 }
 0x346   :  { %v8308_v48 = vpop.eup %8307 }
 0x347   :  { %v1499_v59 = vadd.f32 1e-05, %v1495_v28  ;;  %v1527_v49 = vmul.f32 %v8308_v48, %v1513_v12  ;;  %v14491_v28 = vld [vmem:[#allocation80_spill] sm:$0xff] }
 0x349   :  { %8309 = vrsqrt.f32 %v1499_v59  ;;  %v1537_v33 = vrot.slane %v1527_v49, %v14412_v43 }
 0x34b   :  { %v1547_v27 = vmul.f32 %v1537_v33, %v14487_v26  ;;  %v1551_v32 = vmul.f32 %v1537_v33, %v14488_v57  ;;  %v1555_v22 = vmul.f32 %v1537_v33, %v14489_v10  ;;  %v1559_v47 = vmul.f32 %v1537_v33, %v14490_v54 }
 0x34c   :  { %v1563_v25 = vmul.f32 %v1537_v33, %v14491_v28  ;;  %v1567_v59 = vmul.f32 %v1537_v33, %v9406_v58  ;;  %v1571_v49 = vmul.f32 %v1537_v33, %v9409_v31  ;;  %v1575_v48 = vmul.f32 %v1537_v33, %v9412_v1 }
 0x34d   :  { %v1579_v12 = vmul.f32 %v1537_v33, %v9415_v9  ;;  %v1583_v61 = vmul.f32 %v1537_v33, %v9418_v17  ;;  %v1587_v26 = vmul.f32 %v1537_v33, %v9421_v24  ;;  %v1591_v57 = vmul.f32 %v1537_v33, %v9424_v3 }
 0x34e   :  { %v1595_v10 = vmul.f32 %v1537_v33, %v9427_v63  ;;  %v1599_v54 = vmul.f32 %v1537_v33, %v9430_v53  ;;  %v1603_v28 = vmul.f32 %v1537_v33, %v9435_v44  ;;  %v1607_v58 = vmul.f32 %v1537_v33, %v9438_v39 }
 0x34f   :  { %v9905_v36 = vadd.f32 %v1619_v16, %v1547_v27  ;;  %v9907_v31 = vadd.f32 %v1619_v16, %v1551_v32  ;;  %v9909_v1 = vadd.f32 %v1619_v16, %v1555_v22  ;;  %v1521_v9 = vrot.slane %v9588_v50, %v9887_v5  ;;  %v14505_v5 = vld [vmem:[#allocation49_spill] sm:$0xff] }
 0x350   :  { %v9913_v17 = vadd.f32 %v1619_v16, %v1559_v47  ;;  %v9915_v24 = vadd.f32 %v1619_v16, %v1563_v25  ;;  %v9917_v3 = vadd.f32 %v1619_v16, %v1567_v59  ;;  %v9919_v63 = vadd.f32 %v1619_v16, %v1571_v49 }
 0x351   :  { %v9921_v44 = vadd.f32 %v1619_v16, %v1575_v48  ;;  %v9923_v39 = vadd.f32 %v1619_v16, %v1579_v12  ;;  %v9925_v33 = vadd.f32 %v1619_v16, %v1583_v61  ;;  %v9927_v27 = vadd.f32 %v1619_v16, %v1587_v26 }
 0x352   :  { %v9929_v32 = vadd.f32 %v1619_v16, %v1591_v57  ;;  %v9931_v50 = vadd.f32 %v1619_v16, %v1595_v10  ;;  %v9933_v47 = vadd.f32 %v1619_v16, %v1599_v54  ;;  %v9935_v25 = vadd.f32 %v1619_v16, %v1603_v28 }
 0x353   :  { %v8310_v53 = vpop.eup %8309  ;;  %v9937_v22 = vadd.f32 %v1619_v16, %v1607_v58  ;;  %v9940_v59 = vmul.f32 0.2, %v9905_v36  ;;  %v9943_v49 = vmul.f32 0.2, %v9907_v31  ;;  %v9946_v61 = vmul.f32 0.2, %v9909_v1 }
 0x354   :  { %14492 = vst [vmem:[#allocation76_spill] sm:$0xff] %v9931_v50  ;;  %14493 = vst [vmem:[#allocation77_spill] sm:$0xff] %v9933_v47  ;;  %v9949_v48 = vmul.f32 0.2, %v9913_v17  ;;  %v9952_v12 = vmul.f32 0.2, %v9915_v24  ;;  %v1529_v16 = vmul.f32 %v8310_v53, %v1521_v9 }
 0x355   :  { %14494 = vst [vmem:[#allocation78_spill] sm:$0xff] %v9935_v25  ;;  %14495 = vst [vmem:[#allocation79_spill] sm:$0xff] %v9937_v22  ;;  %v9955_v26 = vmul.f32 0.2, %v9917_v3  ;;  %v9958_v57 = vmul.f32 0.2, %v9919_v63 }
 0x356   :  { %v9961_v10 = vmul.f32 0.2, %v9921_v44  ;;  %v9964_v54 = vmul.f32 0.2, %v9923_v39  ;;  %v9969_v58 = vmul.f32 0.2, %v9925_v33  ;;  %v1545_v40 = vrot.slane %v1529_v16, %v14412_v43 }
 0x357   :  { %v9972_v29 = vmul.f32 0.2, %v9927_v27  ;;  %v9975_v9 = vmul.f32 0.2, %v9929_v32  ;;  %v9980_v41 = vmul.f32 0.2, %v9931_v50 }
 0x358   :  { %v9983_v38 = vmul.f32 0.2, %v9933_v47  ;;  %v9986_v28 = vmul.f32 0.2, %v9935_v25  ;;  %v9991_v15 = vmul.f32 0.2, %v9937_v22  ;;  %v1549_v55 = vmul.f32 %v1545_v40, %v14501_v34 }
 0x359   :  { %14496 = vst [vmem:[#allocation80_spill] sm:$0xff] %v9975_v9  ;;  %14497 = vst [vmem:[#allocation110_spill] sm:$0xff] %v9980_v41  ;;  %v14502_v53 = vld [vmem:[#allocation43_spill] sm:$0xff]  ;;  %v1557_v62 = vmul.f32 %v1545_v40, %v14503_v52  ;;  %v1561_v37 = vmul.f32 %v1545_v40, %v9484_v14  ;;  %v1565_v8 = vmul.f32 %v1545_v40, %v9488_v35  ;;  %v14509_v22 = vld [vmem:[#allocation57_spill] sm:$0xff] }
 0x35a   :  { %14498 = vst [vmem:[#allocation111_spill] sm:$0xff] %v9983_v38  ;;  %14499 = vst [vmem:[#allocation112_spill] sm:$0xff] %v9986_v28  ;;  %v1553_v0 = vmul.f32 %v1545_v40, %v14502_v53  ;;  %v1569_v42 = vmul.f32 %v1545_v40, %v9492_v56  ;;  %v1573_v20 = vmul.f32 %v1545_v40, %v9496_v6  ;;  %v14504_v43 = vld [vmem:[#allocation47_spill] sm:$0xff] }
 0x35b   :  { %14500 = vst [vmem:[#allocation113_spill] sm:$0xff] %v9991_v15  ;;  %v1577_v4 = vmul.f32 %v1545_v40, %v9500_v11  ;;  %v1581_v16 = vmul.f32 %v1545_v40, %v9504_v46  ;;  %v1585_v19 = vmul.f32 %v1545_v40, %v14504_v43  ;;  %v1589_v34 = vmul.f32 %v1545_v40, %v14505_v5  ;;  %v14508_v15 = vld [vmem:[#allocation55_spill] sm:$0xff] }
 0x35c   :  { %v1593_v53 = vmul.f32 %v1545_v40, %v14506_v7  ;;  %v1597_v52 = vmul.f32 %v1545_v40, %v14507_v45  ;;  %v1601_v14 = vmul.f32 %v1545_v40, %v14508_v15  ;;  %v1605_v35 = vmul.f32 %v1545_v40, %v14509_v22  ;;  %v14510_v28 = vld [vmem:[#allocation59_spill] sm:$0xff] }
 0x35d   :  { %v1609_v56 = vmul.f32 %v1545_v40, %v14510_v28  ;;  %v10038_v25 = vadd.f32 %v1627_v51, %v1549_v55  ;;  %v10040_v6 = vadd.f32 %v1627_v51, %v1553_v0  ;;  %v10042_v11 = vadd.f32 %v1627_v51, %v1557_v62 }
 0x35e   :  { %v10044_v46 = vadd.f32 %v1627_v51, %v1561_v37  ;;  %v10046_v43 = vadd.f32 %v1627_v51, %v1565_v8  ;;  %v10048_v5 = vadd.f32 %v1627_v51, %v1569_v42  ;;  %v10050_v7 = vadd.f32 %v1627_v51, %v1573_v20 }
 0x35f   :  { %14511 = vst [vmem:[#allocation41_spill] sm:$0xff] %v10038_v25  ;;  %14512 = vst [vmem:[#allocation43_spill] sm:$0xff] %v10040_v6  ;;  %v10052_v45 = vadd.f32 %v1627_v51, %v1577_v4  ;;  %v10054_v15 = vadd.f32 %v1627_v51, %v1581_v16  ;;  %v10056_v22 = vadd.f32 %v1627_v51, %v1585_v19  ;;  %v10069_v42 = vmul.f32 0.2, %v10038_v25 }
 0x360   :  { %v10058_v55 = vadd.f32 %v1627_v51, %v1589_v34  ;;  %v10060_v0 = vadd.f32 %v1627_v51, %v1593_v53  ;;  %v10062_v62 = vadd.f32 %v1627_v51, %v1597_v52  ;;  %v10064_v37 = vadd.f32 %v1627_v51, %v1601_v14 }
 0x361   :  { %v10066_v40 = vadd.f32 %v1627_v51, %v1605_v35  ;;  %14515 = vst [vmem:[#allocation49_spill] sm:$0xff] %v10069_v42  ;;  %v10072_v4 = vmul.f32 0.2, %v10040_v6  ;;  %v10075_v20 = vmul.f32 0.2, %v10042_v11  ;;  %v10077_v8 = vadd.f32 %v1627_v51, %v1609_v56 }
 0x362   :  { %14513 = vst [vmem:[#allocation45_spill] sm:$0xff] %v10064_v37  ;;  %v10080_v28 = vmul.f32 0.2, %v10044_v46  ;;  %v10083_v16 = vmul.f32 0.2, %v10046_v43 }
 0x363   :  { %14514 = vst [vmem:[#allocation47_spill] sm:$0xff] %v10066_v40  ;;  %14516 = vst [vmem:[#allocation51_spill] sm:$0xff] %v10072_v4  ;;  %v10086_v19 = vmul.f32 0.2, %v10048_v5  ;;  %v10089_v34 = vmul.f32 0.2, %v10050_v7 }
 0x364   :  { %14517 = vst [vmem:[#allocation53_spill] sm:$0xff] %v10075_v20  ;;  %14518 = vst [vmem:[#allocation55_spill] sm:$0xff] %v10077_v8  ;;  %v10092_v53 = vmul.f32 0.2, %v10052_v45  ;;  %v10095_v52 = vmul.f32 0.2, %v10054_v15 }
 0x365   :  { %v10100_v14 = vmul.f32 0.2, %v10056_v22  ;;  %v10103_v35 = vmul.f32 0.2, %v10058_v55  ;;  %v10106_v56 = vmul.f32 0.2, %v10060_v0 }
 0x366   :  { %v10111_v47 = vmul.f32 0.2, %v10062_v62  ;;  %v10114_v41 = vmul.f32 0.2, %v10064_v37  ;;  %v10117_v51 = vmul.f32 0.2, %v10066_v40 }
 0x367   :  { %v10122_v25 = vmul.f32 0.2, %v10077_v8 }
 0x368   :  { %14519 = vst [vmem:[#allocation57_spill] sm:$0xff] %v10114_v41  ;;  %14520 = vst [vmem:[#allocation59_spill] sm:$0xff] %v10117_v51 }
 0x369   :  { %14521 = vst [vmem:[#allocation114_spill] sm:$0xff] %v10122_v25 }
 0x36a   :  { %8800 = dma.done.wait [#allocation4], 32768 }
 0x36b   :  { %8801 = vsyncadd [#allocation4], 4294934528  ;;  %v14522_v50 = vmax.f32 %v9905_v36, %v9940_v59  ;;  %v14523_v38 = vmax.f32 %v9907_v31, %v9943_v49  ;;  %v1861_v6 = vld [vmem:[#allocation2 + $0x8] sm:$0xff]  ;;  %v1863_v4 = vld [vmem:[#allocation2 + $0x18] sm:$0xff]  ;;  %v14532_v37 = vmax.f32 %v9913_v17, %v9949_v48 }
 0x36c   :  { %v1860_v9 = vld [vmem:[#allocation2] sm:$0xff]  ;;  %2116 = vmatprep.subr.bf16.mxu1 %v1861_v6  ;;  %2342 = vmatprep.subr.bf16.mxu0 %v1863_v4  ;;  %v1862_v42 = vld [vmem:[#allocation2 + $0x10] sm:$0xff]  ;;  %v1869_v25 = vld [vmem:[#allocation2 + $0x48] sm:$0xff] }
 0x36d   :  { %v10156_v20 = vpack.c.bf16 %v14523_v38, %v14522_v50  ;;  %v1871_v8 = vld [vmem:[#allocation2 + $0x58] sm:$0xff]  ;;  %2117 = vmatpush1.bf16.msra.mxu1 %v1860_v9  ;;  %2343 = vmatpush1.bf16.msra.mxu0 %v1862_v42  ;;  %v1868_v36 = vld [vmem:[#allocation2 + $0x40] sm:$0xff]  ;;  %v1870_v31 = vld [vmem:[#allocation2 + $0x50] sm:$0xff] }
 0x36e   :  { %2118 = vmatprep.subr.bf16.mxu1 %v1869_v25  ;;  %2344 = vmatprep.subr.bf16.mxu0 %v1871_v8  ;;  %v1877_v38 = vld [vmem:[#allocation2 + $0x88] sm:$0xff]  ;;  %v1879_v50 = vld [vmem:[#allocation2 + $0x98] sm:$0xff]  ;;  %v1876_v59 = vld [vmem:[#allocation2 + $0x80] sm:$0xff] }
 0x36f   :  { %14524 = vst [vmem:[#allocation115_spill] sm:$0xff] %v10156_v20  ;;  %2148 = vmatprep.mubr.bf16.mxu1 %v10156_v20  ;;  %2374 = vmatprep.mubr.bf16.mxu0 %v10156_v20  ;;  %v1878_v49 = vld [vmem:[#allocation2 + $0x90] sm:$0xff]  ;;  %v1885_v20 = vld [vmem:[#allocation2 + $0xc8] sm:$0xff]  ;;  %v1887_v6 = vld [vmem:[#allocation2 + $0xd8] sm:$0xff] }
 0x370   :  { %v1884_v9 = vld [vmem:[#allocation2 + $0xc0] sm:$0xff]  ;;  %v1886_v42 = vld [vmem:[#allocation2 + $0xd0] sm:$0xff]  ;;  %v1893_v25 = vld [vmem:[#allocation2 + $0x108] sm:$0xff] }
 0x371   :  { %2119 = vmatpush1.bf16.msra.mxu1 %v1868_v36  ;;  %2345 = vmatpush1.bf16.msra.mxu0 %v1870_v31  ;;  %v1895_v4 = vld [vmem:[#allocation2 + $0x118] sm:$0xff]  ;;  %v1892_v8 = vld [vmem:[#allocation2 + $0x100] sm:$0xff]  ;;  %v1894_v36 = vld [vmem:[#allocation2 + $0x110] sm:$0xff] }
 0x372   :  { %2120 = vmatprep.subr.bf16.mxu1 %v1877_v38  ;;  %2346 = vmatprep.subr.bf16.mxu0 %v1879_v50  ;;  %v1901_v31 = vld [vmem:[#allocation2 + $0x148] sm:$0xff]  ;;  %v1903_v38 = vld [vmem:[#allocation2 + $0x158] sm:$0xff]  ;;  %v1900_v50 = vld [vmem:[#allocation2 + $0x140] sm:$0xff] }
 0x373   :  { %v14526_v51 = vld [vmem:[#allocation56_spill] sm:$0xff]  ;;  %v14528_v41 = vld [vmem:[#allocation37_spill] sm:$0xff] }
 0x374   :  { %v14533_v17 = vld [vmem:[#allocation60_spill] sm:$0xff] }
 0x375   :  { %2121 = vmatpush1.bf16.msra.mxu1 %v1876_v59  ;;  %2347 = vmatpush1.bf16.msra.mxu0 %v1878_v49  ;;  %v1902_v59 = vld [vmem:[#allocation2 + $0x150] sm:$0xff]  ;;  %v1911_v49 = vld [vmem:[#allocation2 + $0x198] sm:$0xff]  ;;  %v14534_v48 = vmax.f32 %v9634_v30, %v14533_v17 }
 0x376   :  { %2122 = vmatprep.subr.bf16.mxu1 %v1885_v20  ;;  %2348 = vmatprep.subr.bf16.mxu0 %v1887_v6  ;;  %v1909_v20 = vld [vmem:[#allocation2 + $0x188] sm:$0xff]  ;;  %v1908_v6 = vld [vmem:[#allocation2 + $0x180] sm:$0xff] }
 0x379   :  { %2123 = vmatpush1.bf16.msra.mxu1 %v1884_v9  ;;  %2349 = vmatpush1.bf16.msra.mxu0 %v1886_v42  ;;  %v1910_v9 = vld [vmem:[#allocation2 + $0x190] sm:$0xff]  ;;  %v1917_v42 = vld [vmem:[#allocation2 + $0x1c8] sm:$0xff] }
 0x37a   :  { %2124 = vmatprep.subr.bf16.mxu1 %v1893_v25  ;;  %2350 = vmatprep.subr.bf16.mxu0 %v1895_v4  ;;  %v1919_v25 = vld [vmem:[#allocation2 + $0x1d8] sm:$0xff]  ;;  %v1916_v4 = vld [vmem:[#allocation2 + $0x1c0] sm:$0xff] }
 0x37d   :  { %2125 = vmatpush1.bf16.msra.mxu1 %v1892_v8  ;;  %2351 = vmatpush1.bf16.msra.mxu0 %v1894_v36  ;;  %v1918_v8 = vld [vmem:[#allocation2 + $0x1d0] sm:$0xff]  ;;  %v1925_v36 = vld [vmem:[#allocation2 + $0x208] sm:$0xff] }
 0x37e   :  { %2126 = vmatprep.subr.bf16.mxu1 %v1901_v31  ;;  %2352 = vmatprep.subr.bf16.mxu0 %v1903_v38  ;;  %v1927_v31 = vld [vmem:[#allocation2 + $0x218] sm:$0xff]  ;;  %v1924_v38 = vld [vmem:[#allocation2 + $0x200] sm:$0xff] }
 0x381   :  { %2127 = vmatpush1.bf16.msra.mxu1 %v1900_v50  ;;  %2353 = vmatpush1.bf16.msra.mxu0 %v1902_v59  ;;  %v1926_v50 = vld [vmem:[#allocation2 + $0x210] sm:$0xff]  ;;  %v1933_v59 = vld [vmem:[#allocation2 + $0x248] sm:$0xff] }
 0x382   :  { %2128 = vmatprep.subr.bf16.mxu1 %v1909_v20  ;;  %2354 = vmatprep.subr.bf16.mxu0 %v1911_v49  ;;  %v1935_v20 = vld [vmem:[#allocation2 + $0x258] sm:$0xff]  ;;  %v1932_v49 = vld [vmem:[#allocation2 + $0x240] sm:$0xff] }
 0x385   :  { %2129 = vmatpush1.bf16.msra.mxu1 %v1908_v6  ;;  %2355 = vmatpush1.bf16.msra.mxu0 %v1910_v9  ;;  %v1934_v6 = vld [vmem:[#allocation2 + $0x250] sm:$0xff]  ;;  %v1941_v9 = vld [vmem:[#allocation2 + $0x288] sm:$0xff] }
 0x386   :  { %2130 = vmatprep.subr.bf16.mxu1 %v1917_v42  ;;  %2356 = vmatprep.subr.bf16.mxu0 %v1919_v25  ;;  %v1943_v42 = vld [vmem:[#allocation2 + $0x298] sm:$0xff]  ;;  %v1940_v25 = vld [vmem:[#allocation2 + $0x280] sm:$0xff] }
 0x389   :  { %2131 = vmatpush1.bf16.msra.mxu1 %v1916_v4  ;;  %2357 = vmatpush1.bf16.msra.mxu0 %v1918_v8  ;;  %v1942_v4 = vld [vmem:[#allocation2 + $0x290] sm:$0xff]  ;;  %v1949_v8 = vld [vmem:[#allocation2 + $0x2c8] sm:$0xff] }
 0x38a   :  { %2132 = vmatprep.subr.bf16.mxu1 %v1925_v36  ;;  %2358 = vmatprep.subr.bf16.mxu0 %v1927_v31  ;;  %v1951_v36 = vld [vmem:[#allocation2 + $0x2d8] sm:$0xff]  ;;  %v1948_v31 = vld [vmem:[#allocation2 + $0x2c0] sm:$0xff] }
 0x38d   :  { %2133 = vmatpush1.bf16.msra.mxu1 %v1924_v38  ;;  %2359 = vmatpush1.bf16.msra.mxu0 %v1926_v50  ;;  %v1950_v38 = vld [vmem:[#allocation2 + $0x2d0] sm:$0xff]  ;;  %v1957_v50 = vld [vmem:[#allocation2 + $0x308] sm:$0xff] }
 0x38e   :  { %2134 = vmatprep.subr.bf16.mxu1 %v1933_v59  ;;  %2360 = vmatprep.subr.bf16.mxu0 %v1935_v20  ;;  %v1959_v59 = vld [vmem:[#allocation2 + $0x318] sm:$0xff]  ;;  %v1956_v20 = vld [vmem:[#allocation2 + $0x300] sm:$0xff] }
 0x391   :  { %2135 = vmatpush1.bf16.msra.mxu1 %v1932_v49  ;;  %2361 = vmatpush1.bf16.msra.mxu0 %v1934_v6  ;;  %v1958_v49 = vld [vmem:[#allocation2 + $0x310] sm:$0xff]  ;;  %v1965_v6 = vld [vmem:[#allocation2 + $0x348] sm:$0xff] }
 0x392   :  { %2136 = vmatprep.subr.bf16.mxu1 %v1941_v9  ;;  %2362 = vmatprep.subr.bf16.mxu0 %v1943_v42  ;;  %v1967_v9 = vld [vmem:[#allocation2 + $0x358] sm:$0xff]  ;;  %v1964_v42 = vld [vmem:[#allocation2 + $0x340] sm:$0xff] }
 0x395   :  { %2137 = vmatpush1.bf16.msra.mxu1 %v1940_v25  ;;  %2363 = vmatpush1.bf16.msra.mxu0 %v1942_v4  ;;  %v1966_v25 = vld [vmem:[#allocation2 + $0x350] sm:$0xff]  ;;  %v1973_v4 = vld [vmem:[#allocation2 + $0x388] sm:$0xff] }
 0x396   :  { %2138 = vmatprep.subr.bf16.mxu1 %v1949_v8  ;;  %2364 = vmatprep.subr.bf16.mxu0 %v1951_v36  ;;  %v1975_v8 = vld [vmem:[#allocation2 + $0x398] sm:$0xff]  ;;  %v1972_v36 = vld [vmem:[#allocation2 + $0x380] sm:$0xff] }
 0x399   :  { %2139 = vmatpush1.bf16.msra.mxu1 %v1948_v31  ;;  %2365 = vmatpush1.bf16.msra.mxu0 %v1950_v38  ;;  %v1974_v31 = vld [vmem:[#allocation2 + $0x390] sm:$0xff]  ;;  %v1981_v38 = vld [vmem:[#allocation2 + $0x3c8] sm:$0xff] }
 0x39a   :  { %2140 = vmatprep.subr.bf16.mxu1 %v1957_v50  ;;  %2366 = vmatprep.subr.bf16.mxu0 %v1959_v59  ;;  %v1983_v50 = vld [vmem:[#allocation2 + $0x3d8] sm:$0xff]  ;;  %v1980_v59 = vld [vmem:[#allocation2 + $0x3c0] sm:$0xff] }
 0x39d   :  { %2141 = vmatpush1.bf16.msra.mxu1 %v1956_v20  ;;  %2367 = vmatpush1.bf16.msra.mxu0 %v1958_v49  ;;  %v1982_v20 = vld [vmem:[#allocation2 + $0x3d0] sm:$0xff]  ;;  %v1989_v49 = vld [vmem:[#allocation2 + $0x408] sm:$0xff] }
 0x39e   :  { %2142 = vmatprep.subr.bf16.mxu1 %v1965_v6  ;;  %2368 = vmatprep.subr.bf16.mxu0 %v1967_v9  ;;  %v1991_v6 = vld [vmem:[#allocation2 + $0x418] sm:$0xff] }
 0x39f   :  { %v14525_v9 = vld [vmem:[#allocation36_spill] sm:$0xff] }
 0x3a0   :  { %v14527_v40 = vmax.f32 %v14525_v9, %v14526_v51  ;;  %v2015_v9 = vld [vmem:[#allocation2 + $0x4d8] sm:$0xff] }
 0x3a1   :  { %2143 = vmatpush1.bf16.msra.mxu1 %v1964_v42  ;;  %2369 = vmatpush1.bf16.msra.mxu0 %v1966_v25  ;;  %v14529_v42 = vld [vmem:[#allocation58_spill] sm:$0xff] }
 0x3a2   :  { %2144 = vmatprep.subr.bf16.mxu1 %v1973_v4  ;;  %2370 = vmatprep.subr.bf16.mxu0 %v1975_v8  ;;  %v14530_v25 = vmax.f32 %v14528_v41, %v14529_v42  ;;  %v1988_v8 = vld [vmem:[#allocation2 + $0x400] sm:$0xff]  ;;  %v14536_v42 = vmax.f32 %v9915_v24, %v9952_v12  ;;  %v2021_v24 = vld [vmem:[#allocation2 + $0x508] sm:$0xff]  ;;  %v2023_v12 = vld [vmem:[#allocation2 + $0x518] sm:$0xff] }
 0x3a3   :  { %v1996_v41 = vld [vmem:[#allocation2 + $0x440] sm:$0xff] }
 0x3a4   :  { %v10166_v4 = vpack.c.bf16 %v14530_v25, %v14527_v40  ;;  %v1998_v40 = vld [vmem:[#allocation2 + $0x450] sm:$0xff]  ;;  %v14537_v25 = vmax.f32 %v9917_v3, %v9955_v26  ;;  %v14538_v3 = vmax.f32 %v9638_v13, %v9675_v18  ;;  %v14539_v26 = vmax.f32 %v9640_v21, %v9678_v2  ;;  %v2028_v21 = vld [vmem:[#allocation2 + $0x540] sm:$0xff]  ;;  %v2037_v2 = vld [vmem:[#allocation2 + $0x588] sm:$0xff] }
 0x3a5   :  { %2145 = vmatpush1.bf16.msra.mxu1 %v1972_v36  ;;  %2371 = vmatpush1.bf16.msra.mxu0 %v1974_v31  ;;  %v1990_v36 = vld [vmem:[#allocation2 + $0x410] sm:$0xff]  ;;  %v1997_v31 = vld [vmem:[#allocation2 + $0x448] sm:$0xff] }
 0x3a6   :  { %2146 = vmatprep.subr.bf16.mxu1 %v1981_v38  ;;  %2372 = vmatprep.subr.bf16.mxu0 %v1983_v50  ;;  %v1999_v38 = vld [vmem:[#allocation2 + $0x458] sm:$0xff]  ;;  %v14531_v50 = vmax.f32 %v9909_v1, %v9946_v61  ;;  %v2005_v1 = vld [vmem:[#allocation2 + $0x488] sm:$0xff]  ;;  %v10194_v30 = vpack.c.bf16 %v14537_v25, %v14536_v42  ;;  %v2030_v18 = vld [vmem:[#allocation2 + $0x550] sm:$0xff]  ;;  %v14549_v42 = vmax.f32 %v9925_v33, %v9969_v58 }
 0x3a7   :  { %v2007_v61 = vld [vmem:[#allocation2 + $0x498] sm:$0xff] }
 0x3a8   :  { %v10174_v51 = vpack.c.bf16 %v14532_v37, %v14531_v50  ;;  %v14535_v37 = vmax.f32 %v9636_v60, %v9672_v23  ;;  %v2012_v60 = vld [vmem:[#allocation2 + $0x4c0] sm:$0xff]  ;;  %v2014_v23 = vld [vmem:[#allocation2 + $0x4d0] sm:$0xff]  ;;  %v2031_v50 = vld [vmem:[#allocation2 + $0x558] sm:$0xff] }
 0x3a9   :  { %2147 = vmatpush1.bf16.msra.mxu1 %v1980_v59  ;;  %2373 = vmatpush1.bf16.msra.mxu0 %v1982_v20  ;;  %v2004_v20 = vld [vmem:[#allocation2 + $0x480] sm:$0xff] }
 0x3aa   :  { %2229 = vmatprep.subr.bf16.mxu1 %v1989_v49  ;;  %2455 = vmatprep.subr.bf16.mxu0 %v1991_v6  ;;  %v10186_v59 = vpack.c.bf16 %v14535_v37, %v14534_v48  ;;  %v2006_v49 = vld [vmem:[#allocation2 + $0x490] sm:$0xff]  ;;  %v2013_v6 = vld [vmem:[#allocation2 + $0x4c8] sm:$0xff]  ;;  %v2036_v37 = vld [vmem:[#allocation2 + $0x580] sm:$0xff] }
 0x3ab   :  { %v14551_v33 = vld [vmem:[#allocation64_spill] sm:$0xff] }
 0x3ac   :  { %2149 = vmatmul.mubr.bf16.vlgmr.msra.gmra.mrb[32].mxu1 %v10166_v4  ;;  %2375 = vmatmul.mubr.bf16.vlgmr.msra.gmra.mrb[64].mxu0 %v10166_v4 }
 0x3ad   :  { %2230 = vmatpush1.bf16.msra.mxu1 %v1988_v8  ;;  %2456 = vmatpush1.bf16.msra.mxu0 %v1990_v36  ;;  %v10206_v8 = vpack.c.bf16 %v14539_v26, %v14538_v3  ;;  %v2020_v36 = vld [vmem:[#allocation2 + $0x500] sm:$0xff] }
 0x3ae   :  { %2231 = vmatprep.subr.bf16.mxu1 %v1997_v31  ;;  %2457 = vmatprep.subr.bf16.mxu0 %v1999_v38  ;;  %v2022_v31 = vld [vmem:[#allocation2 + $0x510] sm:$0xff]  ;;  %v2029_v38 = vld [vmem:[#allocation2 + $0x548] sm:$0xff] }
 0x3af   :  { %2158 = vmatprep.mubr.bf16.mxu1 %v10174_v51  ;;  %2384 = vmatprep.mubr.bf16.mxu0 %v10174_v51  ;;  %v14554_v3 = vld [vmem:[#allocation81_spill] sm:$0xff] }
 0x3b1   :  { %2232 = vmatpush1.bf16.msra.mxu1 %v1996_v41  ;;  %2458 = vmatpush1.bf16.msra.mxu0 %v1998_v40  ;;  %v14540_v41 = vmax.f32 %v9919_v63, %v9958_v57  ;;  %v14541_v40 = vmax.f32 %v9921_v44, %v9961_v10  ;;  %v2039_v63 = vld [vmem:[#allocation2 + $0x598] sm:$0xff]  ;;  %v14542_v57 = vld [vmem:[#allocation38_spill] sm:$0xff] }
 0x3b2   :  { %2233 = vmatprep.subr.bf16.mxu1 %v2005_v1  ;;  %2459 = vmatprep.subr.bf16.mxu0 %v2007_v61  ;;  %v14543_v44 = vld [vmem:[#allocation62_spill] sm:$0xff]  ;;  %v14545_v1 = vld [vmem:[#allocation39_spill] sm:$0xff] }
 0x3b3   :  { %v10214_v13 = vpack.c.bf16 %v14541_v40, %v14540_v41  ;;  %v14544_v10 = vmax.f32 %v14542_v57, %v14543_v44  ;;  %v14546_v61 = vld [vmem:[#allocation63_spill] sm:$0xff]  ;;  %v14556_v40 = vmax.f32 %v9927_v27, %v9972_v29  ;;  %v2069_v29 = vld [vmem:[#allocation2 + $0x688] sm:$0xff]  ;;  %v14559_v44 = vld [vmem:[#allocation44_spill] sm:$0xff] }
 0x3b4   :  { %2159 = vmatmul.mubr.bf16.gmra.mrb[36].mxu1 %v10186_v59  ;;  %2385 = vmatmul.mubr.bf16.gmra.mrb[68].mxu0 %v10186_v59  ;;  %v14547_v17 = vmax.f32 %v14545_v1, %v14546_v61  ;;  %v2063_v41 = vld [vmem:[#allocation2 + $0x658] sm:$0xff]  ;;  %v2062_v57 = vld [vmem:[#allocation2 + $0x650] sm:$0xff] }
 0x3b5   :  { %2234 = vmatpush1.bf16.msra.mxu1 %v2004_v20  ;;  %2460 = vmatpush1.bf16.msra.mxu0 %v2006_v49  ;;  %v2038_v20 = vld [vmem:[#allocation2 + $0x590] sm:$0xff]  ;;  %v2045_v49 = vld [vmem:[#allocation2 + $0x5c8] sm:$0xff]  ;;  %v2071_v27 = vld [vmem:[#allocation2 + $0x698] sm:$0xff] }
 0x3b6   :  { %2235 = vmatprep.subr.bf16.mxu1 %v2013_v6  ;;  %2461 = vmatprep.subr.bf16.mxu0 %v2015_v9  ;;  %v10226_v48 = vpack.c.bf16 %v14547_v17, %v14544_v10  ;;  %v2047_v6 = vld [vmem:[#allocation2 + $0x5d8] sm:$0xff]  ;;  %v14548_v9 = vmax.f32 %v9923_v39, %v9964_v54  ;;  %v2053_v39 = vld [vmem:[#allocation2 + $0x608] sm:$0xff] }
 0x3b7   :  { %2168 = vmatprep.mubr.bf16.mxu1 %v10194_v30  ;;  %2394 = vmatprep.mubr.bf16.mxu0 %v10194_v30  ;;  %v2055_v54 = vld [vmem:[#allocation2 + $0x618] sm:$0xff]  ;;  %v14562_v1 = vld [vmem:[#allocation46_spill] sm:$0xff] }
 0x3b8   :  { %v10234_v25 = vpack.c.bf16 %v14549_v42, %v14548_v9  ;;  %v14563_v61 = vld [vmem:[#allocation83_spill] sm:$0xff]  ;;  %v14565_v42 = vld [vmem:[#allocation76_spill] sm:$0xff] }
 0x3b9   :  { %2236 = vmatpush1.bf16.msra.mxu1 %v2012_v60  ;;  %2462 = vmatpush1.bf16.msra.mxu0 %v2014_v23  ;;  %v2044_v60 = vld [vmem:[#allocation2 + $0x5c0] sm:$0xff]  ;;  %v2046_v23 = vld [vmem:[#allocation2 + $0x5d0] sm:$0xff]  ;;  %v14564_v17 = vmax.f32 %v14562_v1, %v14563_v61  ;;  %v2079_v9 = vld [vmem:[#allocation2 + $0x6d8] sm:$0xff] }
 0x3ba   :  { %2237 = vmatprep.subr.bf16.mxu1 %v2021_v24  ;;  %2463 = vmatprep.subr.bf16.mxu0 %v2023_v12  ;;  %v14550_v24 = vld [vmem:[#allocation40_spill] sm:$0xff]  ;;  %v14553_v12 = vld [vmem:[#allocation42_spill] sm:$0xff]  ;;  %v14580_v1 = vld [vmem:[#allocation79_spill] sm:$0xff] }
 0x3bb   :  { %v14552_v58 = vmax.f32 %v14550_v24, %v14551_v33  ;;  %v14555_v26 = vmax.f32 %v14553_v12, %v14554_v3  ;;  %v2078_v12 = vld [vmem:[#allocation2 + $0x6d0] sm:$0xff]  ;;  %v2085_v3 = vld [vmem:[#allocation2 + $0x708] sm:$0xff] }
 0x3bc   :  { %2169 = vmatmul.mubr.bf16.gmra.mrb[40].mxu1 %v10206_v8  ;;  %2395 = vmatmul.mubr.bf16.gmra.mrb[72].mxu0 %v10206_v8  ;;  %v14581_v61 = vld [vmem:[#allocation113_spill] sm:$0xff] }
 0x3bd   :  { %2238 = vmatpush1.bf16.msra.mxu1 %v2020_v36  ;;  %2464 = vmatpush1.bf16.msra.mxu0 %v2022_v31  ;;  %v10246_v36 = vpack.c.bf16 %v14555_v26, %v14552_v58  ;;  %v2052_v31 = vld [vmem:[#allocation2 + $0x600] sm:$0xff]  ;;  %v2087_v26 = vld [vmem:[#allocation2 + $0x718] sm:$0xff] }
 0x3be   :  { %2239 = vmatprep.subr.bf16.mxu1 %v2029_v38  ;;  %2465 = vmatprep.subr.bf16.mxu0 %v2031_v50  ;;  %v2054_v38 = vld [vmem:[#allocation2 + $0x610] sm:$0xff]  ;;  %v2061_v50 = vld [vmem:[#allocation2 + $0x648] sm:$0xff]  ;;  %v2076_v58 = vld [vmem:[#allocation2 + $0x6c0] sm:$0xff] }
 0x3bf   :  { %2178 = vmatprep.mubr.bf16.mxu1 %v10214_v13  ;;  %2404 = vmatprep.mubr.bf16.mxu0 %v10214_v13 }
 0x3c1   :  { %2240 = vmatpush1.bf16.msra.mxu1 %v2028_v21  ;;  %2466 = vmatpush1.bf16.msra.mxu0 %v2030_v18  ;;  %v14557_v21 = vld [vmem:[#allocation80_spill] sm:$0xff] }
 0x3c2   :  { %2241 = vmatprep.subr.bf16.mxu1 %v2037_v2  ;;  %2467 = vmatprep.subr.bf16.mxu0 %v2039_v63  ;;  %v14558_v18 = vmax.f32 %v9929_v32, %v14557_v21  ;;  %v2060_v63 = vld [vmem:[#allocation2 + $0x640] sm:$0xff]  ;;  %v14560_v32 = vld [vmem:[#allocation82_spill] sm:$0xff] }
 0x3c3   :  { %v14561_v10 = vmax.f32 %v14559_v44, %v14560_v32  ;;  %v14577_v44 = vld [vmem:[#allocation78_spill] sm:$0xff]  ;;  %v14578_v32 = vld [vmem:[#allocation112_spill] sm:$0xff] }
 0x3c4   :  { %2179 = vmatmul.mubr.bf16.gmra.mrb[44].mxu1 %v10226_v48  ;;  %2405 = vmatmul.mubr.bf16.gmra.mrb[76].mxu0 %v10226_v48  ;;  %v10254_v2 = vpack.c.bf16 %v14558_v18, %v14556_v40  ;;  %v14575_v40 = vld [vmem:[#allocation85_spill] sm:$0xff] }
 0x3c5   :  { %2242 = vmatpush1.bf16.msra.mxu1 %v2036_v37  ;;  %2468 = vmatpush1.bf16.msra.mxu0 %v2038_v20  ;;  %v10266_v37 = vpack.c.bf16 %v14564_v17, %v14561_v10  ;;  %v2068_v20 = vld [vmem:[#allocation2 + $0x680] sm:$0xff]  ;;  %v14579_v10 = vmax.f32 %v14577_v44, %v14578_v32  ;;  %v14582_v17 = vmax.f32 %v14580_v1, %v14581_v61  ;;  %v2110_v44 = vld [vmem:[#allocation2 + $0x7d0] sm:$0xff]  ;;  %v1865_v32 = vld [vmem:[#allocation2 + $0x28] sm:$0xff] }
 0x3c6   :  { %2243 = vmatprep.subr.bf16.mxu1 %v2045_v49  ;;  %2469 = vmatprep.subr.bf16.mxu0 %v2047_v6  ;;  %v2070_v49 = vld [vmem:[#allocation2 + $0x690] sm:$0xff]  ;;  %v2077_v6 = vld [vmem:[#allocation2 + $0x6c8] sm:$0xff] }
 0x3c7   :  { %2188 = vmatprep.mubr.bf16.mxu1 %v10234_v25  ;;  %2414 = vmatprep.mubr.bf16.mxu0 %v10234_v25  ;;  %v14595_v1 = vld [vmem:[#allocation65_spill] sm:$0xff] }
 0x3c8   :  { %v14596_v61 = vld [vmem:[#allocation93_spill] sm:$0xff] }
 0x3c9   :  { %2244 = vmatpush1.bf16.msra.mxu1 %v2044_v60  ;;  %2470 = vmatpush1.bf16.msra.mxu0 %v2046_v23  ;;  %v14566_v60 = vld [vmem:[#allocation110_spill] sm:$0xff] }
 0x3ca   :  { %2245 = vmatprep.subr.bf16.mxu1 %v2053_v39  ;;  %2471 = vmatprep.subr.bf16.mxu0 %v2055_v54  ;;  %v14567_v23 = vmax.f32 %v14565_v42, %v14566_v60  ;;  %v14568_v39 = vld [vmem:[#allocation77_spill] sm:$0xff]  ;;  %v14569_v54 = vld [vmem:[#allocation111_spill] sm:$0xff]  ;;  %v14583_v60 = vld [vmem:[#allocation52_spill] sm:$0xff] }
 0x3cb   :  { %v14570_v24 = vmax.f32 %v14568_v39, %v14569_v54  ;;  %v2103_v42 = vld [vmem:[#allocation2 + $0x798] sm:$0xff]  ;;  %v14586_v54 = vld [vmem:[#allocation54_spill] sm:$0xff] }
 0x3cc   :  { %2189 = vmatmul.mubr.bf16.gmra.mrb[48].mxu1 %v10246_v36  ;;  %2415 = vmatmul.mubr.bf16.gmra.mrb[80].mxu0 %v10246_v36 }
 0x3cd   :  { %2246 = vmatpush1.bf16.msra.mxu1 %v2052_v31  ;;  %2472 = vmatpush1.bf16.msra.mxu0 %v2054_v38  ;;  %v10274_v33 = vpack.c.bf16 %v14570_v24, %v14567_v23  ;;  %v14571_v31 = vld [vmem:[#allocation48_spill] sm:$0xff]  ;;  %v14584_v23 = vld [vmem:[#allocation86_spill] sm:$0xff]  ;;  %v14587_v24 = vld [vmem:[#allocation87_spill] sm:$0xff] }
 0x3ce   :  { %2247 = vmatprep.subr.bf16.mxu1 %v2061_v50  ;;  %2473 = vmatprep.subr.bf16.mxu0 %v2063_v41  ;;  %v14572_v38 = vld [vmem:[#allocation84_spill] sm:$0xff]  ;;  %v14574_v41 = vld [vmem:[#allocation50_spill] sm:$0xff]  ;;  %v14585_v39 = vmax.f32 %v14583_v60, %v14584_v23 }
 0x3cf   :  { %2198 = vmatprep.mubr.bf16.mxu1 %v10254_v2  ;;  %2424 = vmatprep.mubr.bf16.mxu0 %v10254_v2  ;;  %v14573_v50 = vmax.f32 %v14571_v31, %v14572_v38  ;;  %v14576_v21 = vmax.f32 %v14574_v41, %v14575_v40  ;;  %v2109_v31 = vld [vmem:[#allocation2 + $0x7c8] sm:$0xff]  ;;  %v2111_v38 = vld [vmem:[#allocation2 + $0x7d8] sm:$0xff]  ;;  %v1864_v60 = vld [vmem:[#allocation2 + $0x20] sm:$0xff] }
 0x3d0   :  { %v14590_v41 = vld [vmem:[#allocation49_spill] sm:$0xff]  ;;  %v1866_v23 = vld [vmem:[#allocation2 + $0x30] sm:$0xff] }
 0x3d1   :  { %2248 = vmatpush1.bf16.msra.mxu1 %v2060_v63  ;;  %2474 = vmatpush1.bf16.msra.mxu0 %v2062_v57  ;;  %v10286_v18 = vpack.c.bf16 %v14576_v21, %v14573_v50  ;;  %v2084_v63 = vld [vmem:[#allocation2 + $0x700] sm:$0xff]  ;;  %v2086_v57 = vld [vmem:[#allocation2 + $0x710] sm:$0xff] }
 0x3d2   :  { %2249 = vmatprep.subr.bf16.mxu1 %v2069_v29  ;;  %2475 = vmatprep.subr.bf16.mxu0 %v2071_v27  ;;  %v2093_v29 = vld [vmem:[#allocation2 + $0x748] sm:$0xff]  ;;  %v2095_v27 = vld [vmem:[#allocation2 + $0x758] sm:$0xff] }
 0x3d3   :  { %v14589_v50 = vld [vmem:[#allocation41_spill] sm:$0xff]  ;;  %v14592_v21 = vld [vmem:[#allocation43_spill] sm:$0xff] }
 0x3d4   :  { %2199 = vmatmul.mubr.bf16.gmra.mrb[52].mxu1 %v10266_v37  ;;  %2425 = vmatmul.mubr.bf16.gmra.mrb[84].mxu0 %v10266_v37  ;;  %v14591_v40 = vmax.f32 %v14589_v50, %v14590_v41  ;;  %v1883_v50 = vld [vmem:[#allocation2 + $0xb8] sm:$0xff] }
 0x3d5   :  { %2250 = vmatpush1.bf16.msra.mxu1 %v2068_v20  ;;  %2476 = vmatpush1.bf16.msra.mxu0 %v2070_v49  ;;  %v10294_v20 = vpack.c.bf16 %v14582_v17, %v14579_v10  ;;  %v2092_v49 = vld [vmem:[#allocation2 + $0x740] sm:$0xff]  ;;  %v1867_v10 = vld [vmem:[#allocation2 + $0x38] sm:$0xff]  ;;  %v14597_v17 = vmax.f32 %v14595_v1, %v14596_v61  ;;  %v14610_v1 = vmax.f32 %v10046_v43, %v10083_v16  ;;  %v1897_v43 = vld [vmem:[#allocation2 + $0x128] sm:$0xff] }
 0x3d6   :  { %2251 = vmatprep.subr.bf16.mxu1 %v2077_v6  ;;  %2477 = vmatprep.subr.bf16.mxu0 %v2079_v9  ;;  %v2094_v6 = vld [vmem:[#allocation2 + $0x750] sm:$0xff]  ;;  %v2101_v9 = vld [vmem:[#allocation2 + $0x788] sm:$0xff]  ;;  %v14611_v61 = vmax.f32 %v10048_v5, %v10086_v19  ;;  %v1899_v16 = vld [vmem:[#allocation2 + $0x138] sm:$0xff] }
 0x3d7   :  { %2208 = vmatprep.mubr.bf16.mxu1 %v10274_v33  ;;  %2434 = vmatprep.mubr.bf16.mxu0 %v10274_v33  ;;  %v14604_v41 = vld [vmem:[#allocation67_spill] sm:$0xff]  ;;  %v14613_v5 = vld [vmem:[#allocation97_spill] sm:$0xff] }
 0x3d9   :  { %2252 = vmatpush1.bf16.msra.mxu1 %v2076_v58  ;;  %2478 = vmatpush1.bf16.msra.mxu0 %v2078_v12  ;;  %v14588_v58 = vmax.f32 %v14586_v54, %v14587_v24  ;;  %v1875_v54 = vld [vmem:[#allocation2 + $0x78] sm:$0xff]  ;;  %v14601_v24 = vld [vmem:[#allocation53_spill] sm:$0xff] }
 0x3da   :  { %2253 = vmatprep.subr.bf16.mxu1 %v2085_v3  ;;  %2479 = vmatprep.subr.bf16.mxu0 %v2087_v26  ;;  %v2100_v3 = vld [vmem:[#allocation2 + $0x780] sm:$0xff]  ;;  %v2102_v26 = vld [vmem:[#allocation2 + $0x790] sm:$0xff] }
 0x3db   :  { %v10306_v12 = vpack.c.bf16 %v14588_v58, %v14585_v39  ;;  %v1873_v39 = vld [vmem:[#allocation2 + $0x68] sm:$0xff]  ;;  %v14602_v58 = vmax.f32 %v10042_v11, %v14601_v24  ;;  %v1896_v24 = vld [vmem:[#allocation2 + $0x120] sm:$0xff] }
 0x3dc   :  { %2209 = vmatmul.mubr.bf16.gmra.mrb[56].mxu1 %v10286_v18  ;;  %2435 = vmatmul.mubr.bf16.gmra.mrb[88].mxu0 %v10286_v18  ;;  %v1881_v11 = vld [vmem:[#allocation2 + $0xa8] sm:$0xff] }
 0x3dd   :  { %2254 = vmatpush1.bf16.msra.mxu1 %v2084_v63  ;;  %2480 = vmatpush1.bf16.msra.mxu0 %v2086_v57  ;;  %v14593_v63 = vld [vmem:[#allocation51_spill] sm:$0xff] }
 0x3de   :  { %2255 = vmatprep.subr.bf16.mxu1 %v2093_v29  ;;  %2481 = vmatprep.subr.bf16.mxu0 %v2095_v27  ;;  %v14594_v57 = vmax.f32 %v14592_v21, %v14593_v63  ;;  %v2108_v27 = vld [vmem:[#allocation2 + $0x7c0] sm:$0xff] }
 0x3df   :  { %2218 = vmatprep.mubr.bf16.mxu1 %v10294_v20  ;;  %2444 = vmatprep.mubr.bf16.mxu0 %v10294_v20  ;;  %v14608_v21 = vld [vmem:[#allocation96_spill] sm:$0xff] }
 0x3e0   :  { %v10314_v29 = vpack.c.bf16 %v14594_v57, %v14591_v40  ;;  %v14607_v40 = vld [vmem:[#allocation68_spill] sm:$0xff] }
 0x3e1   :  { %2256 = vmatpush1.bf16.msra.mxu1 %v2092_v49  ;;  %2482 = vmatpush1.bf16.msra.mxu0 %v2094_v6  ;;  %v14598_v49 = vld [vmem:[#allocation66_spill] sm:$0xff]  ;;  %v14609_v63 = vmax.f32 %v14607_v40, %v14608_v21  ;;  %v14623_v40 = vld [vmem:[#allocation72_spill] sm:$0xff] }
 0x3e2   :  { %2257 = vmatprep.subr.bf16.mxu1 %v2101_v9  ;;  %2483 = vmatprep.subr.bf16.mxu0 %v2103_v42  ;;  %v14599_v6 = vld [vmem:[#allocation94_spill] sm:$0xff]  ;;  %v14624_v21 = vld [vmem:[#allocation100_spill] sm:$0xff] }
 0x3e3   :  { %v14600_v9 = vmax.f32 %v14598_v49, %v14599_v6  ;;  %v1888_v49 = vld [vmem:[#allocation2 + $0xe0] sm:$0xff]  ;;  %v1890_v6 = vld [vmem:[#allocation2 + $0xf0] sm:$0xff] }
 0x3e4   :  { %2219 = vmatmul.mubr.bf16.gmra.mrb[60].mxu1 %v10306_v12  ;;  %2445 = vmatmul.mubr.bf16.gmra.mrb[92].mxu0 %v10306_v12 }
 0x3e5   :  { %2258 = vmatpush1.bf16.msra.mxu1 %v2100_v3  ;;  %2484 = vmatpush1.bf16.msra.mxu0 %v2102_v26  ;;  %v10326_v42 = vpack.c.bf16 %v14600_v9, %v14597_v17  ;;  %v14603_v3 = vmax.f32 %v10044_v46, %v10080_v28  ;;  %v14605_v46 = vld [vmem:[#allocation95_spill] sm:$0xff]  ;;  %v10354_v17 = vpack.c.bf16 %v14611_v61, %v14610_v1  ;;  %v14612_v9 = vld [vmem:[#allocation69_spill] sm:$0xff] }
 0x3e6   :  { %2259 = vmatprep.subr.bf16.mxu1 %v2109_v31  ;;  %2485 = vmatprep.subr.bf16.mxu0 %v2111_v38  ;;  %v1872_v31 = vld [vmem:[#allocation2 + $0x60] sm:$0xff]  ;;  %v1874_v38 = vld [vmem:[#allocation2 + $0x70] sm:$0xff]  ;;  %v14606_v28 = vmax.f32 %v14604_v41, %v14605_v46  ;;  %v14614_v19 = vmax.f32 %v14612_v9, %v14613_v5  ;;  %v1923_v1 = vld [vmem:[#allocation2 + $0x1f8] sm:$0xff]  ;;  %v14626_v61 = vmax.f32 %v10054_v15, %v10095_v52 }
 0x3e7   :  { %2261 = vmatprep.mubr.bf16.mxu1 %v10314_v29  ;;  %2487 = vmatprep.mubr.bf16.mxu0 %v10314_v29  ;;  %v10334_v26 = vpack.c.bf16 %v14603_v3, %v14602_v58  ;;  %v1898_v58 = vld [vmem:[#allocation2 + $0x130] sm:$0xff]  ;;  %v1905_v3 = vld [vmem:[#allocation2 + $0x168] sm:$0xff]  ;;  %v1904_v41 = vld [vmem:[#allocation2 + $0x160] sm:$0xff] }
 0x3e8   :  { %v10346_v57 = vpack.c.bf16 %v14609_v63, %v14606_v28  ;;  %v1906_v46 = vld [vmem:[#allocation2 + $0x170] sm:$0xff]  ;;  %v14625_v63 = vmax.f32 %v14623_v40, %v14624_v21  ;;  %v1929_v15 = vld [vmem:[#allocation2 + $0x228] sm:$0xff]  ;;  %v1931_v52 = vld [vmem:[#allocation2 + $0x238] sm:$0xff] }
 0x3e9   :  { %2260 = vmatpush1.bf16.msra.mxu1 %v2108_v27  ;;  %2486 = vmatpush1.bf16.msra.mxu0 %v2110_v44  ;;  %v1880_v27 = vld [vmem:[#allocation2 + $0xa0] sm:$0xff]  ;;  %v1882_v44 = vld [vmem:[#allocation2 + $0xb0] sm:$0xff] }
 0x3ea   :  { %2568 = vmatprep.subr.bf16.mxu1 %v1865_v32  ;;  %2794 = vmatprep.subr.bf16.mxu0 %v1867_v10  ;;  %v1889_v32 = vld [vmem:[#allocation2 + $0xe8] sm:$0xff]  ;;  %v1891_v10 = vld [vmem:[#allocation2 + $0xf8] sm:$0xff]  ;;  %v1944_v40 = vld [vmem:[#allocation2 + $0x2a0] sm:$0xff] }
 0x3eb   :  { %v14620_v28 = vld [vmem:[#allocation71_spill] sm:$0xff]  ;;  %v14628_v9 = vld [vmem:[#allocation73_spill] sm:$0xff]  ;;  %v14631_v5 = vld [vmem:[#allocation74_spill] sm:$0xff] }
 0x3ec   :  { %2262 = vmatmul.mubr.bf16.vlgmr.msra.gmra.mrb[32].mxu1 %v10326_v42  ;;  %2488 = vmatmul.mubr.bf16.vlgmr.msra.gmra.mrb[64].mxu0 %v10326_v42  ;;  %v1946_v21 = vld [vmem:[#allocation2 + $0x2b0] sm:$0xff] }
 0x3ed   :  { %2569 = vmatpush1.bf16.msra.mxu1 %v1864_v60  ;;  %2795 = vmatpush1.bf16.msra.mxu0 %v1866_v23  ;;  %v14615_v60 = vld [vmem:[#allocation70_spill] sm:$0xff] }
 0x3ee   :  { %2570 = vmatprep.subr.bf16.mxu1 %v1873_v39  ;;  %2796 = vmatprep.subr.bf16.mxu0 %v1875_v54  ;;  %v14616_v23 = vld [vmem:[#allocation98_spill] sm:$0xff] }
 0x3ef   :  { %2271 = vmatprep.mubr.bf16.mxu1 %v10334_v26  ;;  %2497 = vmatprep.mubr.bf16.mxu0 %v10334_v26  ;;  %v14617_v39 = vmax.f32 %v14615_v60, %v14616_v23 }
 0x3f1   :  { %2571 = vmatpush1.bf16.msra.mxu1 %v1872_v31  ;;  %2797 = vmatpush1.bf16.msra.mxu0 %v1874_v38  ;;  %v10366_v54 = vpack.c.bf16 %v14617_v39, %v14614_v19  ;;  %v1907_v31 = vld [vmem:[#allocation2 + $0x178] sm:$0xff]  ;;  %v14618_v38 = vmax.f32 %v10050_v7, %v10089_v34  ;;  %v1913_v7 = vld [vmem:[#allocation2 + $0x1a8] sm:$0xff]  ;;  %v1928_v39 = vld [vmem:[#allocation2 + $0x220] sm:$0xff] }
 0x3f2   :  { %2572 = vmatprep.subr.bf16.mxu1 %v1881_v11  ;;  %2798 = vmatprep.subr.bf16.mxu0 %v1883_v50  ;;  %v14619_v11 = vmax.f32 %v10052_v45, %v10092_v53  ;;  %v1915_v34 = vld [vmem:[#allocation2 + $0x1b8] sm:$0xff]  ;;  %v14632_v19 = vld [vmem:[#allocation102_spill] sm:$0xff] }
 0x3f3   :  { %v14621_v45 = vld [vmem:[#allocation99_spill] sm:$0xff]  ;;  %v14633_v60 = vmax.f32 %v14631_v5, %v14632_v19 }
 0x3f4   :  { %2272 = vmatmul.mubr.bf16.gmra.mrb[36].mxu1 %v10346_v57  ;;  %2498 = vmatmul.mubr.bf16.gmra.mrb[68].mxu0 %v10346_v57  ;;  %v10374_v50 = vpack.c.bf16 %v14619_v11, %v14618_v38  ;;  %v14622_v53 = vmax.f32 %v14620_v28, %v14621_v45  ;;  %v14635_v38 = vmax.f32 %v10060_v0, %v10106_v56  ;;  %v14637_v0 = vld [vmem:[#allocation103_spill] sm:$0xff]  ;;  %v14640_v28 = vld [vmem:[#allocation104_spill] sm:$0xff] }
 0x3f5   :  { %2573 = vmatpush1.bf16.msra.mxu1 %v1880_v27  ;;  %2799 = vmatpush1.bf16.msra.mxu0 %v1882_v44  ;;  %v1912_v44 = vld [vmem:[#allocation2 + $0x1a0] sm:$0xff] }
 0x3f6   :  { %2574 = vmatprep.subr.bf16.mxu1 %v1889_v32  ;;  %2800 = vmatprep.subr.bf16.mxu0 %v1891_v10  ;;  %v10386_v27 = vpack.c.bf16 %v14625_v63, %v14622_v53  ;;  %v1914_v32 = vld [vmem:[#allocation2 + $0x1b0] sm:$0xff]  ;;  %v1921_v10 = vld [vmem:[#allocation2 + $0x1e8] sm:$0xff] }
 0x3f7   :  { %2281 = vmatprep.mubr.bf16.mxu1 %v10354_v17  ;;  %2507 = vmatprep.mubr.bf16.mxu0 %v10354_v17  ;;  %v1953_v63 = vld [vmem:[#allocation2 + $0x2e8] sm:$0xff] }
 0x3f9   :  { %2575 = vmatpush1.bf16.msra.mxu1 %v1888_v49  ;;  %2801 = vmatpush1.bf16.msra.mxu0 %v1890_v6  ;;  %v14627_v49 = vmax.f32 %v10056_v22, %v10100_v14  ;;  %v14629_v22 = vld [vmem:[#allocation101_spill] sm:$0xff] }
 0x3fa   :  { %2576 = vmatprep.subr.bf16.mxu1 %v1897_v43  ;;  %2802 = vmatprep.subr.bf16.mxu0 %v1899_v16  ;;  %v1920_v43 = vld [vmem:[#allocation2 + $0x1e0] sm:$0xff]  ;;  %v1922_v16 = vld [vmem:[#allocation2 + $0x1f0] sm:$0xff]  ;;  %v14630_v14 = vmax.f32 %v14628_v9, %v14629_v22 }
 0x3fb   :  { %v10394_v6 = vpack.c.bf16 %v14627_v49, %v14626_v61  ;;  %v14649_v22 = vld [vmem:[#allocation90_spill] sm:$0xff] }
 0x3fc   :  { %2282 = vmatmul.mubr.bf16.gmra.mrb[40].mxu1 %v10366_v54  ;;  %2508 = vmatmul.mubr.bf16.gmra.mrb[72].mxu0 %v10366_v54  ;;  %v10406_v23 = vpack.c.bf16 %v14633_v60, %v14630_v14  ;;  %v14650_v14 = vld [vmem:[#allocation106_spill] sm:$0xff]  ;;  %v1960_v60 = vld [vmem:[#allocation2 + $0x320] sm:$0xff] }
 0x3fd   :  { %2577 = vmatpush1.bf16.msra.mxu1 %v1896_v24  ;;  %2803 = vmatpush1.bf16.msra.mxu0 %v1898_v58  ;;  %v1930_v24 = vld [vmem:[#allocation2 + $0x230] sm:$0xff]  ;;  %v1937_v58 = vld [vmem:[#allocation2 + $0x268] sm:$0xff]  ;;  %v14651_v5 = vmax.f32 %v14649_v22, %v14650_v14 }
 0x3fe   :  { %2578 = vmatprep.subr.bf16.mxu1 %v1905_v3  ;;  %2804 = vmatprep.subr.bf16.mxu0 %v1907_v31  ;;  %v1939_v3 = vld [vmem:[#allocation2 + $0x278] sm:$0xff]  ;;  %v14634_v31 = vmax.f32 %v10058_v55, %v10103_v35  ;;  %v1945_v55 = vld [vmem:[#allocation2 + $0x2a8] sm:$0xff]  ;;  %v1994_v22 = vld [vmem:[#allocation2 + $0x430] sm:$0xff] }
 0x3ff   :  { %2291 = vmatprep.mubr.bf16.mxu1 %v10374_v50  ;;  %2517 = vmatprep.mubr.bf16.mxu0 %v10374_v50  ;;  %v1947_v35 = vld [vmem:[#allocation2 + $0x2b8] sm:$0xff]  ;;  %v2001_v14 = vld [vmem:[#allocation2 + $0x468] sm:$0xff] }
 0x400   :  { %v10414_v11 = vpack.c.bf16 %v14635_v38, %v14634_v31  ;;  %v14653_v31 = vld [vmem:[#allocation59_spill] sm:$0xff] }
 0x401   :  { %2579 = vmatpush1.bf16.msra.mxu1 %v1904_v41  ;;  %2805 = vmatpush1.bf16.msra.mxu0 %v1906_v46  ;;  %v1936_v41 = vld [vmem:[#allocation2 + $0x260] sm:$0xff]  ;;  %v1938_v46 = vld [vmem:[#allocation2 + $0x270] sm:$0xff] }
 0x402   :  { %2580 = vmatprep.subr.bf16.mxu1 %v1913_v7  ;;  %2806 = vmatprep.subr.bf16.mxu0 %v1915_v34  ;;  %v14636_v7 = vld [vmem:[#allocation75_spill] sm:$0xff]  ;;  %v14639_v34 = vld [vmem:[#allocation88_spill] sm:$0xff] }
 0x403   :  { %v14638_v56 = vmax.f32 %v14636_v7, %v14637_v0  ;;  %v14641_v45 = vmax.f32 %v14639_v34, %v14640_v28  ;;  %v1968_v7 = vld [vmem:[#allocation2 + $0x360] sm:$0xff]  ;;  %v1970_v0 = vld [vmem:[#allocation2 + $0x370] sm:$0xff]  ;;  %v1979_v34 = vld [vmem:[#allocation2 + $0x3b8] sm:$0xff] }
 0x404   :  { %2292 = vmatmul.mubr.bf16.gmra.mrb[44].mxu1 %v10386_v27  ;;  %2518 = vmatmul.mubr.bf16.gmra.mrb[76].mxu0 %v10386_v27  ;;  %v14658_v28 = vld [vmem:[#allocation91_spill] sm:$0xff] }
 0x405   :  { %2581 = vmatpush1.bf16.msra.mxu1 %v1912_v44  ;;  %2807 = vmatpush1.bf16.msra.mxu0 %v1914_v32  ;;  %v10426_v53 = vpack.c.bf16 %v14641_v45, %v14638_v56  ;;  %v1955_v44 = vld [vmem:[#allocation2 + $0x2f8] sm:$0xff]  ;;  %v14642_v32 = vmax.f32 %v10062_v62, %v10111_v47  ;;  %v1961_v47 = vld [vmem:[#allocation2 + $0x328] sm:$0xff] }
 0x406   :  { %2582 = vmatprep.subr.bf16.mxu1 %v1921_v10  ;;  %2808 = vmatprep.subr.bf16.mxu0 %v1923_v1  ;;  %v14643_v10 = vld [vmem:[#allocation45_spill] sm:$0xff]  ;;  %v1963_v62 = vld [vmem:[#allocation2 + $0x338] sm:$0xff] }
 0x407   :  { %2301 = vmatprep.mubr.bf16.mxu1 %v10394_v6  ;;  %2527 = vmatprep.mubr.bf16.mxu0 %v10394_v6  ;;  %v14644_v1 = vld [vmem:[#allocation57_spill] sm:$0xff]  ;;  %v14659_v45 = vld [vmem:[#allocation107_spill] sm:$0xff] }
 0x408   :  { %v14645_v61 = vmax.f32 %v14643_v10, %v14644_v1  ;;  %v1977_v56 = vld [vmem:[#allocation2 + $0x3a8] sm:$0xff]  ;;  %v1976_v10 = vld [vmem:[#allocation2 + $0x3a0] sm:$0xff]  ;;  %v1978_v1 = vld [vmem:[#allocation2 + $0x3b0] sm:$0xff] }
 0x409   :  { %2583 = vmatpush1.bf16.msra.mxu1 %v1920_v43  ;;  %2809 = vmatpush1.bf16.msra.mxu0 %v1922_v16  ;;  %v1952_v43 = vld [vmem:[#allocation2 + $0x2e0] sm:$0xff]  ;;  %v1954_v16 = vld [vmem:[#allocation2 + $0x2f0] sm:$0xff] }
 0x40a   :  { %2584 = vmatprep.subr.bf16.mxu1 %v1929_v15  ;;  %2810 = vmatprep.subr.bf16.mxu0 %v1931_v52  ;;  %v10434_v49 = vpack.c.bf16 %v14645_v61, %v14642_v32  ;;  %v14646_v15 = vld [vmem:[#allocation89_spill] sm:$0xff] }
 0x40b   :  { %v14647_v52 = vld [vmem:[#allocation105_spill] sm:$0xff] }
 0x40c   :  { %2302 = vmatmul.mubr.bf16.gmra.mrb[48].mxu1 %v10406_v23  ;;  %2528 = vmatmul.mubr.bf16.gmra.mrb[80].mxu0 %v10406_v23  ;;  %v14648_v9 = vmax.f32 %v14646_v15, %v14647_v52  ;;  %v1985_v61 = vld [vmem:[#allocation2 + $0x3e8] sm:$0xff]  ;;  %v1995_v52 = vld [vmem:[#allocation2 + $0x438] sm:$0xff] }
 0x40d   :  { %2585 = vmatpush1.bf16.msra.mxu1 %v1928_v39  ;;  %2811 = vmatpush1.bf16.msra.mxu0 %v1930_v24  ;;  %v1962_v39 = vld [vmem:[#allocation2 + $0x330] sm:$0xff]  ;;  %v1969_v24 = vld [vmem:[#allocation2 + $0x368] sm:$0xff] }
 0x40e   :  { %2586 = vmatprep.subr.bf16.mxu1 %v1937_v58  ;;  %2812 = vmatprep.subr.bf16.mxu0 %v1939_v3  ;;  %v10446_v19 = vpack.c.bf16 %v14651_v5, %v14648_v9  ;;  %v1971_v58 = vld [vmem:[#allocation2 + $0x378] sm:$0xff]  ;;  %v1993_v15 = vld [vmem:[#allocation2 + $0x428] sm:$0xff]  ;;  %v1992_v9 = vld [vmem:[#allocation2 + $0x420] sm:$0xff] }
 0x40f   :  { %2311 = vmatprep.mubr.bf16.mxu1 %v10414_v11  ;;  %2537 = vmatprep.mubr.bf16.mxu0 %v10414_v11  ;;  %v14652_v3 = vld [vmem:[#allocation47_spill] sm:$0xff] }
 0x410   :  { %v14654_v38 = vmax.f32 %v14652_v3, %v14653_v31  ;;  %v2003_v5 = vld [vmem:[#allocation2 + $0x478] sm:$0xff]  ;;  %v2008_v3 = vld [vmem:[#allocation2 + $0x4a0] sm:$0xff]  ;;  %v2010_v31 = vld [vmem:[#allocation2 + $0x4b0] sm:$0xff] }
 0x411   :  { %2587 = vmatpush1.bf16.msra.mxu1 %v1936_v41  ;;  %2813 = vmatpush1.bf16.msra.mxu0 %v1938_v46  ;;  %v14655_v41 = vld [vmem:[#allocation55_spill] sm:$0xff]  ;;  %v14656_v46 = vld [vmem:[#allocation114_spill] sm:$0xff] }
 0x412   :  { %2588 = vmatprep.subr.bf16.mxu1 %v1945_v55  ;;  %2814 = vmatprep.subr.bf16.mxu0 %v1947_v35  ;;  %v14657_v55 = vmax.f32 %v14655_v41, %v14656_v46  ;;  %v2016_v41 = vld [vmem:[#allocation2 + $0x4e0] sm:$0xff]  ;;  %v2025_v46 = vld [vmem:[#allocation2 + $0x528] sm:$0xff] }
 0x414   :  { %2312 = vmatmul.mubr.bf16.gmra.mrb[52].mxu1 %v10426_v53  ;;  %2538 = vmatmul.mubr.bf16.gmra.mrb[84].mxu0 %v10426_v53  ;;  %v10454_v35 = vpack.c.bf16 %v14657_v55, %v14654_v38  ;;  %v2017_v38 = vld [vmem:[#allocation2 + $0x4e8] sm:$0xff]  ;;  %v2027_v55 = vld [vmem:[#allocation2 + $0x538] sm:$0xff] }
 0x415   :  { %2589 = vmatpush1.bf16.msra.mxu1 %v1944_v40  ;;  %2815 = vmatpush1.bf16.msra.mxu0 %v1946_v21  ;;  %v14660_v40 = vmax.f32 %v14658_v28, %v14659_v45  ;;  %v14661_v21 = vld [vmem:[#allocation92_spill] sm:$0xff]  ;;  %v2041_v28 = vld [vmem:[#allocation2 + $0x5a8] sm:$0xff] }
 0x416   :  { %2590 = vmatprep.subr.bf16.mxu1 %v1953_v63  ;;  %2816 = vmatprep.subr.bf16.mxu0 %v1955_v44  ;;  %v14662_v63 = vld [vmem:[#allocation108_spill] sm:$0xff] }
 0x417   :  { %2321 = vmatprep.mubr.bf16.mxu1 %v10434_v49  ;;  %2547 = vmatprep.mubr.bf16.mxu0 %v10434_v49  ;;  %v14663_v44 = vmax.f32 %v14661_v21, %v14662_v63  ;;  %v2043_v45 = vld [vmem:[#allocation2 + $0x5b8] sm:$0xff]  ;;  %v2042_v21 = vld [vmem:[#allocation2 + $0x5b0] sm:$0xff]  ;;  %v2049_v63 = vld [vmem:[#allocation2 + $0x5e8] sm:$0xff] }
 0x419   :  { %2591 = vmatpush1.bf16.msra.mxu1 %v1952_v43  ;;  %2817 = vmatpush1.bf16.msra.mxu0 %v1954_v16  ;;  %v10466_v32 = vpack.c.bf16 %v14663_v44, %v14660_v40  ;;  %v1987_v43 = vld [vmem:[#allocation2 + $0x3f8] sm:$0xff]  ;;  %v1984_v16 = vld [vmem:[#allocation2 + $0x3e0] sm:$0xff] }
 0x41a   :  { %2592 = vmatprep.subr.bf16.mxu1 %v1961_v47  ;;  %2818 = vmatprep.subr.bf16.mxu0 %v1963_v62  ;;  %v1986_v47 = vld [vmem:[#allocation2 + $0x3f0] sm:$0xff]  ;;  %v2040_v40 = vld [vmem:[#allocation2 + $0x5a0] sm:$0xff] }
 0x41b   :  { %v14664_v62 = vld [vmem:[#allocation115_spill] sm:$0xff]  ;;  %v2048_v44 = vld [vmem:[#allocation2 + $0x5e0] sm:$0xff] }
 0x41c   :  { %2322 = vmatmul.mubr.bf16.gmra.mrb[56].mxu1 %v10446_v19  ;;  %2548 = vmatmul.mubr.bf16.gmra.mrb[88].mxu0 %v10446_v19 }
 0x41d   :  { %2593 = vmatpush1.bf16.msra.mxu1 %v1960_v60  ;;  %2819 = vmatpush1.bf16.msra.mxu0 %v1962_v39  ;;  %v2000_v60 = vld [vmem:[#allocation2 + $0x460] sm:$0xff]  ;;  %v2002_v39 = vld [vmem:[#allocation2 + $0x470] sm:$0xff] }
 0x41e   :  { %2594 = vmatprep.subr.bf16.mxu1 %v1969_v24  ;;  %2820 = vmatprep.subr.bf16.mxu0 %v1971_v58  ;;  %v2009_v24 = vld [vmem:[#allocation2 + $0x4a8] sm:$0xff]  ;;  %v2011_v58 = vld [vmem:[#allocation2 + $0x4b8] sm:$0xff] }
 0x41f   :  { %2331 = vmatprep.mubr.bf16.mxu1 %v10454_v35  ;;  %2557 = vmatprep.mubr.bf16.mxu0 %v10454_v35 }
 0x421   :  { %2595 = vmatpush1.bf16.msra.mxu1 %v1968_v7  ;;  %2821 = vmatpush1.bf16.msra.mxu0 %v1970_v0  ;;  %v2024_v7 = vld [vmem:[#allocation2 + $0x520] sm:$0xff]  ;;  %v2026_v0 = vld [vmem:[#allocation2 + $0x530] sm:$0xff] }
 0x422   :  { %2596 = vmatprep.subr.bf16.mxu1 %v1977_v56  ;;  %2822 = vmatprep.subr.bf16.mxu0 %v1979_v34  ;;  %v2033_v56 = vld [vmem:[#allocation2 + $0x568] sm:$0xff]  ;;  %v2032_v34 = vld [vmem:[#allocation2 + $0x560] sm:$0xff] }
 0x424   :  { %2332 = vmatmul.mubr.bf16.gmra.mrb[60].mxu1 %v10466_v32  ;;  %2558 = vmatmul.mubr.bf16.gmra.mrb[92].mxu0 %v10466_v32 }
 0x425   :  { %2597 = vmatpush1.bf16.msra.mxu1 %v1976_v10  ;;  %2823 = vmatpush1.bf16.msra.mxu0 %v1978_v1  ;;  %v2057_v10 = vld [vmem:[#allocation2 + $0x628] sm:$0xff]  ;;  %v2059_v1 = vld [vmem:[#allocation2 + $0x638] sm:$0xff] }
 0x426   :  { %2598 = vmatprep.subr.bf16.mxu1 %v1985_v61  ;;  %2824 = vmatprep.subr.bf16.mxu0 %v1987_v43  ;;  %v2056_v61 = vld [vmem:[#allocation2 + $0x620] sm:$0xff]  ;;  %v2058_v43 = vld [vmem:[#allocation2 + $0x630] sm:$0xff] }
 0x427   :  { %2600 = vmatprep.mubr.bf16.mxu1 %v14664_v62  ;;  %2826 = vmatprep.mubr.bf16.mxu0 %v14664_v62  ;;  %v2073_v62 = vld [vmem:[#allocation2 + $0x6a8] sm:$0xff] }
 0x429   :  { %2599 = vmatpush1.bf16.msra.mxu1 %v1984_v16  ;;  %2825 = vmatpush1.bf16.msra.mxu0 %v1986_v47  ;;  %v2065_v16 = vld [vmem:[#allocation2 + $0x668] sm:$0xff]  ;;  %v2064_v47 = vld [vmem:[#allocation2 + $0x660] sm:$0xff] }
 0x42a   :  { %2681 = vmatprep.subr.bf16.mxu1 %v1993_v15  ;;  %2907 = vmatprep.subr.bf16.mxu0 %v1995_v52  ;;  %v2075_v15 = vld [vmem:[#allocation2 + $0x6b8] sm:$0xff]  ;;  %v2072_v52 = vld [vmem:[#allocation2 + $0x6a0] sm:$0xff] }
 0x42c   :  { %2601 = vmatmul.mubr.bf16.vlgmr.msra.gmra.mrb[64].mxu1 %v10166_v4  ;;  %2827 = vmatmul.mubr.bf16.vlgmr.msra.gmra.mrb[96].mxu0 %v10166_v4  ;;  %v2019_v4 = vld [vmem:[#allocation2 + $0x4f8] sm:$0xff] }
 0x42d   :  { %2682 = vmatpush1.bf16.msra.mxu1 %v1992_v9  ;;  %2908 = vmatpush1.bf16.msra.mxu0 %v1994_v22  ;;  %v2074_v9 = vld [vmem:[#allocation2 + $0x6b0] sm:$0xff]  ;;  %v2081_v22 = vld [vmem:[#allocation2 + $0x6e8] sm:$0xff] }
 0x42e   :  { %2683 = vmatprep.subr.bf16.mxu1 %v2001_v14  ;;  %2909 = vmatprep.subr.bf16.mxu0 %v2003_v5  ;;  %v2080_v14 = vld [vmem:[#allocation2 + $0x6e0] sm:$0xff]  ;;  %v2089_v5 = vld [vmem:[#allocation2 + $0x728] sm:$0xff] }
 0x42f   :  { %2610 = vmatprep.mubr.bf16.mxu1 %v10174_v51  ;;  %2836 = vmatprep.mubr.bf16.mxu0 %v10174_v51  ;;  %v2018_v51 = vld [vmem:[#allocation2 + $0x4f0] sm:$0xff] }
 0x431   :  { %2684 = vmatpush1.bf16.msra.mxu1 %v2000_v60  ;;  %2910 = vmatpush1.bf16.msra.mxu0 %v2002_v39  ;;  %v2091_v60 = vld [vmem:[#allocation2 + $0x738] sm:$0xff]  ;;  %v2088_v39 = vld [vmem:[#allocation2 + $0x720] sm:$0xff] }
 0x432   :  { %2685 = vmatprep.subr.bf16.mxu1 %v2009_v24  ;;  %2911 = vmatprep.subr.bf16.mxu0 %v2011_v58  ;;  %v2090_v24 = vld [vmem:[#allocation2 + $0x730] sm:$0xff]  ;;  %v2097_v58 = vld [vmem:[#allocation2 + $0x768] sm:$0xff] }
 0x434   :  { %2611 = vmatmul.mubr.bf16.gmra.mrb[68].mxu1 %v10186_v59  ;;  %2837 = vmatmul.mubr.bf16.gmra.mrb[100].mxu0 %v10186_v59  ;;  %v2035_v59 = vld [vmem:[#allocation2 + $0x578] sm:$0xff] }
 0x435   :  { %2686 = vmatpush1.bf16.msra.mxu1 %v2008_v3  ;;  %2912 = vmatpush1.bf16.msra.mxu0 %v2010_v31  ;;  %v2096_v3 = vld [vmem:[#allocation2 + $0x760] sm:$0xff]  ;;  %v2105_v31 = vld [vmem:[#allocation2 + $0x7a8] sm:$0xff] }
 0x436   :  { %2687 = vmatprep.subr.bf16.mxu1 %v2017_v38  ;;  %2913 = vmatprep.subr.bf16.mxu0 %v2019_v4  ;;  %v2107_v38 = vld [vmem:[#allocation2 + $0x7b8] sm:$0xff]  ;;  %v2104_v4 = vld [vmem:[#allocation2 + $0x7a0] sm:$0xff] }
 0x437   :  { %2620 = vmatprep.mubr.bf16.mxu1 %v10194_v30  ;;  %2846 = vmatprep.mubr.bf16.mxu0 %v10194_v30  ;;  %v2034_v30 = vld [vmem:[#allocation2 + $0x570] sm:$0xff] }
 0x439   :  { %2688 = vmatpush1.bf16.msra.mxu1 %v2016_v41  ;;  %2914 = vmatpush1.bf16.msra.mxu0 %v2018_v51  ;;  %v2106_v41 = vld [vmem:[#allocation2 + $0x7b0] sm:$0xff]  ;;  %v2113_v51 = vld [vmem:[#allocation2 + $0x7e8] sm:$0xff] }
 0x43a   :  { %2689 = vmatprep.subr.bf16.mxu1 %v2025_v46  ;;  %2915 = vmatprep.subr.bf16.mxu0 %v2027_v55  ;;  %v2112_v46 = vld [vmem:[#allocation2 + $0x7e0] sm:$0xff] }
 0x43c   :  { %2621 = vmatmul.mubr.bf16.gmra.mrb[72].mxu1 %v10206_v8  ;;  %2847 = vmatmul.mubr.bf16.gmra.mrb[104].mxu0 %v10206_v8  ;;  %v2051_v8 = vld [vmem:[#allocation2 + $0x5f8] sm:$0xff] }
 0x43d   :  { %2690 = vmatpush1.bf16.msra.mxu1 %v2024_v7  ;;  %2916 = vmatpush1.bf16.msra.mxu0 %v2026_v0 }
 0x43e   :  { %2691 = vmatprep.subr.bf16.mxu1 %v2033_v56  ;;  %2917 = vmatprep.subr.bf16.mxu0 %v2035_v59 }
 0x43f   :  { %2630 = vmatprep.mubr.bf16.mxu1 %v10214_v13  ;;  %2856 = vmatprep.mubr.bf16.mxu0 %v10214_v13  ;;  %v2050_v13 = vld [vmem:[#allocation2 + $0x5f0] sm:$0xff] }
 0x441   :  { %2692 = vmatpush1.bf16.msra.mxu1 %v2032_v34  ;;  %2918 = vmatpush1.bf16.msra.mxu0 %v2034_v30 }
 0x442   :  { %2693 = vmatprep.subr.bf16.mxu1 %v2041_v28  ;;  %2919 = vmatprep.subr.bf16.mxu0 %v2043_v45 }
 0x444   :  { %2631 = vmatmul.mubr.bf16.gmra.mrb[76].mxu1 %v10226_v48  ;;  %2857 = vmatmul.mubr.bf16.gmra.mrb[108].mxu0 %v10226_v48  ;;  %v2067_v48 = vld [vmem:[#allocation2 + $0x678] sm:$0xff] }
 0x445   :  { %2694 = vmatpush1.bf16.msra.mxu1 %v2040_v40  ;;  %2920 = vmatpush1.bf16.msra.mxu0 %v2042_v21 }
 0x446   :  { %2695 = vmatprep.subr.bf16.mxu1 %v2049_v63  ;;  %2921 = vmatprep.subr.bf16.mxu0 %v2051_v8 }
 0x447   :  { %2640 = vmatprep.mubr.bf16.mxu1 %v10234_v25  ;;  %2866 = vmatprep.mubr.bf16.mxu0 %v10234_v25  ;;  %v2066_v25 = vld [vmem:[#allocation2 + $0x670] sm:$0xff] }
 0x449   :  { %2696 = vmatpush1.bf16.msra.mxu1 %v2048_v44  ;;  %2922 = vmatpush1.bf16.msra.mxu0 %v2050_v13 }
 0x44a   :  { %2697 = vmatprep.subr.bf16.mxu1 %v2057_v10  ;;  %2923 = vmatprep.subr.bf16.mxu0 %v2059_v1 }
 0x44c   :  { %2641 = vmatmul.mubr.bf16.gmra.mrb[80].mxu1 %v10246_v36  ;;  %2867 = vmatmul.mubr.bf16.gmra.mrb[112].mxu0 %v10246_v36  ;;  %v2083_v36 = vld [vmem:[#allocation2 + $0x6f8] sm:$0xff] }
 0x44d   :  { %2698 = vmatpush1.bf16.msra.mxu1 %v2056_v61  ;;  %2924 = vmatpush1.bf16.msra.mxu0 %v2058_v43 }
 0x44e   :  { %2699 = vmatprep.subr.bf16.mxu1 %v2065_v16  ;;  %2925 = vmatprep.subr.bf16.mxu0 %v2067_v48 }
 0x44f   :  { %2650 = vmatprep.mubr.bf16.mxu1 %v10254_v2  ;;  %2876 = vmatprep.mubr.bf16.mxu0 %v10254_v2  ;;  %v2082_v2 = vld [vmem:[#allocation2 + $0x6f0] sm:$0xff] }
 0x451   :  { %2700 = vmatpush1.bf16.msra.mxu1 %v2064_v47  ;;  %2926 = vmatpush1.bf16.msra.mxu0 %v2066_v25 }
 0x452   :  { %2701 = vmatprep.subr.bf16.mxu1 %v2073_v62  ;;  %2927 = vmatprep.subr.bf16.mxu0 %v2075_v15 }
 0x454   :  { %2651 = vmatmul.mubr.bf16.gmra.mrb[84].mxu1 %v10266_v37  ;;  %2877 = vmatmul.mubr.bf16.gmra.mrb[116].mxu0 %v10266_v37  ;;  %v2099_v37 = vld [vmem:[#allocation2 + $0x778] sm:$0xff] }
 0x455   :  { %2702 = vmatpush1.bf16.msra.mxu1 %v2072_v52  ;;  %2928 = vmatpush1.bf16.msra.mxu0 %v2074_v9 }
 0x456   :  { %2703 = vmatprep.subr.bf16.mxu1 %v2081_v22  ;;  %2929 = vmatprep.subr.bf16.mxu0 %v2083_v36 }
 0x457   :  { %2660 = vmatprep.mubr.bf16.mxu1 %v10274_v33  ;;  %2886 = vmatprep.mubr.bf16.mxu0 %v10274_v33  ;;  %v2098_v33 = vld [vmem:[#allocation2 + $0x770] sm:$0xff] }
 0x459   :  { %2704 = vmatpush1.bf16.msra.mxu1 %v2080_v14  ;;  %2930 = vmatpush1.bf16.msra.mxu0 %v2082_v2 }
 0x45a   :  { %2705 = vmatprep.subr.bf16.mxu1 %v2089_v5  ;;  %2931 = vmatprep.subr.bf16.mxu0 %v2091_v60 }
 0x45c   :  { %2661 = vmatmul.mubr.bf16.gmra.mrb[88].mxu1 %v10286_v18  ;;  %2887 = vmatmul.mubr.bf16.gmra.mrb[120].mxu0 %v10286_v18  ;;  %v2115_v18 = vld [vmem:[#allocation2 + $0x7f8] sm:$0xff] }
 0x45d   :  { %2706 = vmatpush1.bf16.msra.mxu1 %v2088_v39  ;;  %2932 = vmatpush1.bf16.msra.mxu0 %v2090_v24 }
 0x45e   :  { %2707 = vmatprep.subr.bf16.mxu1 %v2097_v58  ;;  %2933 = vmatprep.subr.bf16.mxu0 %v2099_v37 }
 0x45f   :  { %2670 = vmatprep.mubr.bf16.mxu1 %v10294_v20  ;;  %2896 = vmatprep.mubr.bf16.mxu0 %v10294_v20  ;;  %v2114_v20 = vld [vmem:[#allocation2 + $0x7f0] sm:$0xff] }
 0x461   :  { %2708 = vmatpush1.bf16.msra.mxu1 %v2096_v3  ;;  %2934 = vmatpush1.bf16.msra.mxu0 %v2098_v33 }
 0x462   :  { %2709 = vmatprep.subr.bf16.mxu1 %v2105_v31  ;;  %2935 = vmatprep.subr.bf16.mxu0 %v2107_v38 }
 0x464   :  { %2671 = vmatmul.mubr.bf16.gmra.mrb[92].mxu1 %v10306_v12  ;;  %2897 = vmatmul.mubr.bf16.gmra.mrb[124].mxu0 %v10306_v12 }
 0x465   :  { %2710 = vmatpush1.bf16.msra.mxu1 %v2104_v4  ;;  %2936 = vmatpush1.bf16.msra.mxu0 %v2106_v41 }
 0x466   :  { %2711 = vmatprep.subr.bf16.mxu1 %v2113_v51  ;;  %2937 = vmatprep.subr.bf16.mxu0 %v2115_v18 }
 0x467   :  { %2713 = vmatprep.mubr.bf16.mxu1 %v10314_v29  ;;  %2939 = vmatprep.mubr.bf16.mxu0 %v10314_v29 }
 0x469   :  { %2712 = vmatpush1.bf16.msra.mxu1 %v2112_v46  ;;  %2938 = vmatpush1.bf16.msra.mxu0 %v2114_v20 }
 0x46c   :  { %2714 = vmatmul.mubr.bf16.vlgmr.msra.gmra.mrb[64].mxu1 %v10326_v42  ;;  %2940 = vmatmul.mubr.bf16.vlgmr.msra.gmra.mrb[96].mxu0 %v10326_v42 }
 0x46d   :  { %2723 = vmatprep.mubr.bf16.mxu1 %v10334_v26  ;;  %2949 = vmatprep.mubr.bf16.mxu0 %v10334_v26 }
 0x474   :  { %2724 = vmatmul.mubr.bf16.gmra.mrb[68].mxu1 %v10346_v57  ;;  %2950 = vmatmul.mubr.bf16.gmra.mrb[100].mxu0 %v10346_v57 }
 0x475   :  { %2733 = vmatprep.mubr.bf16.mxu1 %v10354_v17  ;;  %2959 = vmatprep.mubr.bf16.mxu0 %v10354_v17 }
 0x47c   :  { %2734 = vmatmul.mubr.bf16.gmra.mrb[72].mxu1 %v10366_v54  ;;  %2960 = vmatmul.mubr.bf16.gmra.mrb[104].mxu0 %v10366_v54 }
 0x47d   :  { %2743 = vmatprep.mubr.bf16.mxu1 %v10374_v50  ;;  %2969 = vmatprep.mubr.bf16.mxu0 %v10374_v50 }
 0x484   :  { %2744 = vmatmul.mubr.bf16.gmra.mrb[76].mxu1 %v10386_v27  ;;  %2970 = vmatmul.mubr.bf16.gmra.mrb[108].mxu0 %v10386_v27 }
 0x485   :  { %2753 = vmatprep.mubr.bf16.mxu1 %v10394_v6  ;;  %2979 = vmatprep.mubr.bf16.mxu0 %v10394_v6 }
 0x48c   :  { %2754 = vmatmul.mubr.bf16.gmra.mrb[80].mxu1 %v10406_v23  ;;  %2980 = vmatmul.mubr.bf16.gmra.mrb[112].mxu0 %v10406_v23 }
 0x48d   :  { %2763 = vmatprep.mubr.bf16.mxu1 %v10414_v11  ;;  %2989 = vmatprep.mubr.bf16.mxu0 %v10414_v11 }
 0x494   :  { %2764 = vmatmul.mubr.bf16.gmra.mrb[84].mxu1 %v10426_v53  ;;  %2990 = vmatmul.mubr.bf16.gmra.mrb[116].mxu0 %v10426_v53 }
 0x495   :  { %2773 = vmatprep.mubr.bf16.mxu1 %v10434_v49  ;;  %2999 = vmatprep.mubr.bf16.mxu0 %v10434_v49 }
 0x49c   :  { %2774 = vmatmul.mubr.bf16.gmra.mrb[88].mxu1 %v10446_v19  ;;  %3000 = vmatmul.mubr.bf16.gmra.mrb[120].mxu0 %v10446_v19 }
 0x49d   :  { %2783 = vmatprep.mubr.bf16.mxu1 %v10454_v35  ;;  %3009 = vmatprep.mubr.bf16.mxu0 %v10454_v35 }
 0x4a4   :  { %2784 = vmatmul.mubr.bf16.gmra.mrb[92].mxu1 %v10466_v32  ;;  %3010 = vmatmul.mubr.bf16.gmra.mrb[124].mxu0 %v10466_v32 }
 0x4bf   :  { %v10534_v12 = vpop.f32.mrb[32].mxu1  ;;  %v10536_v29 = vpop.f32.mrb[64].mxu0 }
 0x4c0   :  { %v10538_v42 = vpop.f32.mrb[33].mxu1  ;;  %v10540_v26 = vpop.f32.mrb[65].mxu0 }
 0x4c1   :  { %14665 = vst [vmem:[#allocation36_spill] sm:$0xff] %v10540_v26  ;;  %v10542_v57 = vpop.f32.mrb[34].mxu1  ;;  %v10544_v17 = vpop.f32.mrb[66].mxu0 }
 0x4c2   :  { %v3020_v54 = vadd.f32 %v10542_v57, %v10534_v12  ;;  %v3062_v50 = vadd.f32 %v10544_v17, %v10536_v29  ;;  %v10550_v27 = vpop.f32.mrb[35].mxu1  ;;  %v10552_v6 = vpop.f32.mrb[67].mxu0 }
 0x4c3   :  { %14666 = vst [vmem:[#allocation56_spill] sm:$0xff] %v10552_v6  ;;  %v3041_v23 = vadd.f32 %v10550_v27, %v10538_v42  ;;  %v3083_v11 = vadd.f32 %v10552_v6, %v10540_v26 }
 0x4c7   :  { %v10558_v53 = vpop.f32.mrb[36].mxu1  ;;  %v10560_v49 = vpop.f32.mrb[68].mxu0 }
 0x4c8   :  { %v3021_v19 = vadd.f32 %v3020_v54, %v10558_v53  ;;  %v3063_v35 = vadd.f32 %v3062_v50, %v10560_v49  ;;  %v10564_v32 = vpop.f32.mrb[37].mxu1  ;;  %v10566_v55 = vpop.f32.mrb[69].mxu0 }
 0x4c9   :  { %14667 = vst [vmem:[#allocation37_spill] sm:$0xff] %v10566_v55  ;;  %v3042_v7 = vadd.f32 %v3041_v23, %v10564_v32  ;;  %v3084_v0 = vadd.f32 %v3083_v11, %v10566_v55  ;;  %v10570_v56 = vpop.f32.mrb[38].mxu1  ;;  %v10572_v59 = vpop.f32.mrb[70].mxu0 }
 0x4ca   :  { %v3022_v34 = vadd.f32 %v3021_v19, %v10570_v56  ;;  %v3064_v30 = vadd.f32 %v3063_v35, %v10572_v59  ;;  %v10576_v28 = vpop.f32.mrb[39].mxu1  ;;  %v10578_v45 = vpop.f32.mrb[71].mxu0 }
 0x4cb   :  { %14668 = vst [vmem:[#allocation58_spill] sm:$0xff] %v10578_v45  ;;  %v3043_v40 = vadd.f32 %v3042_v7, %v10576_v28  ;;  %v3085_v21 = vadd.f32 %v3084_v0, %v10578_v45 }
 0x4cf   :  { %v10582_v63 = vpop.f32.mrb[40].mxu1  ;;  %v10584_v8 = vpop.f32.mrb[72].mxu0 }
 0x4d0   :  { %v3023_v44 = vadd.f32 %v3022_v34, %v10582_v63  ;;  %v3065_v13 = vadd.f32 %v3064_v30, %v10584_v8  ;;  %v10588_v10 = vpop.f32.mrb[41].mxu1  ;;  %v10590_v1 = vpop.f32.mrb[73].mxu0 }
 0x4d1   :  { %14669 = vst [vmem:[#allocation60_spill] sm:$0xff] %v10590_v1  ;;  %v3044_v61 = vadd.f32 %v3043_v40, %v10588_v10  ;;  %v3086_v43 = vadd.f32 %v3085_v21, %v10590_v1  ;;  %v10594_v16 = vpop.f32.mrb[42].mxu1  ;;  %v10596_v48 = vpop.f32.mrb[74].mxu0 }
 0x4d2   :  { %v3024_v47 = vadd.f32 %v3023_v44, %v10594_v16  ;;  %v3066_v25 = vadd.f32 %v3065_v13, %v10596_v48  ;;  %v10600_v62 = vpop.f32.mrb[43].mxu1  ;;  %v10602_v15 = vpop.f32.mrb[75].mxu0 }
 0x4d3   :  { %14670 = vst [vmem:[#allocation38_spill] sm:$0xff] %v10600_v62  ;;  %14671 = vst [vmem:[#allocation62_spill] sm:$0xff] %v10602_v15  ;;  %v3045_v52 = vadd.f32 %v3044_v61, %v10600_v62  ;;  %v3087_v9 = vadd.f32 %v3086_v43, %v10602_v15 }
 0x4d7   :  { %v10606_v22 = vpop.f32.mrb[44].mxu1  ;;  %v10608_v36 = vpop.f32.mrb[76].mxu0 }
 0x4d8   :  { %v3025_v14 = vadd.f32 %v3024_v47, %v10606_v22  ;;  %v3067_v2 = vadd.f32 %v3066_v25, %v10608_v36  ;;  %v10612_v5 = vpop.f32.mrb[45].mxu1  ;;  %v10614_v60 = vpop.f32.mrb[77].mxu0 }
 0x4d9   :  { %14672 = vst [vmem:[#allocation39_spill] sm:$0xff] %v10612_v5  ;;  %14673 = vst [vmem:[#allocation63_spill] sm:$0xff] %v10614_v60  ;;  %v3046_v39 = vadd.f32 %v3045_v52, %v10612_v5  ;;  %v3088_v24 = vadd.f32 %v3087_v9, %v10614_v60  ;;  %v10618_v58 = vpop.f32.mrb[46].mxu1  ;;  %v10620_v37 = vpop.f32.mrb[78].mxu0 }
 0x4da   :  { %v3026_v3 = vadd.f32 %v3025_v14, %v10618_v58  ;;  %v3068_v33 = vadd.f32 %v3067_v2, %v10620_v37  ;;  %v10624_v31 = vpop.f32.mrb[47].mxu1  ;;  %v10626_v38 = vpop.f32.mrb[79].mxu0 }
 0x4db   :  { %14674 = vst [vmem:[#allocation40_spill] sm:$0xff] %v10624_v31  ;;  %14675 = vst [vmem:[#allocation64_spill] sm:$0xff] %v10626_v38  ;;  %v3047_v4 = vadd.f32 %v3046_v39, %v10624_v31  ;;  %v3089_v41 = vadd.f32 %v3088_v24, %v10626_v38 }
 0x4df   :  { %v10630_v51 = vpop.f32.mrb[48].mxu1  ;;  %v10632_v18 = vpop.f32.mrb[80].mxu0 }
 0x4e0   :  { %v3027_v46 = vadd.f32 %v3026_v3, %v10630_v51  ;;  %v3069_v20 = vadd.f32 %v3068_v33, %v10632_v18  ;;  %v10636_v54 = vpop.f32.mrb[49].mxu1  ;;  %v10638_v50 = vpop.f32.mrb[81].mxu0 }
 0x4e1   :  { %14676 = vst [vmem:[#allocation42_spill] sm:$0xff] %v10636_v54  ;;  %14677 = vst [vmem:[#allocation81_spill] sm:$0xff] %v10638_v50  ;;  %v3048_v23 = vadd.f32 %v3047_v4, %v10636_v54  ;;  %v3090_v11 = vadd.f32 %v3089_v41, %v10638_v50  ;;  %v10642_v19 = vpop.f32.mrb[50].mxu1  ;;  %v10644_v35 = vpop.f32.mrb[82].mxu0 }
 0x4e2   :  { %v3028_v7 = vadd.f32 %v3027_v46, %v10642_v19  ;;  %v3070_v0 = vadd.f32 %v3069_v20, %v10644_v35  ;;  %v10648_v34 = vpop.f32.mrb[51].mxu1  ;;  %v10650_v30 = vpop.f32.mrb[83].mxu0 }
 0x4e3   :  { %14678 = vst [vmem:[#allocation80_spill] sm:$0xff] %v10648_v34  ;;  %14679 = vst [vmem:[#allocation44_spill] sm:$0xff] %v10650_v30  ;;  %v3049_v40 = vadd.f32 %v3048_v23, %v10648_v34  ;;  %v3091_v21 = vadd.f32 %v3090_v11, %v10650_v30 }
 0x4e7   :  { %v10654_v44 = vpop.f32.mrb[52].mxu1  ;;  %v10656_v13 = vpop.f32.mrb[84].mxu0 }
 0x4e8   :  { %v3029_v61 = vadd.f32 %v3028_v7, %v10654_v44  ;;  %v3071_v43 = vadd.f32 %v3070_v0, %v10656_v13  ;;  %v10660_v47 = vpop.f32.mrb[53].mxu1  ;;  %v10662_v25 = vpop.f32.mrb[85].mxu0 }
 0x4e9   :  { %14680 = vst [vmem:[#allocation82_spill] sm:$0xff] %v10660_v47  ;;  %14681 = vst [vmem:[#allocation46_spill] sm:$0xff] %v10662_v25  ;;  %v3050_v52 = vadd.f32 %v3049_v40, %v10660_v47  ;;  %v3092_v9 = vadd.f32 %v3091_v21, %v10662_v25  ;;  %v10666_v14 = vpop.f32.mrb[54].mxu1  ;;  %v10668_v2 = vpop.f32.mrb[86].mxu0 }
 0x4ea   :  { %v3030_v39 = vadd.f32 %v3029_v61, %v10666_v14  ;;  %v3072_v24 = vadd.f32 %v3071_v43, %v10668_v2  ;;  %v10672_v3 = vpop.f32.mrb[55].mxu1  ;;  %v10674_v33 = vpop.f32.mrb[87].mxu0 }
 0x4eb   :  { %14682 = vst [vmem:[#allocation83_spill] sm:$0xff] %v10672_v3  ;;  %14683 = vst [vmem:[#allocation76_spill] sm:$0xff] %v10674_v33  ;;  %v3051_v4 = vadd.f32 %v3050_v52, %v10672_v3  ;;  %v3093_v41 = vadd.f32 %v3092_v9, %v10674_v33 }
 0x4ef   :  { %v10678_v46 = vpop.f32.mrb[56].mxu1  ;;  %v10680_v20 = vpop.f32.mrb[88].mxu0 }
 0x4f0   :  { %v3031_v23 = vadd.f32 %v3030_v39, %v10678_v46  ;;  %v3073_v11 = vadd.f32 %v3072_v24, %v10680_v20  ;;  %v10684_v7 = vpop.f32.mrb[57].mxu1  ;;  %v10686_v0 = vpop.f32.mrb[89].mxu0 }
 0x4f1   :  { %14684 = vst [vmem:[#allocation110_spill] sm:$0xff] %v10684_v7  ;;  %14685 = vst [vmem:[#allocation77_spill] sm:$0xff] %v10686_v0  ;;  %v3052_v40 = vadd.f32 %v3051_v4, %v10684_v7  ;;  %v3094_v21 = vadd.f32 %v3093_v41, %v10686_v0  ;;  %v2327_v61 = vpop.f32.mrb[58].mxu1  ;;  %v10690_v43 = vpop.f32.mrb[90].mxu0 }
 0x4f2   :  { %v3032_v52 = vadd.f32 %v3031_v23, %v2327_v61  ;;  %v3074_v9 = vadd.f32 %v3073_v11, %v10690_v43  ;;  %v10693_v33 = vpop.f32.mrb[59].mxu1  ;;  %v10695_v25 = vpop.f32.mrb[91].mxu0 }
 0x4f3   :  { %14686 = vst [vmem:[#allocation111_spill] sm:$0xff] %v10693_v33  ;;  %14687 = vst [vmem:[#allocation48_spill] sm:$0xff] %v10695_v25  ;;  %v3053_v39 = vadd.f32 %v3052_v40, %v10693_v33  ;;  %v3095_v24 = vadd.f32 %v3094_v21, %v10695_v25 }
 0x4f7   :  { %v2333_v30 = vpop.f32.mrb[60].mxu1  ;;  %v10699_v50 = vpop.f32.mrb[92].mxu0 }
 0x4f8   :  { %v3033_v4 = vadd.f32 %v3032_v52, %v2333_v30  ;;  %v3075_v41 = vadd.f32 %v3074_v9, %v10699_v50  ;;  %v10702_v0 = vpop.f32.mrb[61].mxu1  ;;  %v10704_v38 = vpop.f32.mrb[93].mxu0 }
 0x4f9   :  { %14688 = vst [vmem:[#allocation84_spill] sm:$0xff] %v10702_v0  ;;  %14689 = vst [vmem:[#allocation50_spill] sm:$0xff] %v10704_v38  ;;  %v3054_v23 = vadd.f32 %v3053_v39, %v10702_v0  ;;  %v3096_v11 = vadd.f32 %v3095_v24, %v10704_v38  ;;  %v2337_v60 = vpop.f32.mrb[62].mxu1  ;;  %v10708_v15 = vpop.f32.mrb[94].mxu0 }
 0x4fa   :  { %v3034_v40 = vadd.f32 %v3033_v4, %v2337_v60  ;;  %v3076_v21 = vadd.f32 %v3075_v41, %v10708_v15  ;;  %v10711_v25 = vpop.f32.mrb[63].mxu1  ;;  %v10713_v1 = vpop.f32.mrb[95].mxu0 }
 0x4fb   :  { %14690 = vst [vmem:[#allocation85_spill] sm:$0xff] %v10711_v25  ;;  %14691 = vst [vmem:[#allocation78_spill] sm:$0xff] %v10713_v1  ;;  %v3055_v52 = vadd.f32 %v3054_v23, %v10711_v25  ;;  %v3097_v9 = vadd.f32 %v3096_v11, %v10713_v1 }
 0x4fc   :  { %v3035_v45 = vrot.slane %v3034_v40, 4  ;;  %v3077_v55 = vrot.slane %v3076_v21, 4 }
 0x4fd   :  { %v3056_v6 = vrot.slane %v3055_v52, 4  ;;  %v3098_v39 = vrot.slane %v3097_v9, 4 }
 0x4fe   :  { %v3036_v26 = vadd.f32 %v3035_v45, %v3034_v40  ;;  %v3078_v24 = vadd.f32 %v3077_v55, %v3076_v21 }
 0x4ff   :  { %v3057_v38 = vadd.f32 %v3056_v6, %v3055_v52  ;;  %v3099_v0 = vadd.f32 %v3098_v39, %v3097_v9 }
 0x500   :  { %v3037_v33 = vrot.slane %v3036_v26, 2  ;;  %v3079_v4 = vrot.slane %v3078_v24, 2 }
 0x501   :  { %v3058_v7 = vrot.slane %v3057_v38, 2  ;;  %v3100_v41 = vrot.slane %v3099_v0, 2 }
 0x502   :  { %v3038_v3 = vadd.f32 %v3037_v33, %v3036_v26  ;;  %v3080_v47 = vadd.f32 %v3079_v4, %v3078_v24 }
 0x503   :  { %v3059_v31 = vadd.f32 %v3058_v7, %v3057_v38  ;;  %v3101_v23 = vadd.f32 %v3100_v41, %v3099_v0 }
 0x504   :  { %v3039_v34 = vrot.slane %v3038_v3, 1  ;;  %v3081_v54 = vrot.slane %v3080_v47, 1 }
 0x505   :  { %v3060_v5 = vrot.slane %v3059_v31, 1  ;;  %v3102_v62 = vrot.slane %v3101_v23, 1 }
 0x506   :  { %v3040_v25 = vadd.f32 %v3039_v34, %v3038_v3  ;;  %v3082_v1 = vadd.f32 %v3081_v54, %v3080_v47 }
 0x507   :  { %v3061_v3 = vadd.f32 %v3060_v5, %v3059_v31  ;;  %v3103_v33 = vadd.f32 %v3102_v62, %v3101_v23 }
 0x508   :  { %v3188_v11 = vmul.f32 0.0078125, %v3040_v25 }
 0x509   :  { %v10826_v21 = vmul.f32 0.0078125, %v3103_v33 }
 0x50a   :  { %v10718_v45 = vsub.f32 %v10534_v12, %v3188_v11  ;;  %v10721_v6 = vsub.f32 %v10542_v57, %v3188_v11  ;;  %v10724_v55 = vsub.f32 %v10558_v53, %v3188_v11  ;;  %v10727_v26 = vsub.f32 %v10570_v56, %v3188_v11 }
 0x50b   :  { %v10730_v38 = vsub.f32 %v10582_v63, %v3188_v11  ;;  %v10733_v34 = vsub.f32 %v10594_v16, %v3188_v11  ;;  %v10736_v54 = vsub.f32 %v10606_v22, %v3188_v11  ;;  %v10739_v12 = vsub.f32 %v10618_v58, %v3188_v11 }
 0x50c   :  { %v10742_v57 = vsub.f32 %v10630_v51, %v3188_v11  ;;  %v10745_v53 = vsub.f32 %v10642_v19, %v3188_v11  ;;  %v10748_v56 = vsub.f32 %v10654_v44, %v3188_v11  ;;  %v10751_v63 = vsub.f32 %v10666_v14, %v3188_v11 }
 0x50d   :  { %v10754_v16 = vsub.f32 %v10678_v46, %v3188_v11  ;;  %v10756_v22 = vsub.f32 %v2327_v61, %v3188_v11  ;;  %v10758_v47 = vsub.f32 %v2333_v30, %v3188_v11  ;;  %v10760_v58 = vsub.f32 %v2337_v60, %v3188_v11 }
 0x50e   :  { %v3324_v51 = vmul.f32 %v10718_v45, %v10718_v45  ;;  %v3332_v19 = vmul.f32 %v10721_v6, %v10721_v6  ;;  %v3190_v44 = vmul.f32 0.0078125, %v3082_v1  ;;  %v3340_v25 = vmul.f32 %v10724_v55, %v10724_v55 }
 0x50f   :  { %14692 = vst [vmem:[#allocation112_spill] sm:$0xff] %v10758_v47  ;;  %14693 = vst [vmem:[#allocation79_spill] sm:$0xff] %v10760_v58  ;;  %v3348_v14 = vmul.f32 %v10727_v26, %v10727_v26  ;;  %v3388_v52 = vmul.f32 %v10742_v57, %v10742_v57  ;;  %v3396_v9 = vmul.f32 %v10745_v53, %v10745_v53 }
 0x510   :  { %v3452_v46 = vadd.f32 %v3332_v19, %v3324_v51  ;;  %v10771_v30 = vsub.f32 %v10536_v29, %v3190_v44  ;;  %v10774_v60 = vsub.f32 %v10544_v17, %v3190_v44  ;;  %v10777_v7 = vsub.f32 %v10560_v49, %v3190_v44 }
 0x511   :  { %v10780_v1 = vsub.f32 %v10572_v59, %v3190_v44  ;;  %v10783_v0 = vsub.f32 %v10584_v8, %v3190_v44  ;;  %v10786_v61 = vsub.f32 %v10596_v48, %v3190_v44  ;;  %v10789_v62 = vsub.f32 %v10608_v36, %v3190_v44 }
 0x512   :  { %14694 = vst [vmem:[#allocation113_spill] sm:$0xff] %v10771_v30  ;;  %14695 = vst [vmem:[#allocation52_spill] sm:$0xff] %v10774_v60  ;;  %v3453_v29 = vadd.f32 %v3452_v46, %v3340_v25  ;;  %v10792_v5 = vsub.f32 %v10620_v37, %v3190_v44  ;;  %v10795_v17 = vsub.f32 %v10632_v18, %v3190_v44  ;;  %v14710_v46 = vld [vmem:[#allocation38_spill] sm:$0xff] }
 0x513   :  { %14696 = vst [vmem:[#allocation86_spill] sm:$0xff] %v10777_v7  ;;  %14697 = vst [vmem:[#allocation54_spill] sm:$0xff] %v10780_v1  ;;  %v10798_v49 = vsub.f32 %v10644_v35, %v3190_v44  ;;  %v10801_v59 = vsub.f32 %v10656_v13, %v3190_v44  ;;  %v10804_v8 = vsub.f32 %v10668_v2, %v3190_v44 }
 0x514   :  { %14698 = vst [vmem:[#allocation87_spill] sm:$0xff] %v10783_v0  ;;  %14699 = vst [vmem:[#allocation41_spill] sm:$0xff] %v10786_v61  ;;  %v10807_v48 = vsub.f32 %v10680_v20, %v3190_v44  ;;  %v10810_v36 = vsub.f32 %v10690_v43, %v3190_v44  ;;  %v3356_v37 = vmul.f32 %v10730_v38, %v10730_v38  ;;  %v3189_v20 = vmul.f32 0.0078125, %v3061_v3 }
 0x515   :  { %14700 = vst [vmem:[#allocation49_spill] sm:$0xff] %v10789_v62  ;;  %14701 = vst [vmem:[#allocation43_spill] sm:$0xff] %v10792_v5  ;;  %v3454_v31 = vadd.f32 %v3453_v29, %v3348_v14  ;;  %v10815_v18 = vsub.f32 %v10699_v50, %v3190_v44  ;;  %v10818_v35 = vsub.f32 %v10708_v15, %v3190_v44 }
 0x516   :  { %14702 = vst [vmem:[#allocation51_spill] sm:$0xff] %v10795_v17  ;;  %14703 = vst [vmem:[#allocation65_spill] sm:$0xff] %v10798_v49  ;;  %v3326_v13 = vmul.f32 %v10771_v30, %v10771_v30  ;;  %v3334_v2 = vmul.f32 %v10774_v60, %v10774_v60  ;;  %v3364_v43 = vmul.f32 %v10733_v34, %v10733_v34 }
 0x517   :  { %14704 = vst [vmem:[#allocation93_spill] sm:$0xff] %v10801_v59  ;;  %v3455_v40 = vadd.f32 %v3454_v31, %v3356_v37  ;;  %v3372_v50 = vmul.f32 %v10736_v54, %v10736_v54  ;;  %v3380_v15 = vmul.f32 %v10739_v12, %v10739_v12  ;;  %v3404_v39 = vmul.f32 %v10748_v56, %v10748_v56  ;;  %v14712_v37 = vld [vmem:[#allocation39_spill] sm:$0xff]  ;;  %v14714_v31 = vld [vmem:[#allocation40_spill] sm:$0xff] }
 0x518   :  { %v3342_v4 = vmul.f32 %v10777_v7, %v10777_v7  ;;  %v3350_v41 = vmul.f32 %v10780_v1, %v10780_v1  ;;  %v3358_v23 = vmul.f32 %v10783_v0, %v10783_v0  ;;  %v3494_v11 = vadd.f32 %v3334_v2, %v3326_v13  ;;  %v14716_v2 = vld [vmem:[#allocation42_spill] sm:$0xff]  ;;  %v14730_v0 = vld [vmem:[#allocation85_spill] sm:$0xff] }
 0x519   :  { %v3456_v24 = vadd.f32 %v3455_v40, %v3364_v43  ;;  %v10845_v51 = vsub.f32 %v10538_v42, %v3189_v20  ;;  %v10848_v19 = vsub.f32 %v10550_v27, %v3189_v20  ;;  %v10851_v25 = vsub.f32 %v10564_v32, %v3189_v20  ;;  %v14718_v43 = vld [vmem:[#allocation80_spill] sm:$0xff]  ;;  %v14720_v40 = vld [vmem:[#allocation82_spill] sm:$0xff] }
 0x51a   :  { %v10854_v14 = vsub.f32 %v10576_v28, %v3189_v20  ;;  %v10857_v3 = vsub.f32 %v10588_v10, %v3189_v20  ;;  %v3495_v33 = vadd.f32 %v3494_v11, %v3342_v4  ;;  %v10860_v29 = vsub.f32 %v14710_v46, %v3189_v20  ;;  %v14724_v11 = vld [vmem:[#allocation110_spill] sm:$0xff] }
 0x51b   :  { %14705 = vst [vmem:[#allocation66_spill] sm:$0xff] %v10845_v51  ;;  %14706 = vst [vmem:[#allocation94_spill] sm:$0xff] %v10848_v19  ;;  %v3457_v44 = vadd.f32 %v3456_v24, %v3372_v50  ;;  %v10863_v42 = vsub.f32 %v14712_v37, %v3189_v20  ;;  %v10866_v27 = vsub.f32 %v14714_v31, %v3189_v20  ;;  %v14722_v24 = vld [vmem:[#allocation83_spill] sm:$0xff] }
 0x51c   :  { %14707 = vst [vmem:[#allocation53_spill] sm:$0xff] %v10851_v25  ;;  %14708 = vst [vmem:[#allocation67_spill] sm:$0xff] %v10854_v14  ;;  %v10869_v32 = vsub.f32 %v14716_v2, %v3189_v20  ;;  %v10872_v28 = vsub.f32 %v14718_v43, %v3189_v20  ;;  %v10875_v10 = vsub.f32 %v14720_v40, %v3189_v20  ;;  %v14726_v37 = vld [vmem:[#allocation111_spill] sm:$0xff]  ;;  %v14728_v2 = vld [vmem:[#allocation84_spill] sm:$0xff] }
 0x51d   :  { %14709 = vst [vmem:[#allocation95_spill] sm:$0xff] %v10857_v3  ;;  %14711 = vst [vmem:[#allocation68_spill] sm:$0xff] %v10860_v29  ;;  %v3458_v13 = vadd.f32 %v3457_v44, %v3380_v15  ;;  %v3496_v50 = vadd.f32 %v3495_v33, %v3350_v41  ;;  %v10878_v4 = vsub.f32 %v14722_v24, %v3189_v20 }
 0x51e   :  { %14713 = vst [vmem:[#allocation96_spill] sm:$0xff] %v10863_v42  ;;  %14715 = vst [vmem:[#allocation69_spill] sm:$0xff] %v10866_v27  ;;  %v10881_v46 = vsub.f32 %v14724_v11, %v3189_v20  ;;  %v10884_v31 = vsub.f32 %v14726_v37, %v3189_v20  ;;  %v3412_v15 = vmul.f32 %v10751_v63, %v10751_v63 }
 0x51f   :  { %14717 = vst [vmem:[#allocation97_spill] sm:$0xff] %v10869_v32  ;;  %14719 = vst [vmem:[#allocation70_spill] sm:$0xff] %v10872_v28  ;;  %v3459_v44 = vadd.f32 %v3458_v13, %v3388_v52  ;;  %v10889_v43 = vsub.f32 %v14728_v2, %v3189_v20  ;;  %v10892_v40 = vsub.f32 %v14730_v0, %v3189_v20 }
 0x520   :  { %14721 = vst [vmem:[#allocation98_spill] sm:$0xff] %v10875_v10  ;;  %14723 = vst [vmem:[#allocation71_spill] sm:$0xff] %v10878_v4  ;;  %v3420_v41 = vmul.f32 %v10754_v16, %v10754_v16  ;;  %v3428_v33 = vmul.f32 %v10756_v22, %v10756_v22  ;;  %v3366_v24 = vmul.f32 %v10786_v61, %v10786_v61 }
 0x521   :  { %14725 = vst [vmem:[#allocation99_spill] sm:$0xff] %v10881_v46  ;;  %14727 = vst [vmem:[#allocation72_spill] sm:$0xff] %v10884_v31  ;;  %v3497_v11 = vadd.f32 %v3496_v50, %v3358_v23  ;;  %v3436_v37 = vmul.f32 %v10758_v47, %v10758_v47  ;;  %v3460_v52 = vadd.f32 %v3459_v44, %v3396_v9 }
 0x522   :  { %14729 = vst [vmem:[#allocation100_spill] sm:$0xff] %v10889_v43  ;;  %14731 = vst [vmem:[#allocation73_spill] sm:$0xff] %v10892_v40  ;;  %v3325_v13 = vmul.f32 %v10845_v51, %v10845_v51  ;;  %v3333_v0 = vmul.f32 %v10848_v19, %v10848_v19  ;;  %v3444_v20 = vmul.f32 %v10760_v58, %v10760_v58 }
 0x523   :  { %v3374_v2 = vmul.f32 %v10789_v62, %v10789_v62  ;;  %v3382_v61 = vmul.f32 %v10792_v5, %v10792_v5  ;;  %v3498_v23 = vadd.f32 %v3497_v11, %v3366_v24  ;;  %v3461_v50 = vadd.f32 %v3460_v52, %v3404_v39  ;;  %v14732_v52 = vld [vmem:[#allocation36_spill] sm:$0xff] }
 0x524   :  { %v3390_v9 = vmul.f32 %v10795_v17, %v10795_v17  ;;  %v3398_v44 = vmul.f32 %v10798_v49, %v10798_v49  ;;  %v3406_v19 = vmul.f32 %v10801_v59, %v10801_v59  ;;  %v3341_v1 = vmul.f32 %v10851_v25, %v10851_v25  ;;  %v14734_v49 = vld [vmem:[#allocation56_spill] sm:$0xff] }
 0x525   :  { %v3499_v51 = vadd.f32 %v3498_v23, %v3374_v2  ;;  %v3349_v62 = vmul.f32 %v10854_v14, %v10854_v14  ;;  %v3357_v24 = vmul.f32 %v10857_v3, %v10857_v3  ;;  %v3462_v39 = vadd.f32 %v3461_v50, %v3412_v15  ;;  %v14736_v23 = vld [vmem:[#allocation37_spill] sm:$0xff]  ;;  %v14738_v14 = vld [vmem:[#allocation58_spill] sm:$0xff]  ;;  %v14740_v15 = vld [vmem:[#allocation60_spill] sm:$0xff] }
 0x526   :  { %v3473_v11 = vadd.f32 %v3333_v0, %v3325_v13  ;;  %v10926_v17 = vsub.f32 %v14732_v52, %v10826_v21  ;;  %v10930_v5 = vsub.f32 %v14734_v49, %v10826_v21  ;;  %v10934_v25 = vsub.f32 %v14736_v23, %v10826_v21  ;;  %v14742_v52 = vld [vmem:[#allocation62_spill] sm:$0xff]  ;;  %v14746_v23 = vld [vmem:[#allocation64_spill] sm:$0xff] }
 0x527   :  { %v3500_v2 = vadd.f32 %v3499_v51, %v3382_v61  ;;  %v10938_v59 = vsub.f32 %v14738_v14, %v10826_v21  ;;  %v10942_v13 = vsub.f32 %v14740_v15, %v10826_v21  ;;  %v3463_v0 = vadd.f32 %v3462_v39, %v3420_v41  ;;  %v14744_v61 = vld [vmem:[#allocation63_spill] sm:$0xff]  ;;  %v14748_v14 = vld [vmem:[#allocation81_spill] sm:$0xff]  ;;  %v14750_v41 = vld [vmem:[#allocation44_spill] sm:$0xff] }
 0x528   :  { %14733 = vst [vmem:[#allocation101_spill] sm:$0xff] %v10926_v17  ;;  %14735 = vst [vmem:[#allocation74_spill] sm:$0xff] %v10930_v5  ;;  %v3474_v50 = vadd.f32 %v3473_v11, %v3341_v1  ;;  %v10946_v3 = vsub.f32 %v14742_v52, %v10826_v21  ;;  %v10950_v49 = vsub.f32 %v14744_v61, %v10826_v21  ;;  %v14752_v15 = vld [vmem:[#allocation46_spill] sm:$0xff] }
 0x529   :  { %14737 = vst [vmem:[#allocation102_spill] sm:$0xff] %v10934_v25  ;;  %14739 = vst [vmem:[#allocation75_spill] sm:$0xff] %v10938_v59  ;;  %v3501_v51 = vadd.f32 %v3500_v2, %v3390_v9  ;;  %v10954_v7 = vsub.f32 %v14746_v23, %v10826_v21  ;;  %v10958_v60 = vsub.f32 %v14748_v14, %v10826_v21  ;;  %v14754_v9 = vld [vmem:[#allocation76_spill] sm:$0xff]  ;;  %v14756_v23 = vld [vmem:[#allocation77_spill] sm:$0xff] }
 0x52a   :  { %14741 = vst [vmem:[#allocation103_spill] sm:$0xff] %v10942_v13  ;;  %14743 = vst [vmem:[#allocation88_spill] sm:$0xff] %v10946_v3  ;;  %v10962_v1 = vsub.f32 %v14750_v41, %v10826_v21  ;;  %v3464_v39 = vadd.f32 %v3463_v0, %v3428_v33  ;;  %v3475_v11 = vadd.f32 %v3474_v50, %v3349_v62  ;;  %v14758_v14 = vld [vmem:[#allocation48_spill] sm:$0xff]  ;;  %v14760_v33 = vld [vmem:[#allocation50_spill] sm:$0xff] }
 0x52b   :  { %14745 = vst [vmem:[#allocation104_spill] sm:$0xff] %v10950_v49  ;;  %14747 = vst [vmem:[#allocation45_spill] sm:$0xff] %v10954_v7  ;;  %v10966_v52 = vsub.f32 %v14752_v15, %v10826_v21  ;;  %v10970_v2 = vsub.f32 %v14754_v9, %v10826_v21  ;;  %v3502_v61 = vadd.f32 %v3501_v51, %v3398_v44  ;;  %v14762_v15 = vld [vmem:[#allocation78_spill] sm:$0xff] }
 0x52c   :  { %14749 = vst [vmem:[#allocation57_spill] sm:$0xff] %v10958_v60  ;;  %14751 = vst [vmem:[#allocation89_spill] sm:$0xff] %v10962_v1  ;;  %v10974_v30 = vsub.f32 %v14756_v23, %v10826_v21  ;;  %v10978_v58 = vsub.f32 %v14758_v14, %v10826_v21  ;;  %v10982_v62 = vsub.f32 %v14760_v33, %v10826_v21 }
 0x52d   :  { %14753 = vst [vmem:[#allocation105_spill] sm:$0xff] %v10966_v52  ;;  %14755 = vst [vmem:[#allocation90_spill] sm:$0xff] %v10970_v2  ;;  %v3465_v0 = vadd.f32 %v3464_v39, %v3436_v37  ;;  %v3365_v50 = vmul.f32 %v10860_v29, %v10860_v29  ;;  %v3476_v41 = vadd.f32 %v3475_v11, %v3357_v24 }
 0x52e   :  { %14757 = vst [vmem:[#allocation106_spill] sm:$0xff] %v10974_v30  ;;  %14759 = vst [vmem:[#allocation47_spill] sm:$0xff] %v10978_v58  ;;  %v10988_v44 = vsub.f32 %v14762_v15, %v10826_v21  ;;  %v3414_v51 = vmul.f32 %v10804_v8, %v10804_v8  ;;  %v3503_v9 = vadd.f32 %v3502_v61, %v3406_v19 }
 0x52f   :  { %14761 = vst [vmem:[#allocation59_spill] sm:$0xff] %v10982_v62  ;;  %v3466_v23 = vadd.f32 %v3465_v0, %v3444_v20  ;;  %v3373_v14 = vmul.f32 %v10863_v42, %v10863_v42  ;;  %v3477_v47 = vadd.f32 %v3476_v41, %v3365_v50  ;;  %v3422_v37 = vmul.f32 %v10807_v48, %v10807_v48 }
 0x530   :  { %14763 = vst [vmem:[#allocation55_spill] sm:$0xff] %v10988_v44  ;;  %v3504_v39 = vadd.f32 %v3503_v9, %v3414_v51  ;;  %v3327_v24 = vmul.f32 %v10926_v17, %v10926_v17  ;;  %v3335_v21 = vmul.f32 %v10930_v5, %v10930_v5  ;;  %v3381_v33 = vmul.f32 %v10866_v27, %v10866_v27 }
 0x531   :  { %v3467_v11 = vrot.slane %v3466_v23, 4  ;;  %v3478_v19 = vadd.f32 %v3477_v47, %v3373_v14  ;;  %v3430_v20 = vmul.f32 %v10810_v36, %v10810_v36  ;;  %v3389_v50 = vmul.f32 %v10869_v32, %v10869_v32 }
 0x532   :  { %v3505_v61 = vadd.f32 %v3504_v39, %v3422_v37  ;;  %v3438_v15 = vmul.f32 %v10815_v18, %v10815_v18  ;;  %v3343_v9 = vmul.f32 %v10934_v25, %v10934_v25  ;;  %v3515_v5 = vadd.f32 %v3335_v21, %v3327_v24 }
 0x533   :  { %v3468_v0 = vadd.f32 %v3467_v11, %v3466_v23  ;;  %v3479_v41 = vadd.f32 %v3478_v19, %v3381_v33  ;;  %v3397_v47 = vmul.f32 %v10872_v28, %v10872_v28  ;;  %v3446_v23 = vmul.f32 %v10818_v35, %v10818_v35 }
 0x534   :  { %v3506_v51 = vadd.f32 %v3505_v61, %v3430_v20  ;;  %v3351_v39 = vmul.f32 %v10938_v59, %v10938_v59  ;;  %v3516_v11 = vadd.f32 %v3515_v5, %v3343_v9  ;;  %v3405_v19 = vmul.f32 %v10875_v10, %v10875_v10 }
 0x535   :  { %v3469_v17 = vrot.slane %v3468_v0, 2  ;;  %v3480_v14 = vadd.f32 %v3479_v41, %v3389_v50  ;;  %v3359_v24 = vmul.f32 %v10942_v13, %v10942_v13  ;;  %v3413_v50 = vmul.f32 %v10878_v4, %v10878_v4 }
 0x536   :  { %v3507_v37 = vadd.f32 %v3506_v51, %v3438_v15  ;;  %v3517_v21 = vadd.f32 %v3516_v11, %v3351_v39  ;;  %v3367_v51 = vmul.f32 %v10946_v3, %v10946_v3  ;;  %v3429_v39 = vmul.f32 %v10884_v31, %v10884_v31 }
 0x537   :  { %v3470_v33 = vadd.f32 %v3469_v17, %v3468_v0  ;;  %v3481_v20 = vadd.f32 %v3480_v14, %v3397_v47  ;;  %v3421_v0 = vmul.f32 %v10881_v46, %v10881_v46  ;;  %v3375_v14 = vmul.f32 %v10950_v49, %v10950_v49 }
 0x538   :  { %v3508_v61 = vadd.f32 %v3507_v37, %v3446_v23  ;;  %v3518_v5 = vadd.f32 %v3517_v21, %v3359_v24 }
 0x539   :  { %v3471_v25 = vrot.slane %v3470_v33, 1  ;;  %v3482_v41 = vadd.f32 %v3481_v20, %v3405_v19  ;;  %v3383_v20 = vmul.f32 %v10954_v7, %v10954_v7 }
 0x53a   :  { %v3509_v15 = vrot.slane %v3508_v61, 4  ;;  %v3519_v23 = vadd.f32 %v3518_v5, %v3367_v51  ;;  %v3445_v5 = vmul.f32 %v10892_v40, %v10892_v40 }
 0x53b   :  { %v3472_v17 = vadd.f32 %v3471_v25, %v3470_v33  ;;  %v3483_v9 = vadd.f32 %v3482_v41, %v3413_v50  ;;  %v3437_v33 = vmul.f32 %v10889_v43, %v10889_v43  ;;  %v3391_v50 = vmul.f32 %v10958_v60, %v10958_v60 }
 0x53c   :  { %v3510_v47 = vadd.f32 %v3509_v15, %v3508_v61  ;;  %v3520_v24 = vadd.f32 %v3519_v23, %v3375_v14 }
 0x53d   :  { %v3620_v37 = vmul.f32 0.0078125, %v3472_v17  ;;  %v3484_v11 = vadd.f32 %v3483_v9, %v3421_v0 }
 0x53e   :  { %v3511_v19 = vrot.slane %v3510_v47, 2  ;;  %v3521_v41 = vadd.f32 %v3520_v24, %v3383_v20 }
 0x53f   :  { %v3628_v25 = vadd.f32 1e-05, %v3620_v37  ;;  %v3485_v21 = vadd.f32 %v3484_v11, %v3429_v39  ;;  %v11036_v15 = vpop.f32.mrb[64].mxu1  ;;  %v11038_v51 = vpop.f32.mrb[96].mxu0 }
 0x540   :  { %v3512_v61 = vadd.f32 %v3511_v19, %v3510_v47  ;;  %14764 = vst [vmem:[#allocation114_spill] sm:$0xff] %v11036_v15  ;;  %14765 = vst [vmem:[#allocation91_spill] sm:$0xff] %v11038_v51  ;;  %v11042_v0 = vpop.f32.mrb[65].mxu1  ;;  %v11044_v9 = vpop.f32.mrb[97].mxu0  ;;  %v3399_v47 = vmul.f32 %v10962_v1, %v10962_v1  ;;  %v3522_v23 = vadd.f32 %v3521_v41, %v3391_v50 }
 0x541   :  { %8311 = vrsqrt.f32 %v3628_v25  ;;  %v3486_v17 = vadd.f32 %v3485_v21, %v3437_v33  ;;  %14766 = vst [vmem:[#allocation107_spill] sm:$0xff] %v11042_v0  ;;  %14767 = vst [vmem:[#allocation92_spill] sm:$0xff] %v11044_v9  ;;  %v11048_v37 = vpop.f32.mrb[66].mxu1  ;;  %v11050_v39 = vpop.f32.mrb[98].mxu0  ;;  %v3407_v19 = vmul.f32 %v10966_v52, %v10966_v52 }
 0x542   :  { %v3513_v14 = vrot.slane %v3512_v61, 1  ;;  %14768 = vst [vmem:[#allocation108_spill] sm:$0xff] %v11048_v37  ;;  %14769 = vst [vmem:[#allocation115_spill] sm:$0xff] %v11050_v39  ;;  %v3104_v20 = vadd.f32 %v11048_v37, %v11036_v15  ;;  %v3146_v24 = vadd.f32 %v11050_v39, %v11038_v51  ;;  %v11058_v25 = vpop.f32.mrb[67].mxu1  ;;  %v11060_v33 = vpop.f32.mrb[99].mxu0  ;;  %v3523_v50 = vadd.f32 %v3522_v23, %v3399_v47  ;;  %v14772_v15 = vld [vmem:[#allocation34_spill] sm:$0xff] }
 0x543   :  { %v3487_v11 = vadd.f32 %v3486_v17, %v3445_v5  ;;  %14770 = vst [vmem:[#allocation38_spill] sm:$0xff] %v11058_v25  ;;  %14771 = vst [vmem:[#allocation39_spill] sm:$0xff] %v11060_v33  ;;  %v3125_v41 = vadd.f32 %v11058_v25, %v11042_v0  ;;  %v3167_v5 = vadd.f32 %v11060_v33, %v11044_v9  ;;  %v11066_v17 = vld [vmem:[#allocation16] sm:$0xff] }
 0x544   :  { %v3514_v21 = vadd.f32 %v3513_v14, %v3512_v61  ;;  %v3415_v37 = vmul.f32 %v10970_v2, %v10970_v2  ;;  %v3524_v39 = vadd.f32 %v3523_v50, %v3407_v19  ;;  %v3649_v60 = vrot.slane %v11066_v17, %v14772_v15  ;;  %v14788_v2 = vld [vmem:[#allocation79_spill] sm:$0xff] }
 0x545   :  { %v3488_v52 = vrot.slane %v3487_v11, 4  ;;  %v3423_v14 = vmul.f32 %v10974_v30, %v10974_v30 }
 0x546   :  { %v3622_v1 = vmul.f32 0.0078125, %v3514_v21  ;;  %v3525_v47 = vadd.f32 %v3524_v39, %v3415_v37  ;;  %v3431_v21 = vmul.f32 %v10978_v58, %v10978_v58 }
 0x547   :  { %v3489_v51 = vadd.f32 %v3488_v52, %v3487_v11  ;;  %v11074_v23 = vpop.f32.mrb[68].mxu1  ;;  %v11076_v33 = vpop.f32.mrb[100].mxu0 }
 0x548   :  { %v3630_v61 = vadd.f32 1e-05, %v3622_v1  ;;  %14773 = vst [vmem:[#allocation40_spill] sm:$0xff] %v11074_v23  ;;  %14774 = vst [vmem:[#allocation42_spill] sm:$0xff] %v11076_v33  ;;  %v3105_v25 = vadd.f32 %v3104_v20, %v11074_v23  ;;  %v3147_v52 = vadd.f32 %v3146_v24, %v11076_v33  ;;  %v11082_v11 = vpop.f32.mrb[69].mxu1  ;;  %v11084_v19 = vpop.f32.mrb[101].mxu0  ;;  %v3439_v1 = vmul.f32 %v10982_v62, %v10982_v62 }
 0x549   :  { %v3490_v9 = vrot.slane %v3489_v51, 2  ;;  %14775 = vst [vmem:[#allocation80_spill] sm:$0xff] %v11082_v11  ;;  %14776 = vst [vmem:[#allocation82_spill] sm:$0xff] %v11084_v19  ;;  %v3526_v37 = vadd.f32 %v3525_v47, %v3423_v14  ;;  %v3126_v39 = vadd.f32 %v3125_v41, %v11082_v11  ;;  %v3168_v50 = vadd.f32 %v3167_v5, %v11084_v19  ;;  %v11090_v0 = vpop.f32.mrb[70].mxu1  ;;  %v11092_v30 = vpop.f32.mrb[102].mxu0  ;;  %v11094_v20 = vld [vmem:[#allocation17] sm:$0xff] }
 0x54a   :  { %14777 = vst [vmem:[#allocation83_spill] sm:$0xff] %v11090_v0  ;;  %14778 = vst [vmem:[#allocation110_spill] sm:$0xff] %v11092_v30  ;;  %8313 = vrsqrt.f32 %v3630_v61  ;;  %v11097_v33 = vadd.f32 %v3105_v25, %v11090_v0  ;;  %v11100_v23 = vadd.f32 %v3147_v52, %v11092_v30  ;;  %v11102_v14 = vpop.f32.mrb[71].mxu1  ;;  %v11104_v41 = vpop.f32.mrb[103].mxu0  ;;  %v14782_v52 = vld [vmem:[#allocation61_spill] sm:$0xff] }
 0x54b   :  { %v8312_v58 = vpop.eup %8311  ;;  %14779 = vst [vmem:[#allocation111_spill] sm:$0xff] %v11094_v20  ;;  %v3491_v24 = vadd.f32 %v3490_v9, %v3489_v51  ;;  %14780 = vst [vmem:[#allocation84_spill] sm:$0xff] %v11102_v14  ;;  %v3527_v47 = vadd.f32 %v3526_v37, %v3431_v21  ;;  %v11107_v19 = vadd.f32 %v3126_v39, %v11102_v14 }
 0x54c   :  { %14781 = vst [vmem:[#allocation85_spill] sm:$0xff] %v11104_v41  ;;  %v3686_v5 = vmul.f32 %v8312_v58, %v3649_v60  ;;  %v11110_v11 = vadd.f32 %v3168_v50, %v11104_v41  ;;  %v3859_v9 = vrot.slane %v11094_v20, %v14772_v15  ;;  %v3657_v30 = vrot.slane %v11066_v17, %v14782_v52 }
 0x54d   :  { %v3492_v61 = vrot.slane %v3491_v24, 1  ;;  %v3528_v25 = vadd.f32 %v3527_v47, %v3439_v1  ;;  %v11119_v58 = vrot.slane %v11094_v20, %v14782_v52  ;;  %v3447_v21 = vmul.f32 %v10988_v44, %v10988_v44 }
 0x54e   :  { %v3697_v51 = vrot.slane %v3686_v5, %v14772_v15 }
 0x54f   :  { %v11121_v60 = vadd.f32 %v3492_v61, %v3491_v24  ;;  %v11129_v5 = vpop.f32.mrb[72].mxu1  ;;  %v11131_v47 = vpop.f32.mrb[104].mxu0 }
 0x550   :  { %v3726_v37 = vmul.f32 %v3697_v51, %v10718_v45  ;;  %v3734_v39 = vmul.f32 %v3697_v51, %v10721_v6  ;;  %v3742_v50 = vmul.f32 %v3697_v51, %v10724_v55  ;;  %v3750_v1 = vmul.f32 %v3697_v51, %v10727_v26  ;;  %14783 = vst [vmem:[#allocation36_spill] sm:$0xff] %v11129_v5  ;;  %v11137_v14 = vpop.f32.mrb[73].mxu1  ;;  %v11139_v45 = vpop.f32.mrb[105].mxu0 }
 0x551   :  { %14784 = vst [vmem:[#allocation56_spill] sm:$0xff] %v11131_v47  ;;  %v3758_v52 = vmul.f32 %v3697_v51, %v10730_v38  ;;  %v3766_v24 = vmul.f32 %v3697_v51, %v10733_v34  ;;  %v3774_v61 = vmul.f32 %v3697_v51, %v10736_v54  ;;  %v3782_v41 = vmul.f32 %v3697_v51, %v10739_v12  ;;  %v11145_v44 = vpop.f32.mrb[74].mxu1  ;;  %v11147_v38 = vpop.f32.mrb[106].mxu0  ;;  %v14787_v12 = vld [vmem:[#allocation112_spill] sm:$0xff] }
 0x552   :  { %14785 = vst [vmem:[#allocation37_spill] sm:$0xff] %v11137_v14  ;;  %14786 = vst [vmem:[#allocation58_spill] sm:$0xff] %v11139_v45  ;;  %v3790_v6 = vmul.f32 %v3697_v51, %v10742_v57  ;;  %v3798_v55 = vmul.f32 %v3697_v51, %v10745_v53  ;;  %v3806_v26 = vmul.f32 %v3697_v51, %v10748_v56  ;;  %v11153_v49 = vpop.f32.mrb[75].mxu1  ;;  %v11155_v57 = vpop.f32.mrb[107].mxu0 }
 0x553   :  { %v3814_v0 = vmul.f32 %v3697_v51, %v10751_v63  ;;  %v3822_v34 = vmul.f32 %v3697_v51, %v10754_v16  ;;  %v3830_v54 = vmul.f32 %v3697_v51, %v10756_v22  ;;  %v3838_v62 = vmul.f32 %v3697_v51, %v14787_v12  ;;  %14789 = vst [vmem:[#allocation60_spill] sm:$0xff] %v11153_v49 }
 0x554   :  { %v3846_v7 = vmul.f32 %v3697_v51, %v14788_v2  ;;  %14790 = vst [vmem:[#allocation62_spill] sm:$0xff] %v11155_v57  ;;  %v11157_v53 = vadd.f32 %v3859_v9, %v3726_v37  ;;  %v11159_v56 = vadd.f32 %v3859_v9, %v3734_v39  ;;  %v11161_v63 = vadd.f32 %v3859_v9, %v3742_v50  ;;  %v8314_v13 = vpop.eup %8313 }
 0x555   :  { %v11163_v3 = vadd.f32 %v3859_v9, %v3750_v1  ;;  %v11165_v16 = vadd.f32 %v3859_v9, %v3758_v52  ;;  %v11167_v22 = vadd.f32 %v3859_v9, %v3766_v24  ;;  %v11169_v12 = vadd.f32 %v3859_v9, %v3774_v61 }
 0x556   :  { %14791 = vst [vmem:[#allocation63_spill] sm:$0xff] %v11157_v53  ;;  %14792 = vst [vmem:[#allocation64_spill] sm:$0xff] %v11159_v56  ;;  %v11171_v2 = vadd.f32 %v3859_v9, %v3782_v41  ;;  %v11173_v51 = vadd.f32 %v3859_v9, %v3790_v6  ;;  %v11175_v59 = vadd.f32 %v3859_v9, %v3798_v55  ;;  %v11190_v61 = vmul.f32 0.2, %v11157_v53 }
 0x557   :  { %14793 = vst [vmem:[#allocation81_spill] sm:$0xff] %v11161_v63  ;;  %14794 = vst [vmem:[#allocation44_spill] sm:$0xff] %v11163_v3  ;;  %v11177_v37 = vadd.f32 %v3859_v9, %v3806_v26  ;;  %v11179_v39 = vadd.f32 %v3859_v9, %v3814_v0  ;;  %v11181_v50 = vadd.f32 %v3859_v9, %v3822_v34  ;;  %v11193_v41 = vmul.f32 0.2, %v11159_v56  ;;  %v11251_v56 = vpop.f32.mrb[76].mxu1  ;;  %v11253_v4 = vpop.f32.mrb[108].mxu0 }
 0x558   :  { %14795 = vst [vmem:[#allocation46_spill] sm:$0xff] %v11165_v16  ;;  %14796 = vst [vmem:[#allocation76_spill] sm:$0xff] %v11167_v22  ;;  %v11183_v1 = vadd.f32 %v3859_v9, %v3830_v54  ;;  %v11185_v52 = vadd.f32 %v3859_v9, %v3838_v62  ;;  %v11187_v24 = vadd.f32 %v3859_v9, %v3846_v7  ;;  %v11196_v6 = vmul.f32 0.2, %v11161_v63 }
 0x559   :  { %14797 = vst [vmem:[#allocation77_spill] sm:$0xff] %v11169_v12  ;;  %14798 = vst [vmem:[#allocation48_spill] sm:$0xff] %v11171_v2  ;;  %v3688_v55 = vmul.f32 %v8314_v13, %v3657_v30  ;;  %v11199_v0 = vmul.f32 0.2, %v11163_v3  ;;  %v11202_v26 = vmul.f32 0.2, %v11165_v16  ;;  %v11207_v7 = vadd.f32 %v3528_v25, %v3447_v21 }
 0x55a   :  { %14799 = vst [vmem:[#allocation50_spill] sm:$0xff] %v11173_v51  ;;  %14800 = vst [vmem:[#allocation78_spill] sm:$0xff] %v11175_v59  ;;  %v11205_v62 = vmul.f32 0.2, %v11167_v22  ;;  %v11210_v9 = vmul.f32 0.2, %v11169_v12  ;;  %v11298_v46 = vadd.f32 %v11100_v23, %v11131_v47 }
 0x55b   :  { %14801 = vst [vmem:[#allocation112_spill] sm:$0xff] %v11177_v37  ;;  %14802 = vst [vmem:[#allocation79_spill] sm:$0xff] %v11179_v39  ;;  %v11213_v34 = vmul.f32 0.2, %v11171_v2  ;;  %v11216_v54 = vmul.f32 0.2, %v11173_v51 }
 0x55c   :  { %14803 = vst [vmem:[#allocation116_spill] sm:$0xff] %v11181_v50  ;;  %14804 = vst [vmem:[#allocation117_spill] sm:$0xff] %v11183_v1  ;;  %v11221_v13 = vmul.f32 0.2, %v11175_v59  ;;  %v11224_v40 = vmul.f32 0.2, %v11177_v37 }
 0x55d   :  { %14805 = vst [vmem:[#allocation118_spill] sm:$0xff] %v11185_v52  ;;  %14806 = vst [vmem:[#allocation119_spill] sm:$0xff] %v11187_v24  ;;  %v11227_v25 = vmul.f32 0.2, %v11179_v39  ;;  %v11232_v43 = vmul.f32 0.2, %v11181_v50 }
 0x55e   :  { %14807 = vst [vmem:[#allocation120_spill] sm:$0xff] %v11190_v61  ;;  %14808 = vst [vmem:[#allocation121_spill] sm:$0xff] %v11193_v41  ;;  %v11235_v31 = vmul.f32 0.2, %v11183_v1  ;;  %v11238_v30 = vmul.f32 0.2, %v11185_v52  ;;  %v3705_v41 = vrot.slane %v3688_v55, %v14772_v15  ;;  %v11302_v55 = vadd.f32 %v11107_v19, %v11137_v14 }
 0x55f   :  { %14809 = vst [vmem:[#allocation122_spill] sm:$0xff] %v11196_v6  ;;  %14810 = vst [vmem:[#allocation123_spill] sm:$0xff] %v11199_v0  ;;  %v11243_v53 = vmul.f32 0.2, %v11187_v24  ;;  %v11263_v21 = vpop.f32.mrb[77].mxu1  ;;  %v3530_v61 = vrot.slane %v11207_v7, 4 }
 0x560   :  { %14811 = vst [vmem:[#allocation124_spill] sm:$0xff] %v11202_v26  ;;  %14812 = vst [vmem:[#allocation125_spill] sm:$0xff] %v11205_v62  ;;  %v11265_v26 = vpop.f32.mrb[109].mxu0  ;;  %v11275_v6 = vpop.f32.mrb[78].mxu1  ;;  %v11285_v62 = vmul.f32 0.0078125, %v11121_v60  ;;  %v14831_v1 = vld [vmem:[#allocation86_spill] sm:$0xff]  ;;  %v3816_v3 = vmul.f32 %v3705_v41, %v10804_v8  ;;  %v3848_v14 = vmul.f32 %v3705_v41, %v10818_v35 }
 0x561   :  { %14813 = vst [vmem:[#allocation126_spill] sm:$0xff] %v11210_v9  ;;  %14814 = vst [vmem:[#allocation127_spill] sm:$0xff] %v11213_v34  ;;  %v14836_v19 = vld [vmem:[#allocation41_spill] sm:$0xff]  ;;  %v14838_v2 = vld [vmem:[#allocation43_spill] sm:$0xff] }
 0x562   :  { %14815 = vst [vmem:[#allocation128_spill] sm:$0xff] %v11216_v54  ;;  %14816 = vst [vmem:[#allocation129_spill] sm:$0xff] %v11221_v13  ;;  %v11277_v54 = vpop.f32.mrb[110].mxu0  ;;  %v3768_v59 = vmul.f32 %v3705_v41, %v14836_v19  ;;  %v14837_v51 = vld [vmem:[#allocation49_spill] sm:$0xff]  ;;  %v3784_v9 = vmul.f32 %v3705_v41, %v14838_v2  ;;  %v3832_v2 = vmul.f32 %v3705_v41, %v10810_v36 }
 0x563   :  { %14817 = vst [vmem:[#allocation130_spill] sm:$0xff] %v11224_v40  ;;  %14818 = vst [vmem:[#allocation131_spill] sm:$0xff] %v11227_v25  ;;  %v11287_v25 = vpop.f32.mrb[79].mxu1  ;;  %v11289_v10 = vpop.f32.mrb[111].mxu0  ;;  %v14835_v40 = vld [vmem:[#allocation87_spill] sm:$0xff]  ;;  %v3776_v34 = vmul.f32 %v3705_v41, %v14837_v51  ;;  %v14841_v22 = vld [vmem:[#allocation65_spill] sm:$0xff]  ;;  %v3824_v51 = vmul.f32 %v3705_v41, %v10807_v48  ;;  %v3840_v19 = vmul.f32 %v3705_v41, %v10815_v18 }
 0x564   :  { %14819 = vst [vmem:[#allocation132_spill] sm:$0xff] %v11232_v43  ;;  %14820 = vst [vmem:[#allocation133_spill] sm:$0xff] %v11235_v31  ;;  %v11294_v31 = vadd.f32 %v11097_v33, %v11129_v5  ;;  %v11304_v60 = vpop.f32.mrb[80].mxu1  ;;  %v11306_v13 = vpop.f32.mrb[112].mxu0  ;;  %v3744_v43 = vmul.f32 %v3705_v41, %v14831_v1  ;;  %v14832_v33 = vld [vmem:[#allocation54_spill] sm:$0xff]  ;;  %v3760_v37 = vmul.f32 %v3705_v41, %v14835_v40  ;;  %v14842_v16 = vld [vmem:[#allocation93_spill] sm:$0xff] }
 0x565   :  { %14821 = vst [vmem:[#allocation134_spill] sm:$0xff] %v11238_v30  ;;  %14822 = vst [vmem:[#allocation135_spill] sm:$0xff] %v11243_v53  ;;  %v14829_v53 = vld [vmem:[#allocation113_spill] sm:$0xff]  ;;  %v14830_v30 = vld [vmem:[#allocation52_spill] sm:$0xff]  ;;  %v3752_v50 = vmul.f32 %v3705_v41, %v14832_v33  ;;  %v11312_v39 = vpop.f32.mrb[81].mxu1  ;;  %v11314_v23 = vpop.f32.mrb[113].mxu0  ;;  %v3800_v33 = vmul.f32 %v3705_v41, %v14841_v22  ;;  %v3808_v0 = vmul.f32 %v3705_v41, %v14842_v16 }
 0x566   :  { %14823 = vst [vmem:[#allocation136_spill] sm:$0xff] %v11263_v21  ;;  %14824 = vst [vmem:[#allocation137_spill] sm:$0xff] %v11265_v26  ;;  %v3728_v24 = vmul.f32 %v3705_v41, %v14829_v53  ;;  %v3736_v52 = vmul.f32 %v3705_v41, %v14830_v30  ;;  %v11320_v12 = vpop.f32.mrb[82].mxu1  ;;  %v11322_v53 = vpop.f32.mrb[114].mxu0  ;;  %v14840_v30 = vld [vmem:[#allocation51_spill] sm:$0xff]  ;;  %v11343_v8 = vadd.f32 %v11119_v58, %v3744_v43 }
 0x567   :  { %14825 = vst [vmem:[#allocation138_spill] sm:$0xff] %v11277_v54  ;;  %14826 = vst [vmem:[#allocation139_spill] sm:$0xff] %v11287_v25  ;;  %v3792_v1 = vmul.f32 %v3705_v41, %v14840_v30  ;;  %v11328_v63 = vpop.f32.mrb[83].mxu1  ;;  %v11330_v40 = vpop.f32.mrb[115].mxu0  ;;  %v11346_v16 = vadd.f32 %v11119_v58, %v3752_v50  ;;  %v11349_v48 = vadd.f32 %v11119_v58, %v3760_v37 }
 0x568   :  { %14827 = vst [vmem:[#allocation140_spill] sm:$0xff] %v11289_v10  ;;  %14828 = vst [vmem:[#allocation141_spill] sm:$0xff] %v11306_v13  ;;  %v11337_v30 = vadd.f32 %v11119_v58, %v3728_v24  ;;  %v11340_v22 = vadd.f32 %v11119_v58, %v3736_v52  ;;  %v11352_v36 = vadd.f32 %v11119_v58, %v3768_v59  ;;  %v11372_v59 = vpop.f32.mrb[84].mxu1  ;;  %v11374_v24 = vpop.f32.mrb[116].mxu0 }
 0x569   :  { %14833 = vst [vmem:[#allocation113_spill] sm:$0xff] %v11312_v39  ;;  %14834 = vst [vmem:[#allocation52_spill] sm:$0xff] %v11314_v23  ;;  %v11355_v18 = vadd.f32 %v11119_v58, %v3776_v34  ;;  %v11358_v35 = vadd.f32 %v11119_v58, %v3784_v9  ;;  %v11361_v52 = vadd.f32 %v11119_v58, %v3792_v1 }
 0x56a   :  { %14839 = vst [vmem:[#allocation86_spill] sm:$0xff] %v11322_v53  ;;  %14843 = vst [vmem:[#allocation54_spill] sm:$0xff] %v11328_v63  ;;  %v11364_v43 = vadd.f32 %v11119_v58, %v3800_v33  ;;  %v11367_v50 = vadd.f32 %v11119_v58, %v3808_v0  ;;  %v11370_v37 = vadd.f32 %v11119_v58, %v3816_v3  ;;  %v11388_v0 = vpop.f32.mrb[85].mxu1  ;;  %v11390_v3 = vpop.f32.mrb[117].mxu0  ;;  %v11393_v33 = vmul.f32 0.2, %v11337_v30 }
 0x56b   :  { %14844 = vst [vmem:[#allocation87_spill] sm:$0xff] %v11330_v40  ;;  %14845 = vst [vmem:[#allocation41_spill] sm:$0xff] %v11337_v30  ;;  %v11377_v41 = vadd.f32 %v11119_v58, %v3824_v51  ;;  %v11380_v9 = vadd.f32 %v11119_v58, %v3832_v2  ;;  %v11383_v34 = vadd.f32 %v11119_v58, %v3840_v19  ;;  %v11396_v47 = vmul.f32 0.2, %v11340_v22 }
 0x56c   :  { %14846 = vst [vmem:[#allocation49_spill] sm:$0xff] %v11340_v22  ;;  %14847 = vst [vmem:[#allocation43_spill] sm:$0xff] %v11343_v8  ;;  %v11386_v1 = vadd.f32 %v11119_v58, %v3848_v14  ;;  %v11399_v51 = vmul.f32 0.2, %v11343_v8  ;;  %v3531_v2 = vadd.f32 %v3530_v61, %v11207_v7  ;;  %v11403_v19 = vmul.f32 0.2, %v11346_v16 }
 0x56d   :  { %14848 = vst [vmem:[#allocation51_spill] sm:$0xff] %v11346_v16  ;;  %14849 = vst [vmem:[#allocation65_spill] sm:$0xff] %v11349_v48  ;;  %v11406_v14 = vmul.f32 0.2, %v11349_v48  ;;  %v11409_v58 = vmul.f32 0.2, %v11352_v36  ;;  %v3170_v5 = vadd.f32 %v11110_v11, %v11139_v45 }
 0x56e   :  { %14850 = vst [vmem:[#allocation93_spill] sm:$0xff] %v11352_v36  ;;  %14851 = vst [vmem:[#allocation142_spill] sm:$0xff] %v11355_v18  ;;  %v11414_v28 = vmul.f32 0.2, %v11355_v18  ;;  %v11417_v32 = vmul.f32 0.2, %v11358_v35 }
 0x56f   :  { %14852 = vst [vmem:[#allocation143_spill] sm:$0xff] %v11358_v35  ;;  %14853 = vst [vmem:[#allocation144_spill] sm:$0xff] %v11361_v52  ;;  %v11420_v61 = vmul.f32 0.2, %v11361_v52  ;;  %v11425_v27 = vmul.f32 0.2, %v11364_v43  ;;  %v3171_v15 = vadd.f32 %v3170_v5, %v11155_v57 }
 0x570   :  { %14854 = vst [vmem:[#allocation145_spill] sm:$0xff] %v11364_v43  ;;  %14855 = vst [vmem:[#allocation146_spill] sm:$0xff] %v11367_v50  ;;  %v11428_v42 = vmul.f32 0.2, %v11367_v50  ;;  %v11431_v11 = vmul.f32 0.2, %v11370_v37 }
 0x571   :  { %14856 = vst [vmem:[#allocation147_spill] sm:$0xff] %v11370_v37  ;;  %14857 = vst [vmem:[#allocation148_spill] sm:$0xff] %v11374_v24  ;;  %v11436_v29 = vmul.f32 0.2, %v11377_v41  ;;  %v11439_v20 = vmul.f32 0.2, %v11380_v9 }
 0x572   :  { %14858 = vst [vmem:[#allocation149_spill] sm:$0xff] %v11377_v41  ;;  %14859 = vst [vmem:[#allocation150_spill] sm:$0xff] %v11380_v9  ;;  %v11442_v7 = vmul.f32 0.2, %v11383_v34  ;;  %v11447_v30 = vmul.f32 0.2, %v11386_v1 }
 0x573   :  { %14860 = vst [vmem:[#allocation151_spill] sm:$0xff] %v11383_v34  ;;  %14861 = vst [vmem:[#allocation152_spill] sm:$0xff] %v11386_v1  ;;  %v11455_v22 = vpop.f32.mrb[86].mxu1  ;;  %v14899_v57 = vld [vmem:[#allocation69_spill] sm:$0xff] }
 0x574   :  { %14862 = vst [vmem:[#allocation153_spill] sm:$0xff] %v11388_v0  ;;  %14863 = vst [vmem:[#allocation154_spill] sm:$0xff] %v11390_v3  ;;  %v11457_v3 = vpop.f32.mrb[118].mxu0  ;;  %v11467_v45 = vpop.f32.mrb[87].mxu1  ;;  %v3150_v0 = vadd.f32 %v11298_v46, %v11147_v38 }
 0x575   :  { %14864 = vst [vmem:[#allocation155_spill] sm:$0xff] %v11393_v33  ;;  %14865 = vst [vmem:[#allocation156_spill] sm:$0xff] %v11396_v47  ;;  %v3629_v47 = vadd.f32 1e-05, %v11285_v62  ;;  %v3108_v33 = vadd.f32 %v11294_v31, %v11145_v44 }
 0x576   :  { %14866 = vst [vmem:[#allocation157_spill] sm:$0xff] %v11399_v51  ;;  %14867 = vst [vmem:[#allocation158_spill] sm:$0xff] %v11403_v19  ;;  %v11479_v51 = vpop.f32.mrb[88].mxu1  ;;  %v3151_v34 = vadd.f32 %v3150_v0, %v11253_v4 }
 0x577   :  { %14868 = vst [vmem:[#allocation159_spill] sm:$0xff] %v11406_v14  ;;  %14869 = vst [vmem:[#allocation160_spill] sm:$0xff] %v11409_v58  ;;  %v11469_v14 = vpop.f32.mrb[119].mxu0  ;;  %v11488_v58 = vpop.f32.mrb[89].mxu1  ;;  %8315 = vrsqrt.f32 %v3629_v47  ;;  %v3109_v31 = vadd.f32 %v3108_v33, %v11251_v56 }
 0x578   :  { %14870 = vst [vmem:[#allocation161_spill] sm:$0xff] %v11414_v28  ;;  %14871 = vst [vmem:[#allocation162_spill] sm:$0xff] %v11417_v32 }
 0x579   :  { %14872 = vst [vmem:[#allocation163_spill] sm:$0xff] %v11420_v61  ;;  %14873 = vst [vmem:[#allocation164_spill] sm:$0xff] %v11425_v27  ;;  %v11481_v61 = vpop.f32.mrb[120].mxu0  ;;  %v3110_v5 = vadd.f32 %v3109_v31, %v11275_v6 }
 0x57a   :  { %14874 = vst [vmem:[#allocation165_spill] sm:$0xff] %v11428_v42  ;;  %14875 = vst [vmem:[#allocation166_spill] sm:$0xff] %v11431_v11  ;;  %v3532_v42 = vrot.slane %v3531_v2, 2  ;;  %v11490_v11 = vpop.f32.mrb[121].mxu0 }
 0x57b   :  { %14876 = vst [vmem:[#allocation167_spill] sm:$0xff] %v11436_v29  ;;  %14877 = vst [vmem:[#allocation168_spill] sm:$0xff] %v11439_v20  ;;  %v3129_v20 = vadd.f32 %v11302_v55, %v11153_v49  ;;  %v11501_v27 = vpop.f32.mrb[122].mxu0  ;;  %v3172_v55 = vadd.f32 %v3171_v15, %v11265_v26  ;;  %v3152_v29 = vadd.f32 %v3151_v34, %v11277_v54  ;;  %v14887_v28 = vld [vmem:[#allocation153_spill] sm:$0xff]  ;;  %v14888_v36 = vld [vmem:[#allocation154_spill] sm:$0xff] }
 0x57c   :  { %14878 = vst [vmem:[#allocation169_spill] sm:$0xff] %v11442_v7  ;;  %14879 = vst [vmem:[#allocation170_spill] sm:$0xff] %v11447_v30  ;;  %v11499_v7 = vpop.f32.mrb[90].mxu1  ;;  %v3533_v62 = vadd.f32 %v3532_v42, %v3531_v2  ;;  %v11505_v1 = vpop.f32.mrb[123].mxu0  ;;  %v3111_v0 = vadd.f32 %v3110_v5, %v11304_v60  ;;  %v14898_v26 = vld [vmem:[#allocation96_spill] sm:$0xff]  ;;  %v14907_v49 = vld [vmem:[#allocation73_spill] sm:$0xff] }
 0x57d   :  { %14880 = vst [vmem:[#allocation171_spill] sm:$0xff] %v11457_v3  ;;  %14881 = vst [vmem:[#allocation172_spill] sm:$0xff] %v11467_v45  ;;  %v11503_v30 = vpop.f32.mrb[91].mxu1  ;;  %v3130_v46 = vadd.f32 %v3129_v20, %v11263_v21  ;;  %v3173_v42 = vadd.f32 %v3172_v55, %v11289_v10  ;;  %v11517_v37 = vpop.f32.mrb[124].mxu0  ;;  %v3153_v20 = vadd.f32 %v3152_v29, %v11306_v13  ;;  %v14906_v21 = vld [vmem:[#allocation100_spill] sm:$0xff] }
 0x57e   :  { %14882 = vst [vmem:[#allocation173_spill] sm:$0xff] %v11469_v14  ;;  %14883 = vst [vmem:[#allocation174_spill] sm:$0xff] %v11481_v61  ;;  %v3534_v9 = vrot.slane %v3533_v62, 1  ;;  %v11515_v41 = vpop.f32.mrb[92].mxu1  ;;  %v11525_v34 = vpop.f32.mrb[125].mxu0  ;;  %v3112_v5 = vadd.f32 %v3111_v0, %v11320_v12 }
 0x57f   :  { %14884 = vst [vmem:[#allocation175_spill] sm:$0xff] %v11488_v58  ;;  %14885 = vst [vmem:[#allocation176_spill] sm:$0xff] %v11490_v11  ;;  %v3131_v47 = vadd.f32 %v3130_v46, %v11287_v25  ;;  %v3174_v33 = vadd.f32 %v3173_v42, %v11314_v23  ;;  %v11523_v31 = vpop.f32.mrb[93].mxu1  ;;  %v14886_v46 = vld [vmem:[#allocation35_spill] sm:$0xff]  ;;  %v11531_v50 = vpop.f32.mrb[126].mxu0  ;;  %v3154_v29 = vadd.f32 %v3153_v20, %v11322_v53  ;;  %v14897_v23 = vld [vmem:[#allocation68_spill] sm:$0xff] }
 0x580   :  { %v3535_v2 = vadd.f32 %v3534_v9, %v3533_v62  ;;  %v3653_v55 = vrot.slane %v11066_v17, %v14886_v46  ;;  %v11529_v62 = vpop.f32.mrb[94].mxu1  ;;  %v11539_v52 = vpop.f32.mrb[127].mxu0  ;;  %v3113_v35 = vadd.f32 %v3112_v5, %v11372_v59  ;;  %v14905_v25 = vld [vmem:[#allocation72_spill] sm:$0xff] }
 0x581   :  { %v3132_v15 = vadd.f32 %v3131_v47, %v11312_v39  ;;  %v3175_v42 = vadd.f32 %v3174_v33, %v11330_v40  ;;  %v11537_v43 = vpop.f32.mrb[95].mxu1  ;;  %v8316_v0 = vpop.eup %8315  ;;  %v14896_v40 = vld [vmem:[#allocation95_spill] sm:$0xff] }
 0x582   :  { %v3623_v9 = vmul.f32 0.0078125, %v3535_v2  ;;  %v3155_v2 = vadd.f32 %v3154_v29, %v11374_v24  ;;  %v3687_v20 = vmul.f32 %v8316_v0, %v3653_v55  ;;  %v14893_v0 = vld [vmem:[#allocation94_spill] sm:$0xff]  ;;  %v14904_v39 = vld [vmem:[#allocation99_spill] sm:$0xff] }
 0x583   :  { %v3133_v47 = vadd.f32 %v3132_v15, %v11328_v63  ;;  %v3176_v48 = vadd.f32 %v3175_v42, %v14888_v36  ;;  %v3114_v15 = vadd.f32 %v3113_v35, %v11455_v22  ;;  %v14891_v35 = vld [vmem:[#allocation109_spill] sm:$0xff]  ;;  %v14903_v63 = vld [vmem:[#allocation71_spill] sm:$0xff] }
 0x584   :  { %v3631_v32 = vadd.f32 1e-05, %v3623_v9  ;;  %v3156_v33 = vadd.f32 %v3155_v2, %v11457_v3  ;;  %v14889_v9 = vld [vmem:[#allocation34_spill] sm:$0xff]  ;;  %v3661_v42 = vrot.slane %v11066_v17, %v14891_v35  ;;  %v14900_v17 = vld [vmem:[#allocation97_spill] sm:$0xff] }
 0x585   :  { %v3134_v18 = vadd.f32 %v3133_v47, %v14887_v28  ;;  %v3177_v16 = vadd.f32 %v3176_v48, %v11469_v14  ;;  %v3701_v8 = vrot.slane %v3687_v20, %v14889_v9  ;;  %v3115_v5 = vadd.f32 %v3114_v15, %v11479_v51  ;;  %v14892_v48 = vld [vmem:[#allocation66_spill] sm:$0xff]  ;;  %v14894_v15 = vld [vmem:[#allocation53_spill] sm:$0xff] }
 0x586   :  { %8317 = vrsqrt.f32 %v3631_v32  ;;  %v11552_v29 = vadd.f32 %v3156_v33, %v11481_v61  ;;  %v14890_v32 = vld [vmem:[#allocation111_spill] sm:$0xff]  ;;  %v14902_v28 = vld [vmem:[#allocation98_spill] sm:$0xff] }
 0x587   :  { %v3135_v19 = vadd.f32 %v3134_v18, %v11467_v45  ;;  %v3863_v55 = vrot.slane %v14890_v32, %v14886_v46  ;;  %v11562_v18 = vadd.f32 %v3177_v16, %v11490_v11  ;;  %v3727_v2 = vmul.f32 %v3701_v8, %v14892_v48  ;;  %v14895_v33 = vld [vmem:[#allocation67_spill] sm:$0xff]  ;;  %v14901_v16 = vld [vmem:[#allocation70_spill] sm:$0xff] }
 0x588   :  { %v3735_v20 = vmul.f32 %v3701_v8, %v14893_v0  ;;  %v3743_v14 = vmul.f32 %v3701_v8, %v14894_v15  ;;  %v3751_v36 = vmul.f32 %v3701_v8, %v14895_v33  ;;  %v3767_v10 = vmul.f32 %v3701_v8, %v14897_v23 }
 0x589   :  { %v11555_v47 = vadd.f32 %v3135_v19, %v11488_v58  ;;  %v3759_v19 = vmul.f32 %v3701_v8, %v14896_v40  ;;  %v3775_v46 = vmul.f32 %v3701_v8, %v14898_v26  ;;  %v3783_v58 = vmul.f32 %v3701_v8, %v14899_v57 }
 0x58a   :  { %v3791_v45 = vmul.f32 %v3701_v8, %v14900_v17  ;;  %v3799_v11 = vmul.f32 %v3701_v8, %v14901_v16  ;;  %v3807_v48 = vmul.f32 %v3701_v8, %v14902_v28  ;;  %v3815_v0 = vmul.f32 %v3701_v8, %v14903_v63 }
 0x58b   :  { %v3823_v15 = vmul.f32 %v3701_v8, %v14904_v39  ;;  %v3831_v33 = vmul.f32 %v3701_v8, %v14905_v25  ;;  %v3839_v40 = vmul.f32 %v3701_v8, %v14906_v21  ;;  %v3847_v23 = vmul.f32 %v3701_v8, %v14907_v49 }
 0x58c   :  { %v11580_v61 = vadd.f32 %v3863_v55, %v3727_v2  ;;  %v11582_v26 = vadd.f32 %v3863_v55, %v3735_v20  ;;  %v11584_v57 = vadd.f32 %v3863_v55, %v3743_v14  ;;  %v11586_v17 = vadd.f32 %v3863_v55, %v3751_v36 }
 0x58d   :  { %v11588_v28 = vadd.f32 %v3863_v55, %v3759_v19  ;;  %v11590_v63 = vadd.f32 %v3863_v55, %v3767_v10  ;;  %v11592_v39 = vadd.f32 %v3863_v55, %v3775_v46  ;;  %v11594_v25 = vadd.f32 %v3863_v55, %v3783_v58 }
 0x58e   :  { %14908 = vst [vmem:[#allocation111_spill] sm:$0xff] %v11580_v61  ;;  %14909 = vst [vmem:[#allocation66_spill] sm:$0xff] %v11582_v26  ;;  %v11596_v21 = vadd.f32 %v3863_v55, %v3791_v45  ;;  %v11598_v49 = vadd.f32 %v3863_v55, %v3799_v11  ;;  %v11600_v8 = vadd.f32 %v3863_v55, %v3807_v48  ;;  %v11613_v46 = vmul.f32 0.2, %v11580_v61 }
 0x58f   :  { %14910 = vst [vmem:[#allocation94_spill] sm:$0xff] %v11584_v57  ;;  %14911 = vst [vmem:[#allocation53_spill] sm:$0xff] %v11586_v17  ;;  %v11602_v2 = vadd.f32 %v3863_v55, %v3815_v0  ;;  %v11604_v14 = vadd.f32 %v3863_v55, %v3823_v15  ;;  %v11606_v36 = vadd.f32 %v3863_v55, %v3831_v33  ;;  %v11616_v45 = vmul.f32 0.2, %v11582_v26 }
 0x590   :  { %v8318_v16 = vpop.eup %8317  ;;  %14912 = vst [vmem:[#allocation67_spill] sm:$0xff] %v11588_v28  ;;  %14913 = vst [vmem:[#allocation95_spill] sm:$0xff] %v11590_v63  ;;  %v11608_v20 = vadd.f32 %v3863_v55, %v3839_v40  ;;  %v11610_v10 = vadd.f32 %v3863_v55, %v3847_v23  ;;  %v11619_v58 = vmul.f32 0.2, %v11584_v57  ;;  %v11622_v19 = vmul.f32 0.2, %v11586_v17 }
 0x591   :  { %14914 = vst [vmem:[#allocation68_spill] sm:$0xff] %v11592_v39  ;;  %14915 = vst [vmem:[#allocation96_spill] sm:$0xff] %v11594_v25  ;;  %v3689_v11 = vmul.f32 %v8318_v16, %v3661_v42  ;;  %v11625_v48 = vmul.f32 0.2, %v11588_v28  ;;  %v11628_v0 = vmul.f32 0.2, %v11590_v63  ;;  %v3116_v55 = vadd.f32 %v3115_v5, %v11499_v7 }
 0x592   :  { %14916 = vst [vmem:[#allocation69_spill] sm:$0xff] %v11596_v21  ;;  %14917 = vst [vmem:[#allocation97_spill] sm:$0xff] %v11598_v49  ;;  %v11632_v15 = vmul.f32 0.2, %v11592_v39  ;;  %v11635_v33 = vmul.f32 0.2, %v11594_v25  ;;  %v3158_v13 = vadd.f32 %v11552_v29, %v11501_v27  ;;  %v3871_v3 = vrot.slane %v14890_v32, %v14891_v35 }
 0x593   :  { %14918 = vst [vmem:[#allocation70_spill] sm:$0xff] %v11600_v8  ;;  %14919 = vst [vmem:[#allocation98_spill] sm:$0xff] %v11602_v2  ;;  %v11638_v40 = vmul.f32 0.2, %v11596_v21  ;;  %v11643_v23 = vmul.f32 0.2, %v11598_v49  ;;  %v11702_v26 = vadd.f32 %v11562_v18, %v11505_v1  ;;  %v11705_v54 = vadd.f32 %v3116_v55, %v11515_v41 }
 0x594   :  { %14920 = vst [vmem:[#allocation71_spill] sm:$0xff] %v11604_v14  ;;  %14921 = vst [vmem:[#allocation99_spill] sm:$0xff] %v11606_v36  ;;  %v11646_v16 = vmul.f32 0.2, %v11600_v8  ;;  %v11649_v5 = vmul.f32 0.2, %v11602_v2 }
 0x595   :  { %14922 = vst [vmem:[#allocation72_spill] sm:$0xff] %v11608_v20  ;;  %14923 = vst [vmem:[#allocation100_spill] sm:$0xff] %v11610_v10  ;;  %v11654_v24 = vmul.f32 0.2, %v11604_v14  ;;  %v11657_v53 = vmul.f32 0.2, %v11606_v36 }
 0x596   :  { %14924 = vst [vmem:[#allocation73_spill] sm:$0xff] %v11613_v46  ;;  %14925 = vst [vmem:[#allocation177_spill] sm:$0xff] %v11616_v45  ;;  %v11660_v42 = vmul.f32 0.2, %v11608_v20  ;;  %v11665_v61 = vmul.f32 0.2, %v11610_v10  ;;  %v3137_v45 = vadd.f32 %v11555_v47, %v11503_v30 }
 0x597   :  { %14926 = vst [vmem:[#allocation178_spill] sm:$0xff] %v11619_v58  ;;  %14927 = vst [vmem:[#allocation179_spill] sm:$0xff] %v11622_v19  ;;  %v3709_v58 = vrot.slane %v3689_v11, %v14889_v9  ;;  %v14942_v10 = vld [vmem:[#allocation102_spill] sm:$0xff]  ;;  %v14943_v29 = vld [vmem:[#allocation75_spill] sm:$0xff] }
 0x598   :  { %14928 = vst [vmem:[#allocation180_spill] sm:$0xff] %v11625_v48  ;;  %14929 = vst [vmem:[#allocation181_spill] sm:$0xff] %v11628_v0  ;;  %v14944_v36 = vld [vmem:[#allocation103_spill] sm:$0xff]  ;;  %v14945_v35 = vld [vmem:[#allocation88_spill] sm:$0xff]  ;;  %v3118_v48 = vadd.f32 %v11705_v54, %v11529_v62 }
 0x599   :  { %14930 = vst [vmem:[#allocation182_spill] sm:$0xff] %v11632_v15  ;;  %14931 = vst [vmem:[#allocation183_spill] sm:$0xff] %v11635_v33  ;;  %v3745_v20 = vmul.f32 %v3709_v58, %v14942_v10  ;;  %v3761_v32 = vmul.f32 %v3709_v58, %v14944_v36  ;;  %v14946_v47 = vld [vmem:[#allocation104_spill] sm:$0xff]  ;;  %v14948_v2 = vld [vmem:[#allocation57_spill] sm:$0xff] }
 0x59a   :  { %14932 = vst [vmem:[#allocation184_spill] sm:$0xff] %v11638_v40  ;;  %14933 = vst [vmem:[#allocation185_spill] sm:$0xff] %v11643_v23  ;;  %v3777_v14 = vmul.f32 %v3709_v58, %v14946_v47  ;;  %v14949_v55 = vld [vmem:[#allocation89_spill] sm:$0xff]  ;;  %v14951_v49 = vld [vmem:[#allocation90_spill] sm:$0xff] }
 0x59b   :  { %14934 = vst [vmem:[#allocation186_spill] sm:$0xff] %v11646_v16  ;;  %14935 = vst [vmem:[#allocation187_spill] sm:$0xff] %v11649_v5  ;;  %v14947_v5 = vld [vmem:[#allocation45_spill] sm:$0xff]  ;;  %v3793_v16 = vmul.f32 %v3709_v58, %v14948_v2  ;;  %v3801_v8 = vmul.f32 %v3709_v58, %v14949_v55  ;;  %v14952_v40 = vld [vmem:[#allocation106_spill] sm:$0xff]  ;;  %v11731_v55 = vadd.f32 %v3871_v3, %v3761_v32 }
 0x59c   :  { %14936 = vst [vmem:[#allocation188_spill] sm:$0xff] %v11654_v24  ;;  %14937 = vst [vmem:[#allocation189_spill] sm:$0xff] %v11657_v53  ;;  %v3753_v53 = vmul.f32 %v3709_v58, %v14943_v29  ;;  %v3769_v24 = vmul.f32 %v3709_v58, %v14945_v35  ;;  %v3785_v18 = vmul.f32 %v3709_v58, %v14947_v5  ;;  %v14950_v23 = vld [vmem:[#allocation105_spill] sm:$0xff]  ;;  %v14953_v21 = vld [vmem:[#allocation47_spill] sm:$0xff] }
 0x59d   :  { %14938 = vst [vmem:[#allocation190_spill] sm:$0xff] %v11660_v42  ;;  %14939 = vst [vmem:[#allocation191_spill] sm:$0xff] %v11665_v61  ;;  %v14940_v42 = vld [vmem:[#allocation101_spill] sm:$0xff]  ;;  %v14941_v61 = vld [vmem:[#allocation74_spill] sm:$0xff]  ;;  %v3825_v10 = vmul.f32 %v3709_v58, %v14952_v40  ;;  %v3833_v29 = vmul.f32 %v3709_v58, %v14953_v21  ;;  %v11727_v5 = vadd.f32 %v3871_v3, %v3745_v20 }
 0x59e   :  { %v3729_v46 = vmul.f32 %v3709_v58, %v14940_v42  ;;  %v3737_v11 = vmul.f32 %v3709_v58, %v14941_v61  ;;  %v3809_v42 = vmul.f32 %v3709_v58, %v14950_v23  ;;  %v3817_v61 = vmul.f32 %v3709_v58, %v14951_v49  ;;  %v14954_v33 = vld [vmem:[#allocation59_spill] sm:$0xff]  ;;  %14960 = vst [vmem:[#allocation103_spill] sm:$0xff] %v11731_v55  ;;  %v15029_v57 = vld [vmem:[#allocation60_spill] sm:$0xff] }
 0x59f   :  { %v3841_v36 = vmul.f32 %v3709_v58, %v14954_v33  ;;  %v14955_v25 = vld [vmem:[#allocation55_spill] sm:$0xff]  ;;  %14958 = vst [vmem:[#allocation102_spill] sm:$0xff] %v11727_v5  ;;  %v11729_v2 = vadd.f32 %v3871_v3, %v3753_v53  ;;  %v11733_v23 = vadd.f32 %v3871_v3, %v3769_v24  ;;  %v11735_v49 = vadd.f32 %v3871_v3, %v3777_v14 }
 0x5a0   :  { %v3849_v35 = vmul.f32 %v3709_v58, %v14955_v25  ;;  %v11723_v15 = vadd.f32 %v3871_v3, %v3729_v46  ;;  %v11725_v47 = vadd.f32 %v3871_v3, %v3737_v11  ;;  %v11737_v40 = vadd.f32 %v3871_v3, %v3785_v18 }
 0x5a1   :  { %14959 = vst [vmem:[#allocation75_spill] sm:$0xff] %v11729_v2  ;;  %14961 = vst [vmem:[#allocation88_spill] sm:$0xff] %v11733_v23  ;;  %v11739_v21 = vadd.f32 %v3871_v3, %v3793_v16  ;;  %v11741_v33 = vadd.f32 %v3871_v3, %v3801_v8  ;;  %v11743_v25 = vadd.f32 %v3871_v3, %v3809_v42  ;;  %v11762_v8 = vmul.f32 0.2, %v11727_v5  ;;  %v15027_v5 = vld [vmem:[#allocation37_spill] sm:$0xff] }
 0x5a2   :  { %14956 = vst [vmem:[#allocation101_spill] sm:$0xff] %v11723_v15  ;;  %14957 = vst [vmem:[#allocation74_spill] sm:$0xff] %v11725_v47  ;;  %v11745_v46 = vadd.f32 %v3871_v3, %v3817_v61  ;;  %v11747_v20 = vadd.f32 %v3871_v3, %v3825_v10  ;;  %v11749_v53 = vadd.f32 %v3871_v3, %v3833_v29  ;;  %v11756_v14 = vmul.f32 0.2, %v11723_v15 }
 0x5a3   :  { %14962 = vst [vmem:[#allocation104_spill] sm:$0xff] %v11735_v49  ;;  %14963 = vst [vmem:[#allocation45_spill] sm:$0xff] %v11737_v40  ;;  %v11751_v58 = vadd.f32 %v3871_v3, %v3841_v36  ;;  %v11753_v24 = vadd.f32 %v3871_v3, %v3849_v35  ;;  %v11759_v16 = vmul.f32 0.2, %v11725_v47  ;;  %v3159_v11 = vadd.f32 %v3158_v13, %v11517_v37 }
 0x5a4   :  { %14964 = vst [vmem:[#allocation57_spill] sm:$0xff] %v11739_v21  ;;  %14965 = vst [vmem:[#allocation89_spill] sm:$0xff] %v11741_v33  ;;  %v11766_v32 = vmul.f32 0.2, %v11729_v2  ;;  %v11769_v18 = vmul.f32 0.2, %v11731_v55  ;;  %v3138_v42 = vadd.f32 %v3137_v45, %v11523_v31 }
 0x5a5   :  { %14966 = vst [vmem:[#allocation105_spill] sm:$0xff] %v11743_v25  ;;  %14967 = vst [vmem:[#allocation90_spill] sm:$0xff] %v11745_v46  ;;  %v11772_v3 = vmul.f32 0.2, %v11733_v23  ;;  %v11776_v61 = vmul.f32 0.2, %v11735_v49  ;;  %v3160_v39 = vadd.f32 %v3159_v11, %v11531_v50 }
 0x5a6   :  { %14968 = vst [vmem:[#allocation106_spill] sm:$0xff] %v11747_v20  ;;  %14969 = vst [vmem:[#allocation47_spill] sm:$0xff] %v11749_v53  ;;  %v11779_v10 = vmul.f32 0.2, %v11737_v40  ;;  %v11782_v29 = vmul.f32 0.2, %v11739_v21 }
 0x5a7   :  { %14970 = vst [vmem:[#allocation59_spill] sm:$0xff] %v11751_v58  ;;  %14971 = vst [vmem:[#allocation55_spill] sm:$0xff] %v11753_v24  ;;  %v11787_v36 = vmul.f32 0.2, %v11741_v33  ;;  %v11790_v35 = vmul.f32 0.2, %v11743_v25 }
 0x5a8   :  { %14972 = vst [vmem:[#allocation192_spill] sm:$0xff] %v11756_v14  ;;  %14973 = vst [vmem:[#allocation193_spill] sm:$0xff] %v11759_v16  ;;  %v11793_v45 = vmul.f32 0.2, %v11745_v46  ;;  %v11798_v0 = vmul.f32 0.2, %v11747_v20 }
 0x5a9   :  { %14974 = vst [vmem:[#allocation194_spill] sm:$0xff] %v11762_v8  ;;  %14975 = vst [vmem:[#allocation195_spill] sm:$0xff] %v11766_v32  ;;  %v11801_v63 = vmul.f32 0.2, %v11749_v53  ;;  %v11804_v13 = vmul.f32 0.2, %v11751_v58  ;;  %v3180_v8 = vadd.f32 %v11702_v26, %v11525_v34 }
 0x5aa   :  { %14976 = vst [vmem:[#allocation196_spill] sm:$0xff] %v11769_v18  ;;  %14977 = vst [vmem:[#allocation197_spill] sm:$0xff] %v11772_v3  ;;  %v11809_v15 = vmul.f32 0.2, %v11753_v24  ;;  %v3119_v16 = vrot.slane %v3118_v48, 4  ;;  %v3161_v47 = vrot.slane %v3160_v39, 4 }
 0x5ab   :  { %14978 = vst [vmem:[#allocation198_spill] sm:$0xff] %v11776_v61  ;;  %14979 = vst [vmem:[#allocation199_spill] sm:$0xff] %v11779_v10  ;;  %v14988_v21 = vld [vmem:[#allocation114_spill] sm:$0xff]  ;;  %v15019_v23 = vld [vmem:[#allocation107_spill] sm:$0xff] }
 0x5ac   :  { %14980 = vst [vmem:[#allocation200_spill] sm:$0xff] %v11782_v29  ;;  %14981 = vst [vmem:[#allocation201_spill] sm:$0xff] %v11787_v36  ;;  %v3120_v53 = vadd.f32 %v3119_v16, %v3118_v48  ;;  %v15021_v55 = vld [vmem:[#allocation38_spill] sm:$0xff] }
 0x5ad   :  { %14982 = vst [vmem:[#allocation202_spill] sm:$0xff] %v11790_v35  ;;  %14983 = vst [vmem:[#allocation203_spill] sm:$0xff] %v11793_v45  ;;  %v3139_v45 = vadd.f32 %v3138_v42, %v11537_v43 }
 0x5ae   :  { %14984 = vst [vmem:[#allocation204_spill] sm:$0xff] %v11798_v0  ;;  %14985 = vst [vmem:[#allocation205_spill] sm:$0xff] %v11801_v63  ;;  %v3181_v0 = vadd.f32 %v3180_v8, %v11539_v52  ;;  %v3121_v14 = vrot.slane %v3120_v53, 2 }
 0x5af   :  { %14986 = vst [vmem:[#allocation206_spill] sm:$0xff] %v11804_v13  ;;  %14987 = vst [vmem:[#allocation207_spill] sm:$0xff] %v11809_v15  ;;  %v3140_v63 = vrot.slane %v3139_v45, 4  ;;  %v3162_v13 = vadd.f32 %v3161_v47, %v3160_v39  ;;  %v14989_v39 = vld [vmem:[#allocation108_spill] sm:$0xff] }
 0x5b0   :  { %v3182_v28 = vrot.slane %v3181_v0, 4  ;;  %v3122_v20 = vadd.f32 %v3121_v14, %v3120_v53  ;;  %v14990_v47 = vld [vmem:[#allocation40_spill] sm:$0xff] }
 0x5b1   :  { %v3141_v58 = vadd.f32 %v3140_v63, %v3139_v45  ;;  %v3163_v15 = vrot.slane %v3162_v13, 2  ;;  %v14996_v45 = vld [vmem:[#allocation91_spill] sm:$0xff] }
 0x5b2   :  { %v3183_v26 = vadd.f32 %v3182_v28, %v3181_v0  ;;  %v3123_v54 = vrot.slane %v3122_v20, 1  ;;  %v14991_v28 = vld [vmem:[#allocation83_spill] sm:$0xff] }
 0x5b3   :  { %v3142_v24 = vrot.slane %v3141_v58, 2  ;;  %v3164_v46 = vadd.f32 %v3163_v15, %v3162_v13  ;;  %v14992_v15 = vld [vmem:[#allocation36_spill] sm:$0xff] }
 0x5b4   :  { %v3184_v25 = vrot.slane %v3183_v26, 2  ;;  %v3124_v42 = vadd.f32 %v3123_v54, %v3122_v20  ;;  %v15000_v54 = vld [vmem:[#allocation42_spill] sm:$0xff] }
 0x5b5   :  { %v3165_v35 = vrot.slane %v3164_v46, 1  ;;  %v3143_v11 = vadd.f32 %v3142_v24, %v3141_v58 }
 0x5b6   :  { %v3192_v36 = vmul.f32 0.0078125, %v3124_v42  ;;  %v3185_v29 = vadd.f32 %v3184_v25, %v3183_v26 }
 0x5b7   :  { %v3166_v33 = vadd.f32 %v3165_v35, %v3164_v46  ;;  %v3144_v8 = vrot.slane %v3143_v11, 1 }
 0x5b8   :  { %v11845_v48 = vsub.f32 %v14988_v21, %v3192_v36  ;;  %v11848_v63 = vsub.f32 %v14989_v39, %v3192_v36  ;;  %v11851_v16 = vsub.f32 %v14990_v47, %v3192_v36  ;;  %v11854_v0 = vsub.f32 %v14991_v28, %v3192_v36  ;;  %v15002_v39 = vld [vmem:[#allocation110_spill] sm:$0xff]  ;;  %v15004_v47 = vld [vmem:[#allocation56_spill] sm:$0xff] }
 0x5b9   :  { %v11857_v53 = vsub.f32 %v14992_v15, %v3192_v36  ;;  %v11860_v20 = vsub.f32 %v11145_v44, %v3192_v36  ;;  %v11863_v25 = vsub.f32 %v11251_v56, %v3192_v36  ;;  %v11866_v21 = vsub.f32 %v11275_v6, %v3192_v36 }
 0x5ba   :  { %v11869_v46 = vsub.f32 %v11304_v60, %v3192_v36  ;;  %v11872_v58 = vsub.f32 %v11320_v12, %v3192_v36  ;;  %v11875_v24 = vsub.f32 %v11372_v59, %v3192_v36  ;;  %v11878_v14 = vsub.f32 %v11455_v22, %v3192_v36 }
 0x5bb   :  { %v11881_v44 = vsub.f32 %v11479_v51, %v3192_v36  ;;  %v11884_v56 = vsub.f32 %v11499_v7, %v3192_v36  ;;  %v11887_v6 = vsub.f32 %v11515_v41, %v3192_v36  ;;  %v11890_v60 = vsub.f32 %v11529_v62, %v3192_v36  ;;  %v14998_v62 = vld [vmem:[#allocation115_spill] sm:$0xff] }
 0x5bc   :  { %v3328_v12 = vmul.f32 %v11845_v48, %v11845_v48  ;;  %v3336_v59 = vmul.f32 %v11848_v63, %v11848_v63  ;;  %v3194_v22 = vmul.f32 0.0078125, %v3166_v33  ;;  %v3344_v51 = vmul.f32 %v11851_v16, %v11851_v16 }
 0x5bd   :  { %14993 = vst [vmem:[#allocation114_spill] sm:$0xff] %v11884_v56  ;;  %14994 = vst [vmem:[#allocation108_spill] sm:$0xff] %v11887_v6  ;;  %v3352_v7 = vmul.f32 %v11854_v0, %v11854_v0  ;;  %v3145_v13 = vadd.f32 %v3144_v8, %v3143_v11  ;;  %v3186_v35 = vrot.slane %v3185_v29, 1 }
 0x5be   :  { %14995 = vst [vmem:[#allocation40_spill] sm:$0xff] %v11890_v60  ;;  %v3536_v41 = vadd.f32 %v3336_v59, %v3328_v12  ;;  %v11901_v26 = vsub.f32 %v14996_v45, %v3194_v22  ;;  %v11904_v36 = vsub.f32 %v14998_v62, %v3194_v22  ;;  %v11907_v42 = vsub.f32 %v15000_v54, %v3194_v22  ;;  %v15008_v12 = vld [vmem:[#allocation138_spill] sm:$0xff]  ;;  %v15010_v45 = vld [vmem:[#allocation141_spill] sm:$0xff] }
 0x5bf   :  { %v11910_v33 = vsub.f32 %v15002_v39, %v3194_v22  ;;  %v11913_v28 = vsub.f32 %v15004_v47, %v3194_v22  ;;  %v11916_v15 = vsub.f32 %v11147_v38, %v3194_v22  ;;  %v11919_v11 = vsub.f32 %v11253_v4, %v3194_v22  ;;  %v15012_v54 = vld [vmem:[#allocation86_spill] sm:$0xff]  ;;  %v15014_v39 = vld [vmem:[#allocation148_spill] sm:$0xff]  ;;  %v15016_v47 = vld [vmem:[#allocation171_spill] sm:$0xff] }
 0x5c0   :  { %14997 = vst [vmem:[#allocation83_spill] sm:$0xff] %v11901_v26  ;;  %14999 = vst [vmem:[#allocation36_spill] sm:$0xff] %v11904_v36  ;;  %v3537_v8 = vadd.f32 %v3536_v41, %v3344_v51  ;;  %v11922_v59 = vsub.f32 %v15008_v12, %v3194_v22  ;;  %v11925_v62 = vsub.f32 %v15010_v45, %v3194_v22  ;;  %v15018_v38 = vld [vmem:[#allocation174_spill] sm:$0xff] }
 0x5c1   :  { %15001 = vst [vmem:[#allocation91_spill] sm:$0xff] %v11907_v42  ;;  %15003 = vst [vmem:[#allocation115_spill] sm:$0xff] %v11910_v33  ;;  %v11928_v10 = vsub.f32 %v15012_v54, %v3194_v22  ;;  %v11931_v40 = vsub.f32 %v15014_v39, %v3194_v22  ;;  %v11934_v61 = vsub.f32 %v15016_v47, %v3194_v22  ;;  %v3193_v47 = vmul.f32 0.0078125, %v3145_v13 }
 0x5c2   :  { %15005 = vst [vmem:[#allocation42_spill] sm:$0xff] %v11913_v28  ;;  %15006 = vst [vmem:[#allocation110_spill] sm:$0xff] %v11916_v15  ;;  %v11937_v49 = vsub.f32 %v15018_v38, %v3194_v22  ;;  %v11940_v4 = vsub.f32 %v11501_v27, %v3194_v22  ;;  %v3360_v51 = vmul.f32 %v11857_v53, %v11857_v53 }
 0x5c3   :  { %15007 = vst [vmem:[#allocation56_spill] sm:$0xff] %v11919_v11  ;;  %15009 = vst [vmem:[#allocation138_spill] sm:$0xff] %v11922_v59  ;;  %v3538_v41 = vadd.f32 %v3537_v8, %v3352_v7  ;;  %v11945_v12 = vsub.f32 %v11517_v37, %v3194_v22  ;;  %v11948_v45 = vsub.f32 %v11531_v50, %v3194_v22 }
 0x5c4   :  { %15011 = vst [vmem:[#allocation141_spill] sm:$0xff] %v11925_v62  ;;  %15013 = vst [vmem:[#allocation86_spill] sm:$0xff] %v11928_v10  ;;  %v3330_v54 = vmul.f32 %v11901_v26, %v11901_v26  ;;  %v3338_v39 = vmul.f32 %v11904_v36, %v11904_v36  ;;  %v3368_v27 = vmul.f32 %v11860_v20, %v11860_v20  ;;  %v15037_v36 = vld [vmem:[#allocation175_spill] sm:$0xff] }
 0x5c5   :  { %15015 = vst [vmem:[#allocation148_spill] sm:$0xff] %v11931_v40  ;;  %15017 = vst [vmem:[#allocation171_spill] sm:$0xff] %v11934_v61  ;;  %v3539_v38 = vadd.f32 %v3538_v41, %v3360_v51  ;;  %v3376_v7 = vmul.f32 %v11863_v25, %v11863_v25  ;;  %v3384_v37 = vmul.f32 %v11866_v21, %v11866_v21 }
 0x5c6   :  { %v3187_v8 = vadd.f32 %v3186_v35, %v3185_v29  ;;  %v3392_v50 = vmul.f32 %v11869_v46, %v11869_v46  ;;  %v3346_v3 = vmul.f32 %v11907_v42, %v11907_v42  ;;  %v3354_v13 = vmul.f32 %v11910_v33, %v11910_v33  ;;  %v15023_v35 = vld [vmem:[#allocation80_spill] sm:$0xff]  ;;  %v15034_v33 = vld [vmem:[#allocation54_spill] sm:$0xff]  ;;  %v15035_v42 = vld [vmem:[#allocation153_spill] sm:$0xff] }
 0x5c7   :  { %v3540_v22 = vadd.f32 %v3539_v38, %v3368_v27  ;;  %v3362_v51 = vmul.f32 %v11913_v28, %v11913_v28  ;;  %v3578_v41 = vadd.f32 %v3338_v39, %v3330_v54  ;;  %v11969_v18 = vsub.f32 %v15019_v23, %v3193_v47  ;;  %v15025_v27 = vld [vmem:[#allocation84_spill] sm:$0xff]  ;;  %v15032_v39 = vld [vmem:[#allocation139_spill] sm:$0xff] }
 0x5c8   :  { %v11972_v32 = vsub.f32 %v15021_v55, %v3193_v47  ;;  %v11975_v2 = vsub.f32 %v15023_v35, %v3193_v47  ;;  %v11978_v38 = vsub.f32 %v15025_v27, %v3193_v47  ;;  %v11981_v19 = vsub.f32 %v15027_v5, %v3193_v47  ;;  %v15031_v54 = vld [vmem:[#allocation136_spill] sm:$0xff] }
 0x5c9   :  { %15020 = vst [vmem:[#allocation174_spill] sm:$0xff] %v11969_v18  ;;  %v3541_v29 = vadd.f32 %v3540_v22, %v3376_v7  ;;  %v3579_v17 = vadd.f32 %v3578_v41, %v3346_v3  ;;  %v11984_v28 = vsub.f32 %v15029_v57, %v3193_v47  ;;  %v11987_v23 = vsub.f32 %v15031_v54, %v3193_v47  ;;  %v15033_v22 = vld [vmem:[#allocation113_spill] sm:$0xff]  ;;  %v15036_v41 = vld [vmem:[#allocation172_spill] sm:$0xff] }
 0x5ca   :  { %15022 = vst [vmem:[#allocation107_spill] sm:$0xff] %v11972_v32  ;;  %15024 = vst [vmem:[#allocation38_spill] sm:$0xff] %v11975_v2  ;;  %v11990_v55 = vsub.f32 %v15032_v39, %v3193_v47  ;;  %v11993_v35 = vsub.f32 %v15033_v22, %v3193_v47  ;;  %v11996_v27 = vsub.f32 %v15034_v33, %v3193_v47  ;;  %v3195_v26 = vmul.f32 0.0078125, %v3187_v8  ;;  %v15041_v8 = vld [vmem:[#allocation82_spill] sm:$0xff] }
 0x5cb   :  { %15026 = vst [vmem:[#allocation80_spill] sm:$0xff] %v11978_v38  ;;  %15028 = vst [vmem:[#allocation84_spill] sm:$0xff] %v11981_v19  ;;  %v3542_v7 = vadd.f32 %v3541_v29, %v3384_v37  ;;  %v11999_v5 = vsub.f32 %v15035_v42, %v3193_v47  ;;  %v3580_v3 = vadd.f32 %v3579_v17, %v3354_v13 }
 0x5cc   :  { %15030 = vst [vmem:[#allocation37_spill] sm:$0xff] %v11984_v28  ;;  %v12002_v57 = vsub.f32 %v15036_v41, %v3193_v47  ;;  %v12005_v54 = vsub.f32 %v15037_v36, %v3193_v47  ;;  %v12008_v39 = vsub.f32 %v11503_v30, %v3193_v47  ;;  %v3400_v37 = vmul.f32 %v11872_v58, %v11872_v58 }
 0x5cd   :  { %v3543_v29 = vadd.f32 %v3542_v7, %v3392_v50  ;;  %v12013_v33 = vsub.f32 %v11523_v31, %v3193_v47  ;;  %v12016_v42 = vsub.f32 %v11537_v43, %v3193_v47  ;;  %v3408_v17 = vmul.f32 %v11875_v24, %v11875_v24 }
 0x5ce   :  { %v3416_v36 = vmul.f32 %v11878_v14, %v11878_v14  ;;  %v3370_v30 = vmul.f32 %v11916_v15, %v11916_v15  ;;  %v3581_v13 = vadd.f32 %v3580_v3, %v3362_v51  ;;  %v3424_v22 = vmul.f32 %v11881_v44, %v11881_v44 }
 0x5cf   :  { %v3544_v50 = vadd.f32 %v3543_v29, %v3400_v37  ;;  %v3329_v31 = vmul.f32 %v11969_v18, %v11969_v18  ;;  %v3337_v43 = vmul.f32 %v11972_v32, %v11972_v32  ;;  %v3432_v47 = vmul.f32 %v11884_v56, %v11884_v56 }
 0x5d0   :  { %v3440_v7 = vmul.f32 %v11887_v6, %v11887_v6  ;;  %v3378_v41 = vmul.f32 %v11919_v11, %v11919_v11  ;;  %v3582_v51 = vadd.f32 %v3581_v13, %v3370_v30  ;;  %v3448_v3 = vmul.f32 %v11890_v60, %v11890_v60 }
 0x5d1   :  { %v3545_v37 = vadd.f32 %v3544_v50, %v3408_v17  ;;  %v3386_v29 = vmul.f32 %v11922_v59, %v11922_v59  ;;  %v3394_v32 = vmul.f32 %v11925_v62, %v11925_v62  ;;  %v3402_v18 = vmul.f32 %v11928_v10, %v11928_v10 }
 0x5d2   :  { %v3410_v15 = vmul.f32 %v11931_v40, %v11931_v40  ;;  %v3418_v11 = vmul.f32 %v11934_v61, %v11934_v61  ;;  %v3583_v30 = vadd.f32 %v3582_v51, %v3378_v41  ;;  %v3345_v17 = vmul.f32 %v11975_v2, %v11975_v2  ;;  %v15038_v61 = vld [vmem:[#allocation92_spill] sm:$0xff] }
 0x5d3   :  { %v3546_v13 = vadd.f32 %v3545_v37, %v3416_v36  ;;  %v3557_v50 = vadd.f32 %v3337_v43, %v3329_v31  ;;  %v3353_v62 = vmul.f32 %v11978_v38, %v11978_v38  ;;  %v3361_v10 = vmul.f32 %v11981_v19, %v11981_v19  ;;  %v15039_v36 = vld [vmem:[#allocation39_spill] sm:$0xff]  ;;  %v15042_v37 = vld [vmem:[#allocation85_spill] sm:$0xff] }
 0x5d4   :  { %v3584_v59 = vadd.f32 %v3583_v30, %v3386_v29  ;;  %v3369_v40 = vmul.f32 %v11984_v28, %v11984_v28  ;;  %v12057_v41 = vsub.f32 %v15038_v61, %v3195_v26  ;;  %v12060_v51 = vsub.f32 %v15039_v36, %v3195_v26  ;;  %v15043_v30 = vld [vmem:[#allocation58_spill] sm:$0xff]  ;;  %v15045_v61 = vld [vmem:[#allocation137_spill] sm:$0xff]  ;;  %v15046_v36 = vld [vmem:[#allocation140_spill] sm:$0xff] }
 0x5d5   :  { %v3547_v60 = vadd.f32 %v3546_v13, %v3424_v22  ;;  %v3558_v6 = vadd.f32 %v3557_v50, %v3345_v17  ;;  %v12063_v43 = vsub.f32 %v15041_v8, %v3195_v26  ;;  %v12066_v29 = vsub.f32 %v15042_v37, %v3195_v26  ;;  %v15044_v22 = vld [vmem:[#allocation62_spill] sm:$0xff]  ;;  %v15049_v37 = vld [vmem:[#allocation87_spill] sm:$0xff] }
 0x5d6   :  { %15040 = vst [vmem:[#allocation60_spill] sm:$0xff] %v12060_v51  ;;  %v3585_v31 = vadd.f32 %v3584_v59, %v3394_v32  ;;  %v12069_v19 = vsub.f32 %v15043_v30, %v3195_v26  ;;  %v12072_v13 = vsub.f32 %v15044_v22, %v3195_v26  ;;  %v12075_v17 = vsub.f32 %v15045_v61, %v3195_v26  ;;  %v15047_v59 = vld [vmem:[#allocation52_spill] sm:$0xff] }
 0x5d7   :  { %v3548_v38 = vadd.f32 %v3547_v60, %v3432_v47  ;;  %v3559_v28 = vadd.f32 %v3558_v6, %v3353_v62  ;;  %v12078_v32 = vsub.f32 %v15046_v36, %v3195_v26  ;;  %v12081_v8 = vsub.f32 %v15047_v59, %v3195_v26  ;;  %v15051_v60 = vld [vmem:[#allocation154_spill] sm:$0xff]  ;;  %v15053_v62 = vld [vmem:[#allocation173_spill] sm:$0xff]  ;;  %v15055_v61 = vld [vmem:[#allocation176_spill] sm:$0xff] }
 0x5d8   :  { %v3586_v50 = vadd.f32 %v3585_v31, %v3402_v18  ;;  %v12084_v2 = vsub.f32 %v15049_v37, %v3195_v26  ;;  %v12087_v6 = vsub.f32 %v15051_v60, %v3195_v26  ;;  %v12090_v47 = vsub.f32 %v15053_v62, %v3195_v26 }
 0x5d9   :  { %15048 = vst [vmem:[#allocation136_spill] sm:$0xff] %v12081_v8  ;;  %v3549_v30 = vadd.f32 %v3548_v38, %v3440_v7  ;;  %v3560_v56 = vadd.f32 %v3559_v28, %v3361_v10  ;;  %v12093_v18 = vsub.f32 %v15055_v61, %v3195_v26  ;;  %v12096_v31 = vsub.f32 %v11505_v1, %v3195_v26 }
 0x5da   :  { %15050 = vst [vmem:[#allocation139_spill] sm:$0xff] %v12084_v2  ;;  %15052 = vst [vmem:[#allocation113_spill] sm:$0xff] %v12087_v6  ;;  %v3587_v22 = vadd.f32 %v3586_v50, %v3410_v15  ;;  %v12099_v36 = vsub.f32 %v11525_v34, %v3195_v26  ;;  %v3377_v10 = vmul.f32 %v11987_v23, %v11987_v23 }
 0x5db   :  { %15054 = vst [vmem:[#allocation54_spill] sm:$0xff] %v12090_v47  ;;  %15056 = vst [vmem:[#allocation153_spill] sm:$0xff] %v12093_v18  ;;  %v3550_v59 = vadd.f32 %v3549_v30, %v3448_v3  ;;  %v3561_v28 = vadd.f32 %v3560_v56, %v3369_v40  ;;  %v12104_v38 = vsub.f32 %v11539_v52, %v3195_v26 }
 0x5dc   :  { %15057 = vst [vmem:[#allocation172_spill] sm:$0xff] %v12096_v31  ;;  %15058 = vst [vmem:[#allocation175_spill] sm:$0xff] %v12099_v36  ;;  %v3426_v15 = vmul.f32 %v11937_v49, %v11937_v49  ;;  %v3588_v7 = vadd.f32 %v3587_v22, %v3418_v11  ;;  %v3385_v1 = vmul.f32 %v11990_v55, %v11990_v55 }
 0x5dd   :  { %15059 = vst [vmem:[#allocation92_spill] sm:$0xff] %v12104_v38  ;;  %v3551_v50 = vrot.slane %v3550_v59, 4  ;;  %v3562_v37 = vadd.f32 %v3561_v28, %v3377_v10  ;;  %v3434_v34 = vmul.f32 %v11940_v4, %v11940_v4  ;;  %v3331_v30 = vmul.f32 %v12057_v41, %v12057_v41 }
 0x5de   :  { %v3589_v3 = vadd.f32 %v3588_v7, %v3426_v15  ;;  %v3339_v52 = vmul.f32 %v12060_v51, %v12060_v51  ;;  %v3393_v56 = vmul.f32 %v11993_v35, %v11993_v35  ;;  %v3442_v11 = vmul.f32 %v11945_v12, %v11945_v12 }
 0x5df   :  { %v3552_v40 = vadd.f32 %v3551_v50, %v3550_v59  ;;  %v3563_v26 = vadd.f32 %v3562_v37, %v3385_v1  ;;  %v3401_v22 = vmul.f32 %v11996_v27, %v11996_v27  ;;  %v3450_v10 = vmul.f32 %v11948_v45, %v11948_v45 }
 0x5e0   :  { %v3590_v60 = vadd.f32 %v3589_v3, %v3434_v34  ;;  %v3347_v59 = vmul.f32 %v12063_v43, %v12063_v43  ;;  %v3599_v15 = vadd.f32 %v3339_v52, %v3331_v30  ;;  %v3409_v50 = vmul.f32 %v11999_v5, %v11999_v5 }
 0x5e1   :  { %v3553_v62 = vrot.slane %v3552_v40, 2  ;;  %v3564_v61 = vadd.f32 %v3563_v26, %v3393_v56  ;;  %v3355_v34 = vmul.f32 %v12066_v29, %v12066_v29  ;;  %v3417_v56 = vmul.f32 %v12002_v57, %v12002_v57 }
 0x5e2   :  { %v3591_v28 = vadd.f32 %v3590_v60, %v3442_v11  ;;  %v3600_v3 = vadd.f32 %v3599_v15, %v3347_v59  ;;  %v3363_v60 = vmul.f32 %v12069_v19, %v12069_v19  ;;  %v3433_v59 = vmul.f32 %v12008_v39, %v12008_v39 }
 0x5e3   :  { %v3554_v7 = vadd.f32 %v3553_v62, %v3552_v40  ;;  %v3565_v1 = vadd.f32 %v3564_v61, %v3401_v22  ;;  %v3425_v40 = vmul.f32 %v12005_v54, %v12005_v54  ;;  %v3371_v61 = vmul.f32 %v12072_v13, %v12072_v13 }
 0x5e4   :  { %v3592_v37 = vadd.f32 %v3591_v28, %v3450_v10  ;;  %v3601_v30 = vadd.f32 %v3600_v3, %v3355_v34 }
 0x5e5   :  { %v3555_v51 = vrot.slane %v3554_v7, 1  ;;  %v3566_v26 = vadd.f32 %v3565_v1, %v3409_v50  ;;  %v3379_v1 = vmul.f32 %v12075_v17, %v12075_v17 }
 0x5e6   :  { %v3593_v11 = vrot.slane %v3592_v37, 4  ;;  %v3602_v10 = vadd.f32 %v3601_v30, %v3363_v60 }
 0x5e7   :  { %v3556_v52 = vadd.f32 %v3555_v51, %v3554_v7  ;;  %v3567_v62 = vadd.f32 %v3566_v26, %v3417_v56  ;;  %v3441_v7 = vmul.f32 %v12013_v33, %v12013_v33  ;;  %v3387_v56 = vmul.f32 %v12078_v32, %v12078_v32 }
 0x5e8   :  { %v3594_v22 = vadd.f32 %v3593_v11, %v3592_v37  ;;  %v3603_v34 = vadd.f32 %v3602_v10, %v3371_v61  ;;  %v3449_v11 = vmul.f32 %v12016_v42, %v12016_v42  ;;  %v15060_v61 = vld [vmem:[#allocation33_spill] sm:$0xff] }
 0x5e9   :  { %v3624_v28 = vmul.f32 0.0078125, %v3556_v52  ;;  %v3568_v15 = vadd.f32 %v3567_v62, %v3425_v40  ;;  %v3395_v52 = vmul.f32 %v12081_v8, %v12081_v8  ;;  %v12151_v10 = vsub.s32 4, %v15060_v61  ;;  %v15094_v8 = vld [vmem:[#allocation91_spill] sm:$0xff] }
 0x5ea   :  { %v3595_v50 = vrot.slane %v3594_v22, 2  ;;  %v3604_v26 = vadd.f32 %v3603_v34, %v3379_v1  ;;  %v3411_v1 = vmul.f32 %v12087_v6, %v12087_v6 }
 0x5eb   :  { %v3632_v51 = vadd.f32 1e-05, %v3624_v28  ;;  %v3569_v3 = vadd.f32 %v3568_v15, %v3433_v59  ;;  %15061 = vst [vmem:[#allocation39_spill] sm:$0xff] %v12151_v10 }
 0x5ec   :  { %v3596_v37 = vadd.f32 %v3595_v50, %v3594_v22  ;;  %v3605_v40 = vadd.f32 %v3604_v26, %v3387_v56  ;;  %v3403_v22 = vmul.f32 %v12084_v2, %v12084_v2 }
 0x5ed   :  { %8319 = vrsqrt.f32 %v3632_v51  ;;  %v3570_v60 = vadd.f32 %v3569_v3, %v3441_v7  ;;  %v12157_v7 = vld [vmem:[#allocation16] sm:$0xff] }
 0x5ee   :  { %v3597_v30 = vrot.slane %v3596_v37, 1  ;;  %v3606_v59 = vadd.f32 %v3605_v40, %v3395_v52  ;;  %v3665_v3 = vrot.slane %v12157_v7, %v12151_v10  ;;  %v12166_v40 = vsub.s32 6, %v15060_v61 }
 0x5ef   :  { %v3571_v62 = vadd.f32 %v3570_v60, %v3449_v11  ;;  %v3427_v60 = vmul.f32 %v12093_v18, %v12093_v18 }
 0x5f0   :  { %v3598_v28 = vadd.f32 %v3597_v30, %v3596_v37  ;;  %v3607_v34 = vadd.f32 %v3606_v59, %v3403_v22  ;;  %v3419_v37 = vmul.f32 %v12090_v47, %v12090_v47  ;;  %15062 = vst [vmem:[#allocation82_spill] sm:$0xff] %v12166_v40  ;;  %v3435_v22 = vmul.f32 %v12096_v31, %v12096_v31  ;;  %v15065_v31 = vld [vmem:[#allocation40_spill] sm:$0xff] }
 0x5f1   :  { %v3572_v15 = vrot.slane %v3571_v62, 4 }
 0x5f2   :  { %v3626_v50 = vmul.f32 0.0078125, %v3598_v28  ;;  %v3608_v26 = vadd.f32 %v3607_v34, %v3411_v1 }
 0x5f3   :  { %v3573_v51 = vadd.f32 %v3572_v15, %v3571_v62 }
 0x5f4   :  { %v3634_v56 = vadd.f32 1e-05, %v3626_v50  ;;  %v3609_v30 = vadd.f32 %v3608_v26, %v3419_v37  ;;  %v12173_v50 = vld [vmem:[#allocation17] sm:$0xff] }
 0x5f5   :  { %v3574_v11 = vrot.slane %v3573_v51, 2  ;;  %v3875_v1 = vrot.slane %v12173_v50, %v12151_v10  ;;  %v3883_v2 = vrot.slane %v12173_v50, %v12166_v40 }
 0x5f6   :  { %8321 = vrsqrt.f32 %v3634_v56  ;;  %v3610_v59 = vadd.f32 %v3609_v30, %v3427_v60  ;;  %v3673_v56 = vrot.slane %v12157_v7, %v12166_v40  ;;  %v15098_v40 = vld [vmem:[#allocation56_spill] sm:$0xff] }
 0x5f7   :  { %v8320_v52 = vpop.eup %8319  ;;  %v12168_v62 = vadd.f32 %v3574_v11, %v3573_v51  ;;  %v3443_v51 = vmul.f32 %v12099_v36, %v12099_v36  ;;  %v15064_v36 = vld [vmem:[#allocation108_spill] sm:$0xff] }
 0x5f8   :  { %v3690_v28 = vmul.f32 %v8320_v52, %v3665_v3  ;;  %v3611_v34 = vadd.f32 %v3610_v59, %v3435_v22  ;;  %v12184_v3 = vmul.f32 %v12104_v38, %v12104_v38  ;;  %v15063_v38 = vld [vmem:[#allocation114_spill] sm:$0xff] }
 0x5fa   :  { %v3713_v15 = vrot.slane %v3690_v28, %v14889_v9 }
 0x5fc   :  { %v3730_v26 = vmul.f32 %v3713_v15, %v11845_v48  ;;  %v3738_v11 = vmul.f32 %v3713_v15, %v11848_v63  ;;  %v3746_v60 = vmul.f32 %v3713_v15, %v11851_v16  ;;  %v3754_v30 = vmul.f32 %v3713_v15, %v11854_v0 }
 0x5fd   :  { %v3762_v52 = vmul.f32 %v3713_v15, %v11857_v53  ;;  %v3770_v28 = vmul.f32 %v3713_v15, %v11860_v20  ;;  %v3778_v22 = vmul.f32 %v3713_v15, %v11863_v25  ;;  %v3786_v59 = vmul.f32 %v3713_v15, %v11866_v21 }
 0x5fe   :  { %v3794_v37 = vmul.f32 %v3713_v15, %v11869_v46  ;;  %v3802_v10 = vmul.f32 %v3713_v15, %v11872_v58  ;;  %v3810_v48 = vmul.f32 %v3713_v15, %v11875_v24  ;;  %v3818_v63 = vmul.f32 %v3713_v15, %v11878_v14 }
 0x5ff   :  { %v3826_v16 = vmul.f32 %v3713_v15, %v11881_v44  ;;  %v3834_v0 = vmul.f32 %v3713_v15, %v15063_v38  ;;  %v3842_v53 = vmul.f32 %v3713_v15, %v15064_v36  ;;  %v3850_v20 = vmul.f32 %v3713_v15, %v15065_v31 }
 0x600   :  { %v12202_v18 = vadd.f32 %v3875_v1, %v3730_v26  ;;  %v12204_v25 = vadd.f32 %v3875_v1, %v3738_v11  ;;  %v12206_v21 = vadd.f32 %v3875_v1, %v3746_v60  ;;  %v12208_v46 = vadd.f32 %v3875_v1, %v3754_v30  ;;  %v8322_v58 = vpop.eup %8321 }
 0x601   :  { %v12210_v24 = vadd.f32 %v3875_v1, %v3762_v52  ;;  %v12212_v14 = vadd.f32 %v3875_v1, %v3770_v28  ;;  %v12214_v44 = vadd.f32 %v3875_v1, %v3778_v22  ;;  %v12216_v38 = vadd.f32 %v3875_v1, %v3786_v59 }
 0x602   :  { %15066 = vst [vmem:[#allocation85_spill] sm:$0xff] %v12202_v18  ;;  %15067 = vst [vmem:[#allocation58_spill] sm:$0xff] %v12204_v25  ;;  %v12218_v36 = vadd.f32 %v3875_v1, %v3794_v37  ;;  %v12220_v31 = vadd.f32 %v3875_v1, %v3802_v10  ;;  %v12222_v15 = vadd.f32 %v3875_v1, %v3810_v48  ;;  %v12235_v28 = vmul.f32 0.2, %v12202_v18 }
 0x603   :  { %15068 = vst [vmem:[#allocation62_spill] sm:$0xff] %v12214_v44  ;;  %15069 = vst [vmem:[#allocation137_spill] sm:$0xff] %v12216_v38  ;;  %v12224_v26 = vadd.f32 %v3875_v1, %v3818_v63  ;;  %v12226_v11 = vadd.f32 %v3875_v1, %v3826_v16  ;;  %v12228_v60 = vadd.f32 %v3875_v1, %v3834_v0  ;;  %v12238_v37 = vmul.f32 0.2, %v12204_v25 }
 0x604   :  { %15070 = vst [vmem:[#allocation140_spill] sm:$0xff] %v12218_v36  ;;  %15071 = vst [vmem:[#allocation52_spill] sm:$0xff] %v12220_v31  ;;  %v12230_v30 = vadd.f32 %v3875_v1, %v3842_v53  ;;  %v12232_v52 = vadd.f32 %v3875_v1, %v3850_v20  ;;  %v12241_v10 = vmul.f32 0.2, %v12206_v21  ;;  %v3692_v22 = vmul.f32 %v8322_v58, %v3673_v56 }
 0x605   :  { %15072 = vst [vmem:[#allocation87_spill] sm:$0xff] %v12222_v15  ;;  %15073 = vst [vmem:[#allocation154_spill] sm:$0xff] %v12224_v26  ;;  %v12244_v59 = vmul.f32 0.2, %v12208_v46  ;;  %v12247_v48 = vmul.f32 0.2, %v12210_v24  ;;  %v3612_v1 = vadd.f32 %v3611_v34, %v3443_v51 }
 0x606   :  { %15074 = vst [vmem:[#allocation173_spill] sm:$0xff] %v12226_v11  ;;  %15075 = vst [vmem:[#allocation176_spill] sm:$0xff] %v12228_v60  ;;  %v12250_v63 = vmul.f32 0.2, %v12212_v14  ;;  %v12253_v16 = vmul.f32 0.2, %v12214_v44 }
 0x607   :  { %15076 = vst [vmem:[#allocation33_spill] sm:$0xff] %v12230_v30  ;;  %15077 = vst [vmem:[#allocation114_spill] sm:$0xff] %v12232_v52  ;;  %v12256_v0 = vmul.f32 0.2, %v12216_v38  ;;  %v12259_v53 = vmul.f32 0.2, %v12218_v36 }
 0x608   :  { %15078 = vst [vmem:[#allocation108_spill] sm:$0xff] %v12235_v28  ;;  %15079 = vst [vmem:[#allocation40_spill] sm:$0xff] %v12238_v37  ;;  %v12264_v20 = vmul.f32 0.2, %v12220_v31  ;;  %v12267_v58 = vmul.f32 0.2, %v12222_v15  ;;  %v12321_v37 = vadd.f32 %v3612_v1, %v12184_v3 }
 0x609   :  { %15080 = vst [vmem:[#allocation208_spill] sm:$0xff] %v12241_v10  ;;  %15081 = vst [vmem:[#allocation209_spill] sm:$0xff] %v12253_v16  ;;  %v12270_v34 = vmul.f32 0.2, %v12224_v26  ;;  %v12275_v47 = vmul.f32 0.2, %v12226_v11  ;;  %v3721_v10 = vrot.slane %v3692_v22, %v14889_v9 }
 0x60a   :  { %15082 = vst [vmem:[#allocation210_spill] sm:$0xff] %v12256_v0  ;;  %15083 = vst [vmem:[#allocation211_spill] sm:$0xff] %v12259_v53  ;;  %v12278_v6 = vmul.f32 0.2, %v12228_v60  ;;  %v12281_v56 = vmul.f32 0.2, %v12230_v30 }
 0x60b   :  { %15084 = vst [vmem:[#allocation212_spill] sm:$0xff] %v12264_v20  ;;  %15085 = vst [vmem:[#allocation213_spill] sm:$0xff] %v12267_v58  ;;  %v12286_v18 = vmul.f32 0.2, %v12232_v52  ;;  %v15091_v51 = vrot.slane %v12168_v62, 1  ;;  %v15095_v30 = vld [vmem:[#allocation115_spill] sm:$0xff]  ;;  %v3780_v26 = vmul.f32 %v3721_v10, %v15098_v40 }
 0x60c   :  { %15086 = vst [vmem:[#allocation214_spill] sm:$0xff] %v12270_v34  ;;  %15087 = vst [vmem:[#allocation215_spill] sm:$0xff] %v12275_v47  ;;  %v15092_v47 = vld [vmem:[#allocation83_spill] sm:$0xff]  ;;  %v3756_v28 = vmul.f32 %v3721_v10, %v15095_v30  ;;  %v15097_v52 = vld [vmem:[#allocation110_spill] sm:$0xff]  ;;  %v3836_v30 = vmul.f32 %v3721_v10, %v11940_v4  ;;  %v12454_v36 = vsub.s32 5, %v15060_v61 }
 0x60d   :  { %15088 = vst [vmem:[#allocation216_spill] sm:$0xff] %v12278_v6  ;;  %15089 = vst [vmem:[#allocation217_spill] sm:$0xff] %v12281_v56  ;;  %v3577_v34 = vadd.f32 %v15091_v51, %v12168_v62  ;;  %v3732_v25 = vmul.f32 %v3721_v10, %v15092_v47  ;;  %v15093_v6 = vld [vmem:[#allocation36_spill] sm:$0xff]  ;;  %v3748_v56 = vmul.f32 %v3721_v10, %v15094_v8  ;;  %v15099_v58 = vld [vmem:[#allocation138_spill] sm:$0xff] }
 0x60e   :  { %15090 = vst [vmem:[#allocation218_spill] sm:$0xff] %v12286_v18  ;;  %v3740_v60 = vmul.f32 %v3721_v10, %v15093_v6  ;;  %v15096_v18 = vld [vmem:[#allocation42_spill] sm:$0xff]  ;;  %v3772_v11 = vmul.f32 %v3721_v10, %v15097_v52  ;;  %v3788_v15 = vmul.f32 %v3721_v10, %v15099_v58  ;;  %v15100_v62 = vld [vmem:[#allocation141_spill] sm:$0xff]  ;;  %v15102_v20 = vld [vmem:[#allocation148_spill] sm:$0xff]  ;;  %v3828_v8 = vmul.f32 %v3721_v10, %v11937_v49 }
 0x60f   :  { %v3764_v22 = vmul.f32 %v3721_v10, %v15096_v18  ;;  %v3796_v51 = vmul.f32 %v3721_v10, %v15100_v62  ;;  %v15101_v3 = vld [vmem:[#allocation86_spill] sm:$0xff]  ;;  %v3812_v47 = vmul.f32 %v3721_v10, %v15102_v20  ;;  %v15103_v31 = vld [vmem:[#allocation171_spill] sm:$0xff]  ;;  %v3844_v18 = vmul.f32 %v3721_v10, %v11945_v12  ;;  %15136 = vst [vmem:[#allocation239_spill] sm:$0xff] %v12454_v36 }
 0x610   :  { %v3804_v1 = vmul.f32 %v3721_v10, %v15101_v3  ;;  %v3820_v6 = vmul.f32 %v3721_v10, %v15103_v31  ;;  %v3852_v52 = vmul.f32 %v3721_v10, %v11948_v45  ;;  %v12339_v53 = vadd.f32 %v3883_v2, %v3732_v25 }
 0x611   :  { %v12341_v40 = vadd.f32 %v3883_v2, %v3740_v60  ;;  %v12343_v58 = vadd.f32 %v3883_v2, %v3748_v56  ;;  %v12345_v62 = vadd.f32 %v3883_v2, %v3756_v28  ;;  %v12347_v3 = vadd.f32 %v3883_v2, %v3764_v22 }
 0x612   :  { %15104 = vst [vmem:[#allocation83_spill] sm:$0xff] %v12339_v53  ;;  %v12349_v20 = vadd.f32 %v3883_v2, %v3772_v11  ;;  %v3625_v31 = vmul.f32 0.0078125, %v3577_v34  ;;  %v12351_v49 = vadd.f32 %v3883_v2, %v3780_v26  ;;  %v12353_v4 = vadd.f32 %v3883_v2, %v3788_v15 }
 0x613   :  { %15105 = vst [vmem:[#allocation36_spill] sm:$0xff] %v12341_v40  ;;  %15106 = vst [vmem:[#allocation91_spill] sm:$0xff] %v12343_v58  ;;  %v12355_v12 = vadd.f32 %v3883_v2, %v3796_v51  ;;  %v12357_v45 = vadd.f32 %v3883_v2, %v3804_v1  ;;  %v12359_v25 = vadd.f32 %v3883_v2, %v3812_v47  ;;  %v12370_v11 = vmul.f32 0.2, %v12339_v53 }
 0x614   :  { %15107 = vst [vmem:[#allocation115_spill] sm:$0xff] %v12345_v62  ;;  %15108 = vst [vmem:[#allocation42_spill] sm:$0xff] %v12347_v3  ;;  %v12361_v60 = vadd.f32 %v3883_v2, %v3820_v6  ;;  %v12363_v10 = vadd.f32 %v3883_v2, %v3828_v8  ;;  %v12365_v28 = vadd.f32 %v3883_v2, %v3836_v30  ;;  %v12373_v15 = vmul.f32 0.2, %v12341_v40 }
 0x615   :  { %15109 = vst [vmem:[#allocation110_spill] sm:$0xff] %v12349_v20  ;;  %15110 = vst [vmem:[#allocation56_spill] sm:$0xff] %v12351_v49  ;;  %v12367_v56 = vadd.f32 %v3883_v2, %v3844_v18  ;;  %v12376_v26 = vmul.f32 0.2, %v12343_v58  ;;  %v12378_v34 = vadd.f32 %v3883_v2, %v3852_v52  ;;  %v12381_v22 = vmul.f32 0.2, %v12345_v62 }
 0x616   :  { %15111 = vst [vmem:[#allocation138_spill] sm:$0xff] %v12353_v4  ;;  %15112 = vst [vmem:[#allocation141_spill] sm:$0xff] %v12355_v12  ;;  %v12384_v51 = vmul.f32 0.2, %v12347_v3  ;;  %v12387_v1 = vmul.f32 0.2, %v12349_v20  ;;  %v3669_v40 = vrot.slane %v12157_v7, %v12454_v36 }
 0x617   :  { %15113 = vst [vmem:[#allocation86_spill] sm:$0xff] %v12357_v45  ;;  %15114 = vst [vmem:[#allocation148_spill] sm:$0xff] %v12359_v25  ;;  %v12390_v47 = vmul.f32 0.2, %v12351_v49  ;;  %v12393_v6 = vmul.f32 0.2, %v12353_v4 }
 0x618   :  { %15115 = vst [vmem:[#allocation171_spill] sm:$0xff] %v12361_v60  ;;  %15116 = vst [vmem:[#allocation219_spill] sm:$0xff] %v12363_v10  ;;  %v12396_v8 = vmul.f32 0.2, %v12355_v12  ;;  %v12401_v30 = vmul.f32 0.2, %v12357_v45 }
 0x619   :  { %15117 = vst [vmem:[#allocation220_spill] sm:$0xff] %v12365_v28  ;;  %15118 = vst [vmem:[#allocation221_spill] sm:$0xff] %v12367_v56  ;;  %v12404_v18 = vmul.f32 0.2, %v12359_v25  ;;  %v12407_v52 = vmul.f32 0.2, %v12361_v60 }
 0x61a   :  { %15119 = vst [vmem:[#allocation222_spill] sm:$0xff] %v12370_v11  ;;  %15120 = vst [vmem:[#allocation223_spill] sm:$0xff] %v12373_v15  ;;  %v12412_v0 = vmul.f32 0.2, %v12363_v10  ;;  %v12415_v38 = vmul.f32 0.2, %v12365_v28 }
 0x61b   :  { %15121 = vst [vmem:[#allocation224_spill] sm:$0xff] %v12376_v26  ;;  %15122 = vst [vmem:[#allocation225_spill] sm:$0xff] %v12378_v34  ;;  %v12418_v2 = vmul.f32 0.2, %v12367_v56  ;;  %v12423_v53 = vmul.f32 0.2, %v12378_v34 }
 0x61c   :  { %15123 = vst [vmem:[#allocation226_spill] sm:$0xff] %v12381_v22  ;;  %15124 = vst [vmem:[#allocation227_spill] sm:$0xff] %v12384_v51  ;;  %v3614_v26 = vrot.slane %v12321_v37, 4  ;;  %v15139_v34 = vld [vmem:[#allocation38_spill] sm:$0xff]  ;;  %v15140_v10 = vld [vmem:[#allocation80_spill] sm:$0xff] }
 0x61d   :  { %15125 = vst [vmem:[#allocation228_spill] sm:$0xff] %v12387_v1  ;;  %15126 = vst [vmem:[#allocation229_spill] sm:$0xff] %v12390_v47  ;;  %v15154_v3 = vld [vmem:[#allocation60_spill] sm:$0xff]  ;;  %v15156_v45 = vld [vmem:[#allocation139_spill] sm:$0xff] }
 0x61e   :  { %15127 = vst [vmem:[#allocation230_spill] sm:$0xff] %v12393_v6  ;;  %15128 = vst [vmem:[#allocation231_spill] sm:$0xff] %v12396_v8  ;;  %v3633_v8 = vadd.f32 1e-05, %v3625_v31  ;;  %v3615_v16 = vadd.f32 %v3614_v26, %v12321_v37  ;;  %v15137_v26 = vld [vmem:[#allocation174_spill] sm:$0xff]  ;;  %v15153_v6 = vsub.s32 7, %v15060_v61 }
 0x61f   :  { %15129 = vst [vmem:[#allocation232_spill] sm:$0xff] %v12401_v30  ;;  %15130 = vst [vmem:[#allocation233_spill] sm:$0xff] %v12404_v18  ;;  %v15159_v58 = vld [vmem:[#allocation153_spill] sm:$0xff] }
 0x620   :  { %15131 = vst [vmem:[#allocation234_spill] sm:$0xff] %v12407_v52  ;;  %15132 = vst [vmem:[#allocation235_spill] sm:$0xff] %v12412_v0  ;;  %8323 = vrsqrt.f32 %v3633_v8  ;;  %v3616_v18 = vrot.slane %v3615_v16, 2  ;;  %v3879_v8 = vrot.slane %v12173_v50, %v12454_v36  ;;  %v3887_v51 = vrot.slane %v12173_v50, %v15153_v6  ;;  %v15157_v6 = vld [vmem:[#allocation113_spill] sm:$0xff] }
 0x621   :  { %15133 = vst [vmem:[#allocation236_spill] sm:$0xff] %v12415_v38  ;;  %15134 = vst [vmem:[#allocation237_spill] sm:$0xff] %v12418_v2 }
 0x622   :  { %15135 = vst [vmem:[#allocation238_spill] sm:$0xff] %v12423_v53  ;;  %v3617_v15 = vadd.f32 %v3616_v18, %v3615_v16  ;;  %v15138_v16 = vld [vmem:[#allocation107_spill] sm:$0xff] }
 0x624   :  { %v3618_v0 = vrot.slane %v3617_v15, 1 }
 0x626   :  { %v3619_v38 = vadd.f32 %v3618_v0, %v3617_v15  ;;  %v15141_v15 = vld [vmem:[#allocation84_spill] sm:$0xff] }
 0x628   :  { %v3627_v2 = vmul.f32 0.0078125, %v3619_v38 }
 0x62a   :  { %v8324_v44 = vpop.eup %8323  ;;  %v3635_v11 = vadd.f32 1e-05, %v3627_v2 }
 0x62b   :  { %v3691_v56 = vmul.f32 %v8324_v44, %v3669_v40  ;;  %v15142_v44 = vld [vmem:[#allocation37_spill] sm:$0xff] }
 0x62c   :  { %8325 = vrsqrt.f32 %v3635_v11 }
 0x62d   :  { %v3717_v31 = vrot.slane %v3691_v56, %v14889_v9 }
 0x62f   :  { %v3731_v53 = vmul.f32 %v3717_v31, %v15137_v26  ;;  %v3739_v18 = vmul.f32 %v3717_v31, %v15138_v16  ;;  %v3747_v28 = vmul.f32 %v3717_v31, %v15139_v34  ;;  %v3755_v0 = vmul.f32 %v3717_v31, %v15140_v10 }
 0x630   :  { %v3763_v38 = vmul.f32 %v3717_v31, %v15141_v15  ;;  %v3771_v40 = vmul.f32 %v3717_v31, %v15142_v44  ;;  %v3779_v56 = vmul.f32 %v3717_v31, %v11987_v23  ;;  %v3787_v2 = vmul.f32 %v3717_v31, %v11990_v55 }
 0x631   :  { %v3795_v11 = vmul.f32 %v3717_v31, %v11993_v35  ;;  %v3803_v37 = vmul.f32 %v3717_v31, %v11996_v27  ;;  %v3811_v26 = vmul.f32 %v3717_v31, %v11999_v5  ;;  %v3819_v16 = vmul.f32 %v3717_v31, %v12002_v57 }
 0x632   :  { %v3827_v34 = vmul.f32 %v3717_v31, %v12005_v54  ;;  %v3835_v10 = vmul.f32 %v3717_v31, %v12008_v39  ;;  %v3843_v15 = vmul.f32 %v3717_v31, %v12013_v33  ;;  %v3851_v44 = vmul.f32 %v3717_v31, %v12016_v42 }
 0x633   :  { %v12478_v36 = vadd.f32 %v3879_v8, %v3731_v53  ;;  %v12480_v23 = vadd.f32 %v3879_v8, %v3739_v18  ;;  %v12482_v55 = vadd.f32 %v3879_v8, %v3747_v28  ;;  %v12484_v35 = vadd.f32 %v3879_v8, %v3755_v0 }
 0x634   :  { %v12486_v27 = vadd.f32 %v3879_v8, %v3763_v38  ;;  %v12488_v5 = vadd.f32 %v3879_v8, %v3771_v40  ;;  %v15143_v57 = vsub.s32 7, %v15060_v61  ;;  %v12493_v39 = vadd.f32 %v3879_v8, %v3779_v56 }
 0x635   :  { %v12495_v33 = vadd.f32 %v3879_v8, %v3787_v2  ;;  %v12497_v42 = vadd.f32 %v3879_v8, %v3795_v11  ;;  %v12499_v53 = vadd.f32 %v3879_v8, %v3803_v37  ;;  %v12501_v28 = vadd.f32 %v3879_v8, %v3811_v26 }
 0x636   :  { %v3677_v54 = vrot.slane %v12157_v7, %v15143_v57  ;;  %v12503_v31 = vadd.f32 %v3879_v8, %v3819_v16  ;;  %v12505_v18 = vadd.f32 %v3879_v8, %v3827_v34  ;;  %v12507_v0 = vadd.f32 %v3879_v8, %v3835_v10  ;;  %v8326_v37 = vpop.eup %8325 }
 0x637   :  { %v12509_v38 = vadd.f32 %v3879_v8, %v3843_v15  ;;  %v12512_v7 = vmul.f32 0.2, %v12478_v36  ;;  %v12515_v40 = vmul.f32 0.2, %v12480_v23  ;;  %v12518_v56 = vmul.f32 0.2, %v12482_v55 }
 0x638   :  { %15144 = vst [vmem:[#allocation174_spill] sm:$0xff] %v12505_v18  ;;  %15145 = vst [vmem:[#allocation107_spill] sm:$0xff] %v12507_v0  ;;  %v12520_v2 = vadd.f32 %v3879_v8, %v3851_v44  ;;  %v12523_v11 = vmul.f32 0.2, %v12484_v35  ;;  %v12526_v26 = vmul.f32 0.2, %v12486_v27  ;;  %v3693_v20 = vmul.f32 %v8326_v37, %v3677_v54 }
 0x639   :  { %15146 = vst [vmem:[#allocation38_spill] sm:$0xff] %v12509_v38  ;;  %v12529_v16 = vmul.f32 0.2, %v12488_v5  ;;  %v12532_v34 = vmul.f32 0.2, %v12493_v39  ;;  %v15155_v37 = vld [vmem:[#allocation136_spill] sm:$0xff] }
 0x63a   :  { %15147 = vst [vmem:[#allocation80_spill] sm:$0xff] %v12520_v2  ;;  %v12535_v10 = vmul.f32 0.2, %v12495_v33  ;;  %v12538_v15 = vmul.f32 0.2, %v12497_v42  ;;  %v3725_v1 = vrot.slane %v3693_v20, %v14889_v9  ;;  %v15158_v9 = vld [vmem:[#allocation54_spill] sm:$0xff] }
 0x63b   :  { %v12543_v44 = vmul.f32 0.2, %v12499_v53  ;;  %v12546_v57 = vmul.f32 0.2, %v12501_v28  ;;  %v12549_v52 = vmul.f32 0.2, %v12503_v31 }
 0x63c   :  { %v12554_v25 = vmul.f32 0.2, %v12505_v18  ;;  %v12557_v30 = vmul.f32 0.2, %v12507_v0  ;;  %v12560_v8 = vmul.f32 0.2, %v12509_v38  ;;  %v3733_v60 = vmul.f32 %v3725_v1, %v12057_v41 }
 0x63d   :  { %15148 = vst [vmem:[#allocation84_spill] sm:$0xff] %v12549_v52  ;;  %v12565_v12 = vmul.f32 0.2, %v12520_v2  ;;  %v3741_v4 = vmul.f32 %v3725_v1, %v15154_v3  ;;  %v3749_v22 = vmul.f32 %v3725_v1, %v12063_v43  ;;  %v3757_v47 = vmul.f32 %v3725_v1, %v12066_v29  ;;  %v15161_v2 = vld [vmem:[#allocation175_spill] sm:$0xff] }
 0x63e   :  { %15149 = vst [vmem:[#allocation37_spill] sm:$0xff] %v12554_v25  ;;  %15150 = vst [vmem:[#allocation240_spill] sm:$0xff] %v12557_v30  ;;  %v3765_v49 = vmul.f32 %v3725_v1, %v12069_v19  ;;  %v3773_v62 = vmul.f32 %v3725_v1, %v12072_v13  ;;  %v3781_v54 = vmul.f32 %v3725_v1, %v12075_v17 }
 0x63f   :  { %15151 = vst [vmem:[#allocation241_spill] sm:$0xff] %v12560_v8  ;;  %15152 = vst [vmem:[#allocation242_spill] sm:$0xff] %v12565_v12  ;;  %v3789_v20 = vmul.f32 %v3725_v1, %v12078_v32  ;;  %v3797_v61 = vmul.f32 %v3725_v1, %v15155_v37  ;;  %v3805_v50 = vmul.f32 %v3725_v1, %v15156_v45  ;;  %v15160_v12 = vld [vmem:[#allocation172_spill] sm:$0xff] }
 0x640   :  { %v3813_v41 = vmul.f32 %v3725_v1, %v15157_v6  ;;  %v3821_v3 = vmul.f32 %v3725_v1, %v15158_v9  ;;  %v3829_v43 = vmul.f32 %v3725_v1, %v15159_v58  ;;  %v3837_v29 = vmul.f32 %v3725_v1, %v15160_v12  ;;  %v15162_v8 = vld [vmem:[#allocation92_spill] sm:$0xff] }
 0x641   :  { %v3845_v19 = vmul.f32 %v3725_v1, %v15161_v2  ;;  %v3853_v13 = vmul.f32 %v3725_v1, %v15162_v8  ;;  %v12613_v38 = vadd.f32 %v3887_v51, %v3733_v60  ;;  %v12615_v17 = vadd.f32 %v3887_v51, %v3741_v4 }
 0x642   :  { %v12617_v32 = vadd.f32 %v3887_v51, %v3749_v22  ;;  %v12619_v37 = vadd.f32 %v3887_v51, %v3757_v47  ;;  %v12621_v45 = vadd.f32 %v3887_v51, %v3765_v49  ;;  %v12623_v6 = vadd.f32 %v3887_v51, %v3773_v62 }
 0x643   :  { %15163 = vst [vmem:[#allocation60_spill] sm:$0xff] %v12613_v38  ;;  %15164 = vst [vmem:[#allocation136_spill] sm:$0xff] %v12615_v17  ;;  %v12625_v9 = vadd.f32 %v3887_v51, %v3781_v54  ;;  %v12627_v58 = vadd.f32 %v3887_v51, %v3789_v20  ;;  %v12629_v12 = vadd.f32 %v3887_v51, %v3797_v61  ;;  %v12644_v62 = vmul.f32 0.2, %v12613_v38 }
 0x644   :  { %v12631_v2 = vadd.f32 %v3887_v51, %v3805_v50  ;;  %v12633_v60 = vadd.f32 %v3887_v51, %v3813_v41  ;;  %v12635_v4 = vadd.f32 %v3887_v51, %v3821_v3  ;;  %v12637_v22 = vadd.f32 %v3887_v51, %v3829_v43 }
 0x645   :  { %v12639_v1 = vadd.f32 %v3887_v51, %v3837_v29  ;;  %v12641_v49 = vadd.f32 %v3887_v51, %v3845_v19  ;;  %15171 = vst [vmem:[#allocation92_spill] sm:$0xff] %v12644_v62  ;;  %v12647_v47 = vmul.f32 0.2, %v12615_v17  ;;  %v12650_v8 = vmul.f32 0.2, %v12617_v32 }
 0x646   :  { %15165 = vst [vmem:[#allocation139_spill] sm:$0xff] %v12631_v2  ;;  %15166 = vst [vmem:[#allocation113_spill] sm:$0xff] %v12633_v60  ;;  %v12652_v54 = vadd.f32 %v3887_v51, %v3853_v13  ;;  %v12655_v20 = vmul.f32 0.2, %v12619_v37  ;;  %v12658_v61 = vmul.f32 0.2, %v12621_v45 }
 0x647   :  { %15167 = vst [vmem:[#allocation54_spill] sm:$0xff] %v12635_v4  ;;  %15168 = vst [vmem:[#allocation153_spill] sm:$0xff] %v12637_v22  ;;  %v12661_v50 = vmul.f32 0.2, %v12623_v6  ;;  %v12664_v41 = vmul.f32 0.2, %v12625_v9 }
 0x648   :  { %15169 = vst [vmem:[#allocation172_spill] sm:$0xff] %v12639_v1  ;;  %15170 = vst [vmem:[#allocation175_spill] sm:$0xff] %v12641_v49  ;;  %v12667_v3 = vmul.f32 0.2, %v12627_v58  ;;  %v12670_v43 = vmul.f32 0.2, %v12629_v12 }
 0x649   :  { %15172 = vst [vmem:[#allocation243_spill] sm:$0xff] %v12647_v47  ;;  %15173 = vst [vmem:[#allocation244_spill] sm:$0xff] %v12650_v8  ;;  %v12675_v29 = vmul.f32 0.2, %v12631_v2  ;;  %v12678_v19 = vmul.f32 0.2, %v12633_v60 }
 0x64a   :  { %15174 = vst [vmem:[#allocation245_spill] sm:$0xff] %v12652_v54  ;;  %v12681_v13 = vmul.f32 0.2, %v12635_v4  ;;  %v12686_v0 = vmul.f32 0.2, %v12637_v22 }
 0x64b   :  { %15175 = vst [vmem:[#allocation246_spill] sm:$0xff] %v12675_v29  ;;  %15176 = vst [vmem:[#allocation247_spill] sm:$0xff] %v12678_v19  ;;  %v12689_v25 = vmul.f32 0.2, %v12639_v1  ;;  %v12692_v51 = vmul.f32 0.2, %v12641_v49 }
 0x64c   :  { %15177 = vst [vmem:[#allocation248_spill] sm:$0xff] %v12681_v13  ;;  %15178 = vst [vmem:[#allocation249_spill] sm:$0xff] %v12686_v0  ;;  %v12697_v38 = vmul.f32 0.2, %v12652_v54 }
 0x64d   :  { %15179 = vst [vmem:[#allocation250_spill] sm:$0xff] %v12689_v25  ;;  %15180 = vst [vmem:[#allocation251_spill] sm:$0xff] %v12692_v51 }
 0x64e   :  { %15181 = vst [vmem:[#allocation252_spill] sm:$0xff] %v12697_v38 }
 0x64f   :  { %8802 = dma.done.wait [#allocation4 + $0x1], 57344 }
 0x650   :  { %8803 = vsyncadd [#allocation4 + $0x1], 4294909952  ;;  %v15182_v8 = vld [vmem:[#allocation111_spill] sm:$0xff]  ;;  %v15183_v29 = vld [vmem:[#allocation73_spill] sm:$0xff]  ;;  %s8834_s9 = smov [#allocation20]  }
 0x651   :  { %v15184_v18 = vmax.f32 %v15182_v8, %v15183_v29  ;;  %v15185_v19 = vld [vmem:[#allocation66_spill] sm:$0xff]  ;;  %v15186_v60 = vld [vmem:[#allocation177_spill] sm:$0xff]  ;;  %v4351_v47 = vld [vmem:[#allocation3 + $0x18] sm:$0xff]  ;;  %s7110_s27 = sshll.u32 %s8834_s9, 4  ;;  %s7111_s27 = int_to_ptr.vmem [resolvable:$true] %s7110_s27 }
 0x652   :  { %v15187_v30 = vmax.f32 %v15185_v19, %v15186_v60  ;;  %v4349_v17 = vld [vmem:[#allocation3 + $0x8] sm:$0xff]  ;;  %v4348_v52 = vld [vmem:[#allocation3] sm:$0xff]  ;;  %5285 = vmatprep.subr.bf16.mxu0 %v4351_v47  ;;  %v4350_v62 = vld [vmem:[#allocation3 + $0x10] sm:$0xff]  ;;  %s8768_s8 = scalar_lea.vmem %s7111_s27, 7168  ;;  %p8773_p3 = scmp.lt.s32.totalorder %s7111_s27, %s7111_s27 }
 0x653   :  { %4833 = vmatprep.subr.bf16.mxu1 %v4349_v17  ;;  %v4356_v38 = vld [vmem:[#allocation3 + $0x40] sm:$0xff]  ;;  %v4358_v54 = vld [vmem:[#allocation3 + $0x50] sm:$0xff]  ;;  %5286 = vmatpush1.bf16.msra.mxu0 %v4350_v62  ;;  %v4355_v8 = vld [vmem:[#allocation3 + $0x38] sm:$0xff]  ;;  %p8769_p2 = scmp.ne.s32.totalorder %s7111_s27, %s8768_s8  ;;  %p8774_p4 = scmp.lt.s32.totalorder %s8768_s8, %s8768_s8 }
 0x654   :  { %v12731_v13 = vpack.c.bf16 %v15187_v30, %v15184_v18  ;;  %4834 = vmatpush1.bf16.msra.mxu1 %v4348_v52  ;;  %5287 = vmatprep.subr.bf16.mxu0 %v4358_v54  ;;  %v4357_v60 = vld [vmem:[#allocation3 + $0x48] sm:$0xff]  ;;  %v4363_v30 = vld [vmem:[#allocation3 + $0x78] sm:$0xff]  ;;  %v4362_v29 = vld [vmem:[#allocation3 + $0x70] sm:$0xff] }
 0x655   :  { %4835 = vmatprep.subr.bf16.mxu1 %v4356_v38  ;;  %v4365_v18 = vld [vmem:[#allocation3 + $0x88] sm:$0xff]  ;;  %v4364_v19 = vld [vmem:[#allocation3 + $0x80] sm:$0xff]  ;;  %v4371_v62 = vld [vmem:[#allocation3 + $0xb8] sm:$0xff]  ;;  %p8775_p5 = por %p8774_p4, %p8773_p3 }
 0x656   :  { %15188 = vst [vmem:[#allocation111_spill] sm:$0xff] %v12731_v13  ;;  %4865 = vmatprep.mubr.bf16.mxu1 %v12731_v13  ;;  %5317 = vmatprep.mubr.bf16.mxu0 %v12731_v13  ;;  %v4370_v13 = vld [vmem:[#allocation3 + $0xb0] sm:$0xff]  ;;  %v4372_v17 = vld [vmem:[#allocation3 + $0xc0] sm:$0xff]  ;;  %v4369_v52 = vld [vmem:[#allocation3 + $0xa8] sm:$0xff] }
 0x657   :  { %5288 = vmatpush1.bf16.msra.mxu0 %v4357_v60  ;;  %v4377_v38 = vld [vmem:[#allocation3 + $0xe8] sm:$0xff]  ;;  %v4379_v47 = vld [vmem:[#allocation3 + $0xf8] sm:$0xff]  ;;  %v4376_v54 = vld [vmem:[#allocation3 + $0xe0] sm:$0xff]  ;;  %p8776_p6 = pnand %p8775_p5, %p8769_p2 }
 0x658   :  { %4836 = vmatpush1.bf16.msra.mxu1 %v4355_v8  ;;  %5289 = vmatprep.subr.bf16.mxu0 %v4365_v18  ;;  %v4378_v8 = vld [vmem:[#allocation3 + $0xf0] sm:$0xff]  ;;  %v4384_v60 = vld [vmem:[#allocation3 + $0x120] sm:$0xff]  ;;  %v4383_v18 = vld [vmem:[#allocation3 + $0x118] sm:$0xff] }
 0x659   :  { %4837 = vmatprep.subr.bf16.mxu1 %v4363_v30  ;;  %v4386_v30 = vld [vmem:[#allocation3 + $0x130] sm:$0xff]  ;;  %v15190_v51 = vld [vmem:[#allocation120_spill] sm:$0xff]  ;;  %v15199_v22 = vld [vmem:[#allocation53_spill] sm:$0xff] }
 0x65a   :  { %v15192_v25 = vld [vmem:[#allocation64_spill] sm:$0xff]  ;;  %v15197_v1 = vld [vmem:[#allocation178_spill] sm:$0xff]  ;;  %v15200_v4 = vld [vmem:[#allocation179_spill] sm:$0xff] }
 0x65b   :  { %5290 = vmatpush1.bf16.msra.mxu0 %v4364_v19  ;;  %v4393_v19 = vld [vmem:[#allocation3 + $0x168] sm:$0xff]  ;;  %v15201_v2 = vmax.f32 %v15199_v22, %v15200_v4  ;;  %v15207_v22 = vld [vmem:[#allocation123_spill] sm:$0xff] }
 0x65c   :  { %4838 = vmatpush1.bf16.msra.mxu1 %v4362_v29  ;;  %5291 = vmatprep.subr.bf16.mxu0 %v4372_v17  ;;  %v4385_v29 = vld [vmem:[#allocation3 + $0x128] sm:$0xff]  ;;  %v4390_v17 = vld [vmem:[#allocation3 + $0x150] sm:$0xff] }
 0x65d   :  { %4839 = vmatprep.subr.bf16.mxu1 %v4370_v13  ;;  %v4391_v13 = vld [vmem:[#allocation3 + $0x158] sm:$0xff]  ;;  %v15204_v4 = vld [vmem:[#allocation122_spill] sm:$0xff] }
 0x65f   :  { %5292 = vmatpush1.bf16.msra.mxu0 %v4371_v62  ;;  %v4398_v62 = vld [vmem:[#allocation3 + $0x190] sm:$0xff] }
 0x660   :  { %4840 = vmatpush1.bf16.msra.mxu1 %v4369_v52  ;;  %5293 = vmatprep.subr.bf16.mxu0 %v4379_v47  ;;  %v4392_v52 = vld [vmem:[#allocation3 + $0x160] sm:$0xff]  ;;  %v4397_v47 = vld [vmem:[#allocation3 + $0x188] sm:$0xff] }
 0x661   :  { %4841 = vmatprep.subr.bf16.mxu1 %v4377_v38  ;;  %v4400_v38 = vld [vmem:[#allocation3 + $0x1a0] sm:$0xff] }
 0x663   :  { %5294 = vmatpush1.bf16.msra.mxu0 %v4378_v8  ;;  %v4405_v8 = vld [vmem:[#allocation3 + $0x1c8] sm:$0xff] }
 0x664   :  { %4842 = vmatpush1.bf16.msra.mxu1 %v4376_v54  ;;  %5295 = vmatprep.subr.bf16.mxu0 %v4386_v30  ;;  %v4399_v54 = vld [vmem:[#allocation3 + $0x198] sm:$0xff]  ;;  %v4404_v30 = vld [vmem:[#allocation3 + $0x1c0] sm:$0xff] }
 0x665   :  { %4843 = vmatprep.subr.bf16.mxu1 %v4384_v60  ;;  %v4407_v60 = vld [vmem:[#allocation3 + $0x1d8] sm:$0xff] }
 0x667   :  { %5296 = vmatpush1.bf16.msra.mxu0 %v4385_v29  ;;  %v4412_v29 = vld [vmem:[#allocation3 + $0x200] sm:$0xff] }
 0x668   :  { %4844 = vmatpush1.bf16.msra.mxu1 %v4383_v18  ;;  %5297 = vmatprep.subr.bf16.mxu0 %v4393_v19  ;;  %v4406_v18 = vld [vmem:[#allocation3 + $0x1d0] sm:$0xff]  ;;  %v4411_v19 = vld [vmem:[#allocation3 + $0x1f8] sm:$0xff] }
 0x669   :  { %4845 = vmatprep.subr.bf16.mxu1 %v4391_v13  ;;  %v4414_v13 = vld [vmem:[#allocation3 + $0x210] sm:$0xff] }
 0x66b   :  { %5298 = vmatpush1.bf16.msra.mxu0 %v4392_v52  ;;  %v4419_v52 = vld [vmem:[#allocation3 + $0x238] sm:$0xff] }
 0x66c   :  { %4846 = vmatpush1.bf16.msra.mxu1 %v4390_v17  ;;  %5299 = vmatprep.subr.bf16.mxu0 %v4400_v38  ;;  %v4413_v17 = vld [vmem:[#allocation3 + $0x208] sm:$0xff]  ;;  %v4418_v38 = vld [vmem:[#allocation3 + $0x230] sm:$0xff] }
 0x66d   :  { %4847 = vmatprep.subr.bf16.mxu1 %v4398_v62  ;;  %v4421_v62 = vld [vmem:[#allocation3 + $0x248] sm:$0xff] }
 0x66f   :  { %5300 = vmatpush1.bf16.msra.mxu0 %v4399_v54  ;;  %v4426_v54 = vld [vmem:[#allocation3 + $0x270] sm:$0xff] }
 0x670   :  { %4848 = vmatpush1.bf16.msra.mxu1 %v4397_v47  ;;  %5301 = vmatprep.subr.bf16.mxu0 %v4407_v60  ;;  %v4420_v47 = vld [vmem:[#allocation3 + $0x240] sm:$0xff]  ;;  %v4425_v60 = vld [vmem:[#allocation3 + $0x268] sm:$0xff] }
 0x671   :  { %4849 = vmatprep.subr.bf16.mxu1 %v4405_v8  ;;  %v4428_v8 = vld [vmem:[#allocation3 + $0x280] sm:$0xff] }
 0x673   :  { %5302 = vmatpush1.bf16.msra.mxu0 %v4406_v18  ;;  %v4433_v18 = vld [vmem:[#allocation3 + $0x2a8] sm:$0xff] }
 0x674   :  { %4850 = vmatpush1.bf16.msra.mxu1 %v4404_v30  ;;  %5303 = vmatprep.subr.bf16.mxu0 %v4414_v13  ;;  %v4427_v30 = vld [vmem:[#allocation3 + $0x278] sm:$0xff]  ;;  %v4432_v13 = vld [vmem:[#allocation3 + $0x2a0] sm:$0xff] }
 0x675   :  { %4851 = vmatprep.subr.bf16.mxu1 %v4412_v29  ;;  %v4435_v29 = vld [vmem:[#allocation3 + $0x2b8] sm:$0xff] }
 0x677   :  { %5304 = vmatpush1.bf16.msra.mxu0 %v4413_v17  ;;  %v4440_v17 = vld [vmem:[#allocation3 + $0x2e0] sm:$0xff] }
 0x678   :  { %4852 = vmatpush1.bf16.msra.mxu1 %v4411_v19  ;;  %5305 = vmatprep.subr.bf16.mxu0 %v4421_v62  ;;  %v4434_v19 = vld [vmem:[#allocation3 + $0x2b0] sm:$0xff]  ;;  %v4439_v62 = vld [vmem:[#allocation3 + $0x2d8] sm:$0xff] }
 0x679   :  { %4853 = vmatprep.subr.bf16.mxu1 %v4419_v52  ;;  %v4442_v52 = vld [vmem:[#allocation3 + $0x2f0] sm:$0xff] }
 0x67b   :  { %5306 = vmatpush1.bf16.msra.mxu0 %v4420_v47  ;;  %v4447_v47 = vld [vmem:[#allocation3 + $0x318] sm:$0xff] }
 0x67c   :  { %4854 = vmatpush1.bf16.msra.mxu1 %v4418_v38  ;;  %5307 = vmatprep.subr.bf16.mxu0 %v4428_v8  ;;  %v4441_v38 = vld [vmem:[#allocation3 + $0x2e8] sm:$0xff]  ;;  %v4446_v8 = vld [vmem:[#allocation3 + $0x310] sm:$0xff] }
 0x67d   :  { %4855 = vmatprep.subr.bf16.mxu1 %v4426_v54  ;;  %v4449_v54 = vld [vmem:[#allocation3 + $0x328] sm:$0xff] }
 0x67f   :  { %5308 = vmatpush1.bf16.msra.mxu0 %v4427_v30  ;;  %v4454_v30 = vld [vmem:[#allocation3 + $0x350] sm:$0xff] }
 0x680   :  { %4856 = vmatpush1.bf16.msra.mxu1 %v4425_v60  ;;  %5309 = vmatprep.subr.bf16.mxu0 %v4435_v29  ;;  %v4448_v60 = vld [vmem:[#allocation3 + $0x320] sm:$0xff]  ;;  %v4453_v29 = vld [vmem:[#allocation3 + $0x348] sm:$0xff] }
 0x681   :  { %4857 = vmatprep.subr.bf16.mxu1 %v4433_v18  ;;  %v4456_v18 = vld [vmem:[#allocation3 + $0x360] sm:$0xff] }
 0x683   :  { %5310 = vmatpush1.bf16.msra.mxu0 %v4434_v19  ;;  %v4461_v19 = vld [vmem:[#allocation3 + $0x388] sm:$0xff] }
 0x684   :  { %4858 = vmatpush1.bf16.msra.mxu1 %v4432_v13  ;;  %5311 = vmatprep.subr.bf16.mxu0 %v4442_v52  ;;  %v4455_v13 = vld [vmem:[#allocation3 + $0x358] sm:$0xff] }
 0x685   :  { %4859 = vmatprep.subr.bf16.mxu1 %v4440_v17  ;;  %v4463_v17 = vld [vmem:[#allocation3 + $0x398] sm:$0xff] }
 0x686   :  { %v15189_v52 = vld [vmem:[#allocation63_spill] sm:$0xff] }
 0x687   :  { %5312 = vmatpush1.bf16.msra.mxu0 %v4441_v38  ;;  %v15191_v49 = vmax.f32 %v15189_v52, %v15190_v51  ;;  %v4474_v52 = vld [vmem:[#allocation3 + $0x3f0] sm:$0xff] }
 0x688   :  { %4860 = vmatpush1.bf16.msra.mxu1 %v4439_v62  ;;  %5313 = vmatprep.subr.bf16.mxu0 %v4449_v54  ;;  %v15193_v62 = vld [vmem:[#allocation121_spill] sm:$0xff] }
 0x689   :  { %4861 = vmatprep.subr.bf16.mxu1 %v4447_v47  ;;  %v15194_v38 = vmax.f32 %v15192_v25, %v15193_v62  ;;  %v4460_v54 = vld [vmem:[#allocation3 + $0x380] sm:$0xff]  ;;  %v4467_v25 = vld [vmem:[#allocation3 + $0x3b8] sm:$0xff] }
 0x68a   :  { %v4476_v62 = vld [vmem:[#allocation3 + $0x400] sm:$0xff] }
 0x68b   :  { %5314 = vmatpush1.bf16.msra.mxu0 %v4448_v60  ;;  %v12741_v47 = vpack.c.bf16 %v15194_v38, %v15191_v49  ;;  %v4468_v60 = vld [vmem:[#allocation3 + $0x3c0] sm:$0xff]  ;;  %v4469_v49 = vld [vmem:[#allocation3 + $0x3c8] sm:$0xff]  ;;  %v4482_v38 = vld [vmem:[#allocation3 + $0x430] sm:$0xff] }
 0x68c   :  { %4862 = vmatpush1.bf16.msra.mxu1 %v4446_v8  ;;  %5315 = vmatprep.subr.bf16.mxu0 %v4456_v18  ;;  %v4462_v8 = vld [vmem:[#allocation3 + $0x390] sm:$0xff] }
 0x68d   :  { %4863 = vmatprep.subr.bf16.mxu1 %v4454_v30  ;;  %15195 = vst [vmem:[#allocation73_spill] sm:$0xff] %v12741_v47  ;;  %v4470_v30 = vld [vmem:[#allocation3 + $0x3d0] sm:$0xff] }
 0x68e   :  { %v15196_v18 = vld [vmem:[#allocation94_spill] sm:$0xff] }
 0x68f   :  { %5316 = vmatpush1.bf16.msra.mxu0 %v4455_v13  ;;  %v15198_v0 = vmax.f32 %v15196_v18, %v15197_v1  ;;  %v4475_v1 = vld [vmem:[#allocation3 + $0x3f8] sm:$0xff]  ;;  %v15203_v13 = vld [vmem:[#allocation81_spill] sm:$0xff] }
 0x690   :  { %4864 = vmatpush1.bf16.msra.mxu1 %v4453_v29  ;;  %5398 = vmatprep.subr.bf16.mxu0 %v4463_v17  ;;  %v4477_v29 = vld [vmem:[#allocation3 + $0x408] sm:$0xff]  ;;  %v15213_v18 = vld [vmem:[#allocation95_spill] sm:$0xff] }
 0x691   :  { %4946 = vmatprep.subr.bf16.mxu1 %v4461_v19  ;;  %v12749_v51 = vpack.c.bf16 %v15201_v2, %v15198_v0  ;;  %v15205_v0 = vmax.f32 %v15203_v13, %v15204_v4  ;;  %v15206_v2 = vld [vmem:[#allocation44_spill] sm:$0xff]  ;;  %v15217_v4 = vld [vmem:[#allocation46_spill] sm:$0xff] }
 0x692   :  { %5318 = vmatmul.mubr.bf16.vlgmr.msra.gmra.mrb[128].mxu0 %v12741_v47  ;;  %v15208_v19 = vmax.f32 %v15206_v2, %v15207_v22  ;;  %v15221_v2 = vld [vmem:[#allocation125_spill] sm:$0xff] }
 0x693   :  { %15202 = vst [vmem:[#allocation66_spill] sm:$0xff] %v12749_v51  ;;  %4866 = vmatmul.mubr.bf16.vlgmr.msra.gmra.mrb[96].mxu1 %v12741_v47  ;;  %5399 = vmatpush1.bf16.msra.mxu0 %v4462_v8  ;;  %v15210_v8 = vld [vmem:[#allocation67_spill] sm:$0xff] }
 0x694   :  { %4947 = vmatpush1.bf16.msra.mxu1 %v4460_v54  ;;  %5400 = vmatprep.subr.bf16.mxu0 %v4470_v30  ;;  %v12761_v17 = vpack.c.bf16 %v15208_v19, %v15205_v0  ;;  %v4484_v54 = vld [vmem:[#allocation3 + $0x440] sm:$0xff] }
 0x695   :  { %4948 = vmatprep.subr.bf16.mxu1 %v4468_v60  ;;  %4875 = vmatprep.mubr.bf16.mxu1 %v12749_v51  ;;  %v15211_v60 = vld [vmem:[#allocation180_spill] sm:$0xff] }
 0x696   :  { %5327 = vmatprep.mubr.bf16.mxu0 %v12749_v51  ;;  %15209 = vst [vmem:[#allocation177_spill] sm:$0xff] %v12761_v17  ;;  %v15212_v30 = vmax.f32 %v15210_v8, %v15211_v60  ;;  %v15214_v51 = vld [vmem:[#allocation181_spill] sm:$0xff]  ;;  %v15220_v0 = vld [vmem:[#allocation76_spill] sm:$0xff]  ;;  %v15225_v60 = vld [vmem:[#allocation182_spill] sm:$0xff] }
 0x697   :  { %5401 = vmatpush1.bf16.msra.mxu0 %v4469_v49  ;;  %v15215_v47 = vmax.f32 %v15213_v18, %v15214_v51  ;;  %v4483_v49 = vld [vmem:[#allocation3 + $0x438] sm:$0xff]  ;;  %v15222_v22 = vmax.f32 %v15220_v0, %v15221_v2 }
 0x698   :  { %4949 = vmatpush1.bf16.msra.mxu1 %v4467_v25  ;;  %5402 = vmatprep.subr.bf16.mxu0 %v4477_v29  ;;  %v4481_v25 = vld [vmem:[#allocation3 + $0x428] sm:$0xff]  ;;  %v4491_v29 = vld [vmem:[#allocation3 + $0x478] sm:$0xff] }
 0x699   :  { %4950 = vmatprep.subr.bf16.mxu1 %v4475_v1  ;;  %v12769_v13 = vpack.c.bf16 %v15215_v47, %v15212_v30  ;;  %v4489_v1 = vld [vmem:[#allocation3 + $0x468] sm:$0xff]  ;;  %v15218_v51 = vld [vmem:[#allocation124_spill] sm:$0xff]  ;;  %v15235_v0 = vld [vmem:[#allocation127_spill] sm:$0xff] }
 0x69a   :  { %5328 = vmatmul.mubr.bf16.gmra.mrb[132].mxu0 %v12761_v17  ;;  %v15219_v47 = vmax.f32 %v15217_v4, %v15218_v51  ;;  %v15224_v8 = vld [vmem:[#allocation68_spill] sm:$0xff]  ;;  %v15231_v51 = vld [vmem:[#allocation77_spill] sm:$0xff] }
 0x69b   :  { %15216 = vst [vmem:[#allocation63_spill] sm:$0xff] %v12769_v13  ;;  %4876 = vmatmul.mubr.bf16.gmra.mrb[100].mxu1 %v12761_v17  ;;  %5403 = vmatpush1.bf16.msra.mxu0 %v4476_v62  ;;  %v4490_v62 = vld [vmem:[#allocation3 + $0x470] sm:$0xff]  ;;  %v15226_v30 = vmax.f32 %v15224_v8, %v15225_v60  ;;  %v15227_v18 = vld [vmem:[#allocation96_spill] sm:$0xff]  ;;  %v15238_v8 = vld [vmem:[#allocation69_spill] sm:$0xff] }
 0x69c   :  { %4951 = vmatpush1.bf16.msra.mxu1 %v4474_v52  ;;  %5404 = vmatprep.subr.bf16.mxu0 %v4484_v54  ;;  %v12781_v19 = vpack.c.bf16 %v15222_v22, %v15219_v47  ;;  %v4488_v52 = vld [vmem:[#allocation3 + $0x460] sm:$0xff]  ;;  %v4498_v54 = vld [vmem:[#allocation3 + $0x4b0] sm:$0xff] }
 0x69d   :  { %4952 = vmatprep.subr.bf16.mxu1 %v4482_v38  ;;  %4885 = vmatprep.mubr.bf16.mxu1 %v12769_v13  ;;  %v4496_v38 = vld [vmem:[#allocation3 + $0x4a0] sm:$0xff] }
 0x69e   :  { %5337 = vmatprep.mubr.bf16.mxu0 %v12769_v13  ;;  %15223 = vst [vmem:[#allocation120_spill] sm:$0xff] %v12781_v19  ;;  %v15228_v13 = vld [vmem:[#allocation183_spill] sm:$0xff]  ;;  %v15234_v47 = vld [vmem:[#allocation48_spill] sm:$0xff] }
 0x69f   :  { %5405 = vmatpush1.bf16.msra.mxu0 %v4483_v49  ;;  %v15229_v17 = vmax.f32 %v15227_v18, %v15228_v13  ;;  %v4497_v49 = vld [vmem:[#allocation3 + $0x4a8] sm:$0xff]  ;;  %v15236_v2 = vmax.f32 %v15234_v47, %v15235_v0  ;;  %v15239_v60 = vld [vmem:[#allocation184_spill] sm:$0xff] }
 0x6a0   :  { %4953 = vmatpush1.bf16.msra.mxu1 %v4481_v25  ;;  %5406 = vmatprep.subr.bf16.mxu0 %v4491_v29  ;;  %v4495_v25 = vld [vmem:[#allocation3 + $0x498] sm:$0xff]  ;;  %v4505_v29 = vld [vmem:[#allocation3 + $0x4e8] sm:$0xff] }
 0x6a1   :  { %4954 = vmatprep.subr.bf16.mxu1 %v4489_v1  ;;  %v12789_v4 = vpack.c.bf16 %v15229_v17, %v15226_v30  ;;  %v4503_v1 = vld [vmem:[#allocation3 + $0x4d8] sm:$0xff]  ;;  %v15232_v13 = vld [vmem:[#allocation126_spill] sm:$0xff]  ;;  %v15240_v30 = vmax.f32 %v15238_v8, %v15239_v60  ;;  %v15241_v18 = vld [vmem:[#allocation97_spill] sm:$0xff] }
 0x6a2   :  { %5338 = vmatmul.mubr.bf16.gmra.mrb[136].mxu0 %v12781_v19  ;;  %v15233_v17 = vmax.f32 %v15231_v51, %v15232_v13  ;;  %v15245_v13 = vld [vmem:[#allocation50_spill] sm:$0xff]  ;;  %v15249_v47 = vld [vmem:[#allocation129_spill] sm:$0xff] }
 0x6a3   :  { %15230 = vst [vmem:[#allocation64_spill] sm:$0xff] %v12789_v4  ;;  %4886 = vmatmul.mubr.bf16.gmra.mrb[104].mxu1 %v12781_v19  ;;  %5407 = vmatpush1.bf16.msra.mxu0 %v4490_v62  ;;  %v4504_v62 = vld [vmem:[#allocation3 + $0x4e0] sm:$0xff]  ;;  %v15252_v8 = vld [vmem:[#allocation70_spill] sm:$0xff] }
 0x6a4   :  { %4955 = vmatpush1.bf16.msra.mxu1 %v4488_v52  ;;  %5408 = vmatprep.subr.bf16.mxu0 %v4498_v54  ;;  %v12801_v22 = vpack.c.bf16 %v15236_v2, %v15233_v17  ;;  %v4502_v52 = vld [vmem:[#allocation3 + $0x4d0] sm:$0xff]  ;;  %v4512_v54 = vld [vmem:[#allocation3 + $0x520] sm:$0xff] }
 0x6a5   :  { %4956 = vmatprep.subr.bf16.mxu1 %v4496_v38  ;;  %4895 = vmatprep.mubr.bf16.mxu1 %v12789_v4  ;;  %v4510_v38 = vld [vmem:[#allocation3 + $0x510] sm:$0xff] }
 0x6a6   :  { %5347 = vmatprep.mubr.bf16.mxu0 %v12789_v4  ;;  %15237 = vst [vmem:[#allocation121_spill] sm:$0xff] %v12801_v22  ;;  %v15242_v4 = vld [vmem:[#allocation185_spill] sm:$0xff]  ;;  %v15248_v17 = vld [vmem:[#allocation78_spill] sm:$0xff] }
 0x6a7   :  { %5409 = vmatpush1.bf16.msra.mxu0 %v4497_v49  ;;  %v15243_v19 = vmax.f32 %v15241_v18, %v15242_v4  ;;  %v4511_v49 = vld [vmem:[#allocation3 + $0x518] sm:$0xff]  ;;  %v15250_v0 = vmax.f32 %v15248_v17, %v15249_v47  ;;  %v15253_v60 = vld [vmem:[#allocation186_spill] sm:$0xff] }
 0x6a8   :  { %4957 = vmatpush1.bf16.msra.mxu1 %v4495_v25  ;;  %5410 = vmatprep.subr.bf16.mxu0 %v4505_v29  ;;  %v4509_v25 = vld [vmem:[#allocation3 + $0x508] sm:$0xff]  ;;  %v4519_v29 = vld [vmem:[#allocation3 + $0x558] sm:$0xff] }
 0x6a9   :  { %4958 = vmatprep.subr.bf16.mxu1 %v4503_v1  ;;  %v12809_v51 = vpack.c.bf16 %v15243_v19, %v15240_v30  ;;  %v4517_v1 = vld [vmem:[#allocation3 + $0x548] sm:$0xff]  ;;  %v15246_v4 = vld [vmem:[#allocation128_spill] sm:$0xff]  ;;  %v15254_v30 = vmax.f32 %v15252_v8, %v15253_v60  ;;  %v15263_v17 = vld [vmem:[#allocation131_spill] sm:$0xff] }
 0x6aa   :  { %5348 = vmatmul.mubr.bf16.gmra.mrb[140].mxu0 %v12801_v22  ;;  %v15247_v19 = vmax.f32 %v15245_v13, %v15246_v4  ;;  %v15255_v18 = vld [vmem:[#allocation98_spill] sm:$0xff]  ;;  %v15259_v4 = vld [vmem:[#allocation112_spill] sm:$0xff]  ;;  %v15266_v8 = vld [vmem:[#allocation71_spill] sm:$0xff] }
 0x6ab   :  { %15244 = vst [vmem:[#allocation94_spill] sm:$0xff] %v12809_v51  ;;  %4896 = vmatmul.mubr.bf16.gmra.mrb[108].mxu1 %v12801_v22  ;;  %5411 = vmatpush1.bf16.msra.mxu0 %v4504_v62  ;;  %v4518_v62 = vld [vmem:[#allocation3 + $0x550] sm:$0xff]  ;;  %v15267_v60 = vld [vmem:[#allocation188_spill] sm:$0xff] }
 0x6ac   :  { %4959 = vmatpush1.bf16.msra.mxu1 %v4502_v52  ;;  %5412 = vmatprep.subr.bf16.mxu0 %v4512_v54  ;;  %v12821_v2 = vpack.c.bf16 %v15250_v0, %v15247_v19  ;;  %v4516_v52 = vld [vmem:[#allocation3 + $0x540] sm:$0xff]  ;;  %v4526_v54 = vld [vmem:[#allocation3 + $0x590] sm:$0xff] }
 0x6ad   :  { %4960 = vmatprep.subr.bf16.mxu1 %v4510_v38  ;;  %4905 = vmatprep.mubr.bf16.mxu1 %v12809_v51  ;;  %v4524_v38 = vld [vmem:[#allocation3 + $0x580] sm:$0xff]  ;;  %v15262_v19 = vld [vmem:[#allocation79_spill] sm:$0xff] }
 0x6ae   :  { %5357 = vmatprep.mubr.bf16.mxu0 %v12809_v51  ;;  %15251 = vst [vmem:[#allocation178_spill] sm:$0xff] %v12821_v2  ;;  %v15256_v51 = vld [vmem:[#allocation187_spill] sm:$0xff]  ;;  %v15264_v47 = vmax.f32 %v15262_v19, %v15263_v17  ;;  %v15277_v19 = vld [vmem:[#allocation133_spill] sm:$0xff] }
 0x6af   :  { %5413 = vmatpush1.bf16.msra.mxu0 %v4511_v49  ;;  %v15257_v22 = vmax.f32 %v15255_v18, %v15256_v51  ;;  %v4525_v49 = vld [vmem:[#allocation3 + $0x588] sm:$0xff]  ;;  %v15269_v18 = vld [vmem:[#allocation99_spill] sm:$0xff] }
 0x6b0   :  { %4961 = vmatpush1.bf16.msra.mxu1 %v4509_v25  ;;  %5414 = vmatprep.subr.bf16.mxu0 %v4519_v29  ;;  %v4523_v25 = vld [vmem:[#allocation3 + $0x578] sm:$0xff]  ;;  %v4533_v29 = vld [vmem:[#allocation3 + $0x5c8] sm:$0xff] }
 0x6b1   :  { %4962 = vmatprep.subr.bf16.mxu1 %v4517_v1  ;;  %v12829_v13 = vpack.c.bf16 %v15257_v22, %v15254_v30  ;;  %v4531_v1 = vld [vmem:[#allocation3 + $0x5b8] sm:$0xff]  ;;  %v15260_v51 = vld [vmem:[#allocation130_spill] sm:$0xff]  ;;  %v15268_v30 = vmax.f32 %v15266_v8, %v15267_v60 }
 0x6b2   :  { %5358 = vmatmul.mubr.bf16.gmra.mrb[144].mxu0 %v12821_v2  ;;  %v15261_v22 = vmax.f32 %v15259_v4, %v15260_v51  ;;  %v15273_v51 = vld [vmem:[#allocation116_spill] sm:$0xff]  ;;  %v15281_v60 = vld [vmem:[#allocation190_spill] sm:$0xff] }
 0x6b3   :  { %15258 = vst [vmem:[#allocation53_spill] sm:$0xff] %v12829_v13  ;;  %4906 = vmatmul.mubr.bf16.gmra.mrb[112].mxu1 %v12821_v2  ;;  %5415 = vmatpush1.bf16.msra.mxu0 %v4518_v62  ;;  %v4532_v62 = vld [vmem:[#allocation3 + $0x5c0] sm:$0xff] }
 0x6b4   :  { %4963 = vmatpush1.bf16.msra.mxu1 %v4516_v52  ;;  %5416 = vmatprep.subr.bf16.mxu0 %v4526_v54  ;;  %v12841_v0 = vpack.c.bf16 %v15264_v47, %v15261_v22  ;;  %v4530_v52 = vld [vmem:[#allocation3 + $0x5b0] sm:$0xff]  ;;  %v4540_v54 = vld [vmem:[#allocation3 + $0x600] sm:$0xff] }
 0x6b5   :  { %4964 = vmatprep.subr.bf16.mxu1 %v4524_v38  ;;  %4915 = vmatprep.mubr.bf16.mxu1 %v12829_v13  ;;  %v4538_v38 = vld [vmem:[#allocation3 + $0x5f0] sm:$0xff]  ;;  %v15276_v22 = vld [vmem:[#allocation117_spill] sm:$0xff]  ;;  %v15280_v8 = vld [vmem:[#allocation72_spill] sm:$0xff] }
 0x6b6   :  { %5367 = vmatprep.mubr.bf16.mxu0 %v12829_v13  ;;  %15265 = vst [vmem:[#allocation179_spill] sm:$0xff] %v12841_v0  ;;  %v15270_v13 = vld [vmem:[#allocation189_spill] sm:$0xff]  ;;  %v15278_v17 = vmax.f32 %v15276_v22, %v15277_v19  ;;  %v15291_v22 = vld [vmem:[#allocation135_spill] sm:$0xff] }
 0x6b7   :  { %5417 = vmatpush1.bf16.msra.mxu0 %v4525_v49  ;;  %v15271_v2 = vmax.f32 %v15269_v18, %v15270_v13  ;;  %v4539_v49 = vld [vmem:[#allocation3 + $0x5f8] sm:$0xff] }
 0x6b8   :  { %4965 = vmatpush1.bf16.msra.mxu1 %v4523_v25  ;;  %5418 = vmatprep.subr.bf16.mxu0 %v4533_v29  ;;  %v4537_v25 = vld [vmem:[#allocation3 + $0x5e8] sm:$0xff]  ;;  %v4547_v29 = vld [vmem:[#allocation3 + $0x638] sm:$0xff] }
 0x6b9   :  { %4966 = vmatprep.subr.bf16.mxu1 %v4531_v1  ;;  %v12849_v4 = vpack.c.bf16 %v15271_v2, %v15268_v30  ;;  %v4545_v1 = vld [vmem:[#allocation3 + $0x628] sm:$0xff]  ;;  %v15274_v13 = vld [vmem:[#allocation132_spill] sm:$0xff]  ;;  %v15282_v30 = vmax.f32 %v15280_v8, %v15281_v60 }
 0x6ba   :  { %5368 = vmatmul.mubr.bf16.gmra.mrb[148].mxu0 %v12841_v0  ;;  %v15275_v2 = vmax.f32 %v15273_v51, %v15274_v13  ;;  %v15283_v18 = vld [vmem:[#allocation100_spill] sm:$0xff]  ;;  %v15287_v13 = vld [vmem:[#allocation118_spill] sm:$0xff]  ;;  %v15294_v8 = vld [vmem:[#allocation101_spill] sm:$0xff] }
 0x6bb   :  { %15272 = vst [vmem:[#allocation81_spill] sm:$0xff] %v12849_v4  ;;  %4916 = vmatmul.mubr.bf16.gmra.mrb[116].mxu1 %v12841_v0  ;;  %5419 = vmatpush1.bf16.msra.mxu0 %v4532_v62  ;;  %v4546_v62 = vld [vmem:[#allocation3 + $0x630] sm:$0xff]  ;;  %v15295_v60 = vld [vmem:[#allocation192_spill] sm:$0xff] }
 0x6bc   :  { %4967 = vmatpush1.bf16.msra.mxu1 %v4530_v52  ;;  %5420 = vmatprep.subr.bf16.mxu0 %v4540_v54  ;;  %v12861_v47 = vpack.c.bf16 %v15278_v17, %v15275_v2  ;;  %v4544_v52 = vld [vmem:[#allocation3 + $0x620] sm:$0xff]  ;;  %v4554_v54 = vld [vmem:[#allocation3 + $0x670] sm:$0xff] }
 0x6bd   :  { %4968 = vmatprep.subr.bf16.mxu1 %v4538_v38  ;;  %4925 = vmatprep.mubr.bf16.mxu1 %v12849_v4  ;;  %v4552_v38 = vld [vmem:[#allocation3 + $0x660] sm:$0xff]  ;;  %v15290_v2 = vld [vmem:[#allocation119_spill] sm:$0xff] }
 0x6be   :  { %5377 = vmatprep.mubr.bf16.mxu0 %v12849_v4  ;;  %15279 = vst [vmem:[#allocation122_spill] sm:$0xff] %v12861_v47  ;;  %v15284_v4 = vld [vmem:[#allocation191_spill] sm:$0xff]  ;;  %v15292_v19 = vmax.f32 %v15290_v2, %v15291_v22  ;;  %v15305_v2 = vld [vmem:[#allocation156_spill] sm:$0xff] }
 0x6bf   :  { %5421 = vmatpush1.bf16.msra.mxu0 %v4539_v49  ;;  %v15285_v0 = vmax.f32 %v15283_v18, %v15284_v4  ;;  %v4553_v49 = vld [vmem:[#allocation3 + $0x668] sm:$0xff] }
 0x6c0   :  { %4969 = vmatpush1.bf16.msra.mxu1 %v4537_v25  ;;  %5422 = vmatprep.subr.bf16.mxu0 %v4547_v29  ;;  %v4551_v25 = vld [vmem:[#allocation3 + $0x658] sm:$0xff]  ;;  %v4561_v29 = vld [vmem:[#allocation3 + $0x6a8] sm:$0xff] }
 0x6c1   :  { %4970 = vmatprep.subr.bf16.mxu1 %v4545_v1  ;;  %v12869_v51 = vpack.c.bf16 %v15285_v0, %v15282_v30  ;;  %v4559_v1 = vld [vmem:[#allocation3 + $0x698] sm:$0xff]  ;;  %v15288_v4 = vld [vmem:[#allocation134_spill] sm:$0xff]  ;;  %v15296_v30 = vmax.f32 %v15294_v8, %v15295_v60 }
 0x6c2   :  { %5378 = vmatmul.mubr.bf16.gmra.mrb[152].mxu0 %v12861_v47  ;;  %v15289_v0 = vmax.f32 %v15287_v13, %v15288_v4  ;;  %v15297_v18 = vld [vmem:[#allocation74_spill] sm:$0xff]  ;;  %v15301_v4 = vld [vmem:[#allocation41_spill] sm:$0xff] }
 0x6c3   :  { %15286 = vst [vmem:[#allocation44_spill] sm:$0xff] %v12869_v51  ;;  %4926 = vmatmul.mubr.bf16.gmra.mrb[120].mxu1 %v12861_v47  ;;  %5423 = vmatpush1.bf16.msra.mxu0 %v4546_v62  ;;  %v4560_v62 = vld [vmem:[#allocation3 + $0x6a0] sm:$0xff]  ;;  %v15308_v8 = vld [vmem:[#allocation102_spill] sm:$0xff] }
 0x6c4   :  { %4971 = vmatpush1.bf16.msra.mxu1 %v4544_v52  ;;  %5424 = vmatprep.subr.bf16.mxu0 %v4554_v54  ;;  %v12881_v17 = vpack.c.bf16 %v15292_v19, %v15289_v0  ;;  %v4558_v52 = vld [vmem:[#allocation3 + $0x690] sm:$0xff]  ;;  %v4568_v54 = vld [vmem:[#allocation3 + $0x6e0] sm:$0xff] }
 0x6c5   :  { %4972 = vmatprep.subr.bf16.mxu1 %v4552_v38  ;;  %4935 = vmatprep.mubr.bf16.mxu1 %v12869_v51  ;;  %v4566_v38 = vld [vmem:[#allocation3 + $0x6d0] sm:$0xff]  ;;  %v15304_v0 = vld [vmem:[#allocation49_spill] sm:$0xff] }
 0x6c6   :  { %5387 = vmatprep.mubr.bf16.mxu0 %v12869_v51  ;;  %15293 = vst [vmem:[#allocation123_spill] sm:$0xff] %v12881_v17  ;;  %v15298_v51 = vld [vmem:[#allocation193_spill] sm:$0xff]  ;;  %v15306_v22 = vmax.f32 %v15304_v0, %v15305_v2  ;;  %v15309_v60 = vld [vmem:[#allocation194_spill] sm:$0xff] }
 0x6c7   :  { %5425 = vmatpush1.bf16.msra.mxu0 %v4553_v49  ;;  %v15299_v47 = vmax.f32 %v15297_v18, %v15298_v51  ;;  %v4567_v49 = vld [vmem:[#allocation3 + $0x6d8] sm:$0xff]  ;;  %v15319_v0 = vld [vmem:[#allocation158_spill] sm:$0xff] }
 0x6c8   :  { %4973 = vmatpush1.bf16.msra.mxu1 %v4551_v25  ;;  %5426 = vmatprep.subr.bf16.mxu0 %v4561_v29  ;;  %v4565_v25 = vld [vmem:[#allocation3 + $0x6c8] sm:$0xff]  ;;  %v4575_v29 = vld [vmem:[#allocation3 + $0x718] sm:$0xff] }
 0x6c9   :  { %4974 = vmatprep.subr.bf16.mxu1 %v4559_v1  ;;  %v12889_v13 = vpack.c.bf16 %v15299_v47, %v15296_v30  ;;  %v4573_v1 = vld [vmem:[#allocation3 + $0x708] sm:$0xff]  ;;  %v15302_v51 = vld [vmem:[#allocation155_spill] sm:$0xff]  ;;  %v15310_v30 = vmax.f32 %v15308_v8, %v15309_v60  ;;  %v15323_v60 = vld [vmem:[#allocation196_spill] sm:$0xff] }
 0x6ca   :  { %5388 = vmatmul.mubr.bf16.gmra.mrb[156].mxu0 %v12881_v17  ;;  %v15303_v47 = vmax.f32 %v15301_v4, %v15302_v51  ;;  %v15311_v18 = vld [vmem:[#allocation75_spill] sm:$0xff] }
 0x6cb   :  { %15300 = vst [vmem:[#allocation67_spill] sm:$0xff] %v12889_v13  ;;  %4936 = vmatmul.mubr.bf16.gmra.mrb[124].mxu1 %v12881_v17  ;;  %5427 = vmatpush1.bf16.msra.mxu0 %v4560_v62  ;;  %v4574_v62 = vld [vmem:[#allocation3 + $0x710] sm:$0xff] }
 0x6cc   :  { %4975 = vmatpush1.bf16.msra.mxu1 %v4558_v52  ;;  %5428 = vmatprep.subr.bf16.mxu0 %v4568_v54  ;;  %v12901_v19 = vpack.c.bf16 %v15306_v22, %v15303_v47  ;;  %v4572_v52 = vld [vmem:[#allocation3 + $0x700] sm:$0xff]  ;;  %v4582_v54 = vld [vmem:[#allocation3 + $0x750] sm:$0xff] }
 0x6cd   :  { %4976 = vmatprep.subr.bf16.mxu1 %v4566_v38  ;;  %4978 = vmatprep.mubr.bf16.mxu1 %v12889_v13  ;;  %v4580_v38 = vld [vmem:[#allocation3 + $0x740] sm:$0xff]  ;;  %v15312_v17 = vld [vmem:[#allocation195_spill] sm:$0xff] }
 0x6ce   :  { %5430 = vmatprep.mubr.bf16.mxu0 %v12889_v13  ;;  %15307 = vst [vmem:[#allocation180_spill] sm:$0xff] %v12901_v19  ;;  %v15313_v13 = vmax.f32 %v15311_v18, %v15312_v17  ;;  %v15315_v51 = vld [vmem:[#allocation43_spill] sm:$0xff]  ;;  %v15316_v17 = vld [vmem:[#allocation157_spill] sm:$0xff]  ;;  %v15325_v18 = vld [vmem:[#allocation88_spill] sm:$0xff] }
 0x6cf   :  { %5429 = vmatpush1.bf16.msra.mxu0 %v4567_v49  ;;  %v4581_v49 = vld [vmem:[#allocation3 + $0x748] sm:$0xff]  ;;  %v15318_v47 = vld [vmem:[#allocation51_spill] sm:$0xff] }
 0x6d0   :  { %4977 = vmatpush1.bf16.msra.mxu1 %v4565_v25  ;;  %5511 = vmatprep.subr.bf16.mxu0 %v4575_v29  ;;  %v12909_v4 = vpack.c.bf16 %v15313_v13, %v15310_v30  ;;  %v4579_v25 = vld [vmem:[#allocation3 + $0x738] sm:$0xff]  ;;  %v4589_v29 = vld [vmem:[#allocation3 + $0x788] sm:$0xff]  ;;  %v15317_v13 = vmax.f32 %v15315_v51, %v15316_v17  ;;  %v15320_v2 = vmax.f32 %v15318_v47, %v15319_v0 }
 0x6d1   :  { %5059 = vmatprep.subr.bf16.mxu1 %v4573_v1  ;;  %v4587_v1 = vld [vmem:[#allocation3 + $0x778] sm:$0xff]  ;;  %v15329_v17 = vld [vmem:[#allocation65_spill] sm:$0xff] }
 0x6d2   :  { %15314 = vst [vmem:[#allocation95_spill] sm:$0xff] %v12909_v4  ;;  %5431 = vmatmul.mubr.bf16.vlgmr.msra.gmra.mrb[128].mxu0 %v12901_v19  ;;  %v12921_v22 = vpack.c.bf16 %v15320_v2, %v15317_v13  ;;  %v15322_v8 = vld [vmem:[#allocation103_spill] sm:$0xff]  ;;  %v15332_v13 = vld [vmem:[#allocation93_spill] sm:$0xff]  ;;  %v15333_v47 = vld [vmem:[#allocation160_spill] sm:$0xff] }
 0x6d3   :  { %4979 = vmatmul.mubr.bf16.vlgmr.msra.gmra.mrb[96].mxu1 %v12901_v19  ;;  %5512 = vmatpush1.bf16.msra.mxu0 %v4574_v62  ;;  %v4588_v62 = vld [vmem:[#allocation3 + $0x780] sm:$0xff]  ;;  %v15324_v30 = vmax.f32 %v15322_v8, %v15323_v60  ;;  %v15334_v0 = vmax.f32 %v15332_v13, %v15333_v47  ;;  %v15337_v60 = vld [vmem:[#allocation198_spill] sm:$0xff] }
 0x6d4   :  { %5060 = vmatpush1.bf16.msra.mxu1 %v4572_v52  ;;  %5513 = vmatprep.subr.bf16.mxu0 %v4582_v54  ;;  %15321 = vst [vmem:[#allocation181_spill] sm:$0xff] %v12921_v22  ;;  %v4586_v52 = vld [vmem:[#allocation3 + $0x770] sm:$0xff]  ;;  %v4596_v54 = vld [vmem:[#allocation3 + $0x7c0] sm:$0xff] }
 0x6d5   :  { %5061 = vmatprep.subr.bf16.mxu1 %v4580_v38  ;;  %4988 = vmatprep.mubr.bf16.mxu1 %v12909_v4  ;;  %v4594_v38 = vld [vmem:[#allocation3 + $0x7b0] sm:$0xff]  ;;  %v15336_v8 = vld [vmem:[#allocation104_spill] sm:$0xff] }
 0x6d6   :  { %5440 = vmatprep.mubr.bf16.mxu0 %v12909_v4  ;;  %v15326_v4 = vld [vmem:[#allocation197_spill] sm:$0xff]  ;;  %v15347_v13 = vld [vmem:[#allocation162_spill] sm:$0xff] }
 0x6d7   :  { %5514 = vmatpush1.bf16.msra.mxu0 %v4581_v49  ;;  %v15327_v19 = vmax.f32 %v15325_v18, %v15326_v4  ;;  %v4595_v49 = vld [vmem:[#allocation3 + $0x7b8] sm:$0xff]  ;;  %v15339_v18 = vld [vmem:[#allocation45_spill] sm:$0xff] }
 0x6d8   :  { %5062 = vmatpush1.bf16.msra.mxu1 %v4579_v25  ;;  %5515 = vmatprep.subr.bf16.mxu0 %v4589_v29  ;;  %v4593_v25 = vld [vmem:[#allocation3 + $0x7a8] sm:$0xff]  ;;  %v4603_v29 = vld [vmem:[#allocation3 + $0x7f8] sm:$0xff] }
 0x6d9   :  { %5063 = vmatprep.subr.bf16.mxu1 %v4587_v1  ;;  %v12929_v51 = vpack.c.bf16 %v15327_v19, %v15324_v30  ;;  %v4601_v1 = vld [vmem:[#allocation3 + $0x7e8] sm:$0xff]  ;;  %v15330_v4 = vld [vmem:[#allocation159_spill] sm:$0xff]  ;;  %v15338_v30 = vmax.f32 %v15336_v8, %v15337_v60  ;;  %v15351_v60 = vld [vmem:[#allocation200_spill] sm:$0xff] }
 0x6da   :  { %5441 = vmatmul.mubr.bf16.gmra.mrb[132].mxu0 %v12921_v22  ;;  %v15331_v19 = vmax.f32 %v15329_v17, %v15330_v4  ;;  %v15343_v4 = vld [vmem:[#allocation142_spill] sm:$0xff]  ;;  %v15350_v8 = vld [vmem:[#allocation57_spill] sm:$0xff] }
 0x6db   :  { %15328 = vst [vmem:[#allocation46_spill] sm:$0xff] %v12929_v51  ;;  %4989 = vmatmul.mubr.bf16.gmra.mrb[100].mxu1 %v12921_v22  ;;  %5516 = vmatpush1.bf16.msra.mxu0 %v4588_v62  ;;  %v4602_v62 = vld [vmem:[#allocation3 + $0x7f0] sm:$0xff] }
 0x6dc   :  { %5064 = vmatpush1.bf16.msra.mxu1 %v4586_v52  ;;  %5517 = vmatprep.subr.bf16.mxu0 %v4596_v54  ;;  %v12941_v2 = vpack.c.bf16 %v15334_v0, %v15331_v19  ;;  %v4600_v52 = vld [vmem:[#allocation3 + $0x7e0] sm:$0xff]  ;;  %v4610_v54 = vld [vmem:[#allocation3 + $0x830] sm:$0xff] }
 0x6dd   :  { %5065 = vmatprep.subr.bf16.mxu1 %v4594_v38  ;;  %4998 = vmatprep.mubr.bf16.mxu1 %v12929_v51  ;;  %v4608_v38 = vld [vmem:[#allocation3 + $0x820] sm:$0xff]  ;;  %v15346_v19 = vld [vmem:[#allocation143_spill] sm:$0xff] }
 0x6de   :  { %5450 = vmatprep.mubr.bf16.mxu0 %v12929_v51  ;;  %15335 = vst [vmem:[#allocation124_spill] sm:$0xff] %v12941_v2  ;;  %v15340_v51 = vld [vmem:[#allocation199_spill] sm:$0xff]  ;;  %v15348_v47 = vmax.f32 %v15346_v19, %v15347_v13  ;;  %v15361_v19 = vld [vmem:[#allocation164_spill] sm:$0xff] }
 0x6df   :  { %5518 = vmatpush1.bf16.msra.mxu0 %v4595_v49  ;;  %v15341_v22 = vmax.f32 %v15339_v18, %v15340_v51  ;;  %v4609_v49 = vld [vmem:[#allocation3 + $0x828] sm:$0xff] }
 0x6e0   :  { %5066 = vmatpush1.bf16.msra.mxu1 %v4593_v25  ;;  %5519 = vmatprep.subr.bf16.mxu0 %v4603_v29  ;;  %v4607_v25 = vld [vmem:[#allocation3 + $0x818] sm:$0xff]  ;;  %v4617_v29 = vld [vmem:[#allocation3 + $0x868] sm:$0xff] }
 0x6e1   :  { %5067 = vmatprep.subr.bf16.mxu1 %v4601_v1  ;;  %v12949_v17 = vpack.c.bf16 %v15341_v22, %v15338_v30  ;;  %v4615_v1 = vld [vmem:[#allocation3 + $0x858] sm:$0xff]  ;;  %v15344_v51 = vld [vmem:[#allocation161_spill] sm:$0xff]  ;;  %v15352_v30 = vmax.f32 %v15350_v8, %v15351_v60  ;;  %v15365_v60 = vld [vmem:[#allocation202_spill] sm:$0xff] }
 0x6e2   :  { %5451 = vmatmul.mubr.bf16.gmra.mrb[136].mxu0 %v12941_v2  ;;  %v15345_v22 = vmax.f32 %v15343_v4, %v15344_v51  ;;  %v15353_v18 = vld [vmem:[#allocation89_spill] sm:$0xff]  ;;  %v15357_v51 = vld [vmem:[#allocation144_spill] sm:$0xff] }
 0x6e3   :  { %15342 = vst [vmem:[#allocation76_spill] sm:$0xff] %v12949_v17  ;;  %4999 = vmatmul.mubr.bf16.gmra.mrb[104].mxu1 %v12941_v2  ;;  %5520 = vmatpush1.bf16.msra.mxu0 %v4602_v62  ;;  %v4616_v62 = vld [vmem:[#allocation3 + $0x860] sm:$0xff] }
 0x6e4   :  { %5068 = vmatpush1.bf16.msra.mxu1 %v4600_v52  ;;  %5521 = vmatprep.subr.bf16.mxu0 %v4610_v54  ;;  %v12961_v0 = vpack.c.bf16 %v15348_v47, %v15345_v22  ;;  %v4614_v52 = vld [vmem:[#allocation3 + $0x850] sm:$0xff]  ;;  %v4624_v54 = vld [vmem:[#allocation3 + $0x8a0] sm:$0xff] }
 0x6e5   :  { %5069 = vmatprep.subr.bf16.mxu1 %v4608_v38  ;;  %5008 = vmatprep.mubr.bf16.mxu1 %v12949_v17  ;;  %v4622_v38 = vld [vmem:[#allocation3 + $0x890] sm:$0xff]  ;;  %v15360_v22 = vld [vmem:[#allocation145_spill] sm:$0xff] }
 0x6e6   :  { %5460 = vmatprep.mubr.bf16.mxu0 %v12949_v17  ;;  %15349 = vst [vmem:[#allocation125_spill] sm:$0xff] %v12961_v0  ;;  %v15354_v17 = vld [vmem:[#allocation201_spill] sm:$0xff]  ;;  %v15362_v13 = vmax.f32 %v15360_v22, %v15361_v19  ;;  %v15375_v22 = vld [vmem:[#allocation166_spill] sm:$0xff] }
 0x6e7   :  { %5522 = vmatpush1.bf16.msra.mxu0 %v4609_v49  ;;  %v15355_v2 = vmax.f32 %v15353_v18, %v15354_v17  ;;  %v4623_v49 = vld [vmem:[#allocation3 + $0x898] sm:$0xff]  ;;  %v15364_v8 = vld [vmem:[#allocation105_spill] sm:$0xff]  ;;  %v15367_v18 = vld [vmem:[#allocation90_spill] sm:$0xff] }
 0x6e8   :  { %5070 = vmatpush1.bf16.msra.mxu1 %v4607_v25  ;;  %5523 = vmatprep.subr.bf16.mxu0 %v4617_v29  ;;  %v4621_v25 = vld [vmem:[#allocation3 + $0x888] sm:$0xff]  ;;  %v4631_v29 = vld [vmem:[#allocation3 + $0x8d8] sm:$0xff] }
 0x6e9   :  { %5071 = vmatprep.subr.bf16.mxu1 %v4615_v1  ;;  %v12969_v4 = vpack.c.bf16 %v15355_v2, %v15352_v30  ;;  %v4629_v1 = vld [vmem:[#allocation3 + $0x8c8] sm:$0xff]  ;;  %v15358_v17 = vld [vmem:[#allocation163_spill] sm:$0xff]  ;;  %v15366_v30 = vmax.f32 %v15364_v8, %v15365_v60  ;;  %v15379_v60 = vld [vmem:[#allocation204_spill] sm:$0xff] }
 0x6ea   :  { %5461 = vmatmul.mubr.bf16.gmra.mrb[140].mxu0 %v12961_v0  ;;  %v15359_v2 = vmax.f32 %v15357_v51, %v15358_v17  ;;  %v15371_v17 = vld [vmem:[#allocation146_spill] sm:$0xff] }
 0x6eb   :  { %15356 = vst [vmem:[#allocation68_spill] sm:$0xff] %v12969_v4  ;;  %5009 = vmatmul.mubr.bf16.gmra.mrb[108].mxu1 %v12961_v0  ;;  %5524 = vmatpush1.bf16.msra.mxu0 %v4616_v62  ;;  %v4630_v62 = vld [vmem:[#allocation3 + $0x8d0] sm:$0xff] }
 0x6ec   :  { %5072 = vmatpush1.bf16.msra.mxu1 %v4614_v52  ;;  %5525 = vmatprep.subr.bf16.mxu0 %v4624_v54  ;;  %v12981_v47 = vpack.c.bf16 %v15362_v13, %v15359_v2  ;;  %v4628_v52 = vld [vmem:[#allocation3 + $0x8c0] sm:$0xff]  ;;  %v4638_v54 = vld [vmem:[#allocation3 + $0x910] sm:$0xff] }
 0x6ed   :  { %5073 = vmatprep.subr.bf16.mxu1 %v4622_v38  ;;  %5018 = vmatprep.mubr.bf16.mxu1 %v12969_v4  ;;  %v4636_v38 = vld [vmem:[#allocation3 + $0x900] sm:$0xff]  ;;  %v15374_v2 = vld [vmem:[#allocation147_spill] sm:$0xff]  ;;  %v15378_v8 = vld [vmem:[#allocation106_spill] sm:$0xff] }
 0x6ee   :  { %5470 = vmatprep.mubr.bf16.mxu0 %v12969_v4  ;;  %15363 = vst [vmem:[#allocation182_spill] sm:$0xff] %v12981_v47  ;;  %v15368_v4 = vld [vmem:[#allocation203_spill] sm:$0xff]  ;;  %v15376_v19 = vmax.f32 %v15374_v2, %v15375_v22  ;;  %v15389_v2 = vld [vmem:[#allocation168_spill] sm:$0xff] }
 0x6ef   :  { %5526 = vmatpush1.bf16.msra.mxu0 %v4623_v49  ;;  %v15369_v0 = vmax.f32 %v15367_v18, %v15368_v4  ;;  %v4637_v49 = vld [vmem:[#allocation3 + $0x908] sm:$0xff]  ;;  %v15381_v18 = vld [vmem:[#allocation47_spill] sm:$0xff] }
 0x6f0   :  { %5074 = vmatpush1.bf16.msra.mxu1 %v4621_v25  ;;  %5527 = vmatprep.subr.bf16.mxu0 %v4631_v29  ;;  %v4635_v25 = vld [vmem:[#allocation3 + $0x8f8] sm:$0xff]  ;;  %v4645_v29 = vld [vmem:[#allocation3 + $0x948] sm:$0xff] }
 0x6f1   :  { %5075 = vmatprep.subr.bf16.mxu1 %v4629_v1  ;;  %v12989_v51 = vpack.c.bf16 %v15369_v0, %v15366_v30  ;;  %v4643_v1 = vld [vmem:[#allocation3 + $0x938] sm:$0xff]  ;;  %v15372_v4 = vld [vmem:[#allocation165_spill] sm:$0xff]  ;;  %v15380_v30 = vmax.f32 %v15378_v8, %v15379_v60  ;;  %v15392_v60 = vld [vmem:[#allocation206_spill] sm:$0xff] }
 0x6f2   :  { %5471 = vmatmul.mubr.bf16.gmra.mrb[144].mxu0 %v12981_v47  ;;  %v15373_v0 = vmax.f32 %v15371_v17, %v15372_v4  ;;  %v15385_v4 = vld [vmem:[#allocation149_spill] sm:$0xff]  ;;  %v15391_v8 = vld [vmem:[#allocation59_spill] sm:$0xff] }
 0x6f3   :  { %15370 = vst [vmem:[#allocation96_spill] sm:$0xff] %v12989_v51  ;;  %5019 = vmatmul.mubr.bf16.gmra.mrb[112].mxu1 %v12981_v47  ;;  %5528 = vmatpush1.bf16.msra.mxu0 %v4630_v62  ;;  %v4644_v62 = vld [vmem:[#allocation3 + $0x940] sm:$0xff] }
 0x6f4   :  { %5076 = vmatpush1.bf16.msra.mxu1 %v4628_v52  ;;  %5529 = vmatprep.subr.bf16.mxu0 %v4638_v54  ;;  %v13001_v13 = vpack.c.bf16 %v15376_v19, %v15373_v0  ;;  %v4642_v52 = vld [vmem:[#allocation3 + $0x930] sm:$0xff]  ;;  %v4652_v54 = vld [vmem:[#allocation3 + $0x980] sm:$0xff] }
 0x6f5   :  { %5077 = vmatprep.subr.bf16.mxu1 %v4636_v38  ;;  %5028 = vmatprep.mubr.bf16.mxu1 %v12989_v51  ;;  %v4650_v38 = vld [vmem:[#allocation3 + $0x970] sm:$0xff] }
 0x6f6   :  { %5480 = vmatprep.mubr.bf16.mxu0 %v12989_v51  ;;  %15377 = vst [vmem:[#allocation183_spill] sm:$0xff] %v13001_v13  ;;  %v15382_v51 = vld [vmem:[#allocation205_spill] sm:$0xff]  ;;  %v15388_v0 = vld [vmem:[#allocation150_spill] sm:$0xff] }
 0x6f7   :  { %5530 = vmatpush1.bf16.msra.mxu0 %v4637_v49  ;;  %v15383_v47 = vmax.f32 %v15381_v18, %v15382_v51  ;;  %v4651_v49 = vld [vmem:[#allocation3 + $0x978] sm:$0xff]  ;;  %v15390_v22 = vmax.f32 %v15388_v0, %v15389_v2  ;;  %v15401_v0 = vld [vmem:[#allocation170_spill] sm:$0xff] }
 0x6f8   :  { %5078 = vmatpush1.bf16.msra.mxu1 %v4635_v25  ;;  %5531 = vmatprep.subr.bf16.mxu0 %v4645_v29  ;;  %v4649_v25 = vld [vmem:[#allocation3 + $0x968] sm:$0xff]  ;;  %v4659_v29 = vld [vmem:[#allocation3 + $0x9b8] sm:$0xff] }
 0x6f9   :  { %5079 = vmatprep.subr.bf16.mxu1 %v4643_v1  ;;  %v13009_v17 = vpack.c.bf16 %v15383_v47, %v15380_v30  ;;  %v4657_v1 = vld [vmem:[#allocation3 + $0x9a8] sm:$0xff]  ;;  %v15386_v51 = vld [vmem:[#allocation167_spill] sm:$0xff]  ;;  %v15393_v30 = vmax.f32 %v15391_v8, %v15392_v60  ;;  %v15403_v8 = vmax.f32 %v12478_v36, %v12512_v7  ;;  %v15404_v60 = vmax.f32 %v12480_v23, %v12515_v40  ;;  %v15406_v23 = vld [vmem:[#allocation108_spill] sm:$0xff] }
 0x6fa   :  { %5481 = vmatmul.mubr.bf16.gmra.mrb[148].mxu0 %v13001_v13  ;;  %v15387_v47 = vmax.f32 %v15385_v4, %v15386_v51  ;;  %v15394_v18 = vld [vmem:[#allocation55_spill] sm:$0xff]  ;;  %v4685_v36 = vld [vmem:[#allocation3 + $0xa88] sm:$0xff] }
 0x6fb   :  { %15384 = vst [vmem:[#allocation77_spill] sm:$0xff] %v13009_v17  ;;  %5029 = vmatmul.mubr.bf16.gmra.mrb[116].mxu1 %v13001_v13  ;;  %5532 = vmatpush1.bf16.msra.mxu0 %v4644_v62  ;;  %v4658_v62 = vld [vmem:[#allocation3 + $0x9b0] sm:$0xff]  ;;  %v4687_v7 = vld [vmem:[#allocation3 + $0xa98] sm:$0xff] }
 0x6fc   :  { %5080 = vmatpush1.bf16.msra.mxu1 %v4642_v52  ;;  %5533 = vmatprep.subr.bf16.mxu0 %v4652_v54  ;;  %v13021_v19 = vpack.c.bf16 %v15390_v22, %v15387_v47  ;;  %v4656_v52 = vld [vmem:[#allocation3 + $0x9a0] sm:$0xff]  ;;  %v4666_v54 = vld [vmem:[#allocation3 + $0x9f0] sm:$0xff] }
 0x6fd   :  { %5081 = vmatprep.subr.bf16.mxu1 %v4650_v38  ;;  %5038 = vmatprep.mubr.bf16.mxu1 %v13009_v17  ;;  %v4664_v38 = vld [vmem:[#allocation3 + $0x9e0] sm:$0xff]  ;;  %v15397_v51 = vld [vmem:[#allocation151_spill] sm:$0xff] }
 0x6fe   :  { %5490 = vmatprep.mubr.bf16.mxu0 %v13009_v17  ;;  %v15395_v17 = vld [vmem:[#allocation207_spill] sm:$0xff]  ;;  %v15400_v47 = vld [vmem:[#allocation152_spill] sm:$0xff] }
 0x6ff   :  { %5534 = vmatpush1.bf16.msra.mxu0 %v4651_v49  ;;  %v15396_v13 = vmax.f32 %v15394_v18, %v15395_v17  ;;  %v4665_v49 = vld [vmem:[#allocation3 + $0x9e8] sm:$0xff]  ;;  %v15402_v2 = vmax.f32 %v15400_v47, %v15401_v0  ;;  %v4686_v47 = vld [vmem:[#allocation3 + $0xa90] sm:$0xff]  ;;  %v4692_v0 = vld [vmem:[#allocation3 + $0xac0] sm:$0xff] }
 0x700   :  { %5082 = vmatpush1.bf16.msra.mxu1 %v4649_v25  ;;  %5535 = vmatprep.subr.bf16.mxu0 %v4659_v29  ;;  %v4663_v25 = vld [vmem:[#allocation3 + $0x9d8] sm:$0xff]  ;;  %v4673_v29 = vld [vmem:[#allocation3 + $0xa28] sm:$0xff] }
 0x701   :  { %5083 = vmatprep.subr.bf16.mxu1 %v4657_v1  ;;  %v13029_v4 = vpack.c.bf16 %v15396_v13, %v15393_v30  ;;  %v4671_v1 = vld [vmem:[#allocation3 + $0xa18] sm:$0xff]  ;;  %v15398_v17 = vld [vmem:[#allocation169_spill] sm:$0xff]  ;;  %v13049_v30 = vpack.c.bf16 %v15404_v60, %v15403_v8  ;;  %v15415_v60 = vmax.f32 %v12208_v46, %v12244_v59 }
 0x702   :  { %5491 = vmatmul.mubr.bf16.gmra.mrb[152].mxu0 %v13021_v19  ;;  %v15399_v13 = vmax.f32 %v15397_v51, %v15398_v17  ;;  %v4677_v18 = vld [vmem:[#allocation3 + $0xa48] sm:$0xff]  ;;  %v4707_v59 = vld [vmem:[#allocation3 + $0xb38] sm:$0xff] }
 0x703   :  { %5039 = vmatmul.mubr.bf16.gmra.mrb[120].mxu1 %v13021_v19  ;;  %5536 = vmatpush1.bf16.msra.mxu0 %v4658_v62  ;;  %v4672_v62 = vld [vmem:[#allocation3 + $0xa20] sm:$0xff]  ;;  %v4693_v8 = vld [vmem:[#allocation3 + $0xac8] sm:$0xff] }
 0x704   :  { %5084 = vmatpush1.bf16.msra.mxu1 %v4656_v52  ;;  %5537 = vmatprep.subr.bf16.mxu0 %v4666_v54  ;;  %v13041_v22 = vpack.c.bf16 %v15402_v2, %v15399_v13  ;;  %v4670_v52 = vld [vmem:[#allocation3 + $0xa10] sm:$0xff]  ;;  %v4680_v54 = vld [vmem:[#allocation3 + $0xa60] sm:$0xff]  ;;  %v4705_v46 = vld [vmem:[#allocation3 + $0xb28] sm:$0xff] }
 0x705   :  { %5085 = vmatprep.subr.bf16.mxu1 %v4664_v38  ;;  %5048 = vmatprep.mubr.bf16.mxu1 %v13029_v4  ;;  %v4678_v38 = vld [vmem:[#allocation3 + $0xa50] sm:$0xff]  ;;  %v4684_v13 = vld [vmem:[#allocation3 + $0xa80] sm:$0xff] }
 0x706   :  { %5500 = vmatprep.mubr.bf16.mxu0 %v13029_v4  ;;  %v4694_v2 = vld [vmem:[#allocation3 + $0xad0] sm:$0xff] }
 0x707   :  { %5538 = vmatpush1.bf16.msra.mxu0 %v4665_v49  ;;  %v15405_v49 = vld [vmem:[#allocation85_spill] sm:$0xff] }
 0x708   :  { %5086 = vmatpush1.bf16.msra.mxu1 %v4663_v25  ;;  %5539 = vmatprep.subr.bf16.mxu0 %v4673_v29  ;;  %v4679_v25 = vld [vmem:[#allocation3 + $0xa58] sm:$0xff]  ;;  %v15407_v40 = vmax.f32 %v15405_v49, %v15406_v23  ;;  %v4708_v49 = vld [vmem:[#allocation3 + $0xb40] sm:$0xff]  ;;  %v15416_v23 = vmax.f32 %v12486_v27, %v12526_v26  ;;  %v4713_v27 = vld [vmem:[#allocation3 + $0xb68] sm:$0xff] }
 0x709   :  { %5087 = vmatprep.subr.bf16.mxu1 %v4671_v1  ;;  %v15408_v1 = vld [vmem:[#allocation58_spill] sm:$0xff]  ;;  %v15409_v29 = vld [vmem:[#allocation40_spill] sm:$0xff] }
 0x70a   :  { %5501 = vmatmul.mubr.bf16.gmra.mrb[156].mxu0 %v13041_v22  ;;  %v15410_v51 = vmax.f32 %v15408_v1, %v15409_v29  ;;  %v4715_v26 = vld [vmem:[#allocation3 + $0xb78] sm:$0xff]  ;;  %v4712_v29 = vld [vmem:[#allocation3 + $0xb60] sm:$0xff] }
 0x70b   :  { %5049 = vmatmul.mubr.bf16.gmra.mrb[124].mxu1 %v13041_v22  ;;  %5540 = vmatpush1.bf16.msra.mxu0 %v4672_v62  ;;  %v15412_v62 = vmax.f32 %v12484_v35, %v12523_v11  ;;  %v15413_v35 = vld [vmem:[#allocation208_spill] sm:$0xff] }
 0x70c   :  { %5088 = vmatpush1.bf16.msra.mxu1 %v4670_v52  ;;  %5541 = vmatprep.subr.bf16.mxu0 %v4680_v54  ;;  %v13061_v17 = vpack.c.bf16 %v15410_v51, %v15407_v40  ;;  %v15411_v52 = vmax.f32 %v12482_v55, %v12518_v56  ;;  %v4691_v54 = vld [vmem:[#allocation3 + $0xab8] sm:$0xff]  ;;  %v4701_v56 = vld [vmem:[#allocation3 + $0xb08] sm:$0xff]  ;;  %v15414_v11 = vmax.f32 %v12206_v21, %v15413_v35  ;;  %v4714_v51 = vld [vmem:[#allocation3 + $0xb70] sm:$0xff] }
 0x70d   :  { %5089 = vmatprep.subr.bf16.mxu1 %v4678_v38  ;;  %5091 = vmatprep.mubr.bf16.mxu1 %v13049_v30  ;;  %v4699_v55 = vld [vmem:[#allocation3 + $0xaf8] sm:$0xff]  ;;  %v15417_v40 = vmax.f32 %v12488_v5, %v12529_v16  ;;  %v15418_v5 = vmax.f32 %v12210_v24, %v12247_v48  ;;  %v15419_v16 = vmax.f32 %v12212_v14, %v12250_v63  ;;  %v4721_v48 = vld [vmem:[#allocation3 + $0xba8] sm:$0xff]  ;;  %v4734_v35 = vld [vmem:[#allocation3 + $0xc10] sm:$0xff] }
 0x70e   :  { %5543 = vmatprep.mubr.bf16.mxu0 %v13049_v30  ;;  %v13069_v38 = vpack.c.bf16 %v15412_v62, %v15411_v52  ;;  %v4719_v14 = vld [vmem:[#allocation3 + $0xb98] sm:$0xff]  ;;  %v15425_v52 = vld [vmem:[#allocation137_spill] sm:$0xff]  ;;  %v15426_v62 = vld [vmem:[#allocation210_spill] sm:$0xff] }
 0x70f   :  { %5542 = vmatpush1.bf16.msra.mxu0 %v4679_v25  ;;  %v4698_v25 = vld [vmem:[#allocation3 + $0xaf0] sm:$0xff]  ;;  %v13089_v21 = vpack.c.bf16 %v15417_v40, %v15416_v23  ;;  %v13101_v1 = vpack.c.bf16 %v15419_v16, %v15418_v5  ;;  %v4727_v63 = vld [vmem:[#allocation3 + $0xbd8] sm:$0xff]  ;;  %v4748_v16 = vld [vmem:[#allocation3 + $0xc80] sm:$0xff] }
 0x710   :  { %5090 = vmatpush1.bf16.msra.mxu1 %v4677_v18  ;;  %5624 = vmatprep.subr.bf16.mxu0 %v4687_v7  ;;  %v13081_v18 = vpack.c.bf16 %v15415_v60, %v15414_v11  ;;  %v4706_v7 = vld [vmem:[#allocation3 + $0xb30] sm:$0xff]  ;;  %v4736_v11 = vld [vmem:[#allocation3 + $0xc20] sm:$0xff]  ;;  %v15428_v60 = vmax.f32 %v12497_v42, %v12538_v15  ;;  %v4741_v42 = vld [vmem:[#allocation3 + $0xc48] sm:$0xff] }
 0x711   :  { %5172 = vmatprep.subr.bf16.mxu1 %v4685_v36  ;;  %v4700_v36 = vld [vmem:[#allocation3 + $0xb00] sm:$0xff]  ;;  %v4743_v15 = vld [vmem:[#allocation3 + $0xc58] sm:$0xff]  ;;  %v4742_v5 = vld [vmem:[#allocation3 + $0xc50] sm:$0xff] }
 0x712   :  { %5544 = vmatmul.mubr.bf16.vlgmr.msra.gmra.mrb[128].mxu0 %v13061_v17  ;;  %v15430_v23 = vld [vmem:[#allocation140_spill] sm:$0xff] }
 0x713   :  { %5092 = vmatmul.mubr.bf16.vlgmr.msra.gmra.mrb[96].mxu1 %v13061_v17  ;;  %5625 = vmatpush1.bf16.msra.mxu0 %v4686_v47  ;;  %v4722_v47 = vld [vmem:[#allocation3 + $0xbb0] sm:$0xff]  ;;  %v15433_v40 = vld [vmem:[#allocation52_spill] sm:$0xff] }
 0x714   :  { %5173 = vmatpush1.bf16.msra.mxu1 %v4684_v13  ;;  %5626 = vmatprep.subr.bf16.mxu0 %v4694_v2  ;;  %v4720_v13 = vld [vmem:[#allocation3 + $0xba0] sm:$0xff]  ;;  %v15421_v2 = vmax.f32 %v12495_v33, %v12535_v10 }
 0x715   :  { %5174 = vmatprep.subr.bf16.mxu1 %v4692_v0  ;;  %5101 = vmatprep.mubr.bf16.mxu1 %v13069_v38  ;;  %v15420_v0 = vmax.f32 %v12493_v39, %v12532_v34  ;;  %v4729_v39 = vld [vmem:[#allocation3 + $0xbe8] sm:$0xff] }
 0x716   :  { %5553 = vmatprep.mubr.bf16.mxu0 %v13069_v38  ;;  %v15422_v34 = vld [vmem:[#allocation62_spill] sm:$0xff]  ;;  %v15423_v33 = vld [vmem:[#allocation209_spill] sm:$0xff] }
 0x717   :  { %5627 = vmatpush1.bf16.msra.mxu0 %v4693_v8  ;;  %v13109_v24 = vpack.c.bf16 %v15421_v2, %v15420_v0  ;;  %v15424_v10 = vmax.f32 %v15422_v34, %v15423_v33  ;;  %v4747_v2 = vld [vmem:[#allocation3 + $0xc78] sm:$0xff]  ;;  %v15443_v34 = vld [vmem:[#allocation214_spill] sm:$0xff] }
 0x718   :  { %5175 = vmatpush1.bf16.msra.mxu1 %v4691_v54  ;;  %5628 = vmatprep.subr.bf16.mxu0 %v4701_v56  ;;  %v15427_v54 = vmax.f32 %v15425_v52, %v15426_v62  ;;  %v4728_v56 = vld [vmem:[#allocation3 + $0xbe0] sm:$0xff]  ;;  %v4754_v52 = vld [vmem:[#allocation3 + $0xcb0] sm:$0xff] }
 0x719   :  { %5176 = vmatprep.subr.bf16.mxu1 %v4699_v55  ;;  %v4726_v55 = vld [vmem:[#allocation3 + $0xbd0] sm:$0xff]  ;;  %v4756_v62 = vld [vmem:[#allocation3 + $0xcc0] sm:$0xff] }
 0x71a   :  { %5554 = vmatmul.mubr.bf16.gmra.mrb[132].mxu0 %v13081_v18  ;;  %v13121_v8 = vpack.c.bf16 %v15427_v54, %v15424_v10  ;;  %v4762_v54 = vld [vmem:[#allocation3 + $0xcf0] sm:$0xff] }
 0x71b   :  { %5102 = vmatmul.mubr.bf16.gmra.mrb[100].mxu1 %v13081_v18  ;;  %5629 = vmatpush1.bf16.msra.mxu0 %v4700_v36 }
 0x71c   :  { %5177 = vmatpush1.bf16.msra.mxu1 %v4698_v25  ;;  %5630 = vmatprep.subr.bf16.mxu0 %v4708_v49  ;;  %v15429_v25 = vmax.f32 %v12499_v53, %v12543_v44  ;;  %v4735_v49 = vld [vmem:[#allocation3 + $0xc18] sm:$0xff] }
 0x71d   :  { %5178 = vmatprep.subr.bf16.mxu1 %v4706_v7  ;;  %5111 = vmatprep.mubr.bf16.mxu1 %v13089_v21  ;;  %v4733_v7 = vld [vmem:[#allocation3 + $0xc08] sm:$0xff]  ;;  %v15431_v53 = vld [vmem:[#allocation211_spill] sm:$0xff] }
 0x71e   :  { %5563 = vmatprep.mubr.bf16.mxu0 %v13089_v21  ;;  %v13129_v36 = vpack.c.bf16 %v15429_v25, %v15428_v60  ;;  %v15432_v44 = vmax.f32 %v15430_v23, %v15431_v53  ;;  %v15448_v60 = vld [vmem:[#allocation107_spill] sm:$0xff]  ;;  %v15449_v25 = vld [vmem:[#allocation240_spill] sm:$0xff]  ;;  %v4769_v23 = vld [vmem:[#allocation3 + $0xd28] sm:$0xff] }
 0x71f   :  { %5631 = vmatpush1.bf16.msra.mxu0 %v4707_v59  ;;  %v4771_v53 = vld [vmem:[#allocation3 + $0xd38] sm:$0xff] }
 0x720   :  { %5179 = vmatpush1.bf16.msra.mxu1 %v4705_v46  ;;  %5632 = vmatprep.subr.bf16.mxu0 %v4715_v26  ;;  %v15434_v46 = vld [vmem:[#allocation212_spill] sm:$0xff] }
 0x721   :  { %5180 = vmatprep.subr.bf16.mxu1 %v4713_v27  ;;  %v15435_v59 = vmax.f32 %v15433_v40, %v15434_v46  ;;  %v4740_v26 = vld [vmem:[#allocation3 + $0xc40] sm:$0xff]  ;;  %v15452_v40 = vld [vmem:[#allocation215_spill] sm:$0xff] }
 0x722   :  { %5564 = vmatmul.mubr.bf16.gmra.mrb[136].mxu0 %v13101_v1 }
 0x723   :  { %5112 = vmatmul.mubr.bf16.gmra.mrb[104].mxu1 %v13101_v1  ;;  %5633 = vmatpush1.bf16.msra.mxu0 %v4714_v51  ;;  %v13141_v27 = vpack.c.bf16 %v15435_v59, %v15432_v44  ;;  %v15436_v51 = vmax.f32 %v12501_v28, %v12546_v57  ;;  %v4755_v28 = vld [vmem:[#allocation3 + $0xcb8] sm:$0xff]  ;;  %v4757_v57 = vld [vmem:[#allocation3 + $0xcc8] sm:$0xff] }
 0x724   :  { %5181 = vmatpush1.bf16.msra.mxu1 %v4712_v29  ;;  %5634 = vmatprep.subr.bf16.mxu0 %v4722_v47  ;;  %v4750_v29 = vld [vmem:[#allocation3 + $0xc90] sm:$0xff]  ;;  %v15451_v44 = vld [vmem:[#allocation173_spill] sm:$0xff]  ;;  %v15454_v59 = vld [vmem:[#allocation176_spill] sm:$0xff] }
 0x725   :  { %5182 = vmatprep.subr.bf16.mxu1 %v4720_v13  ;;  %5121 = vmatprep.mubr.bf16.mxu1 %v13109_v24  ;;  %v15437_v13 = vld [vmem:[#allocation84_spill] sm:$0xff]  ;;  %v15453_v46 = vmax.f32 %v15451_v44, %v15452_v40 }
 0x726   :  { %5573 = vmatprep.mubr.bf16.mxu0 %v13109_v24  ;;  %v15438_v47 = vmax.f32 %v12503_v31, %v15437_v13  ;;  %v15440_v31 = vld [vmem:[#allocation213_spill] sm:$0xff]  ;;  %v15472_v40 = vld [vmem:[#allocation136_spill] sm:$0xff] }
 0x727   :  { %5635 = vmatpush1.bf16.msra.mxu0 %v4721_v48  ;;  %v15439_v48 = vld [vmem:[#allocation87_spill] sm:$0xff]  ;;  %v4776_v13 = vld [vmem:[#allocation3 + $0xd60] sm:$0xff] }
 0x728   :  { %5183 = vmatpush1.bf16.msra.mxu1 %v4719_v14  ;;  %5636 = vmatprep.subr.bf16.mxu0 %v4729_v39  ;;  %v13149_v0 = vpack.c.bf16 %v15438_v47, %v15436_v51  ;;  %v4749_v14 = vld [vmem:[#allocation3 + $0xc88] sm:$0xff]  ;;  %v4770_v51 = vld [vmem:[#allocation3 + $0xd30] sm:$0xff] }
 0x729   :  { %5184 = vmatprep.subr.bf16.mxu1 %v4727_v63  ;;  %v15441_v63 = vmax.f32 %v15439_v48, %v15440_v31  ;;  %v15442_v39 = vld [vmem:[#allocation154_spill] sm:$0xff] }
 0x72a   :  { %5574 = vmatmul.mubr.bf16.gmra.mrb[140].mxu0 %v13121_v8  ;;  %v15444_v33 = vmax.f32 %v15442_v39, %v15443_v34  ;;  %v4778_v47 = vld [vmem:[#allocation3 + $0xd70] sm:$0xff]  ;;  %v4775_v39 = vld [vmem:[#allocation3 + $0xd58] sm:$0xff]  ;;  %v4777_v34 = vld [vmem:[#allocation3 + $0xd68] sm:$0xff] }
 0x72b   :  { %5122 = vmatmul.mubr.bf16.gmra.mrb[108].mxu1 %v13121_v8  ;;  %5637 = vmatpush1.bf16.msra.mxu0 %v4728_v56  ;;  %v15445_v56 = vld [vmem:[#allocation174_spill] sm:$0xff] }
 0x72c   :  { %5185 = vmatpush1.bf16.msra.mxu1 %v4726_v55  ;;  %5638 = vmatprep.subr.bf16.mxu0 %v4736_v11  ;;  %v13161_v10 = vpack.c.bf16 %v15444_v33, %v15441_v63  ;;  %v4764_v55 = vld [vmem:[#allocation3 + $0xd00] sm:$0xff]  ;;  %v15461_v48 = vld [vmem:[#allocation242_spill] sm:$0xff]  ;;  %v4783_v33 = vld [vmem:[#allocation3 + $0xd98] sm:$0xff] }
 0x72d   :  { %5186 = vmatprep.subr.bf16.mxu1 %v4734_v35  ;;  %5131 = vmatprep.mubr.bf16.mxu1 %v13129_v36  ;;  %v15446_v35 = vld [vmem:[#allocation37_spill] sm:$0xff] }
 0x72e   :  { %5583 = vmatprep.mubr.bf16.mxu0 %v13129_v36  ;;  %v15447_v11 = vmax.f32 %v15445_v56, %v15446_v35  ;;  %v15466_v56 = vld [vmem:[#allocation114_spill] sm:$0xff] }
 0x72f   :  { %5639 = vmatpush1.bf16.msra.mxu0 %v4735_v49  ;;  %v15467_v35 = vld [vmem:[#allocation218_spill] sm:$0xff] }
 0x730   :  { %5187 = vmatpush1.bf16.msra.mxu1 %v4733_v7  ;;  %5640 = vmatprep.subr.bf16.mxu0 %v4743_v15  ;;  %v15450_v7 = vmax.f32 %v15448_v60, %v15449_v25  ;;  %v4763_v15 = vld [vmem:[#allocation3 + $0xcf8] sm:$0xff]  ;;  %v4782_v25 = vld [vmem:[#allocation3 + $0xd90] sm:$0xff] }
 0x731   :  { %5188 = vmatprep.subr.bf16.mxu1 %v4741_v42  ;;  %v4761_v42 = vld [vmem:[#allocation3 + $0xce8] sm:$0xff] }
 0x732   :  { %5584 = vmatmul.mubr.bf16.gmra.mrb[144].mxu0 %v13141_v27  ;;  %v13169_v49 = vpack.c.bf16 %v15450_v7, %v15447_v11  ;;  %v15468_v11 = vmax.f32 %v15466_v56, %v15467_v35  ;;  %v4784_v7 = vld [vmem:[#allocation3 + $0xda0] sm:$0xff]  ;;  %v4417_v56 = vld [vmem:[#allocation3 + $0x228] sm:$0xff] }
 0x733   :  { %5132 = vmatmul.mubr.bf16.gmra.mrb[112].mxu1 %v13141_v27  ;;  %5641 = vmatpush1.bf16.msra.mxu0 %v4742_v5  ;;  %v15485_v35 = vld [vmem:[#allocation224_spill] sm:$0xff] }
 0x734   :  { %5189 = vmatpush1.bf16.msra.mxu1 %v4740_v26  ;;  %5642 = vmatprep.subr.bf16.mxu0 %v4750_v29  ;;  %v15455_v26 = vld [vmem:[#allocation216_spill] sm:$0xff] }
 0x735   :  { %5190 = vmatprep.subr.bf16.mxu1 %v4748_v16  ;;  %5141 = vmatprep.mubr.bf16.mxu1 %v13149_v0  ;;  %v15456_v5 = vmax.f32 %v15454_v59, %v15455_v26  ;;  %v4768_v29 = vld [vmem:[#allocation3 + $0xd20] sm:$0xff] }
 0x736   :  { %5593 = vmatprep.mubr.bf16.mxu0 %v13149_v0 }
 0x737   :  { %5643 = vmatpush1.bf16.msra.mxu0 %v4749_v14  ;;  %v13181_v16 = vpack.c.bf16 %v15456_v5, %v15453_v46  ;;  %v15458_v14 = vld [vmem:[#allocation241_spill] sm:$0xff]  ;;  %v15473_v46 = vld [vmem:[#allocation243_spill] sm:$0xff] }
 0x738   :  { %5191 = vmatpush1.bf16.msra.mxu1 %v4747_v2  ;;  %5644 = vmatprep.subr.bf16.mxu0 %v4757_v57  ;;  %v15457_v2 = vld [vmem:[#allocation38_spill] sm:$0xff]  ;;  %v15460_v57 = vld [vmem:[#allocation80_spill] sm:$0xff]  ;;  %v15474_v59 = vmax.f32 %v15472_v40, %v15473_v46 }
 0x739   :  { %5192 = vmatprep.subr.bf16.mxu1 %v4755_v28  ;;  %v15459_v28 = vmax.f32 %v15457_v2, %v15458_v14  ;;  %v15462_v31 = vmax.f32 %v15460_v57, %v15461_v48  ;;  %v4789_v5 = vld [vmem:[#allocation3 + $0xdc8] sm:$0xff]  ;;  %v15479_v57 = vld [vmem:[#allocation223_spill] sm:$0xff] }
 0x73a   :  { %5594 = vmatmul.mubr.bf16.gmra.mrb[148].mxu0 %v13161_v10  ;;  %v15476_v2 = vld [vmem:[#allocation222_spill] sm:$0xff] }
 0x73b   :  { %5142 = vmatmul.mubr.bf16.gmra.mrb[116].mxu1 %v13161_v10  ;;  %5645 = vmatpush1.bf16.msra.mxu0 %v4756_v62  ;;  %v13189_v63 = vpack.c.bf16 %v15462_v31, %v15459_v28  ;;  %v15463_v62 = vld [vmem:[#allocation33_spill] sm:$0xff]  ;;  %v15478_v28 = vld [vmem:[#allocation36_spill] sm:$0xff]  ;;  %v4366_v46 = vld [vmem:[#allocation3 + $0x90] sm:$0xff] }
 0x73c   :  { %5193 = vmatpush1.bf16.msra.mxu1 %v4754_v52  ;;  %5646 = vmatprep.subr.bf16.mxu0 %v4764_v55  ;;  %v4785_v52 = vld [vmem:[#allocation3 + $0xda8] sm:$0xff]  ;;  %v15480_v48 = vmax.f32 %v15478_v28, %v15479_v57  ;;  %v15498_v57 = vmax.f32 %v12625_v9, %v12664_v41  ;;  %v4387_v9 = vld [vmem:[#allocation3 + $0x138] sm:$0xff] }
 0x73d   :  { %5194 = vmatprep.subr.bf16.mxu1 %v4762_v54  ;;  %5151 = vmatprep.mubr.bf16.mxu1 %v13169_v49  ;;  %v15464_v54 = vld [vmem:[#allocation217_spill] sm:$0xff]  ;;  %v15500_v41 = vld [vmem:[#allocation56_spill] sm:$0xff] }
 0x73e   :  { %5603 = vmatprep.mubr.bf16.mxu0 %v13169_v49  ;;  %v15465_v55 = vmax.f32 %v15463_v62, %v15464_v54  ;;  %v4352_v62 = vld [vmem:[#allocation3 + $0x20] sm:$0xff] }
 0x73f   :  { %5647 = vmatpush1.bf16.msra.mxu0 %v4763_v15  ;;  %v4792_v15 = vld [vmem:[#allocation3 + $0xde0] sm:$0xff] }
 0x740   :  { %5195 = vmatpush1.bf16.msra.mxu1 %v4761_v42  ;;  %5648 = vmatprep.subr.bf16.mxu0 %v4771_v53  ;;  %v13201_v60 = vpack.c.bf16 %v15468_v11, %v15465_v55  ;;  %v4790_v42 = vld [vmem:[#allocation3 + $0xdd0] sm:$0xff]  ;;  %v15470_v53 = vld [vmem:[#allocation92_spill] sm:$0xff] }
 0x741   :  { %5196 = vmatprep.subr.bf16.mxu1 %v4769_v23  ;;  %v15469_v23 = vld [vmem:[#allocation60_spill] sm:$0xff]  ;;  %v4354_v55 = vld [vmem:[#allocation3 + $0x30] sm:$0xff] }
 0x742   :  { %5604 = vmatmul.mubr.bf16.gmra.mrb[152].mxu0 %v13181_v16  ;;  %v15471_v44 = vmax.f32 %v15469_v23, %v15470_v53  ;;  %v4360_v54 = vld [vmem:[#allocation3 + $0x60] sm:$0xff]  ;;  %v4361_v23 = vld [vmem:[#allocation3 + $0x68] sm:$0xff]  ;;  %v15490_v53 = vmax.f32 %v12621_v45, %v12658_v61 }
 0x743   :  { %5152 = vmatmul.mubr.bf16.gmra.mrb[120].mxu1 %v13181_v16  ;;  %5649 = vmatpush1.bf16.msra.mxu0 %v4770_v51  ;;  %v4353_v51 = vld [vmem:[#allocation3 + $0x28] sm:$0xff] }
 0x744   :  { %5197 = vmatpush1.bf16.msra.mxu1 %v4768_v29  ;;  %5650 = vmatprep.subr.bf16.mxu0 %v4778_v47  ;;  %v13209_v26 = vpack.c.bf16 %v15474_v59, %v15471_v44  ;;  %v4791_v29 = vld [vmem:[#allocation3 + $0xdd8] sm:$0xff]  ;;  %v15491_v44 = vmax.f32 %v12623_v6, %v12661_v50  ;;  %v4374_v59 = vld [vmem:[#allocation3 + $0xd0] sm:$0xff]  ;;  %v4373_v45 = vld [vmem:[#allocation3 + $0xc8] sm:$0xff] }
 0x745   :  { %5198 = vmatprep.subr.bf16.mxu1 %v4776_v13  ;;  %5161 = vmatprep.mubr.bf16.mxu1 %v13189_v63  ;;  %v4410_v13 = vld [vmem:[#allocation3 + $0x1f0] sm:$0xff]  ;;  %v4431_v6 = vld [vmem:[#allocation3 + $0x298] sm:$0xff]  ;;  %v4381_v61 = vld [vmem:[#allocation3 + $0x108] sm:$0xff] }
 0x746   :  { %5613 = vmatprep.mubr.bf16.mxu0 %v13189_v63  ;;  %v15475_v47 = vld [vmem:[#allocation83_spill] sm:$0xff]  ;;  %v13249_v40 = vpack.c.bf16 %v15491_v44, %v15490_v53  ;;  %v15492_v50 = vld [vmem:[#allocation42_spill] sm:$0xff] }
 0x747   :  { %5651 = vmatpush1.bf16.msra.mxu0 %v4777_v34  ;;  %v15477_v14 = vmax.f32 %v15475_v47, %v15476_v2  ;;  %v15495_v47 = vld [vmem:[#allocation110_spill] sm:$0xff]  ;;  %v15496_v2 = vld [vmem:[#allocation228_spill] sm:$0xff] }
 0x748   :  { %5199 = vmatpush1.bf16.msra.mxu1 %v4775_v39  ;;  %5652 = vmatprep.subr.bf16.mxu0 %v4785_v52  ;;  %v15481_v39 = vld [vmem:[#allocation244_spill] sm:$0xff]  ;;  %v4394_v53 = vld [vmem:[#allocation3 + $0x170] sm:$0xff] }
 0x749   :  { %5200 = vmatprep.subr.bf16.mxu1 %v4783_v33  ;;  %v13221_v31 = vpack.c.bf16 %v15480_v48, %v15477_v14  ;;  %v15482_v34 = vmax.f32 %v12617_v32, %v15481_v39  ;;  %v15483_v33 = vmax.f32 %v12619_v37, %v12655_v20  ;;  %v4359_v32 = vld [vmem:[#allocation3 + $0x58] sm:$0xff]  ;;  %v15497_v14 = vmax.f32 %v15495_v47, %v15496_v2  ;;  %v4402_v44 = vld [vmem:[#allocation3 + $0x1b0] sm:$0xff]  ;;  %v15516_v47 = vld [vmem:[#allocation113_spill] sm:$0xff] }
 0x74a   :  { %5614 = vmatmul.mubr.bf16.gmra.mrb[156].mxu0 %v13201_v60  ;;  %v4367_v37 = vld [vmem:[#allocation3 + $0x98] sm:$0xff]  ;;  %v15499_v48 = vmax.f32 %v12627_v58, %v12667_v3  ;;  %v15501_v3 = vld [vmem:[#allocation229_spill] sm:$0xff] }
 0x74b   :  { %5162 = vmatmul.mubr.bf16.gmra.mrb[124].mxu1 %v13201_v60  ;;  %5653 = vmatpush1.bf16.msra.mxu0 %v4784_v7  ;;  %v13229_v52 = vpack.c.bf16 %v15483_v33, %v15482_v34  ;;  %v15484_v20 = vld [vmem:[#allocation91_spill] sm:$0xff]  ;;  %v15488_v7 = vld [vmem:[#allocation226_spill] sm:$0xff]  ;;  %v4380_v34 = vld [vmem:[#allocation3 + $0x100] sm:$0xff] }
 0x74c   :  { %5201 = vmatpush1.bf16.msra.mxu1 %v4782_v25  ;;  %5654 = vmatprep.subr.bf16.mxu0 %v4792_v15  ;;  %v15486_v11 = vmax.f32 %v15484_v20, %v15485_v35  ;;  %v15487_v25 = vld [vmem:[#allocation115_spill] sm:$0xff]  ;;  %v13269_v39 = vpack.c.bf16 %v15499_v48, %v15498_v57  ;;  %v4388_v33 = vld [vmem:[#allocation3 + $0x140] sm:$0xff]  ;;  %v15519_v57 = vld [vmem:[#allocation54_spill] sm:$0xff] }
 0x74d   :  { %5202 = vmatprep.subr.bf16.mxu1 %v4790_v42  ;;  %5204 = vmatprep.mubr.bf16.mxu1 %v13209_v26  ;;  %v15489_v42 = vmax.f32 %v15487_v25, %v15488_v7  ;;  %v4395_v58 = vld [vmem:[#allocation3 + $0x178] sm:$0xff]  ;;  %v4382_v35 = vld [vmem:[#allocation3 + $0x110] sm:$0xff] }
 0x74e   :  { %5656 = vmatprep.mubr.bf16.mxu0 %v13209_v26  ;;  %v15507_v25 = vld [vmem:[#allocation139_spill] sm:$0xff]  ;;  %v15508_v7 = vld [vmem:[#allocation246_spill] sm:$0xff]  ;;  %v15520_v48 = vld [vmem:[#allocation248_spill] sm:$0xff] }
 0x74f   :  { %5655 = vmatpush1.bf16.msra.mxu0 %v4791_v29  ;;  %v13241_v15 = vpack.c.bf16 %v15489_v42, %v15486_v11  ;;  %v4368_v29 = vld [vmem:[#allocation3 + $0xa0] sm:$0xff]  ;;  %v15506_v11 = vmax.f32 %v12629_v12, %v12670_v43  ;;  %v15509_v42 = vmax.f32 %v15507_v25, %v15508_v7  ;;  %v4401_v12 = vld [vmem:[#allocation3 + $0x1a8] sm:$0xff]  ;;  %v15517_v2 = vld [vmem:[#allocation247_spill] sm:$0xff] }
 0x750   :  { %5203 = vmatpush1.bf16.msra.mxu1 %v4789_v5  ;;  %7361 = vmatprep.subr.bf16.mxu0 %v4410_v13  ;;  %v4424_v5 = vld [vmem:[#allocation3 + $0x260] sm:$0xff]  ;;  %v4403_v7 = vld [vmem:[#allocation3 + $0x1b8] sm:$0xff] }
 0x751   :  { %5737 = vmatprep.subr.bf16.mxu1 %v4353_v51  ;;  %v15493_v51 = vld [vmem:[#allocation227_spill] sm:$0xff]  ;;  %v4452_v43 = vld [vmem:[#allocation3 + $0x340] sm:$0xff] }
 0x752   :  { %5657 = vmatmul.mubr.bf16.vlgmr.msra.gmra.mrb[128].mxu0 %v13221_v31  ;;  %v15494_v13 = vmax.f32 %v15492_v50, %v15493_v51  ;;  %v15514_v50 = vld [vmem:[#allocation232_spill] sm:$0xff] }
 0x753   :  { %5205 = vmatmul.mubr.bf16.vlgmr.msra.gmra.mrb[96].mxu1 %v13221_v31  ;;  %5666 = vmatprep.mubr.bf16.mxu0 %v13229_v52 }
 0x754   :  { %5738 = vmatpush1.bf16.msra.mxu1 %v4352_v62  ;;  %5214 = vmatprep.mubr.bf16.mxu1 %v13229_v52  ;;  %v13261_v28 = vpack.c.bf16 %v15497_v14, %v15494_v13  ;;  %v4375_v62 = vld [vmem:[#allocation3 + $0xd8] sm:$0xff]  ;;  %v15518_v14 = vmax.f32 %v15516_v47, %v15517_v2 }
 0x755   :  { %5739 = vmatprep.subr.bf16.mxu1 %v4360_v54  ;;  %7362 = vmatpush3.bf16.msra.mxu0 %v4354_v55  ;;  %v4438_v54 = vld [vmem:[#allocation3 + $0x2d0] sm:$0xff]  ;;  %v15502_v55 = vmax.f32 %v15500_v41, %v15501_v3  ;;  %v4415_v41 = vld [vmem:[#allocation3 + $0x218] sm:$0xff] }
 0x756   :  { %7363 = vmatprep.subr.bf16.mxu0 %v4417_v56  ;;  %v15503_v56 = vld [vmem:[#allocation138_spill] sm:$0xff]  ;;  %v4423_v3 = vld [vmem:[#allocation3 + $0x258] sm:$0xff] }
 0x757   :  { %v15537_v2 = vld [vmem:[#allocation220_spill] sm:$0xff] }
 0x758   :  { %5740 = vmatpush1.bf16.msra.mxu1 %v4359_v32  ;;  %v15504_v32 = vld [vmem:[#allocation230_spill] sm:$0xff] }
 0x759   :  { %5741 = vmatprep.subr.bf16.mxu1 %v4367_v37  ;;  %7364 = vmatpush3.bf16.msra.mxu0 %v4361_v23  ;;  %v15505_v37 = vmax.f32 %v15503_v56, %v15504_v32  ;;  %v13289_v23 = vpack.c.bf16 %v15509_v42, %v15506_v11  ;;  %v15523_v56 = vld [vmem:[#allocation233_spill] sm:$0xff] }
 0x75a   :  { %5667 = vmatmul.mubr.bf16.gmra.mrb[132].mxu0 %v13241_v15  ;;  %7365 = vmatprep.subr.bf16.mxu0 %v4424_v5  ;;  %v4409_v5 = vld [vmem:[#allocation3 + $0x1e8] sm:$0xff] }
 0x75b   :  { %5215 = vmatmul.mubr.bf16.gmra.mrb[100].mxu1 %v13241_v15  ;;  %5676 = vmatprep.mubr.bf16.mxu0 %v13249_v40  ;;  %v13281_v20 = vpack.c.bf16 %v15505_v37, %v15502_v55  ;;  %v15522_v55 = vld [vmem:[#allocation148_spill] sm:$0xff]  ;;  %v15525_v37 = vld [vmem:[#allocation171_spill] sm:$0xff]  ;;  %v15528_v42 = vld [vmem:[#allocation153_spill] sm:$0xff] }
 0x75c   :  { %5742 = vmatpush1.bf16.msra.mxu1 %v4366_v46  ;;  %5224 = vmatprep.mubr.bf16.mxu1 %v13249_v40  ;;  %v4445_v46 = vld [vmem:[#allocation3 + $0x308] sm:$0xff]  ;;  %v15524_v32 = vmax.f32 %v15522_v55, %v15523_v56  ;;  %v4436_v55 = vld [vmem:[#allocation3 + $0x2c0] sm:$0xff] }
 0x75d   :  { %5743 = vmatprep.subr.bf16.mxu1 %v4374_v59  ;;  %7366 = vmatpush3.bf16.msra.mxu0 %v4368_v29  ;;  %v4389_v59 = vld [vmem:[#allocation3 + $0x148] sm:$0xff]  ;;  %v4444_v56 = vld [vmem:[#allocation3 + $0x300] sm:$0xff] }
 0x75e   :  { %7367 = vmatprep.subr.bf16.mxu0 %v4431_v6  ;;  %v15510_v29 = vld [vmem:[#allocation141_spill] sm:$0xff] }
 0x760   :  { %5744 = vmatpush1.bf16.msra.mxu1 %v4373_v45  ;;  %v15511_v45 = vld [vmem:[#allocation231_spill] sm:$0xff] }
 0x761   :  { %5745 = vmatprep.subr.bf16.mxu1 %v4381_v61  ;;  %7368 = vmatpush3.bf16.msra.mxu0 %v4375_v62  ;;  %v15512_v6 = vmax.f32 %v15510_v29, %v15511_v45  ;;  %v15513_v61 = vld [vmem:[#allocation86_spill] sm:$0xff]  ;;  %v4408_v62 = vld [vmem:[#allocation3 + $0x1e0] sm:$0xff] }
 0x762   :  { %5677 = vmatmul.mubr.bf16.gmra.mrb[136].mxu0 %v13261_v28  ;;  %7369 = vmatprep.subr.bf16.mxu0 %v4438_v54  ;;  %v15515_v51 = vmax.f32 %v15513_v61, %v15514_v50  ;;  %v4416_v54 = vld [vmem:[#allocation3 + $0x220] sm:$0xff]  ;;  %v4430_v29 = vld [vmem:[#allocation3 + $0x290] sm:$0xff]  ;;  %v4437_v61 = vld [vmem:[#allocation3 + $0x2c8] sm:$0xff] }
 0x763   :  { %5225 = vmatmul.mubr.bf16.gmra.mrb[104].mxu1 %v13261_v28  ;;  %5686 = vmatprep.mubr.bf16.mxu0 %v13269_v39  ;;  %v4522_v45 = vld [vmem:[#allocation3 + $0x570] sm:$0xff] }
 0x764   :  { %5746 = vmatpush1.bf16.msra.mxu1 %v4380_v34  ;;  %5234 = vmatprep.mubr.bf16.mxu1 %v13269_v39  ;;  %v13301_v13 = vpack.c.bf16 %v15515_v51, %v15512_v6  ;;  %v15521_v34 = vmax.f32 %v15519_v57, %v15520_v48  ;;  %v4429_v6 = vld [vmem:[#allocation3 + $0x288] sm:$0xff]  ;;  %v15534_v50 = vld [vmem:[#allocation219_spill] sm:$0xff] }
 0x765   :  { %5747 = vmatprep.subr.bf16.mxu1 %v4388_v33  ;;  %7370 = vmatpush3.bf16.msra.mxu0 %v4382_v35  ;;  %v15526_v35 = vld [vmem:[#allocation234_spill] sm:$0xff]  ;;  %v15535_v51 = vld [vmem:[#allocation235_spill] sm:$0xff] }
 0x766   :  { %7371 = vmatprep.subr.bf16.mxu0 %v4445_v46  ;;  %v13309_v33 = vpack.c.bf16 %v15521_v34, %v15518_v14  ;;  %v15527_v11 = vmax.f32 %v15525_v37, %v15526_v35  ;;  %v15531_v46 = vld [vmem:[#allocation172_spill] sm:$0xff]  ;;  %v15536_v47 = vmax.f32 %v15534_v50, %v15535_v51  ;;  %v15540_v34 = vld [vmem:[#allocation175_spill] sm:$0xff]  ;;  %v15546_v35 = vld [vmem:[#allocation221_spill] sm:$0xff] }
 0x767   :  { %v15538_v14 = vld [vmem:[#allocation236_spill] sm:$0xff]  ;;  %v15553_v50 = vld [vmem:[#allocation73_spill] sm:$0xff]  ;;  %v4466_v51 = vld [vmem:[#allocation3 + $0x3b0] sm:$0xff] }
 0x768   :  { %5748 = vmatpush1.bf16.msra.mxu1 %v4387_v9  ;;  %v4396_v9 = vld [vmem:[#allocation3 + $0x180] sm:$0xff]  ;;  %v13321_v25 = vpack.c.bf16 %v15527_v11, %v15524_v32  ;;  %v15539_v57 = vmax.f32 %v15537_v2, %v15538_v14  ;;  %v4443_v32 = vld [vmem:[#allocation3 + $0x2f8] sm:$0xff]  ;;  %v4529_v2 = vld [vmem:[#allocation3 + $0x5a8] sm:$0xff] }
 0x769   :  { %5749 = vmatprep.subr.bf16.mxu1 %v4395_v58  ;;  %7372 = vmatpush3.bf16.msra.mxu0 %v4389_v59  ;;  %v4459_v58 = vld [vmem:[#allocation3 + $0x378] sm:$0xff]  ;;  %v15532_v59 = vld [vmem:[#allocation250_spill] sm:$0xff]  ;;  %v15547_v11 = vld [vmem:[#allocation237_spill] sm:$0xff] }
 0x76a   :  { %5687 = vmatmul.mubr.bf16.gmra.mrb[140].mxu0 %v13281_v20  ;;  %7373 = vmatprep.subr.bf16.mxu0 %v4452_v43  ;;  %v13341_v48 = vpack.c.bf16 %v15539_v57, %v15536_v47  ;;  %v4451_v37 = vld [vmem:[#allocation3 + $0x338] sm:$0xff]  ;;  %v15554_v47 = vld [vmem:[#allocation66_spill] sm:$0xff] }
 0x76b   :  { %5235 = vmatmul.mubr.bf16.gmra.mrb[108].mxu1 %v13281_v20  ;;  %5696 = vmatprep.mubr.bf16.mxu0 %v13289_v23  ;;  %v4471_v14 = vld [vmem:[#allocation3 + $0x3d8] sm:$0xff] }
 0x76c   :  { %5750 = vmatpush1.bf16.msra.mxu1 %v4394_v53  ;;  %5244 = vmatprep.mubr.bf16.mxu1 %v13289_v23  ;;  %v15529_v53 = vld [vmem:[#allocation249_spill] sm:$0xff]  ;;  %v4479_v57 = vld [vmem:[#allocation3 + $0x418] sm:$0xff] }
 0x76d   :  { %5751 = vmatprep.subr.bf16.mxu1 %v4402_v44  ;;  %7374 = vmatpush3.bf16.msra.mxu0 %v4396_v9  ;;  %v15530_v44 = vmax.f32 %v15528_v42, %v15529_v53  ;;  %v15543_v9 = vld [vmem:[#allocation245_spill] sm:$0xff]  ;;  %v15550_v53 = vld [vmem:[#allocation238_spill] sm:$0xff] }
 0x76e   :  { %7375 = vmatprep.subr.bf16.mxu0 %v4459_v58  ;;  %v15544_v58 = vld [vmem:[#allocation252_spill] sm:$0xff]  ;;  %v15549_v42 = vld [vmem:[#allocation225_spill] sm:$0xff] }
 0x770   :  { %5752 = vmatpush1.bf16.msra.mxu1 %v4401_v12  ;;  %v15533_v12 = vmax.f32 %v15531_v46, %v15532_v59  ;;  %v4450_v59 = vld [vmem:[#allocation3 + $0x330] sm:$0xff] }
 0x771   :  { %5753 = vmatprep.subr.bf16.mxu1 %v4409_v5  ;;  %v4422_v5 = vld [vmem:[#allocation3 + $0x250] sm:$0xff]  ;;  %7376 = vmatpush3.bf16.msra.mxu0 %v4403_v7  ;;  %v15548_v7 = vmax.f32 %v15546_v35, %v15547_v11  ;;  %v4492_v35 = vld [vmem:[#allocation3 + $0x480] sm:$0xff] }
 0x772   :  { %5697 = vmatmul.mubr.bf16.gmra.mrb[144].mxu0 %v13301_v13  ;;  %v13329_v43 = vpack.c.bf16 %v15533_v12, %v15530_v44  ;;  %7425 = vmatprep.subr.bf16.mxu0 %v4522_v45  ;;  %v15551_v44 = vmax.f32 %v15549_v42, %v15550_v53  ;;  %v4458_v12 = vld [vmem:[#allocation3 + $0x370] sm:$0xff]  ;;  %v4465_v45 = vld [vmem:[#allocation3 + $0x3a8] sm:$0xff]  ;;  %v4500_v11 = vld [vmem:[#allocation3 + $0x4c0] sm:$0xff] }
 0x773   :  { %5245 = vmatmul.mubr.bf16.gmra.mrb[112].mxu1 %v13301_v13  ;;  %5706 = vmatprep.mubr.bf16.mxu0 %v13309_v33  ;;  %v4487_v42 = vld [vmem:[#allocation3 + $0x458] sm:$0xff] }
 0x774   :  { %5754 = vmatpush1.bf16.msra.mxu1 %v4408_v62  ;;  %5254 = vmatprep.mubr.bf16.mxu1 %v13309_v33  ;;  %v15541_v62 = vld [vmem:[#allocation251_spill] sm:$0xff]  ;;  %v13361_v46 = vpack.c.bf16 %v15551_v44, %v15548_v7  ;;  %v15557_v7 = vld [vmem:[#allocation120_spill] sm:$0xff] }
 0x775   :  { %5755 = vmatprep.subr.bf16.mxu1 %v4416_v54  ;;  %v15542_v54 = vmax.f32 %v15540_v34, %v15541_v62  ;;  %v4473_v34 = vld [vmem:[#allocation3 + $0x3e8] sm:$0xff]  ;;  %v4478_v62 = vld [vmem:[#allocation3 + $0x410] sm:$0xff]  ;;  %v15558_v53 = vld [vmem:[#allocation64_spill] sm:$0xff] }
 0x776   :  { %v4550_v44 = vld [vmem:[#allocation3 + $0x650] sm:$0xff] }
 0x778   :  { %5756 = vmatpush1.bf16.msra.mxu1 %v4415_v41  ;;  %v15545_v41 = vmax.f32 %v15543_v9, %v15544_v58  ;;  %v15555_v9 = vld [vmem:[#allocation177_spill] sm:$0xff] }
 0x779   :  { %5757 = vmatprep.subr.bf16.mxu1 %v4423_v3  ;;  %v4536_v58 = vld [vmem:[#allocation3 + $0x5e0] sm:$0xff] }
 0x77a   :  { %5707 = vmatmul.mubr.bf16.gmra.mrb[148].mxu0 %v13321_v25  ;;  %v13349_v3 = vpack.c.bf16 %v15545_v41, %v15542_v54  ;;  %v4486_v54 = vld [vmem:[#allocation3 + $0x450] sm:$0xff] }
 0x77b   :  { %5255 = vmatmul.mubr.bf16.gmra.mrb[116].mxu1 %v13321_v25  ;;  %5716 = vmatprep.mubr.bf16.mxu0 %v13329_v43  ;;  %v15556_v41 = vld [vmem:[#allocation63_spill] sm:$0xff] }
 0x77c   :  { %5758 = vmatpush1.bf16.msra.mxu1 %v4422_v5  ;;  %5264 = vmatprep.mubr.bf16.mxu1 %v13329_v43  ;;  %v15552_v5 = vld [vmem:[#allocation111_spill] sm:$0xff] }
 0x77d   :  { %5759 = vmatprep.subr.bf16.mxu1 %v4430_v29  ;;  %v4457_v29 = vld [vmem:[#allocation3 + $0x368] sm:$0xff] }
 0x780   :  { %5760 = vmatpush1.bf16.msra.mxu1 %v4429_v6  ;;  %v4464_v6 = vld [vmem:[#allocation3 + $0x3a0] sm:$0xff] }
 0x781   :  { %5761 = vmatprep.subr.bf16.mxu1 %v4437_v61  ;;  %v4472_v61 = vld [vmem:[#allocation3 + $0x3e0] sm:$0xff] }
 0x782   :  { %5717 = vmatmul.mubr.bf16.gmra.mrb[152].mxu0 %v13341_v48 }
 0x783   :  { %5265 = vmatmul.mubr.bf16.gmra.mrb[120].mxu1 %v13341_v48  ;;  %5726 = vmatprep.mubr.bf16.mxu0 %v13349_v3 }
 0x784   :  { %5762 = vmatpush1.bf16.msra.mxu1 %v4436_v55  ;;  %5274 = vmatprep.mubr.bf16.mxu1 %v13349_v3  ;;  %v4480_v55 = vld [vmem:[#allocation3 + $0x420] sm:$0xff] }
 0x785   :  { %5763 = vmatprep.subr.bf16.mxu1 %v4444_v56  ;;  %v4485_v56 = vld [vmem:[#allocation3 + $0x448] sm:$0xff] }
 0x788   :  { %5764 = vmatpush1.bf16.msra.mxu1 %v4443_v32  ;;  %v4543_v32 = vld [vmem:[#allocation3 + $0x618] sm:$0xff] }
 0x789   :  { %5765 = vmatprep.subr.bf16.mxu1 %v4451_v37  ;;  %v4493_v37 = vld [vmem:[#allocation3 + $0x488] sm:$0xff] }
 0x78a   :  { %5727 = vmatmul.mubr.bf16.gmra.mrb[156].mxu0 %v13361_v46 }
 0x78b   :  { %5275 = vmatmul.mubr.bf16.gmra.mrb[124].mxu1 %v13361_v46  ;;  %6221 = vmatprep.mubr.bf16.mxu0 %v15552_v5 }
 0x78c   :  { %5766 = vmatpush1.bf16.msra.mxu1 %v4450_v59  ;;  %5769 = vmatprep.mubr.bf16.mxu1 %v15552_v5  ;;  %v4499_v59 = vld [vmem:[#allocation3 + $0x4b8] sm:$0xff]  ;;  %v4494_v5 = vld [vmem:[#allocation3 + $0x490] sm:$0xff] }
 0x78d   :  { %5767 = vmatprep.subr.bf16.mxu1 %v4458_v12  ;;  %v4507_v12 = vld [vmem:[#allocation3 + $0x4f8] sm:$0xff] }
 0x790   :  { %5768 = vmatpush1.bf16.msra.mxu1 %v4457_v29  ;;  %v4506_v29 = vld [vmem:[#allocation3 + $0x4f0] sm:$0xff] }
 0x791   :  { %5850 = vmatprep.subr.bf16.mxu1 %v4465_v45  ;;  %v4514_v45 = vld [vmem:[#allocation3 + $0x530] sm:$0xff] }
 0x792   :  { %6222 = vmatmul.mubr.bf16.vlgmr.msra.gmra.mrb[160].mxu0 %v15553_v50 }
 0x793   :  { %5770 = vmatmul.mubr.bf16.vlgmr.msra.gmra.mrb[128].mxu1 %v15553_v50  ;;  %6229 = vmatprep.mubr.bf16.mxu0 %v15554_v47  ;;  %v15560_v50 = vld [vmem:[#allocation94_spill] sm:$0xff] }
 0x794   :  { %5851 = vmatpush1.bf16.msra.mxu1 %v4464_v6  ;;  %5779 = vmatprep.mubr.bf16.mxu1 %v15554_v47  ;;  %v15559_v6 = vld [vmem:[#allocation121_spill] sm:$0xff] }
 0x795   :  { %5852 = vmatprep.subr.bf16.mxu1 %v4472_v61  ;;  %7426 = vmatpush3.bf16.msra.mxu0 %v4466_v51  ;;  %v4557_v61 = vld [vmem:[#allocation3 + $0x688] sm:$0xff] }
 0x796   :  { %7427 = vmatprep.subr.bf16.mxu0 %v4529_v2  ;;  %v4501_v51 = vld [vmem:[#allocation3 + $0x4c8] sm:$0xff]  ;;  %v4564_v2 = vld [vmem:[#allocation3 + $0x6c0] sm:$0xff] }
 0x797   :  { %v4513_v47 = vld [vmem:[#allocation3 + $0x528] sm:$0xff] }
 0x798   :  { %5853 = vmatpush1.bf16.msra.mxu1 %v4471_v14  ;;  %v4521_v14 = vld [vmem:[#allocation3 + $0x568] sm:$0xff] }
 0x799   :  { %5854 = vmatprep.subr.bf16.mxu1 %v4479_v57  ;;  %7428 = vmatpush3.bf16.msra.mxu0 %v4473_v34  ;;  %v4520_v57 = vld [vmem:[#allocation3 + $0x560] sm:$0xff] }
 0x79a   :  { %6230 = vmatmul.mubr.bf16.gmra.mrb[164].mxu0 %v15555_v9  ;;  %7429 = vmatprep.subr.bf16.mxu0 %v4536_v58  ;;  %v4528_v34 = vld [vmem:[#allocation3 + $0x5a0] sm:$0xff]  ;;  %v4571_v58 = vld [vmem:[#allocation3 + $0x6f8] sm:$0xff] }
 0x79b   :  { %5780 = vmatmul.mubr.bf16.gmra.mrb[132].mxu1 %v15555_v9  ;;  %6237 = vmatprep.mubr.bf16.mxu0 %v15556_v41  ;;  %v15562_v9 = vld [vmem:[#allocation53_spill] sm:$0xff] }
 0x79c   :  { %5855 = vmatpush1.bf16.msra.mxu1 %v4478_v62  ;;  %5789 = vmatprep.mubr.bf16.mxu1 %v15556_v41  ;;  %v15561_v62 = vld [vmem:[#allocation178_spill] sm:$0xff]  ;;  %v4527_v41 = vld [vmem:[#allocation3 + $0x598] sm:$0xff] }
 0x79d   :  { %5856 = vmatprep.subr.bf16.mxu1 %v4486_v54  ;;  %7430 = vmatpush3.bf16.msra.mxu0 %v4480_v55  ;;  %v4508_v54 = vld [vmem:[#allocation3 + $0x500] sm:$0xff]  ;;  %v4535_v55 = vld [vmem:[#allocation3 + $0x5d8] sm:$0xff] }
 0x79e   :  { %7431 = vmatprep.subr.bf16.mxu0 %v4543_v32  ;;  %v4534_v32 = vld [vmem:[#allocation3 + $0x5d0] sm:$0xff] }
 0x7a0   :  { %5857 = vmatpush1.bf16.msra.mxu1 %v4485_v56  ;;  %v4515_v56 = vld [vmem:[#allocation3 + $0x538] sm:$0xff] }
 0x7a1   :  { %5858 = vmatprep.subr.bf16.mxu1 %v4493_v37  ;;  %7432 = vmatpush3.bf16.msra.mxu0 %v4487_v42  ;;  %v4542_v37 = vld [vmem:[#allocation3 + $0x610] sm:$0xff]  ;;  %v4541_v42 = vld [vmem:[#allocation3 + $0x608] sm:$0xff] }
 0x7a2   :  { %6238 = vmatmul.mubr.bf16.gmra.mrb[168].mxu0 %v15557_v7  ;;  %7433 = vmatprep.subr.bf16.mxu0 %v4550_v44  ;;  %v4549_v44 = vld [vmem:[#allocation3 + $0x648] sm:$0xff] }
 0x7a3   :  { %5790 = vmatmul.mubr.bf16.gmra.mrb[136].mxu1 %v15557_v7  ;;  %6245 = vmatprep.mubr.bf16.mxu0 %v15558_v53  ;;  %v15564_v7 = vld [vmem:[#allocation81_spill] sm:$0xff] }
 0x7a4   :  { %5859 = vmatpush1.bf16.msra.mxu1 %v4492_v35  ;;  %5799 = vmatprep.mubr.bf16.mxu1 %v15558_v53  ;;  %v15563_v35 = vld [vmem:[#allocation179_spill] sm:$0xff] }
 0x7a5   :  { %5860 = vmatprep.subr.bf16.mxu1 %v4500_v11  ;;  %7434 = vmatpush3.bf16.msra.mxu0 %v4494_v5  ;;  %v4634_v11 = vld [vmem:[#allocation3 + $0x8f0] sm:$0xff] }
 0x7a6   :  { %7435 = vmatprep.subr.bf16.mxu0 %v4557_v61  ;;  %v15565_v53 = vld [vmem:[#allocation67_spill] sm:$0xff]  ;;  %v15566_v5 = vld [vmem:[#allocation122_spill] sm:$0xff] }
 0x7a7   :  { %v4641_v61 = vld [vmem:[#allocation3 + $0x928] sm:$0xff] }
 0x7a8   :  { %5861 = vmatpush1.bf16.msra.mxu1 %v4499_v59  ;;  %v4548_v59 = vld [vmem:[#allocation3 + $0x640] sm:$0xff] }
 0x7a9   :  { %5862 = vmatprep.subr.bf16.mxu1 %v4507_v12  ;;  %7436 = vmatpush3.bf16.msra.mxu0 %v4501_v51  ;;  %v4556_v12 = vld [vmem:[#allocation3 + $0x680] sm:$0xff]  ;;  %v15569_v51 = vld [vmem:[#allocation95_spill] sm:$0xff] }
 0x7aa   :  { %6246 = vmatmul.mubr.bf16.gmra.mrb[172].mxu0 %v15559_v6  ;;  %7437 = vmatprep.subr.bf16.mxu0 %v4564_v2  ;;  %v4585_v2 = vld [vmem:[#allocation3 + $0x768] sm:$0xff] }
 0x7ab   :  { %5800 = vmatmul.mubr.bf16.gmra.mrb[140].mxu1 %v15559_v6  ;;  %6253 = vmatprep.mubr.bf16.mxu0 %v15560_v50  ;;  %v15568_v6 = vld [vmem:[#allocation44_spill] sm:$0xff] }
 0x7ac   :  { %5863 = vmatpush1.bf16.msra.mxu1 %v4506_v29  ;;  %5809 = vmatprep.mubr.bf16.mxu1 %v15560_v50  ;;  %v15567_v29 = vld [vmem:[#allocation180_spill] sm:$0xff] }
 0x7ad   :  { %5864 = vmatprep.subr.bf16.mxu1 %v4514_v45  ;;  %7438 = vmatpush3.bf16.msra.mxu0 %v4508_v54  ;;  %v4578_v45 = vld [vmem:[#allocation3 + $0x730] sm:$0xff]  ;;  %v4555_v50 = vld [vmem:[#allocation3 + $0x678] sm:$0xff]  ;;  %v4648_v54 = vld [vmem:[#allocation3 + $0x960] sm:$0xff] }
 0x7ae   :  { %7439 = vmatprep.subr.bf16.mxu0 %v4571_v58  ;;  %v4569_v58 = vld [vmem:[#allocation3 + $0x6e8] sm:$0xff] }
 0x7b0   :  { %5865 = vmatpush1.bf16.msra.mxu1 %v4513_v47  ;;  %v4563_v47 = vld [vmem:[#allocation3 + $0x6b8] sm:$0xff] }
 0x7b1   :  { %5866 = vmatprep.subr.bf16.mxu1 %v4521_v14  ;;  %7440 = vmatpush3.bf16.msra.mxu0 %v4515_v56  ;;  %v4562_v14 = vld [vmem:[#allocation3 + $0x6b0] sm:$0xff]  ;;  %v4577_v56 = vld [vmem:[#allocation3 + $0x728] sm:$0xff] }
 0x7b2   :  { %6254 = vmatmul.mubr.bf16.gmra.mrb[176].mxu0 %v15561_v62  ;;  %7489 = vmatprep.subr.bf16.mxu0 %v4634_v11  ;;  %v4599_v11 = vld [vmem:[#allocation3 + $0x7d8] sm:$0xff] }
 0x7b3   :  { %5810 = vmatmul.mubr.bf16.gmra.mrb[144].mxu1 %v15561_v62  ;;  %6261 = vmatprep.mubr.bf16.mxu0 %v15562_v9  ;;  %v15571_v62 = vld [vmem:[#allocation181_spill] sm:$0xff] }
 0x7b4   :  { %5867 = vmatpush1.bf16.msra.mxu1 %v4520_v57  ;;  %5819 = vmatprep.mubr.bf16.mxu1 %v15562_v9  ;;  %v4570_v57 = vld [vmem:[#allocation3 + $0x6f0] sm:$0xff]  ;;  %v4592_v9 = vld [vmem:[#allocation3 + $0x7a0] sm:$0xff] }
 0x7b5   :  { %5868 = vmatprep.subr.bf16.mxu1 %v4528_v34  ;;  %v15570_v34 = vld [vmem:[#allocation123_spill] sm:$0xff] }
 0x7b8   :  { %5869 = vmatpush1.bf16.msra.mxu1 %v4527_v41  ;;  %v15572_v41 = vld [vmem:[#allocation46_spill] sm:$0xff] }
 0x7b9   :  { %5870 = vmatprep.subr.bf16.mxu1 %v4535_v55  ;;  %v4655_v55 = vld [vmem:[#allocation3 + $0x998] sm:$0xff] }
 0x7ba   :  { %6262 = vmatmul.mubr.bf16.gmra.mrb[180].mxu0 %v15563_v35 }
 0x7bb   :  { %5820 = vmatmul.mubr.bf16.gmra.mrb[148].mxu1 %v15563_v35  ;;  %6318 = vmatprep.mubr.bf16.mxu0 %v15565_v53  ;;  %v15573_v35 = vld [vmem:[#allocation124_spill] sm:$0xff] }
 0x7bc   :  { %5871 = vmatpush1.bf16.msra.mxu1 %v4534_v32  ;;  %5829 = vmatprep.mubr.bf16.mxu1 %v15564_v7  ;;  %v4576_v32 = vld [vmem:[#allocation3 + $0x720] sm:$0xff] }
 0x7bd   :  { %5872 = vmatprep.subr.bf16.mxu1 %v4542_v37  ;;  %v4584_v37 = vld [vmem:[#allocation3 + $0x760] sm:$0xff] }
 0x7c0   :  { %5873 = vmatpush1.bf16.msra.mxu1 %v4541_v42  ;;  %v4662_v42 = vld [vmem:[#allocation3 + $0x9d0] sm:$0xff] }
 0x7c1   :  { %5874 = vmatprep.subr.bf16.mxu1 %v4549_v44  ;;  %v15574_v44 = vld [vmem:[#allocation76_spill] sm:$0xff] }
 0x7c2   :  { %6319 = vmatmul.mubr.bf16.vlgmr.msra.gmra.mrb[184].mxu0 %v15567_v29 }
 0x7c3   :  { %5830 = vmatmul.mubr.bf16.gmra.mrb[152].mxu1 %v15566_v5  ;;  %6326 = vmatprep.mubr.bf16.mxu0 %v15569_v51 }
 0x7c4   :  { %5875 = vmatpush1.bf16.msra.mxu1 %v4548_v59  ;;  %5839 = vmatprep.mubr.bf16.mxu1 %v15568_v6  ;;  %v4591_v59 = vld [vmem:[#allocation3 + $0x798] sm:$0xff] }
 0x7c5   :  { %5876 = vmatprep.subr.bf16.mxu1 %v4556_v12  ;;  %7490 = vmatpush3.bf16.msra.mxu0 %v4578_v45  ;;  %v4606_v12 = vld [vmem:[#allocation3 + $0x810] sm:$0xff] }
 0x7c6   :  { %7491 = vmatprep.subr.bf16.mxu0 %v4641_v61  ;;  %v4590_v45 = vld [vmem:[#allocation3 + $0x790] sm:$0xff] }
 0x7c7   :  { %v4598_v61 = vld [vmem:[#allocation3 + $0x7d0] sm:$0xff] }
 0x7c8   :  { %5877 = vmatpush1.bf16.msra.mxu1 %v4555_v50  ;;  %v4669_v50 = vld [vmem:[#allocation3 + $0xa08] sm:$0xff] }
 0x7c9   :  { %5878 = vmatprep.subr.bf16.mxu1 %v4563_v47  ;;  %7492 = vmatpush3.bf16.msra.mxu0 %v4585_v2  ;;  %v4597_v47 = vld [vmem:[#allocation3 + $0x7c8] sm:$0xff]  ;;  %v15576_v2 = vld [vmem:[#allocation68_spill] sm:$0xff] }
 0x7ca   :  { %6327 = vmatmul.mubr.bf16.gmra.mrb[188].mxu0 %v15571_v62  ;;  %7493 = vmatprep.subr.bf16.mxu0 %v4648_v54  ;;  %v4604_v54 = vld [vmem:[#allocation3 + $0x800] sm:$0xff] }
 0x7cb   :  { %5840 = vmatmul.mubr.bf16.gmra.mrb[156].mxu1 %v15570_v34  ;;  %6334 = vmatprep.mubr.bf16.mxu0 %v15572_v41 }
 0x7cc   :  { %5879 = vmatpush1.bf16.msra.mxu1 %v4562_v14  ;;  %5882 = vmatprep.mubr.bf16.mxu1 %v15565_v53  ;;  %v4583_v53 = vld [vmem:[#allocation3 + $0x758] sm:$0xff]  ;;  %v4676_v14 = vld [vmem:[#allocation3 + $0xa40] sm:$0xff] }
 0x7cd   :  { %5880 = vmatprep.subr.bf16.mxu1 %v4570_v57  ;;  %7494 = vmatpush3.bf16.msra.mxu0 %v4592_v9  ;;  %v4605_v57 = vld [vmem:[#allocation3 + $0x808] sm:$0xff] }
 0x7ce   :  { %7495 = vmatprep.subr.bf16.mxu0 %v4655_v55  ;;  %v15577_v9 = vld [vmem:[#allocation182_spill] sm:$0xff]  ;;  %v4611_v55 = vld [vmem:[#allocation3 + $0x838] sm:$0xff] }
 0x7d0   :  { %5881 = vmatpush1.bf16.msra.mxu1 %v4569_v58  ;;  %v4620_v58 = vld [vmem:[#allocation3 + $0x880] sm:$0xff] }
 0x7d1   :  { %5963 = vmatprep.subr.bf16.mxu1 %v4577_v56  ;;  %7496 = vmatpush3.bf16.msra.mxu0 %v4599_v11  ;;  %v15578_v56 = vld [vmem:[#allocation96_spill] sm:$0xff]  ;;  %v4618_v11 = vld [vmem:[#allocation3 + $0x870] sm:$0xff] }
 0x7d2   :  { %6335 = vmatmul.mubr.bf16.gmra.mrb[192].mxu0 %v15573_v35  ;;  %7497 = vmatprep.subr.bf16.mxu0 %v4662_v42  ;;  %v4626_v42 = vld [vmem:[#allocation3 + $0x8b0] sm:$0xff] }
 0x7d3   :  { %5883 = vmatmul.mubr.bf16.vlgmr.msra.gmra.mrb[128].mxu1 %v15567_v29  ;;  %6342 = vmatprep.mubr.bf16.mxu0 %v15574_v44  ;;  %v15575_v29 = vld [vmem:[#allocation125_spill] sm:$0xff] }
 0x7d4   :  { %5964 = vmatpush1.bf16.msra.mxu1 %v4576_v32  ;;  %5892 = vmatprep.mubr.bf16.mxu1 %v15569_v51  ;;  %v4613_v51 = vld [vmem:[#allocation3 + $0x848] sm:$0xff]  ;;  %v4619_v32 = vld [vmem:[#allocation3 + $0x878] sm:$0xff] }
 0x7d5   :  { %5965 = vmatprep.subr.bf16.mxu1 %v4584_v37  ;;  %7498 = vmatpush3.bf16.msra.mxu0 %v4606_v12  ;;  %v4627_v37 = vld [vmem:[#allocation3 + $0x8b8] sm:$0xff]  ;;  %v4633_v12 = vld [vmem:[#allocation3 + $0x8e8] sm:$0xff] }
 0x7d6   :  { %7499 = vmatprep.subr.bf16.mxu0 %v4669_v50  ;;  %v4647_v50 = vld [vmem:[#allocation3 + $0x958] sm:$0xff] }
 0x7d8   :  { %5966 = vmatpush1.bf16.msra.mxu1 %v4583_v53  ;;  %v4746_v53 = vld [vmem:[#allocation3 + $0xc70] sm:$0xff] }
 0x7d9   :  { %5967 = vmatprep.subr.bf16.mxu1 %v4591_v59  ;;  %7500 = vmatpush3.bf16.msra.mxu0 %v4613_v51  ;;  %v15580_v59 = vld [vmem:[#allocation77_spill] sm:$0xff]  ;;  %v4646_v51 = vld [vmem:[#allocation3 + $0x950] sm:$0xff] }
 0x7da   :  { %6343 = vmatmul.mubr.bf16.gmra.mrb[196].mxu0 %v15575_v29  ;;  %7501 = vmatprep.subr.bf16.mxu0 %v4676_v14  ;;  %v4661_v14 = vld [vmem:[#allocation3 + $0x9c8] sm:$0xff] }
 0x7db   :  { %5893 = vmatmul.mubr.bf16.gmra.mrb[132].mxu1 %v15571_v62  ;;  %6350 = vmatprep.mubr.bf16.mxu0 %v15576_v2  ;;  %v4612_v62 = vld [vmem:[#allocation3 + $0x840] sm:$0xff] }
 0x7dc   :  { %5968 = vmatpush1.bf16.msra.mxu1 %v4590_v45  ;;  %5902 = vmatprep.mubr.bf16.mxu1 %v15572_v41  ;;  %v4683_v41 = vld [vmem:[#allocation3 + $0xa78] sm:$0xff]  ;;  %v4632_v45 = vld [vmem:[#allocation3 + $0x8e0] sm:$0xff] }
 0x7dd   :  { %5969 = vmatprep.subr.bf16.mxu1 %v4598_v61  ;;  %7502 = vmatpush3.bf16.msra.mxu0 %v4620_v58  ;;  %v4640_v61 = vld [vmem:[#allocation3 + $0x920] sm:$0xff]  ;;  %v4667_v58 = vld [vmem:[#allocation3 + $0x9f8] sm:$0xff] }
 0x7de   :  { %7503 = vmatprep.subr.bf16.mxu0 %v4683_v41  ;;  %v4675_v41 = vld [vmem:[#allocation3 + $0xa38] sm:$0xff] }
 0x7e0   :  { %5970 = vmatpush1.bf16.msra.mxu1 %v4597_v47  ;;  %v4654_v47 = vld [vmem:[#allocation3 + $0x990] sm:$0xff] }
 0x7e1   :  { %5971 = vmatprep.subr.bf16.mxu1 %v4605_v57  ;;  %7504 = vmatpush3.bf16.msra.mxu0 %v4627_v37  ;;  %v4660_v57 = vld [vmem:[#allocation3 + $0x9c0] sm:$0xff]  ;;  %v4681_v37 = vld [vmem:[#allocation3 + $0xa68] sm:$0xff] }
 0x7e2   :  { %6351 = vmatmul.mubr.bf16.gmra.mrb[200].mxu0 %v15577_v9  ;;  %7553 = vmatprep.subr.bf16.mxu0 %v4746_v53  ;;  %v4711_v53 = vld [vmem:[#allocation3 + $0xb58] sm:$0xff] }
 0x7e3   :  { %5903 = vmatmul.mubr.bf16.gmra.mrb[136].mxu1 %v15573_v35  ;;  %6358 = vmatprep.mubr.bf16.mxu0 %v15578_v56  ;;  %v15579_v35 = vld [vmem:[#allocation183_spill] sm:$0xff] }
 0x7e4   :  { %5972 = vmatpush1.bf16.msra.mxu1 %v4604_v54  ;;  %5912 = vmatprep.mubr.bf16.mxu1 %v15574_v44  ;;  %v4625_v44 = vld [vmem:[#allocation3 + $0x8a8] sm:$0xff]  ;;  %v4668_v54 = vld [vmem:[#allocation3 + $0xa00] sm:$0xff] }
 0x7e5   :  { %5973 = vmatprep.subr.bf16.mxu1 %v4612_v62  ;;  %v4690_v62 = vld [vmem:[#allocation3 + $0xab0] sm:$0xff] }
 0x7e8   :  { %5974 = vmatpush1.bf16.msra.mxu1 %v4611_v55  ;;  %v4697_v55 = vld [vmem:[#allocation3 + $0xae8] sm:$0xff] }
 0x7e9   :  { %5975 = vmatprep.subr.bf16.mxu1 %v4619_v32  ;;  %v4682_v32 = vld [vmem:[#allocation3 + $0xa70] sm:$0xff] }
 0x7ea   :  { %6359 = vmatmul.mubr.bf16.gmra.mrb[204].mxu0 %v15579_v35 }
 0x7eb   :  { %5913 = vmatmul.mubr.bf16.gmra.mrb[140].mxu1 %v15575_v29  ;;  %6366 = vmatprep.mubr.bf16.mxu0 %v15580_v59  ;;  %v4639_v29 = vld [vmem:[#allocation3 + $0x918] sm:$0xff] }
 0x7ec   :  { %5976 = vmatpush1.bf16.msra.mxu1 %v4618_v11  ;;  %5922 = vmatprep.mubr.bf16.mxu1 %v15576_v2  ;;  %v4653_v2 = vld [vmem:[#allocation3 + $0x988] sm:$0xff]  ;;  %v4767_v11 = vld [vmem:[#allocation3 + $0xd18] sm:$0xff] }
 0x7ed   :  { %5977 = vmatprep.subr.bf16.mxu1 %v4626_v42  ;;  %v4689_v42 = vld [vmem:[#allocation3 + $0xaa8] sm:$0xff] }
 0x7f0   :  { %5978 = vmatpush1.bf16.msra.mxu1 %v4625_v44  ;;  %v4695_v44 = vld [vmem:[#allocation3 + $0xad8] sm:$0xff] }
 0x7f1   :  { %5979 = vmatprep.subr.bf16.mxu1 %v4633_v12  ;;  %v4718_v12 = vld [vmem:[#allocation3 + $0xb90] sm:$0xff] }
 0x7f2   :  { %6367 = vmatmul.mubr.bf16.gmra.mrb[208].mxu0 %v13021_v19 }
 0x7f3   :  { %5923 = vmatmul.mubr.bf16.gmra.mrb[144].mxu1 %v15577_v9  ;;  %6374 = vmatprep.mubr.bf16.mxu0 %v13029_v4  ;;  %v4753_v9 = vld [vmem:[#allocation3 + $0xca8] sm:$0xff] }
 0x7f4   :  { %5980 = vmatpush1.bf16.msra.mxu1 %v4632_v45  ;;  %5932 = vmatprep.mubr.bf16.mxu1 %v15578_v56  ;;  %v4674_v56 = vld [vmem:[#allocation3 + $0xa30] sm:$0xff] }
 0x7f5   :  { %5981 = vmatprep.subr.bf16.mxu1 %v4640_v61  ;;  %v4702_v45 = vld [vmem:[#allocation3 + $0xb10] sm:$0xff] }
 0x7f6   :  { %v4710_v61 = vld [vmem:[#allocation3 + $0xb50] sm:$0xff] }
 0x7f8   :  { %5982 = vmatpush1.bf16.msra.mxu1 %v4639_v29  ;;  %v4709_v29 = vld [vmem:[#allocation3 + $0xb48] sm:$0xff] }
 0x7f9   :  { %5983 = vmatprep.subr.bf16.mxu1 %v4647_v50  ;;  %v4788_v50 = vld [vmem:[#allocation3 + $0xdc0] sm:$0xff] }
 0x7fa   :  { %6375 = vmatmul.mubr.bf16.gmra.mrb[212].mxu0 %v13041_v22 }
 0x7fb   :  { %5933 = vmatmul.mubr.bf16.gmra.mrb[148].mxu1 %v15579_v35  ;;  %6415 = vmatprep.mubr.bf16.mxu0 %v13049_v30  ;;  %v4688_v35 = vld [vmem:[#allocation3 + $0xaa0] sm:$0xff] }
 0x7fc   :  { %5984 = vmatpush1.bf16.msra.mxu1 %v4646_v51  ;;  %5942 = vmatprep.mubr.bf16.mxu1 %v15580_v59  ;;  %v4703_v59 = vld [vmem:[#allocation3 + $0xb18] sm:$0xff]  ;;  %v4717_v51 = vld [vmem:[#allocation3 + $0xb88] sm:$0xff] }
 0x7fd   :  { %5985 = vmatprep.subr.bf16.mxu1 %v4654_v47  ;;  %v13439_v47 = vld [vmem:[#allocation19] sm:$0xff] }
 0x800   :  { %5986 = vmatpush1.bf16.msra.mxu1 %v4653_v2  ;;  %v4724_v2 = vld [vmem:[#allocation3 + $0xbc0] sm:$0xff] }
 0x801   :  { %5987 = vmatprep.subr.bf16.mxu1 %v4661_v14 }
 0x802   :  { %6416 = vmatmul.mubr.bf16.vlgmr.msra.gmra.mrb[216].mxu0 %v13061_v17 }
 0x803   :  { %5943 = vmatmul.mubr.bf16.gmra.mrb[152].mxu1 %v13021_v19  ;;  %6423 = vmatprep.mubr.bf16.mxu0 %v13069_v38  ;;  %v4760_v19 = vld [vmem:[#allocation3 + $0xce0] sm:$0xff] }
 0x804   :  { %5988 = vmatpush1.bf16.msra.mxu1 %v4660_v57  ;;  %5952 = vmatprep.mubr.bf16.mxu1 %v13029_v4  ;;  %v4704_v4 = vld [vmem:[#allocation3 + $0xb20] sm:$0xff] }
 0x805   :  { %5989 = vmatprep.subr.bf16.mxu1 %v4668_v54  ;;  %7554 = vmatpush3.bf16.msra.mxu0 %v4690_v62  ;;  %v15582_v57 = vld [vmem:[#allocation61_spill] sm:$0xff] }
 0x806   :  { %7555 = vmatprep.subr.bf16.mxu0 %v4753_v9  ;;  %v13449_v54 = vrot.slane %v13439_v47, %v15582_v57  ;;  %v4732_v62 = vld [vmem:[#allocation3 + $0xc00] sm:$0xff]  ;;  %v15583_v9 = vld [vmem:[#allocation35_spill] sm:$0xff] }
 0x808   :  { %5990 = vmatpush1.bf16.msra.mxu1 %v4667_v58  ;;  %v13453_v58 = vrot.slane %v13439_v47, %v15583_v9 }
 0x809   :  { %5991 = vmatprep.subr.bf16.mxu1 %v4675_v41  ;;  %7556 = vmatpush3.bf16.msra.mxu0 %v4697_v55  ;;  %v15584_v41 = vld [vmem:[#allocation109_spill] sm:$0xff] }
 0x80a   :  { %6424 = vmatmul.mubr.bf16.gmra.mrb[220].mxu0 %v13081_v18  ;;  %7557 = vmatprep.subr.bf16.mxu0 %v4760_v19  ;;  %v13457_v55 = vrot.slane %v13439_v47, %v15584_v41 }
 0x80b   :  { %5953 = vmatmul.mubr.bf16.gmra.mrb[156].mxu1 %v13041_v22  ;;  %6431 = vmatprep.mubr.bf16.mxu0 %v13089_v21  ;;  %v4696_v22 = vld [vmem:[#allocation3 + $0xae0] sm:$0xff] }
 0x80c   :  { %5992 = vmatpush1.bf16.msra.mxu1 %v4674_v56  ;;  %5995 = vmatprep.mubr.bf16.mxu1 %v13049_v30  ;;  %v4774_v30 = vld [vmem:[#allocation3 + $0xd50] sm:$0xff]  ;;  %v4723_v56 = vld [vmem:[#allocation3 + $0xbb8] sm:$0xff] }
 0x80d   :  { %5993 = vmatprep.subr.bf16.mxu1 %v4682_v32  ;;  %7558 = vmatpush3.bf16.msra.mxu0 %v4704_v4  ;;  %v4731_v4 = vld [vmem:[#allocation3 + $0xbf8] sm:$0xff] }
 0x80e   :  { %7559 = vmatprep.subr.bf16.mxu0 %v4767_v11 }
 0x810   :  { %5994 = vmatpush1.bf16.msra.mxu1 %v4681_v37 }
 0x811   :  { %6076 = vmatprep.subr.bf16.mxu1 %v4689_v42  ;;  %7560 = vmatpush3.bf16.msra.mxu0 %v4711_v53 }
 0x812   :  { %6432 = vmatmul.mubr.bf16.gmra.mrb[224].mxu0 %v13101_v1  ;;  %7561 = vmatprep.subr.bf16.mxu0 %v4774_v30 }
 0x813   :  { %5996 = vmatmul.mubr.bf16.vlgmr.msra.gmra.mrb[128].mxu1 %v13061_v17  ;;  %6439 = vmatprep.mubr.bf16.mxu0 %v13109_v24  ;;  %v4781_v17 = vld [vmem:[#allocation3 + $0xd88] sm:$0xff] }
 0x814   :  { %6077 = vmatpush1.bf16.msra.mxu1 %v4688_v35  ;;  %6005 = vmatprep.mubr.bf16.mxu1 %v13069_v38  ;;  %v4725_v38 = vld [vmem:[#allocation3 + $0xbc8] sm:$0xff] }
 0x815   :  { %6078 = vmatprep.subr.bf16.mxu1 %v4696_v22  ;;  %7562 = vmatpush3.bf16.msra.mxu0 %v4718_v12  ;;  %v4739_v22 = vld [vmem:[#allocation3 + $0xc38] sm:$0xff] }
 0x816   :  { %7563 = vmatprep.subr.bf16.mxu0 %v4781_v17 }
 0x818   :  { %6079 = vmatpush1.bf16.msra.mxu1 %v4695_v44 }
 0x819   :  { %6080 = vmatprep.subr.bf16.mxu1 %v4703_v59  ;;  %7564 = vmatpush3.bf16.msra.mxu0 %v4725_v38  ;;  %v4738_v38 = vld [vmem:[#allocation3 + $0xc30] sm:$0xff] }
 0x81a   :  { %6440 = vmatmul.mubr.bf16.gmra.mrb[228].mxu0 %v13121_v8  ;;  %7565 = vmatprep.subr.bf16.mxu0 %v4788_v50 }
 0x81b   :  { %6006 = vmatmul.mubr.bf16.gmra.mrb[132].mxu1 %v13081_v18  ;;  %6447 = vmatprep.mubr.bf16.mxu0 %v13129_v36  ;;  %v4716_v18 = vld [vmem:[#allocation3 + $0xb80] sm:$0xff] }
 0x81c   :  { %6081 = vmatpush1.bf16.msra.mxu1 %v4702_v45  ;;  %6015 = vmatprep.mubr.bf16.mxu1 %v13089_v21  ;;  %v15581_v21 = vld [vmem:[#allocation34_spill] sm:$0xff] }
 0x81d   :  { %6082 = vmatprep.subr.bf16.mxu1 %v4710_v61  ;;  %v13445_v14 = vrot.slane %v13439_v47, %v15581_v21  ;;  %7566 = vmatpush3.bf16.msra.mxu0 %v4732_v62  ;;  %v4730_v61 = vld [vmem:[#allocation3 + $0xbf0] sm:$0xff]  ;;  %v4745_v21 = vld [vmem:[#allocation3 + $0xc68] sm:$0xff] }
 0x820   :  { %6083 = vmatpush1.bf16.msra.mxu1 %v4709_v29 }
 0x821   :  { %6084 = vmatprep.subr.bf16.mxu1 %v4717_v51  ;;  %v4737_v51 = vld [vmem:[#allocation3 + $0xc28] sm:$0xff] }
 0x822   :  { %6448 = vmatmul.mubr.bf16.gmra.mrb[232].mxu0 %v13141_v27 }
 0x823   :  { %6016 = vmatmul.mubr.bf16.gmra.mrb[136].mxu1 %v13101_v1  ;;  %v4795_v1 = vld [vmem:[#allocation3 + $0xdf8] sm:$0xff]  ;;  %6455 = vmatprep.mubr.bf16.mxu0 %v13149_v0 }
 0x824   :  { %6085 = vmatpush1.bf16.msra.mxu1 %v4716_v18  ;;  %6025 = vmatprep.mubr.bf16.mxu1 %v13109_v24 }
 0x825   :  { %6086 = vmatprep.subr.bf16.mxu1 %v4724_v2  ;;  %v5658_v19 = vpop.f32.mrb[128].mxu0  ;;  %7567 = vmatprep.subr.bf16.mxu0 %v4795_v1 }
 0x826   :  { %v5206_v32 = vpop.f32.mrb[96].mxu1  ;;  %v7665_v11 = vadd.f32 %v5658_v19, %v13449_v54  ;;  %v5660_v35 = vpop.f32.mrb[129].mxu0  ;;  %7568 = vmatpush3.bf16.msra.mxu0 %v4739_v22 }
 0x827   :  { %v7633_v37 = vadd.f32 %v5206_v32, %v13445_v14  ;;  %v5208_v42 = vpop.f32.mrb[97].mxu1  ;;  %v7666_v24 = vadd.f32 %v5660_v35, %v13457_v55  ;;  %v5662_v44 = vpop.f32.mrb[130].mxu0 }
 0x828   :  { %v7634_v53 = vadd.f32 %v5208_v42, %v13453_v58  ;;  %v5210_v30 = vpop.f32.mrb[98].mxu1  ;;  %6087 = vmatpush1.bf16.msra.mxu1 %v4723_v56  ;;  %v5664_v45 = vpop.f32.mrb[131].mxu0  ;;  %v7667_v17 = vadd.f32 %v5662_v44, %v13449_v54  ;;  %v4752_v42 = vld [vmem:[#allocation3 + $0xca0] sm:$0xff]  ;;  %v4751_v44 = vld [vmem:[#allocation3 + $0xc98] sm:$0xff] }
 0x829   :  { %8329 = vtanh.f32 %v7633_v37  ;;  %v7635_v59 = vadd.f32 %v5210_v30, %v13445_v14  ;;  %v5212_v12 = vpop.f32.mrb[99].mxu1  ;;  %6088 = vmatprep.subr.bf16.mxu1 %v4731_v4  ;;  %v7668_v50 = vadd.f32 %v5664_v45, %v13457_v55  ;;  %v4744_v37 = vld [vmem:[#allocation3 + $0xc60] sm:$0xff] }
 0x82a   :  { %8331 = vtanh.f32 %v7665_v11  ;;  %v7636_v29 = vadd.f32 %v5212_v12, %v13453_v58  ;;  %6456 = vmatmul.mubr.bf16.gmra.mrb[236].mxu0 %v13161_v10 }
 0x82b   :  { %8333 = vtanh.f32 %v7634_v53  ;;  %6026 = vmatmul.mubr.bf16.gmra.mrb[140].mxu1 %v13121_v8  ;;  %6463 = vmatprep.mubr.bf16.mxu0 %v13169_v49 }
 0x82c   :  { %8335 = vtanh.f32 %v7666_v24  ;;  %6089 = vmatpush1.bf16.msra.mxu1 %v4730_v61  ;;  %6035 = vmatprep.mubr.bf16.mxu1 %v13129_v36  ;;  %v4759_v61 = vld [vmem:[#allocation3 + $0xcd8] sm:$0xff] }
 0x82d   :  { %8337 = vtanh.f32 %v7635_v59  ;;  %6090 = vmatprep.subr.bf16.mxu1 %v4738_v38  ;;  %v5668_v2 = vpop.f32.mrb[132].mxu0 }
 0x82e   :  { %8339 = vtanh.f32 %v7667_v17  ;;  %v5216_v18 = vpop.f32.mrb[100].mxu1  ;;  %v7669_v57 = vadd.f32 %v5668_v2, %v13449_v54  ;;  %v5670_v9 = vpop.f32.mrb[133].mxu0 }
 0x82f   :  { %8341 = vtanh.f32 %v7636_v29  ;;  %v7637_v8 = vadd.f32 %v5216_v18, %v13445_v14  ;;  %v5218_v62 = vpop.f32.mrb[101].mxu1  ;;  %v7670_v36 = vadd.f32 %v5670_v9, %v13457_v55  ;;  %v5672_v56 = vpop.f32.mrb[134].mxu0 }
 0x830   :  { %8343 = vtanh.f32 %v7668_v50  ;;  %v7638_v41 = vadd.f32 %v5218_v62, %v13453_v58  ;;  %v5220_v1 = vpop.f32.mrb[102].mxu1  ;;  %6091 = vmatpush1.bf16.msra.mxu1 %v4737_v51  ;;  %v5674_v4 = vpop.f32.mrb[135].mxu0  ;;  %v7671_v11 = vadd.f32 %v5672_v56, %v13449_v54 }
 0x831   :  { %8345 = vtanh.f32 %v7637_v8  ;;  %v7639_v32 = vadd.f32 %v5220_v1, %v13445_v14  ;;  %v5222_v19 = vpop.f32.mrb[103].mxu1  ;;  %6092 = vmatprep.subr.bf16.mxu1 %v4745_v21  ;;  %v7672_v24 = vadd.f32 %v5674_v4, %v13457_v55  ;;  %v4758_v1 = vld [vmem:[#allocation3 + $0xcd0] sm:$0xff] }
 0x832   :  { %8347 = vtanh.f32 %v7669_v57  ;;  %v7640_v22 = vadd.f32 %v5222_v19, %v13453_v58  ;;  %6464 = vmatmul.mubr.bf16.gmra.mrb[240].mxu0 %v13181_v16  ;;  %v4766_v4 = vld [vmem:[#allocation3 + $0xd10] sm:$0xff] }
 0x833   :  { %v8330_v35 = vpop.eup %8329  ;;  %8349 = vtanh.f32 %v7638_v41  ;;  %6036 = vmatmul.mubr.bf16.gmra.mrb[144].mxu1 %v13141_v27  ;;  %6471 = vmatprep.mubr.bf16.mxu0 %v13189_v63 }
 0x834   :  { %v8332_v53 = vpop.eup %8331  ;;  %8351 = vtanh.f32 %v7670_v36  ;;  %6093 = vmatpush1.bf16.msra.mxu1 %v4744_v37  ;;  %6045 = vmatprep.mubr.bf16.mxu1 %v13149_v0 }
 0x835   :  { %v8334_v30 = vpop.eup %8333  ;;  %8353 = vtanh.f32 %v7639_v32  ;;  %6094 = vmatprep.subr.bf16.mxu1 %v4752_v42  ;;  %v5678_v27 = vpop.f32.mrb[136].mxu0 }
 0x836   :  { %v8336_v59 = vpop.eup %8335  ;;  %v7297_v12 = vpack.c.bf16 %v8334_v30, %v8330_v35  ;;  %8355 = vtanh.f32 %v7671_v11  ;;  %v5226_v45 = vpop.f32.mrb[104].mxu1  ;;  %v7673_v50 = vadd.f32 %v5678_v27, %v13449_v54 }
 0x837   :  { %v8338_v17 = vpop.eup %8337  ;;  %v7298_v38 = vpack.c.bf16 %v8336_v59, %v8332_v53  ;;  %8357 = vtanh.f32 %v7640_v22  ;;  %v7641_v29 = vadd.f32 %v5226_v45, %v13445_v14  ;;  %v5228_v0 = vpop.f32.mrb[105].mxu1 }
 0x838   :  { %v5680_v51 = vpop.f32.mrb[137].mxu0  ;;  %v8340_v18 = vpop.eup %8339  ;;  %7041 = vst [vmem:[#allocation20] sm:$0xff] %v7297_v12  ;;  %8359 = vtanh.f32 %v7672_v24  ;;  %v7642_v2 = vadd.f32 %v5228_v0, %v13453_v58  ;;  %6095 = vmatpush1.bf16.msra.mxu1 %v4751_v44  ;;  %v4765_v24 = vld [vmem:[#allocation3 + $0xd08] sm:$0xff] }
 0x839   :  { %v7674_v21 = vadd.f32 %v5680_v51, %v13457_v55  ;;  %v5230_v8 = vpop.f32.mrb[106].mxu1  ;;  %v5682_v57 = vpop.f32.mrb[138].mxu0  ;;  %7042 = vst [vmem:[#allocation20 + $0x8] sm:$0xff] %v7298_v38  ;;  %8361 = vtanh.f32 %v7641_v29  ;;  %6096 = vmatprep.subr.bf16.mxu1 %v4759_v61  ;;  %v4773_v12 = vld [vmem:[#allocation3 + $0xd48] sm:$0xff] }
 0x83a   :  { %v8342_v62 = vpop.eup %8341  ;;  %v7643_v9 = vadd.f32 %v5230_v8, %v13445_v14  ;;  %v5232_v41 = vpop.f32.mrb[107].mxu1  ;;  %8363 = vtanh.f32 %v7673_v50  ;;  %v7675_v19 = vadd.f32 %v5682_v57, %v13449_v54  ;;  %6472 = vmatmul.mubr.bf16.gmra.mrb[244].mxu0 %v13201_v60 }
 0x83b   :  { %v5684_v36 = vpop.f32.mrb[139].mxu0  ;;  %v8344_v56 = vpop.eup %8343  ;;  %v7301_v32 = vpack.c.bf16 %v8342_v62, %v8338_v17  ;;  %8365 = vtanh.f32 %v7642_v2  ;;  %v7644_v42 = vadd.f32 %v5232_v41, %v13453_v58  ;;  %6046 = vmatmul.mubr.bf16.gmra.mrb[148].mxu1 %v13161_v10  ;;  %6512 = vmatprep.mubr.bf16.mxu0 %v13209_v26  ;;  %v4772_v62 = vld [vmem:[#allocation3 + $0xd40] sm:$0xff] }
 0x83c   :  { %v8346_v37 = vpop.eup %8345  ;;  %v7302_v11 = vpack.c.bf16 %v8344_v56, %v8340_v18  ;;  %8367 = vtanh.f32 %v7674_v21  ;;  %v7676_v22 = vadd.f32 %v5684_v36, %v13457_v55  ;;  %6097 = vmatpush1.bf16.msra.mxu1 %v4758_v1  ;;  %6055 = vmatprep.mubr.bf16.mxu1 %v13169_v49  ;;  %v4780_v1 = vld [vmem:[#allocation3 + $0xd80] sm:$0xff] }
 0x83d   :  { %v8348_v35 = vpop.eup %8347  ;;  %7045 = vst [vmem:[#allocation20 + $0x1c] sm:$0xff] %v7301_v32  ;;  %8369 = vtanh.f32 %v7643_v9  ;;  %6098 = vmatprep.subr.bf16.mxu1 %v4766_v4  ;;  %v5688_v59 = vpop.f32.mrb[140].mxu0 }
 0x83e   :  { %v8350_v53 = vpop.eup %8349  ;;  %7046 = vst [vmem:[#allocation20 + $0x24] sm:$0xff] %v7302_v11  ;;  %8371 = vtanh.f32 %v7675_v19  ;;  %v5236_v10 = vpop.f32.mrb[108].mxu1  ;;  %v7677_v49 = vadd.f32 %v5688_v59, %v13449_v54 }
 0x83f   :  { %v8352_v30 = vpop.eup %8351  ;;  %v7305_v44 = vpack.c.bf16 %v8350_v53, %v8346_v37  ;;  %8373 = vtanh.f32 %v7644_v42  ;;  %v7645_v61 = vadd.f32 %v5236_v10, %v13445_v14  ;;  %v5238_v17 = vpop.f32.mrb[109].mxu1  ;;  %v4779_v42 = vld [vmem:[#allocation3 + $0xd78] sm:$0xff] }
 0x840   :  { %v8354_v45 = vpop.eup %8353  ;;  %v7306_v27 = vpack.c.bf16 %v8352_v30, %v8348_v35  ;;  %v5690_v38 = vpop.f32.mrb[141].mxu0  ;;  %8375 = vtanh.f32 %v7676_v22  ;;  %v7646_v50 = vadd.f32 %v5238_v17, %v13453_v58  ;;  %6099 = vmatpush1.bf16.msra.mxu1 %v4765_v24  ;;  %v4787_v24 = vld [vmem:[#allocation3 + $0xdb8] sm:$0xff] }
 0x841   :  { %v8356_v29 = vpop.eup %8355  ;;  %7049 = vst [vmem:[#allocation20 + $0x38] sm:$0xff] %v7305_v44  ;;  %v7678_v0 = vadd.f32 %v5690_v38, %v13457_v55  ;;  %v5240_v51 = vpop.f32.mrb[110].mxu1  ;;  %8377 = vtanh.f32 %v7645_v61  ;;  %6100 = vmatprep.subr.bf16.mxu1 %v4773_v12 }
 0x842   :  { %v5692_v18 = vpop.f32.mrb[142].mxu0  ;;  %v8358_v2 = vpop.eup %8357  ;;  %7050 = vst [vmem:[#allocation20 + $0x40] sm:$0xff] %v7306_v27  ;;  %v7647_v21 = vadd.f32 %v5240_v51, %v13445_v14  ;;  %8379 = vtanh.f32 %v7677_v49  ;;  %6513 = vmatmul.mubr.bf16.vlgmr.msra.gmra.mrb[248].mxu0 %v13221_v31  ;;  %v4786_v51 = vld [vmem:[#allocation3 + $0xdb0] sm:$0xff] }
 0x843   :  { %v5242_v8 = vpop.f32.mrb[111].mxu1  ;;  %v5694_v57 = vpop.f32.mrb[143].mxu0  ;;  %v7309_v41 = vpack.c.bf16 %v8358_v2, %v8354_v45  ;;  %v7679_v36 = vadd.f32 %v5692_v18, %v13449_v54  ;;  %8381 = vtanh.f32 %v7646_v50  ;;  %6056 = vmatmul.mubr.bf16.gmra.mrb[152].mxu1 %v13181_v16  ;;  %6520 = vmatprep.mubr.bf16.mxu0 %v13229_v52 }
 0x844   :  { %v8360_v9 = vpop.eup %8359  ;;  %v7648_v19 = vadd.f32 %v5242_v8, %v13453_v58  ;;  %8383 = vtanh.f32 %v7678_v0  ;;  %v7680_v37 = vadd.f32 %v5694_v57, %v13457_v55  ;;  %6101 = vmatpush1.bf16.msra.mxu1 %v4772_v62  ;;  %6065 = vmatprep.mubr.bf16.mxu1 %v13189_v63  ;;  %v4794_v8 = vld [vmem:[#allocation3 + $0xdf0] sm:$0xff] }
 0x845   :  { %v8362_v56 = vpop.eup %8361  ;;  %v7310_v32 = vpack.c.bf16 %v8360_v9, %v8356_v29  ;;  %7053 = vst [vmem:[#allocation20 + $0x54] sm:$0xff] %v7309_v41  ;;  %8385 = vtanh.f32 %v7647_v21  ;;  %6102 = vmatprep.subr.bf16.mxu1 %v4780_v1  ;;  %v5698_v53 = vpop.f32.mrb[144].mxu0 }
 0x846   :  { %v8364_v4 = vpop.eup %8363  ;;  %8387 = vtanh.f32 %v7679_v36  ;;  %v5246_v16 = vpop.f32.mrb[112].mxu1  ;;  %v7681_v63 = vadd.f32 %v5698_v53, %v13449_v54 }
 0x847   :  { %v8366_v11 = vpop.eup %8365  ;;  %7054 = vst [vmem:[#allocation20 + $0x5c] sm:$0xff] %v7310_v32  ;;  %8389 = vtanh.f32 %v7648_v19  ;;  %v7649_v10 = vadd.f32 %v5246_v16, %v13445_v14  ;;  %v5248_v59 = vpop.f32.mrb[113].mxu1 }
 0x848   :  { %v8368_v35 = vpop.eup %8367  ;;  %v7313_v22 = vpack.c.bf16 %v8366_v11, %v8362_v56  ;;  %v5700_v12 = vpop.f32.mrb[145].mxu0  ;;  %8391 = vtanh.f32 %v7680_v37  ;;  %v7650_v27 = vadd.f32 %v5248_v59, %v13453_v58  ;;  %6103 = vmatpush1.bf16.msra.mxu1 %v4779_v42  ;;  %v4793_v56 = vld [vmem:[#allocation3 + $0xde8] sm:$0xff] }
 0x849   :  { %v8370_v30 = vpop.eup %8369  ;;  %v7314_v44 = vpack.c.bf16 %v8368_v35, %v8364_v4  ;;  %v7682_v61 = vadd.f32 %v5700_v12, %v13457_v55  ;;  %v5250_v49 = vpop.f32.mrb[114].mxu1  ;;  %8393 = vtanh.f32 %v7649_v10  ;;  %6104 = vmatprep.subr.bf16.mxu1 %v4787_v24 }
 0x84a   :  { %v8372_v45 = vpop.eup %8371  ;;  %7057 = vst [vmem:[#allocation20 + $0x70] sm:$0xff] %v7313_v22  ;;  %v5702_v17 = vpop.f32.mrb[146].mxu0  ;;  %v7651_v29 = vadd.f32 %v5250_v49, %v13445_v14  ;;  %8395 = vtanh.f32 %v7681_v63  ;;  %6521 = vmatmul.mubr.bf16.gmra.mrb[252].mxu0 %v13241_v15 }
 0x84b   :  { %v8374_v38 = vpop.eup %8373  ;;  %7058 = vst [vmem:[#allocation20 + $0x78] sm:$0xff] %v7314_v44  ;;  %v5252_v50 = vpop.f32.mrb[115].mxu1  ;;  %v7683_v21 = vadd.f32 %v5702_v17, %v13449_v54  ;;  %8397 = vtanh.f32 %v7650_v27  ;;  %6066 = vmatmul.mubr.bf16.gmra.mrb[156].mxu1 %v13201_v60  ;;  %6528 = vmatprep.mubr.bf16.mxu0 %v13249_v40 }
 0x84c   :  { %v5704_v0 = vpop.f32.mrb[147].mxu0  ;;  %v8376_v18 = vpop.eup %8375  ;;  %v7317_v2 = vpack.c.bf16 %v8374_v38, %v8370_v30  ;;  %v7652_v9 = vadd.f32 %v5252_v50, %v13453_v58  ;;  %8399 = vtanh.f32 %v7682_v61  ;;  %6105 = vmatpush1.bf16.msra.mxu1 %v4786_v51  ;;  %6108 = vmatprep.mubr.bf16.mxu1 %v13209_v26  ;;  %v8554_v51 = vld [vmem:[#allocation3 + $0x30] sm:$0xff] }
 0x84d   :  { %v8378_v57 = vpop.eup %8377  ;;  %v7318_v62 = vpack.c.bf16 %v8376_v18, %v8372_v45  ;;  %v7684_v36 = vadd.f32 %v5704_v0, %v13457_v55  ;;  %8401 = vtanh.f32 %v7651_v29  ;;  %6106 = vmatprep.subr.bf16.mxu1 %v4794_v8  ;;  %v5708_v4 = vpop.f32.mrb[148].mxu0  ;;  %v8553_v45 = vld [vmem:[#allocation3 + $0x1f0] sm:$0xff] }
 0x84e   :  { %v8380_v41 = vpop.eup %8379  ;;  %7061 = vst [vmem:[#allocation20 + $0x8c] sm:$0xff] %v7317_v2  ;;  %8403 = vtanh.f32 %v7683_v21  ;;  %v5256_v60 = vpop.f32.mrb[116].mxu1  ;;  %v7685_v35 = vadd.f32 %v5708_v4, %v13449_v54  ;;  %v8555_v2 = vld [vmem:[#allocation3 + $0x228] sm:$0xff] }
 0x84f   :  { %v8382_v1 = vpop.eup %8381  ;;  %7062 = vst [vmem:[#allocation20 + $0x94] sm:$0xff] %v7318_v62  ;;  %8405 = vtanh.f32 %v7652_v9  ;;  %v7653_v42 = vadd.f32 %v5256_v60, %v13445_v14  ;;  %v5258_v26 = vpop.f32.mrb[117].mxu1 }
 0x850   :  { %v8384_v32 = vpop.eup %8383  ;;  %v7321_v19 = vpack.c.bf16 %v8382_v1, %v8378_v57  ;;  %v5710_v22 = vpop.f32.mrb[149].mxu0  ;;  %8407 = vtanh.f32 %v7684_v36  ;;  %v7654_v53 = vadd.f32 %v5258_v26, %v13453_v58  ;;  %6107 = vmatpush1.bf16.msra.mxu1 %v4793_v56 }
 0x851   :  { %v8386_v37 = vpop.eup %8385  ;;  %v7322_v11 = vpack.c.bf16 %v8384_v32, %v8380_v41  ;;  %v7686_v24 = vadd.f32 %v5710_v22, %v13457_v55  ;;  %v5260_v30 = vpop.f32.mrb[118].mxu1  ;;  %8409 = vtanh.f32 %v7653_v42  ;;  %7617 = vmatprep.subr.bf16.mxu1 %v8553_v45  ;;  %v8557_v22 = vld [vmem:[#allocation3 + $0x260] sm:$0xff] }
 0x852   :  { %v8388_v16 = vpop.eup %8387  ;;  %7065 = vst [vmem:[#allocation20 + $0xa8] sm:$0xff] %v7321_v19  ;;  %v5712_v44 = vpop.f32.mrb[150].mxu0  ;;  %v7655_v63 = vadd.f32 %v5260_v30, %v13445_v14  ;;  %8411 = vtanh.f32 %v7685_v35  ;;  %6529 = vmatmul.mubr.bf16.gmra.mrb[0].mxu0 %v13261_v28  ;;  %v8558_v45 = vld [vmem:[#allocation3 + $0xa0] sm:$0xff] }
 0x853   :  { %v8390_v10 = vpop.eup %8389  ;;  %7066 = vst [vmem:[#allocation20 + $0xb0] sm:$0xff] %v7322_v11  ;;  %v5262_v59 = vpop.f32.mrb[119].mxu1  ;;  %v7687_v49 = vadd.f32 %v5712_v44, %v13449_v54  ;;  %8413 = vtanh.f32 %v7654_v53  ;;  %6109 = vmatmul.mubr.bf16.vlgmr.msra.gmra.mrb[128].mxu1 %v13221_v31  ;;  %6536 = vmatprep.mubr.bf16.mxu0 %v13269_v39 }
 0x854   :  { %v5714_v12 = vpop.f32.mrb[151].mxu0  ;;  %v8392_v27 = vpop.eup %8391  ;;  %v7325_v61 = vpack.c.bf16 %v8390_v10, %v8386_v37  ;;  %v7656_v29 = vadd.f32 %v5262_v59, %v13453_v58  ;;  %8415 = vtanh.f32 %v7686_v24  ;;  %7625 = vmatpush3.bf16.msra.mxu1 %v8554_v51  ;;  %6118 = vmatprep.mubr.bf16.mxu1 %v13229_v52  ;;  %v8556_v37 = vld [vmem:[#allocation3 + $0x68] sm:$0xff] }
 0x855   :  { %v8394_v17 = vpop.eup %8393  ;;  %v7326_v38 = vpack.c.bf16 %v8392_v27, %v8388_v16  ;;  %v7688_v0 = vadd.f32 %v5714_v12, %v13457_v55  ;;  %8417 = vtanh.f32 %v7655_v63  ;;  %7618 = vmatprep.subr.bf16.mxu1 %v8555_v2  ;;  %v5718_v57 = vpop.f32.mrb[152].mxu0 }
 0x856   :  { %v8396_v50 = vpop.eup %8395  ;;  %7069 = vst [vmem:[#allocation20 + $0xc4] sm:$0xff] %v7325_v61  ;;  %8419 = vtanh.f32 %v7687_v49  ;;  %v5266_v8 = vpop.f32.mrb[120].mxu1  ;;  %v7689_v36 = vadd.f32 %v5718_v57, %v13449_v54 }
 0x857   :  { %v8398_v18 = vpop.eup %8397  ;;  %7070 = vst [vmem:[#allocation20 + $0xcc] sm:$0xff] %v7326_v38  ;;  %8421 = vtanh.f32 %v7656_v29  ;;  %v7657_v41 = vadd.f32 %v5266_v8, %v13445_v14  ;;  %v5268_v52 = vpop.f32.mrb[121].mxu1 }
 0x858   :  { %v8400_v21 = vpop.eup %8399  ;;  %v7329_v31 = vpack.c.bf16 %v8398_v18, %v8394_v17  ;;  %v5720_v1 = vpop.f32.mrb[153].mxu0  ;;  %8423 = vtanh.f32 %v7688_v0  ;;  %v7658_v32 = vadd.f32 %v5268_v52, %v13453_v58  ;;  %7626 = vmatpush3.bf16.msra.mxu1 %v8556_v37  ;;  %v8559_v17 = vld [vmem:[#allocation3 + $0x298] sm:$0xff] }
 0x859   :  { %v8402_v62 = vpop.eup %8401  ;;  %v7330_v9 = vpack.c.bf16 %v8400_v21, %v8396_v50  ;;  %v7690_v19 = vadd.f32 %v5720_v1, %v13457_v55  ;;  %v5270_v60 = vpop.f32.mrb[122].mxu1  ;;  %8425 = vtanh.f32 %v7657_v41  ;;  %7619 = vmatprep.subr.bf16.mxu1 %v8557_v22 }
 0x85a   :  { %v8404_v56 = vpop.eup %8403  ;;  %7073 = vst [vmem:[#allocation20 + $0xe0] sm:$0xff] %v7329_v31  ;;  %v5722_v4 = vpop.f32.mrb[154].mxu0  ;;  %v7659_v42 = vadd.f32 %v5270_v60, %v13445_v14  ;;  %8427 = vtanh.f32 %v7689_v36  ;;  %6537 = vmatmul.mubr.bf16.gmra.mrb[4].mxu0 %v13281_v20  ;;  %v8560_v36 = vld [vmem:[#allocation3 + $0xd8] sm:$0xff] }
 0x85b   :  { %v8406_v11 = vpop.eup %8405  ;;  %7074 = vst [vmem:[#allocation20 + $0xe8] sm:$0xff] %v7330_v9  ;;  %v5272_v35 = vpop.f32.mrb[123].mxu1  ;;  %v7691_v24 = vadd.f32 %v5722_v4, %v13449_v54  ;;  %8429 = vtanh.f32 %v7658_v32  ;;  %6119 = vmatmul.mubr.bf16.gmra.mrb[132].mxu1 %v13241_v15  ;;  %6544 = vmatprep.mubr.bf16.mxu0 %v13289_v23  ;;  %v8561_v32 = vld [vmem:[#allocation3 + $0x2d0] sm:$0xff] }
 0x85c   :  { %v5724_v26 = vpop.f32.mrb[155].mxu0  ;;  %v8408_v16 = vpop.eup %8407  ;;  %v7333_v53 = vpack.c.bf16 %v8406_v11, %v8402_v62  ;;  %v7660_v10 = vadd.f32 %v5272_v35, %v13453_v58  ;;  %8431 = vtanh.f32 %v7690_v19  ;;  %6128 = vmatprep.mubr.bf16.mxu1 %v13249_v40  ;;  %7627 = vmatpush3.bf16.msra.mxu1 %v8558_v45  ;;  %v8562_v11 = vld [vmem:[#allocation3 + $0x110] sm:$0xff] }
 0x85d   :  { %v8410_v30 = vpop.eup %8409  ;;  %v7334_v44 = vpack.c.bf16 %v8408_v16, %v8404_v56  ;;  %v7692_v59 = vadd.f32 %v5724_v26, %v13457_v55  ;;  %8433 = vtanh.f32 %v7659_v42  ;;  %v5728_v49 = vpop.f32.mrb[156].mxu0  ;;  %7620 = vmatprep.subr.bf16.mxu1 %v8559_v17 }
 0x85e   :  { %v8412_v63 = vpop.eup %8411  ;;  %7077 = vst [vmem:[#allocation20 + $0xfc] sm:$0xff] %v7333_v53  ;;  %8435 = vtanh.f32 %v7691_v24  ;;  %v5276_v15 = vpop.f32.mrb[124].mxu1  ;;  %v7693_v40 = vadd.f32 %v5728_v49, %v13449_v54  ;;  %v8566_v49 = vld [vmem:[#allocation3 + $0x180] sm:$0xff] }
 0x85f   :  { %v8414_v12 = vpop.eup %8413  ;;  %7078 = vst [vmem:[#allocation20 + $0x104] sm:$0xff] %v7334_v44  ;;  %8437 = vtanh.f32 %v7660_v10  ;;  %v7661_v50 = vadd.f32 %v5276_v15, %v13445_v14  ;;  %v5278_v0 = vpop.f32.mrb[125].mxu1 }
 0x860   :  { %v8416_v27 = vpop.eup %8415  ;;  %v7337_v61 = vpack.c.bf16 %v8414_v12, %v8410_v30  ;;  %v5730_v51 = vpop.f32.mrb[157].mxu0  ;;  %8439 = vtanh.f32 %v7692_v59  ;;  %v7662_v2 = vadd.f32 %v5278_v0, %v13453_v58  ;;  %7628 = vmatpush3.bf16.msra.mxu1 %v8560_v36  ;;  %v8564_v30 = vld [vmem:[#allocation3 + $0x148] sm:$0xff]  ;;  %v8565_v12 = vld [vmem:[#allocation3 + $0x340] sm:$0xff] }
 0x861   :  { %v8418_v38 = vpop.eup %8417  ;;  %v7338_v29 = vpack.c.bf16 %v8416_v27, %v8412_v63  ;;  %v7694_v21 = vadd.f32 %v5730_v51, %v13457_v55  ;;  %v5280_v31 = vpop.f32.mrb[126].mxu1  ;;  %8441 = vtanh.f32 %v7661_v50  ;;  %7621 = vmatprep.subr.bf16.mxu1 %v8561_v32  ;;  %v8567_v50 = vld [vmem:[#allocation3 + $0x378] sm:$0xff] }
 0x862   :  { %v8420_v18 = vpop.eup %8419  ;;  %7081 = vst [vmem:[#allocation20 + $0x118] sm:$0xff] %v7337_v61  ;;  %v5732_v8 = vpop.f32.mrb[158].mxu0  ;;  %v7663_v62 = vadd.f32 %v5280_v31, %v13445_v14  ;;  %8443 = vtanh.f32 %v7693_v40  ;;  %6545 = vmatmul.mubr.bf16.gmra.mrb[8].mxu0 %v13301_v13  ;;  %v8568_v31 = vld [vmem:[#allocation3 + $0x1b8] sm:$0xff] }
 0x863   :  { %v8422_v57 = vpop.eup %8421  ;;  %7082 = vst [vmem:[#allocation20 + $0x120] sm:$0xff] %v7338_v29  ;;  %v5282_v9 = vpop.f32.mrb[127].mxu1  ;;  %v7695_v56 = vadd.f32 %v5732_v8, %v13449_v54  ;;  %8445 = vtanh.f32 %v7662_v2  ;;  %6129 = vmatmul.mubr.bf16.gmra.mrb[136].mxu1 %v13261_v28  ;;  %6552 = vmatprep.mubr.bf16.mxu0 %v13309_v33  ;;  %v8563_v28 = vld [vmem:[#allocation3 + $0x308] sm:$0xff] }
 0x864   :  { %v5734_v41 = vpop.f32.mrb[159].mxu0  ;;  %v8424_v52 = vpop.eup %8423  ;;  %v7341_v1 = vpack.c.bf16 %v8422_v57, %v8418_v38  ;;  %v7664_v4 = vadd.f32 %v5282_v9, %v13453_v58  ;;  %8447 = vtanh.f32 %v7694_v21  ;;  %6138 = vmatprep.mubr.bf16.mxu1 %v13269_v39  ;;  %7629 = vmatpush3.bf16.msra.mxu1 %v8562_v11 }
 0x865   :  { %v8426_v19 = vpop.eup %8425  ;;  %v7342_v60 = vpack.c.bf16 %v8424_v52, %v8420_v18  ;;  %v7696_v37 = vadd.f32 %v5734_v41, %v13457_v55  ;;  %8449 = vtanh.f32 %v7663_v62  ;;  %7622 = vmatprep.subr.bf16.mxu1 %v8563_v28  ;;  %v7377_v35 = vpop.f32.mrb[160].mxu0 }
 0x866   :  { %v8428_v14 = vpop.eup %8427  ;;  %7085 = vst [vmem:[#allocation20 + $0x134] sm:$0xff] %v7341_v1  ;;  %8451 = vtanh.f32 %v7695_v56  ;;  %v7378_v16 = vpop.f32.mrb[161].mxu0 }
 0x867   :  { %v8430_v54 = vpop.eup %8429  ;;  %7086 = vst [vmem:[#allocation20 + $0x13c] sm:$0xff] %v7342_v60  ;;  %8453 = vtanh.f32 %v7664_v4  ;;  %v13557_v39 = vadd.f32 %v7378_v16, %v7377_v35  ;;  %v7380_v53 = vpop.f32.mrb[162].mxu0 }
 0x868   :  { %v8432_v42 = vpop.eup %8431  ;;  %v7345_v58 = vpack.c.bf16 %v8430_v54, %v8426_v19  ;;  %8455 = vtanh.f32 %v7696_v37  ;;  %7630 = vmatpush3.bf16.msra.mxu1 %v8564_v30  ;;  %v7381_v44 = vpop.f32.mrb[163].mxu0 }
 0x869   :  { %v8434_v26 = vpop.eup %8433  ;;  %v7346_v22 = vpack.c.bf16 %v8432_v42, %v8428_v14  ;;  %v13559_v59 = vadd.f32 %v7381_v44, %v7380_v53  ;;  %7623 = vmatprep.subr.bf16.mxu1 %v8565_v12 }
 0x86a   :  { %v8436_v55 = vpop.eup %8435  ;;  %7089 = vst [vmem:[#allocation20 + $0x150] sm:$0xff] %v7345_v58  ;;  %6553 = vmatmul.mubr.bf16.gmra.mrb[12].mxu0 %v13321_v25 }
 0x86b   :  { %v8438_v24 = vpop.eup %8437  ;;  %7090 = vst [vmem:[#allocation20 + $0x158] sm:$0xff] %v7346_v22  ;;  %6139 = vmatmul.mubr.bf16.gmra.mrb[140].mxu1 %v13281_v20  ;;  %6560 = vmatprep.mubr.bf16.mxu0 %v13329_v43 }
 0x86c   :  { %v8440_v10 = vpop.eup %8439  ;;  %v7349_v63 = vpack.c.bf16 %v8438_v24, %v8434_v26  ;;  %6148 = vmatprep.mubr.bf16.mxu1 %v13289_v23  ;;  %7631 = vmatpush3.bf16.msra.mxu1 %v8566_v49 }
 0x86d   :  { %v8442_v45 = vpop.eup %8441  ;;  %v7350_v27 = vpack.c.bf16 %v8440_v10, %v8436_v55  ;;  %v7383_v29 = vpop.f32.mrb[164].mxu0  ;;  %7624 = vmatprep.subr.bf16.mxu1 %v8567_v50 }
 0x86e   :  { %v8444_v61 = vpop.eup %8443  ;;  %7093 = vst [vmem:[#allocation20 + $0x16c] sm:$0xff] %v7349_v63  ;;  %v7384_v20 = vpop.f32.mrb[165].mxu0 }
 0x86f   :  { %v8446_v15 = vpop.eup %8445  ;;  %7094 = vst [vmem:[#allocation20 + $0x174] sm:$0xff] %v7350_v27  ;;  %v13565_v18 = vadd.f32 %v7384_v20, %v7383_v29  ;;  %v7386_v2 = vpop.f32.mrb[166].mxu0 }
 0x870   :  { %v8448_v17 = vpop.eup %8447  ;;  %v7353_v38 = vpack.c.bf16 %v8446_v15, %v8442_v45  ;;  %v7387_v21 = vpop.f32.mrb[167].mxu0  ;;  %7632 = vmatpush3.bf16.msra.mxu1 %v8568_v31 }
 0x871   :  { %v8450_v40 = vpop.eup %8449  ;;  %v7354_v0 = vpack.c.bf16 %v8448_v17, %v8444_v61  ;;  %v7388_v62 = vadd.f32 %v7387_v21, %v7386_v2 }
 0x872   :  { %v8452_v51 = vpop.eup %8451  ;;  %7097 = vst [vmem:[#allocation20 + $0x188] sm:$0xff] %v7353_v38  ;;  %6561 = vmatmul.mubr.bf16.gmra.mrb[16].mxu0 %v13341_v48 }
 0x873   :  { %v8454_v23 = vpop.eup %8453  ;;  %7098 = vst [vmem:[#allocation20 + $0x190] sm:$0xff] %v7354_v0  ;;  %6149 = vmatmul.mubr.bf16.gmra.mrb[144].mxu1 %v13301_v13  ;;  %6568 = vmatprep.mubr.bf16.mxu0 %v13349_v3 }
 0x874   :  { %v8456_v8 = vpop.eup %8455  ;;  %v7357_v57 = vpack.c.bf16 %v8454_v23, %v8450_v40  ;;  %6158 = vmatprep.mubr.bf16.mxu1 %v13309_v33 }
 0x875   :  { %v7358_v9 = vpack.c.bf16 %v8456_v8, %v8452_v51  ;;  %v7389_v41 = vpop.f32.mrb[168].mxu0 }
 0x876   :  { %7101 = vst [vmem:[#allocation20 + $0x1a4] sm:$0xff] %v7357_v57  ;;  %v7390_v36 = vpop.f32.mrb[169].mxu0 }
 0x877   :  { %7102 = vst [vmem:[#allocation20 + $0x1ac] sm:$0xff] %v7358_v9  ;;  %v7391_v52 = vadd.f32 %v7390_v36, %v7389_v41  ;;  %v7392_v1 = vpop.f32.mrb[170].mxu0 }
 0x878   :  { %v7393_v56 = vpop.f32.mrb[171].mxu0 }
 0x879   :  { %v7394_v32 = vadd.f32 %v7393_v56, %v7392_v1 }
 0x87a   :  { %6569 = vmatmul.mubr.bf16.gmra.mrb[20].mxu0 %v13361_v46 }
 0x87b   :  { %6159 = vmatmul.mubr.bf16.gmra.mrb[148].mxu1 %v13321_v25 }
 0x87c   :  { %6168 = vmatprep.mubr.bf16.mxu1 %v13329_v43 }
 0x87d   :  { %v7395_v13 = vpop.f32.mrb[172].mxu0 }
 0x87e   :  { %v7396_v19 = vpop.f32.mrb[173].mxu0 }
 0x87f   :  { %v7397_v60 = vadd.f32 %v7396_v19, %v7395_v13  ;;  %v7398_v4 = vpop.f32.mrb[174].mxu0 }
 0x880   :  { %v7399_v33 = vpop.f32.mrb[175].mxu0 }
 0x881   :  { %v7400_v14 = vadd.f32 %v7399_v33, %v7398_v4 }
 0x883   :  { %6169 = vmatmul.mubr.bf16.gmra.mrb[152].mxu1 %v13341_v48  ;;  %v15585_v48 = vld [vmem:[#allocation82_spill] sm:$0xff] }
 0x884   :  { %6178 = vmatprep.mubr.bf16.mxu1 %v13349_v3  ;;  %v13581_v3 = vrot.slane %v13439_v47, %v15585_v48 }
 0x885   :  { %v7401_v37 = vpop.f32.mrb[176].mxu0 }
 0x886   :  { %v7402_v54 = vpop.f32.mrb[177].mxu0  ;;  %v6227_v44 = vadd.f32 %v13559_v59, %v13581_v3  ;;  %v6232_v12 = vadd.f32 %v13565_v18, %v13581_v3  ;;  %v6235_v61 = vadd.f32 %v7388_v62, %v13581_v3  ;;  %v6243_v0 = vadd.f32 %v7394_v32, %v13581_v3 }
 0x887   :  { %v7403_v11 = vadd.f32 %v7402_v54, %v7401_v37  ;;  %v7404_v42 = vpop.f32.mrb[178].mxu0  ;;  %v6248_v21 = vadd.f32 %v7397_v60, %v13581_v3  ;;  %v6251_v62 = vadd.f32 %v7400_v14, %v13581_v3 }
 0x888   :  { %v7405_v58 = vpop.f32.mrb[179].mxu0 }
 0x889   :  { %v7406_v25 = vadd.f32 %v7405_v58, %v7404_v42  ;;  %v6256_v56 = vadd.f32 %v7403_v11, %v13581_v3 }
 0x88b   :  { %6179 = vmatmul.mubr.bf16.gmra.mrb[156].mxu1 %v13361_v46  ;;  %v6224_v46 = vadd.f32 %v13557_v39, %v13581_v3  ;;  %v6259_v4 = vadd.f32 %v7406_v25, %v13581_v3 }
 0x88c   :  { %6269 = vmatprep.mubr.bf16.mxu1 %v15564_v7 }
 0x88d   :  { %v7407_v43 = vpop.f32.mrb[180].mxu0 }
 0x88e   :  { %v7408_v28 = vpop.f32.mrb[181].mxu0 }
 0x88f   :  { %v7409_v35 = vadd.f32 %v7408_v28, %v7407_v43  ;;  %v7410_v26 = vpop.f32.mrb[182].mxu0 }
 0x890   :  { %v7411_v22 = vpop.f32.mrb[183].mxu0 }
 0x891   :  { %v7412_v16 = vadd.f32 %v7411_v22, %v7410_v26  ;;  %v6264_v14 = vadd.f32 %v7409_v35, %v13581_v3 }
 0x893   :  { %6270 = vmatmul.mubr.bf16.vlgmr.msra.gmra.mrb[160].mxu1 %v15566_v5  ;;  %v6267_v26 = vadd.f32 %v7412_v16, %v13581_v3 }
 0x894   :  { %6277 = vmatprep.mubr.bf16.mxu1 %v15568_v6 }
 0x895   :  { %v7441_v55 = vpop.f32.mrb[184].mxu0 }
 0x896   :  { %v7442_v53 = vpop.f32.mrb[185].mxu0 }
 0x897   :  { %v7443_v7 = vadd.f32 %v7442_v53, %v7441_v55  ;;  %v7444_v24 = vpop.f32.mrb[186].mxu0 }
 0x898   :  { %v7445_v30 = vpop.f32.mrb[187].mxu0 }
 0x899   :  { %v13588_v10 = vadd.f32 %v7443_v7, %v6224_v46  ;;  %v7446_v5 = vadd.f32 %v7445_v30, %v7444_v24 }
 0x89b   :  { %6278 = vmatmul.mubr.bf16.gmra.mrb[164].mxu1 %v15570_v34  ;;  %v13591_v47 = vadd.f32 %v7446_v5, %v6227_v44  ;;  %v6240_v34 = vadd.f32 %v7391_v52, %v13581_v3 }
 0x89d   :  { %v7447_v63 = vpop.f32.mrb[188].mxu0 }
 0x89e   :  { %v7448_v6 = vpop.f32.mrb[189].mxu0 }
 0x89f   :  { %v7449_v45 = vadd.f32 %v7448_v6, %v7447_v63  ;;  %v7450_v39 = vpop.f32.mrb[190].mxu0 }
 0x8a0   :  { %v7451_v27 = vpop.f32.mrb[191].mxu0 }
 0x8a1   :  { %v13596_v15 = vadd.f32 %v7449_v45, %v6232_v12  ;;  %v7452_v59 = vadd.f32 %v7451_v27, %v7450_v39 }
 0x8a3   :  { %v13598_v49 = vadd.f32 %v7452_v59, %v6235_v61 }
 0x8a5   :  { %v7453_v17 = vpop.f32.mrb[192].mxu0 }
 0x8a6   :  { %v7454_v38 = vpop.f32.mrb[193].mxu0 }
 0x8a7   :  { %v7455_v29 = vadd.f32 %v7454_v38, %v7453_v17  ;;  %v7456_v50 = vpop.f32.mrb[194].mxu0 }
 0x8a8   :  { %v7457_v40 = vpop.f32.mrb[195].mxu0 }
 0x8a9   :  { %v13602_v20 = vadd.f32 %v7455_v29, %v6240_v34  ;;  %v7458_v51 = vadd.f32 %v7457_v40, %v7456_v50 }
 0x8ab   :  { %v13604_v18 = vadd.f32 %v7458_v51, %v6243_v0 }
 0x8ad   :  { %v7459_v2 = vpop.f32.mrb[196].mxu0 }
 0x8ae   :  { %v7460_v23 = vpop.f32.mrb[197].mxu0 }
 0x8af   :  { %v7461_v31 = vadd.f32 %v7460_v23, %v7459_v2  ;;  %v7462_v8 = vpop.f32.mrb[198].mxu0 }
 0x8b0   :  { %v7463_v57 = vpop.f32.mrb[199].mxu0 }
 0x8b1   :  { %v13608_v9 = vadd.f32 %v7461_v31, %v6248_v21  ;;  %v7464_v41 = vadd.f32 %v7463_v57, %v7462_v8 }
 0x8b3   :  { %v13610_v36 = vadd.f32 %v7464_v41, %v6251_v62 }
 0x8b5   :  { %v7465_v52 = vpop.f32.mrb[200].mxu0 }
 0x8b6   :  { %v7466_v1 = vpop.f32.mrb[201].mxu0 }
 0x8b7   :  { %v7467_v32 = vadd.f32 %v7466_v1, %v7465_v52  ;;  %v7468_v13 = vpop.f32.mrb[202].mxu0 }
 0x8b8   :  { %v7469_v19 = vpop.f32.mrb[203].mxu0 }
 0x8b9   :  { %v6353_v60 = vadd.f32 %v7467_v32, %v6256_v56  ;;  %v7470_v33 = vadd.f32 %v7469_v19, %v7468_v13 }
 0x8bb   :  { %v6356_v37 = vadd.f32 %v7470_v33, %v6259_v4 }
 0x8bd   :  { %v7471_v54 = vpop.f32.mrb[204].mxu0 }
 0x8be   :  { %v7472_v42 = vpop.f32.mrb[205].mxu0 }
 0x8bf   :  { %v7473_v58 = vadd.f32 %v7472_v42, %v7471_v54  ;;  %v7474_v43 = vpop.f32.mrb[206].mxu0 }
 0x8c0   :  { %v7475_v28 = vpop.f32.mrb[207].mxu0 }
 0x8c1   :  { %v6361_v22 = vadd.f32 %v7473_v58, %v6264_v14  ;;  %v7476_v48 = vadd.f32 %v7475_v28, %v7474_v43 }
 0x8c3   :  { %v6364_v11 = vadd.f32 %v7476_v48, %v6267_v26 }
 0x8c5   :  { %v7477_v55 = vpop.f32.mrb[208].mxu0 }
 0x8c6   :  { %v7478_v53 = vpop.f32.mrb[209].mxu0 }
 0x8c7   :  { %v13616_v46 = vadd.f32 %v7478_v53, %v7477_v55  ;;  %v7480_v25 = vpop.f32.mrb[210].mxu0 }
 0x8c8   :  { %v7481_v7 = vpop.f32.mrb[211].mxu0 }
 0x8c9   :  { %v13618_v24 = vadd.f32 %v7481_v7, %v7480_v25 }
 0x8cd   :  { %v7483_v30 = vpop.f32.mrb[212].mxu0 }
 0x8ce   :  { %v7484_v44 = vpop.f32.mrb[213].mxu0 }
 0x8cf   :  { %v13620_v5 = vadd.f32 %v7484_v44, %v7483_v30  ;;  %v7486_v35 = vpop.f32.mrb[214].mxu0 }
 0x8d0   :  { %v7487_v63 = vpop.f32.mrb[215].mxu0 }
 0x8d1   :  { %v13622_v6 = vadd.f32 %v7487_v63, %v7486_v35 }
 0x8d5   :  { %v7505_v16 = vpop.f32.mrb[216].mxu0 }
 0x8d6   :  { %v7506_v12 = vpop.f32.mrb[217].mxu0 }
 0x8d7   :  { %v7507_v45 = vadd.f32 %v7506_v12, %v7505_v16  ;;  %v7508_v39 = vpop.f32.mrb[218].mxu0 }
 0x8d8   :  { %v7509_v27 = vpop.f32.mrb[219].mxu0 }
 0x8d9   :  { %v6418_v61 = vadd.f32 %v7507_v45, %v13588_v10  ;;  %v7510_v59 = vadd.f32 %v7509_v27, %v7508_v39 }
 0x8db   :  { %v6421_v17 = vadd.f32 %v7510_v59, %v13591_v47 }
 0x8dd   :  { %v7511_v38 = vpop.f32.mrb[220].mxu0 }
 0x8de   :  { %v7512_v34 = vpop.f32.mrb[221].mxu0 }
 0x8df   :  { %v7513_v29 = vadd.f32 %v7512_v34, %v7511_v38  ;;  %v7514_v50 = vpop.f32.mrb[222].mxu0 }
 0x8e0   :  { %v7515_v40 = vpop.f32.mrb[223].mxu0 }
 0x8e1   :  { %v6426_v0 = vadd.f32 %v7513_v29, %v13596_v15  ;;  %v7516_v51 = vadd.f32 %v7515_v40, %v7514_v50 }
 0x8e3   :  { %v13628_v2 = vadd.f32 %v7516_v51, %v13598_v49 }
 0x8e5   :  { %v7517_v23 = vpop.f32.mrb[224].mxu0 }
 0x8e6   :  { %v7518_v21 = vpop.f32.mrb[225].mxu0 }
 0x8e7   :  { %v7519_v31 = vadd.f32 %v7518_v21, %v7517_v23  ;;  %v7520_v8 = vpop.f32.mrb[226].mxu0 }
 0x8e8   :  { %v7521_v57 = vpop.f32.mrb[227].mxu0 }
 0x8e9   :  { %v13631_v10 = vadd.f32 %v7519_v31, %v13602_v20  ;;  %v7522_v47 = vadd.f32 %v7521_v57, %v7520_v8  ;;  %v8569_v57 = vld [vmem:[#allocation19] sm:$0xff] }
 0x8eb   :  { %v13634_v62 = vadd.f32 %v7522_v47, %v13604_v18  ;;  %v15586_v47 = vld [vmem:[#allocation39_spill] sm:$0xff] }
 0x8ed   :  { %v7523_v41 = vpop.f32.mrb[228].mxu0 }
 0x8ee   :  { %v7524_v52 = vpop.f32.mrb[229].mxu0 }
 0x8ef   :  { %v7525_v1 = vadd.f32 %v7524_v52, %v7523_v41  ;;  %v7526_v15 = vpop.f32.mrb[230].mxu0  ;;  %v13659_v41 = vrot.slane %v8569_v57, %v15586_v47 }
 0x8f0   :  { %v7527_v56 = vpop.f32.mrb[231].mxu0 }
 0x8f1   :  { %v13637_v49 = vadd.f32 %v7525_v1, %v13608_v9  ;;  %v7528_v32 = vadd.f32 %v7527_v56, %v7526_v15  ;;  %v15587_v1 = vld [vmem:[#allocation239_spill] sm:$0xff] }
 0x8f3   :  { %v13640_v13 = vadd.f32 %v7528_v32, %v13610_v36 }
 0x8f5   :  { %v7529_v19 = vpop.f32.mrb[232].mxu0 }
 0x8f6   :  { %v7530_v4 = vpop.f32.mrb[233].mxu0 }
 0x8f7   :  { %v7531_v20 = vadd.f32 %v7530_v4, %v7529_v19  ;;  %v7532_v33 = vpop.f32.mrb[234].mxu0 }
 0x8f8   :  { %v7533_v54 = vpop.f32.mrb[235].mxu0 }
 0x8f9   :  { %v13642_v42 = vadd.f32 %v7531_v20, %v6353_v60  ;;  %v7534_v18 = vadd.f32 %v7533_v54, %v7532_v33 }
 0x8fb   :  { %v13644_v14 = vadd.f32 %v7534_v18, %v6356_v37 }
 0x8fd   :  { %v7535_v58 = vpop.f32.mrb[236].mxu0 }
 0x8fe   :  { %v7536_v43 = vpop.f32.mrb[237].mxu0 }
 0x8ff   :  { %v7537_v28 = vadd.f32 %v7536_v43, %v7535_v58  ;;  %v7538_v26 = vpop.f32.mrb[238].mxu0 }
 0x900   :  { %v7539_v9 = vpop.f32.mrb[239].mxu0 }
 0x901   :  { %v13646_v48 = vadd.f32 %v7537_v28, %v6361_v22  ;;  %v7540_v55 = vadd.f32 %v7539_v9, %v7538_v26 }
 0x903   :  { %v13648_v36 = vadd.f32 %v7540_v55, %v6364_v11 }
 0x905   :  { %v7541_v53 = vpop.f32.mrb[240].mxu0 }
 0x906   :  { %v7542_v25 = vpop.f32.mrb[241].mxu0 }
 0x907   :  { %v13650_v7 = vadd.f32 %v7542_v25, %v7541_v53  ;;  %v7544_v30 = vpop.f32.mrb[242].mxu0 }
 0x908   :  { %v7545_v60 = vpop.f32.mrb[243].mxu0 }
 0x909   :  { %v13652_v44 = vadd.f32 %v7545_v60, %v7544_v30 }
 0x90d   :  { %v7547_v37 = vpop.f32.mrb[244].mxu0 }
 0x90e   :  { %v7548_v35 = vpop.f32.mrb[245].mxu0 }
 0x90f   :  { %v13654_v63 = vadd.f32 %v7548_v35, %v7547_v37  ;;  %v7550_v16 = vpop.f32.mrb[246].mxu0 }
 0x910   :  { %v7551_v12 = vpop.f32.mrb[247].mxu0 }
 0x911   :  { %v13656_v45 = vadd.f32 %v7551_v12, %v7550_v16 }
 0x915   :  { %v7569_v22 = vpop.f32.mrb[248].mxu0 }
 0x916   :  { %v7570_v39 = vpop.f32.mrb[249].mxu0 }
 0x917   :  { %v7571_v11 = vadd.f32 %v7570_v39, %v7569_v22  ;;  %v7572_v27 = vpop.f32.mrb[250].mxu0 }
 0x918   :  { %v7573_v59 = vpop.f32.mrb[251].mxu0 }
 0x919   :  { %v6515_v38 = vadd.f32 %v7571_v11, %v6418_v61  ;;  %v7574_v34 = vadd.f32 %v7573_v59, %v7572_v27  ;;  %v13663_v61 = vrot.slane %v8569_v57, %v15587_v1 }
 0x91b   :  { %8457 = vtanh.f32 %v6515_v38  ;;  %v6518_v29 = vadd.f32 %v7574_v34, %v6421_v17 }
 0x91d   :  { %8459 = vtanh.f32 %v6518_v29  ;;  %v7575_v50 = vpop.f32.mrb[252].mxu0 }
 0x91e   :  { %v7576_v40 = vpop.f32.mrb[253].mxu0 }
 0x91f   :  { %v7577_v51 = vadd.f32 %v7576_v40, %v7575_v50  ;;  %v7578_v23 = vpop.f32.mrb[254].mxu0 }
 0x920   :  { %v7579_v21 = vpop.f32.mrb[255].mxu0 }
 0x921   :  { %v6523_v31 = vadd.f32 %v7577_v51, %v6426_v0  ;;  %v7580_v8 = vadd.f32 %v7579_v21, %v7578_v23 }
 0x923   :  { %8461 = vtanh.f32 %v6523_v31  ;;  %v6526_v52 = vadd.f32 %v7580_v8, %v13628_v2 }
 0x925   :  { %v8458_v15 = vpop.eup %8457  ;;  %8463 = vtanh.f32 %v6526_v52  ;;  %v7581_v56 = vpop.f32.mrb[0].mxu0 }
 0x926   :  { %v6110_v17 = vpop.f32.mrb[128].mxu1  ;;  %v7300_v32 = vpack.c.bf16 %v8458_v15, %v8458_v15  ;;  %v7582_v0 = vpop.f32.mrb[1].mxu0 }
 0x927   :  { %v7697_v19 = vadd.f32 %v6110_v17, %v13659_v41  ;;  %v6112_v4 = vpop.f32.mrb[129].mxu1  ;;  %v8460_v20 = vpop.eup %8459  ;;  %v7583_v54 = vadd.f32 %v7582_v0, %v7581_v56 }
 0x928   :  { %v7698_v33 = vadd.f32 %v6112_v4, %v13663_v61  ;;  %v6114_v18 = vpop.f32.mrb[130].mxu1  ;;  %v7584_v58 = vpop.f32.mrb[2].mxu0  ;;  %7044 = vst [vmem:[#allocation20 + $0x18] sm:$0xf] %v7300_v32  ;;  %v7304_v2 = vpack.c.bf16 %v8460_v20, %v8460_v20 }
 0x929   :  { %8465 = vtanh.f32 %v7697_v19  ;;  %v7699_v43 = vadd.f32 %v6114_v18, %v13659_v41  ;;  %v6116_v28 = vpop.f32.mrb[131].mxu1  ;;  %v7585_v26 = vpop.f32.mrb[3].mxu0  ;;  %v6531_v9 = vadd.f32 %v7583_v54, %v13631_v10 }
 0x92a   :  { %8467 = vtanh.f32 %v7698_v33  ;;  %v7700_v55 = vadd.f32 %v6116_v28, %v13663_v61  ;;  %v7586_v53 = vadd.f32 %v7585_v26, %v7584_v58  ;;  %7048 = vst [vmem:[#allocation20 + $0x34] sm:$0xf] %v7304_v2 }
 0x92b   :  { %8469 = vtanh.f32 %v7699_v43 }
 0x92c   :  { %8471 = vtanh.f32 %v6531_v9  ;;  %v6534_v25 = vadd.f32 %v7586_v53, %v13634_v62 }
 0x92d   :  { %8473 = vtanh.f32 %v7700_v55  ;;  %v8462_v30 = vpop.eup %8461  ;;  %v7587_v37 = vpop.f32.mrb[4].mxu0 }
 0x92e   :  { %8475 = vtanh.f32 %v6534_v25  ;;  %v6120_v60 = vpop.f32.mrb[132].mxu1  ;;  %v7308_v35 = vpack.c.bf16 %v8462_v30, %v8462_v30  ;;  %v7588_v22 = vpop.f32.mrb[5].mxu0 }
 0x92f   :  { %v7701_v16 = vadd.f32 %v6120_v60, %v13659_v41  ;;  %v6122_v12 = vpop.f32.mrb[133].mxu1  ;;  %v8464_v39 = vpop.eup %8463  ;;  %v7589_v11 = vadd.f32 %v7588_v22, %v7587_v37 }
 0x930   :  { %v7702_v10 = vadd.f32 %v6122_v12, %v13663_v61  ;;  %v6124_v27 = vpop.f32.mrb[134].mxu1  ;;  %v7590_v59 = vpop.f32.mrb[6].mxu0  ;;  %7052 = vst [vmem:[#allocation20 + $0x50] sm:$0xf] %v7308_v35  ;;  %v7312_v38 = vpack.c.bf16 %v8464_v39, %v8464_v39 }
 0x931   :  { %8477 = vtanh.f32 %v7701_v16  ;;  %v7703_v62 = vadd.f32 %v6124_v27, %v13659_v41  ;;  %v6126_v34 = vpop.f32.mrb[135].mxu1  ;;  %v7591_v29 = vpop.f32.mrb[7].mxu0  ;;  %v6539_v50 = vadd.f32 %v7589_v11, %v13637_v49 }
 0x932   :  { %8479 = vtanh.f32 %v7702_v10  ;;  %v7704_v40 = vadd.f32 %v6126_v34, %v13663_v61  ;;  %v7592_v51 = vadd.f32 %v7591_v29, %v7590_v59  ;;  %7056 = vst [vmem:[#allocation20 + $0x6c] sm:$0xf] %v7312_v38 }
 0x933   :  { %v8466_v23 = vpop.eup %8465  ;;  %8481 = vtanh.f32 %v7703_v62 }
 0x934   :  { %v8468_v21 = vpop.eup %8467  ;;  %8483 = vtanh.f32 %v6539_v50  ;;  %v6542_v31 = vadd.f32 %v7592_v51, %v13640_v13 }
 0x935   :  { %v8470_v8 = vpop.eup %8469  ;;  %v7299_v57 = vpack.c.bf16 %v8468_v21, %v8466_v23  ;;  %8485 = vtanh.f32 %v7704_v40  ;;  %v7593_v1 = vpop.f32.mrb[8].mxu0 }
 0x936   :  { %v8472_v47 = vpop.eup %8471  ;;  %8487 = vtanh.f32 %v6542_v31  ;;  %v6130_v52 = vpop.f32.mrb[136].mxu1 }
 0x937   :  { %v8474_v15 = vpop.eup %8473  ;;  %7043 = vst [vmem:[#allocation20 + $0x10] sm:$0xff] %v7299_v57  ;;  %v7316_v49 = vpack.c.bf16 %v8472_v47, %v8472_v47  ;;  %v7705_v17 = vadd.f32 %v6130_v52, %v13659_v41  ;;  %v6132_v56 = vpop.f32.mrb[137].mxu1 }
 0x938   :  { %v7594_v32 = vpop.f32.mrb[9].mxu0  ;;  %v8476_v19 = vpop.eup %8475  ;;  %v7303_v4 = vpack.c.bf16 %v8474_v15, %v8470_v8  ;;  %v7706_v0 = vadd.f32 %v6132_v56, %v13663_v61 }
 0x939   :  { %v7595_v20 = vadd.f32 %v7594_v32, %v7593_v1  ;;  %v6134_v13 = vpop.f32.mrb[138].mxu1  ;;  %v7596_v33 = vpop.f32.mrb[10].mxu0  ;;  %7060 = vst [vmem:[#allocation20 + $0x88] sm:$0xf] %v7316_v49  ;;  %v7320_v54 = vpack.c.bf16 %v8476_v19, %v8476_v19  ;;  %8489 = vtanh.f32 %v7705_v17 }
 0x93a   :  { %v7707_v18 = vadd.f32 %v6134_v13, %v13659_v41  ;;  %v6136_v58 = vpop.f32.mrb[139].mxu1  ;;  %v7597_v2 = vpop.f32.mrb[11].mxu0  ;;  %7047 = vst [vmem:[#allocation20 + $0x2c] sm:$0xff] %v7303_v4  ;;  %8491 = vtanh.f32 %v7706_v0 }
 0x93b   :  { %v6547_v43 = vadd.f32 %v7595_v20, %v13642_v42  ;;  %v7708_v28 = vadd.f32 %v6136_v58, %v13663_v61  ;;  %v7598_v26 = vadd.f32 %v7597_v2, %v7596_v33  ;;  %v8478_v9 = vpop.eup %8477  ;;  %7064 = vst [vmem:[#allocation20 + $0xa4] sm:$0xf] %v7320_v54 }
 0x93c   :  { %8493 = vtanh.f32 %v7707_v18  ;;  %v8480_v55 = vpop.eup %8479 }
 0x93d   :  { %8495 = vtanh.f32 %v6547_v43  ;;  %v6550_v53 = vadd.f32 %v7598_v26, %v13644_v14  ;;  %v8482_v25 = vpop.eup %8481  ;;  %v7307_v30 = vpack.c.bf16 %v8480_v55, %v8478_v9  ;;  %v7599_v35 = vpop.f32.mrb[12].mxu0 }
 0x93e   :  { %8497 = vtanh.f32 %v7708_v28  ;;  %v8484_v60 = vpop.eup %8483  ;;  %v6140_v37 = vpop.f32.mrb[140].mxu1 }
 0x93f   :  { %8499 = vtanh.f32 %v6550_v53  ;;  %v8486_v16 = vpop.eup %8485  ;;  %7051 = vst [vmem:[#allocation20 + $0x48] sm:$0xff] %v7307_v30  ;;  %v7324_v42 = vpack.c.bf16 %v8484_v60, %v8484_v60  ;;  %v7709_v12 = vadd.f32 %v6140_v37, %v13659_v41  ;;  %v6142_v22 = vpop.f32.mrb[141].mxu1 }
 0x940   :  { %v7600_v39 = vpop.f32.mrb[13].mxu0  ;;  %v8488_v10 = vpop.eup %8487  ;;  %v7311_v11 = vpack.c.bf16 %v8486_v16, %v8482_v25  ;;  %v7710_v27 = vadd.f32 %v6142_v22, %v13663_v61 }
 0x941   :  { %v7601_v59 = vadd.f32 %v7600_v39, %v7599_v35  ;;  %v6144_v14 = vpop.f32.mrb[142].mxu1  ;;  %v7602_v38 = vpop.f32.mrb[14].mxu0  ;;  %7068 = vst [vmem:[#allocation20 + $0xc0] sm:$0xf] %v7324_v42  ;;  %v7328_v62 = vpack.c.bf16 %v8488_v10, %v8488_v10  ;;  %8501 = vtanh.f32 %v7709_v12 }
 0x942   :  { %v7711_v34 = vadd.f32 %v6144_v14, %v13659_v41  ;;  %v6146_v29 = vpop.f32.mrb[143].mxu1  ;;  %v7603_v50 = vpop.f32.mrb[15].mxu0  ;;  %7055 = vst [vmem:[#allocation20 + $0x64] sm:$0xff] %v7311_v11  ;;  %8503 = vtanh.f32 %v7710_v27 }
 0x943   :  { %v6555_v40 = vadd.f32 %v7601_v59, %v13646_v48  ;;  %v7712_v51 = vadd.f32 %v6146_v29, %v13663_v61  ;;  %v7604_v23 = vadd.f32 %v7603_v50, %v7602_v38  ;;  %v8490_v21 = vpop.eup %8489  ;;  %7072 = vst [vmem:[#allocation20 + $0xdc] sm:$0xf] %v7328_v62 }
 0x944   :  { %8505 = vtanh.f32 %v7711_v34  ;;  %v8492_v31 = vpop.eup %8491 }
 0x945   :  { %8507 = vtanh.f32 %v6555_v40  ;;  %v6558_v8 = vadd.f32 %v7604_v23, %v13648_v36  ;;  %v7315_v47 = vpack.c.bf16 %v8492_v31, %v8490_v21  ;;  %v7605_v15 = vpop.f32.mrb[16].mxu0 }
 0x946   :  { %v8494_v57 = vpop.eup %8493  ;;  %8509 = vtanh.f32 %v7712_v51  ;;  %v6150_v1 = vpop.f32.mrb[144].mxu1 }
 0x947   :  { %v8496_v52 = vpop.eup %8495  ;;  %8511 = vtanh.f32 %v6558_v8  ;;  %7059 = vst [vmem:[#allocation20 + $0x80] sm:$0xff] %v7315_v47  ;;  %v7713_v17 = vadd.f32 %v6150_v1, %v13659_v41  ;;  %v6152_v56 = vpop.f32.mrb[145].mxu1 }
 0x948   :  { %v8498_v49 = vpop.eup %8497  ;;  %v7332_v48 = vpack.c.bf16 %v8496_v52, %v8496_v52  ;;  %v7606_v32 = vpop.f32.mrb[17].mxu0  ;;  %v7714_v0 = vadd.f32 %v6152_v56, %v13663_v61 }
 0x949   :  { %v8500_v19 = vpop.eup %8499  ;;  %v7319_v4 = vpack.c.bf16 %v8498_v49, %v8494_v57  ;;  %v6154_v20 = vpop.f32.mrb[146].mxu1  ;;  %v13691_v36 = vadd.f32 %v7606_v32, %v7605_v15  ;;  %8513 = vtanh.f32 %v7713_v17 }
 0x94a   :  { %v7608_v13 = vpop.f32.mrb[18].mxu0  ;;  %7076 = vst [vmem:[#allocation20 + $0xf8] sm:$0xf] %v7332_v48  ;;  %v7336_v33 = vpack.c.bf16 %v8500_v19, %v8500_v19  ;;  %v7715_v54 = vadd.f32 %v6154_v20, %v13659_v41  ;;  %v6156_v18 = vpop.f32.mrb[147].mxu1  ;;  %8515 = vtanh.f32 %v7714_v0 }
 0x94b   :  { %v7609_v58 = vpop.f32.mrb[19].mxu0  ;;  %7063 = vst [vmem:[#allocation20 + $0x9c] sm:$0xff] %v7319_v4  ;;  %v7716_v2 = vadd.f32 %v6156_v18, %v13663_v61  ;;  %v8502_v28 = vpop.eup %8501 }
 0x94c   :  { %v13695_v43 = vadd.f32 %v7609_v58, %v7608_v13  ;;  %7080 = vst [vmem:[#allocation20 + $0x114] sm:$0xf] %v7336_v33  ;;  %8517 = vtanh.f32 %v7715_v54  ;;  %v8504_v26 = vpop.eup %8503 }
 0x94d   :  { %8519 = vtanh.f32 %v7716_v2  ;;  %v7323_v55 = vpack.c.bf16 %v8504_v26, %v8502_v28  ;;  %v7611_v30 = vpop.f32.mrb[20].mxu0 }
 0x94e   :  { %v8506_v9 = vpop.eup %8505  ;;  %v6160_v25 = vpop.f32.mrb[148].mxu1 }
 0x94f   :  { %v8508_v53 = vpop.eup %8507  ;;  %7067 = vst [vmem:[#allocation20 + $0xb8] sm:$0xff] %v7323_v55  ;;  %v7717_v35 = vadd.f32 %v6160_v25, %v13659_v41  ;;  %v6162_v16 = vpop.f32.mrb[149].mxu1 }
 0x950   :  { %v8510_v60 = vpop.eup %8509  ;;  %v7340_v37 = vpack.c.bf16 %v8508_v53, %v8508_v53  ;;  %v7612_v42 = vpop.f32.mrb[21].mxu0  ;;  %v7718_v39 = vadd.f32 %v6162_v16, %v13663_v61 }
 0x951   :  { %v8512_v12 = vpop.eup %8511  ;;  %v7327_v22 = vpack.c.bf16 %v8510_v60, %v8506_v9  ;;  %v6164_v10 = vpop.f32.mrb[150].mxu1  ;;  %v13699_v11 = vadd.f32 %v7612_v42, %v7611_v30  ;;  %8521 = vtanh.f32 %v7717_v35 }
 0x952   :  { %v7614_v27 = vpop.f32.mrb[22].mxu0  ;;  %7084 = vst [vmem:[#allocation20 + $0x130] sm:$0xf] %v7340_v37  ;;  %v7344_v59 = vpack.c.bf16 %v8512_v12, %v8512_v12  ;;  %v7719_v14 = vadd.f32 %v6164_v10, %v13659_v41  ;;  %v6166_v38 = vpop.f32.mrb[151].mxu1  ;;  %8523 = vtanh.f32 %v7718_v39 }
 0x953   :  { %v7615_v62 = vpop.f32.mrb[23].mxu0  ;;  %7071 = vst [vmem:[#allocation20 + $0xd4] sm:$0xff] %v7327_v22  ;;  %v7720_v34 = vadd.f32 %v6166_v38, %v13663_v61  ;;  %v8514_v50 = vpop.eup %8513 }
 0x954   :  { %v13703_v29 = vadd.f32 %v7615_v62, %v7614_v27  ;;  %7088 = vst [vmem:[#allocation20 + $0x14c] sm:$0xf] %v7344_v59  ;;  %8525 = vtanh.f32 %v7719_v14  ;;  %v8516_v40 = vpop.eup %8515 }
 0x955   :  { %8527 = vtanh.f32 %v7720_v34  ;;  %v7331_v23 = vpack.c.bf16 %v8516_v40, %v8514_v50 }
 0x956   :  { %v8518_v51 = vpop.eup %8517  ;;  %v6170_v31 = vpop.f32.mrb[152].mxu1 }
 0x957   :  { %v8520_v21 = vpop.eup %8519  ;;  %7075 = vst [vmem:[#allocation20 + $0xf0] sm:$0xff] %v7331_v23  ;;  %v7721_v57 = vadd.f32 %v6170_v31, %v13659_v41  ;;  %v6172_v47 = vpop.f32.mrb[153].mxu1 }
 0x958   :  { %v7335_v8 = vpack.c.bf16 %v8520_v21, %v8518_v51  ;;  %v7722_v52 = vadd.f32 %v6172_v47, %v13663_v61  ;;  %v6174_v1 = vpop.f32.mrb[154].mxu1 }
 0x959   :  { %8529 = vtanh.f32 %v7721_v57  ;;  %v7723_v15 = vadd.f32 %v6174_v1, %v13659_v41  ;;  %v6176_v49 = vpop.f32.mrb[155].mxu1 }
 0x95a   :  { %7079 = vst [vmem:[#allocation20 + $0x10c] sm:$0xff] %v7335_v8  ;;  %8531 = vtanh.f32 %v7722_v52  ;;  %v7724_v48 = vadd.f32 %v6176_v49, %v13663_v61 }
 0x95b   :  { %v8522_v17 = vpop.eup %8521  ;;  %8533 = vtanh.f32 %v7723_v15 }
 0x95c   :  { %v8524_v56 = vpop.eup %8523  ;;  %8535 = vtanh.f32 %v7724_v48 }
 0x95d   :  { %v7339_v19 = vpack.c.bf16 %v8524_v56, %v8522_v17 }
 0x95e   :  { %v8526_v32 = vpop.eup %8525  ;;  %v6180_v0 = vpop.f32.mrb[156].mxu1 }
 0x95f   :  { %v8528_v4 = vpop.eup %8527  ;;  %7083 = vst [vmem:[#allocation20 + $0x128] sm:$0xff] %v7339_v19  ;;  %v7725_v13 = vadd.f32 %v6180_v0, %v13659_v41  ;;  %v6182_v33 = vpop.f32.mrb[157].mxu1 }
 0x960   :  { %v7343_v20 = vpack.c.bf16 %v8528_v4, %v8526_v32  ;;  %v7726_v54 = vadd.f32 %v6182_v33, %v13663_v61  ;;  %v6184_v18 = vpop.f32.mrb[158].mxu1 }
 0x961   :  { %8537 = vtanh.f32 %v7725_v13  ;;  %v7727_v58 = vadd.f32 %v6184_v18, %v13659_v41  ;;  %v6186_v2 = vpop.f32.mrb[159].mxu1 }
 0x962   :  { %7087 = vst [vmem:[#allocation20 + $0x144] sm:$0xff] %v7343_v20  ;;  %8539 = vtanh.f32 %v7726_v54  ;;  %v7728_v28 = vadd.f32 %v6186_v2, %v13663_v61 }
 0x963   :  { %v8530_v26 = vpop.eup %8529  ;;  %8541 = vtanh.f32 %v7727_v58 }
 0x964   :  { %v8532_v9 = vpop.eup %8531  ;;  %8543 = vtanh.f32 %v7728_v28 }
 0x965   :  { %v8534_v55 = vpop.eup %8533  ;;  %v7347_v53 = vpack.c.bf16 %v8532_v9, %v8530_v26 }
 0x966   :  { %v8536_v25 = vpop.eup %8535  ;;  %v7413_v30 = vpop.f32.mrb[160].mxu1 }
 0x967   :  { %7091 = vst [vmem:[#allocation20 + $0x160] sm:$0xff] %v7347_v53  ;;  %v7351_v60 = vpack.c.bf16 %v8536_v25, %v8534_v55  ;;  %v7414_v37 = vpop.f32.mrb[161].mxu1 }
 0x968   :  { %v7415_v35 = vadd.f32 %v7414_v37, %v7413_v30  ;;  %v7416_v16 = vpop.f32.mrb[162].mxu1 }
 0x969   :  { %7095 = vst [vmem:[#allocation20 + $0x17c] sm:$0xff] %v7351_v60  ;;  %v7417_v42 = vpop.f32.mrb[163].mxu1 }
 0x96a   :  { %v6272_v41 = vadd.f32 %v7415_v35, %v13581_v3  ;;  %v7418_v12 = vadd.f32 %v7417_v42, %v7416_v16 }
 0x96b   :  { %v8538_v22 = vpop.eup %8537 }
 0x96c   :  { %v8540_v61 = vpop.eup %8539  ;;  %v6369_v39 = vadd.f32 %v13616_v46, %v6272_v41  ;;  %v6275_v10 = vadd.f32 %v7418_v12, %v13581_v3 }
 0x96d   :  { %v8542_v27 = vpop.eup %8541  ;;  %v7355_v59 = vpack.c.bf16 %v8540_v61, %v8538_v22 }
 0x96e   :  { %v8544_v14 = vpop.eup %8543  ;;  %v6372_v38 = vadd.f32 %v13618_v24, %v6275_v10  ;;  %v6466_v62 = vadd.f32 %v13650_v7, %v6369_v39  ;;  %v7419_v34 = vpop.f32.mrb[164].mxu1 }
 0x96f   :  { %7099 = vst [vmem:[#allocation20 + $0x198] sm:$0xff] %v7355_v59  ;;  %v7359_v50 = vpack.c.bf16 %v8544_v14, %v8542_v27  ;;  %v7420_v40 = vpop.f32.mrb[165].mxu1 }
 0x970   :  { %v6563_v51 = vadd.f32 %v13691_v36, %v6466_v62  ;;  %v6469_v23 = vadd.f32 %v13652_v44, %v6372_v38  ;;  %v7421_v21 = vadd.f32 %v7420_v40, %v7419_v34  ;;  %v7422_v31 = vpop.f32.mrb[166].mxu1 }
 0x971   :  { %7103 = vst [vmem:[#allocation20 + $0x1b4] sm:$0xff] %v7359_v50  ;;  %v7423_v46 = vpop.f32.mrb[167].mxu1 }
 0x972   :  { %8545 = vtanh.f32 %v6563_v51  ;;  %v6566_v8 = vadd.f32 %v13695_v43, %v6469_v23  ;;  %v6280_v57 = vadd.f32 %v7421_v21, %v13581_v3  ;;  %v7424_v24 = vadd.f32 %v7423_v46, %v7422_v31 }
 0x974   :  { %8547 = vtanh.f32 %v6566_v8  ;;  %v6377_v7 = vadd.f32 %v13620_v5, %v6280_v57  ;;  %v6283_v47 = vadd.f32 %v7424_v24, %v13581_v3 }
 0x976   :  { %v6380_v52 = vadd.f32 %v13622_v6, %v6283_v47  ;;  %v6474_v36 = vadd.f32 %v13654_v63, %v6377_v7 }
 0x978   :  { %v6571_v44 = vadd.f32 %v13699_v11, %v6474_v36  ;;  %v6477_v1 = vadd.f32 %v13656_v45, %v6380_v52 }
 0x97a   :  { %8549 = vtanh.f32 %v6571_v44  ;;  %v6574_v15 = vadd.f32 %v13703_v29, %v6477_v1 }
 0x97c   :  { %v8546_v43 = vpop.eup %8545  ;;  %8551 = vtanh.f32 %v6574_v15 }
 0x97d   :  { %v7348_v49 = vpack.c.bf16 %v8546_v43, %v8546_v43 }
 0x97e   :  { %v8548_v48 = vpop.eup %8547 }
 0x97f   :  { %7092 = vst [vmem:[#allocation20 + $0x168] sm:$0xf] %v7348_v49  ;;  %v7352_v17 = vpack.c.bf16 %v8548_v48, %v8548_v48 }
 0x981   :  { %7096 = vst [vmem:[#allocation20 + $0x184] sm:$0xf] %v7352_v17 }
 0x984   :  { %v8550_v5 = vpop.eup %8549 }
 0x985   :  { %v7356_v3 = vpack.c.bf16 %v8550_v5, %v8550_v5 }
 0x986   :  { %v8552_v6 = vpop.eup %8551 }
 0x987   :  { %7100 = vst [vmem:[#allocation20 + $0x1a0] sm:$0xf] %v7356_v3  ;;  %v7360_v63 = vpack.c.bf16 %v8552_v6, %v8552_v6 }
 0x989   :  { %7104 = vst [vmem:[#allocation20 + $0x1bc] sm:$0xf] %v7360_v63 }
 0x98a   :  { %8779 = shalt.err (!%p8776_p6)
}
 0x98b   :  { %s8780_s24 = scalar_lea.hbm %s13754_s11, 7168 }
 0x98c   :  { %p8781_p7 = scmp.ne.s32.totalorder %s13754_s11, %s8780_s24  ;;  %p8784_p8 = scmp.lt.u32.totalorder %s8780_s24, %s13754_s11 }
 0x98e   :  { %p8786_p9 = pnand %p8784_p8, %p8781_p7 }
 0x990   :  { %8789 = shalt.err (!%p8786_p9)
}
 0x991   :  { %s8835_s16 = smov 28  }
 0x992   :  { %7116 = dma.vmem_to_hbm [thread:$0]  %s7111_s27, 7168, %s13754_s11, [#allocation7], %s8831_s1, %s8831_s1, %s8835_s16  }
 0x993   :  { %8804 = dma.done.wait [#allocation7], 7168  }
 0x994   :  { %8805 = vsyncadd [#allocation7], 4294960128 }
 0x995   :  { %7120 = vsyncpa [#allocation6], 1 }
 0x996   :  { %7121 = vsyncpa [#allocation9], 1 }
 0x997   :  { %7122 = vsyncpa [#allocation12], 1 }
 0x998   :  { %7123 = vsyncpa [#allocation15], 1 }
 0x999   :  { %7124 = vsyncpa [#allocation18], 1 }
 0x99a   :  { %7125 = vsyncpa [#allocation7], 1 }
 0x99b   :  { %7126 = vsyncmov [#allocation4] }
 0x99e   :  { %s7127_s17 = vpop.sfrf %7126 }
 0x99f   :  { %p7295_p10 = scmp.ne.s32.totalorder %s7127_s17, 0 }
 0x9a1   :  { %7131 = shalt.err (%p7295_p10)  }
 0x9a2   :  { %7133 = vsyncmov [#allocation4 + $0x1] }
 0x9a5   :  { %s7134_s19 = vpop.sfrf %7133 }
 0x9a6   :  { %p7296_p11 = scmp.ne.s32.totalorder %s7134_s19, 0 }
 0x9a8   :  { %7138 = shalt.err (%p7296_p11)  }

</bundles_post_ra>
